<compile_context>
chip_gen: v7x
topology: tpu7x:2x2x1
jax: 0.10.0
libtpu: 0.0.40
codegen_flags: <defaults>
</compile_context>

<pallas_src>
import jax
import jax.numpy as jnp
from jax.experimental import pallas as pl
from jax.experimental.pallas import tpu as pltpu

LANES = 128          # decode working-set lane width (requires seq_len <= 128)


def actor_kernel(x_ref, fw_ref, fb_ref,
                 ewhh_ref, ebhh_ref,
                 dwih_ref, dwhh_ref, dbih_ref, dbhh_ref,
                 w1_ref, w2_ref, vpad_ref,
                 tours_ref, enc_ref,
                 gi_scr, enc_scr):
    S, B, E = enc_scr.shape          # B is the padded batch
    H = dwhh_ref.shape[0]
    L = LANES
    f32 = jnp.float32
    bf16 = jnp.bfloat16
    NEG = f32(-1e9)

    # ---------- phase 1: fused embedding + encoder input projection ----------
    # gi = coords @ (ff_w @ W_ih) + (ff_b @ W_ih + b_ih), one tall f32 matmul.
    gi_scr[...] = (jnp.dot(x_ref[...], fw_ref[...], preferred_element_type=f32)
                   + fb_ref[...])                       # (S*B, 3E) f32

    # ---------- phase 2: encoder GRU recurrence (time-major full-tile stores)
    h = jnp.zeros((B, E), f32)
    for t in range(S):                                  # static unroll
        gi = gi_scr[t * B:(t + 1) * B, :]               # (B, 3E) static slice
        gh = (jnp.dot(h.astype(bf16), ewhh_ref[...],
                      preferred_element_type=f32) + ebhh_ref[...])
        r = jax.nn.sigmoid(gi[:, 0:E] + gh[:, 0:E])
        z = jax.nn.sigmoid(gi[:, E:2 * E] + gh[:, E:2 * E])
        n = jnp.tanh(gi[:, 2 * E:3 * E] + r * gh[:, 2 * E:3 * E])
        h = (1.0 - z) * n + z * h                       # (B, E)
        enc_scr[t] = h                                  # full-tile store

    # ---------- phase 2b: one-shot conversion to the PyTorch (B, S, E) layout
    # (masked per-row stores, but off the recurrence's serial chain).
    for t in range(S):
        enc_ref[:, t, :] = enc_scr[t]

    # ---------- phase 3: hoisted attention key projection (one tall matmul) --
    w1e = jnp.dot(enc_scr[...].reshape(S * B, E).astype(bf16), w1_ref[...],
                  preferred_element_type=f32).reshape(S, B, H)   # time-major
    enc_bse = enc_ref[...]                              # (B, S, E) gather operand
    # NOTE: w1e + enc_bse hoisting is ~16 vregs at E=H=128, B=8; keep them in
    # VMEM (read per step) at the production E=256 / large-B config instead.

    # ---------- phase 4: greedy decode, lane-padded (B, 128) working set -----
    pos = jax.lax.broadcasted_iota(jnp.int32, (B, L), 1)        # lane index
    mask = (pos < S).astype(f32)                                # 1 for real, 0 for pad lanes
    eye = (jax.lax.broadcasted_iota(jnp.int32, (S, 1, L), 0)
           == jax.lax.broadcasted_iota(jnp.int32, (S, 1, L), 2)).astype(f32)
    tours = jnp.zeros((B, L), jnp.int32)
    dec_in = jnp.zeros((B, E), f32)

    for t in range(S):                                  # static unroll
        # GRUCell(E -> H) on (decoder_input, h)
        gi_d = (jnp.dot(dec_in.astype(bf16), dwih_ref[...],
                        preferred_element_type=f32) + dbih_ref[...])
        gh_d = (jnp.dot(h.astype(bf16), dwhh_ref[...],
                        preferred_element_type=f32) + dbhh_ref[...])
        r = jax.nn.sigmoid(gi_d[:, 0:H] + gh_d[:, 0:H])
        z = jax.nn.sigmoid(gi_d[:, H:2 * H] + gh_d[:, H:2 * H])
        n = jnp.tanh(gi_d[:, 2 * H:3 * H] + r * gh_d[:, 2 * H:3 * H])
        h = (1.0 - z) * n + z * h                       # (B, H)

        # additive attention: score[b, s] = v . tanh(W1 e[b,s] + W2 h[b]).
        # v-reduction on the MXU (vpad has v in every column); the eye mask +
        # leading-axis sum places the score with s on the lane axis (f32 path).
        w2h = jnp.dot(h.astype(bf16), w2_ref[...],
                      preferred_element_type=f32)       # (B, H)
        tnh = jnp.tanh(w1e + w2h[None, :, :])           # (S, B, H) f32
        sc = jnp.dot(tnh.reshape(S * B, H), vpad_ref[...],
                     preferred_element_type=f32)        # (S*B, 128) f32
        score = jnp.sum(sc.reshape(S, B, L) * eye, axis=0)      # (B, 128)
        score = jnp.where(mask > 0.0, score, NEG)

        # argmax over the lane axis (== argmax of softmax; softmax monotone,
        # attention weights are never returned).  First-max tie-break.
        max_val = jnp.max(score, axis=-1, keepdims=True)        # (B, 1)
        sel = jnp.min(jnp.where(score == max_val, pos, L),
                      axis=-1, keepdims=True)                   # (B, 1) int32

        tours = jnp.where(pos == t, sel, tours)         # record step t (no store)
        onehot = pos == sel                             # (B, 128) bool
        mask = jnp.where(onehot, 0.0, mask)             # mask.scatter_(sel, 0)
        # decoder_input = gather(encoder_outputs, sel) via a one-hot reduce.
        # TODO(synk): for large S, replace with a scalar-indexed / DMA gather
        # to avoid the O(S) re-read each step.
        dec_in = jnp.sum(onehot[:, 0:S].astype(f32)[:, :, None] * enc_bse,
                         axis=1)                        # (B, E)

    tours_ref[...] = tours[:, 0:S]                      # single store at the end


def _vmem_spec():
    # Whole-array, unpipelined, single-buffered VMEM residency (no grid).
    return pl.BlockSpec(memory_space=pltpu.MemorySpace.VMEM)


def actor_forward(params, input_coords, seq_len):
    """input_coords: (B, seq_len, 2) float32.  Returns (tours (B,S) int32,
    encoder_outputs (B,S,E) float32) — same as the PyTorch module."""
    B, S, two = input_coords.shape
    assert two == 2 and S == seq_len
    assert S <= LANES, "decode working set assumes seq_len <= 128"
    E = params["ff_w"].shape[1]
    H = params["dec_whh"].shape[0]
    assert E == H          # required by the module (W1 applied to encoder outputs)

    # Pad the batch up to a full 8-sublane group.  (For real workloads, pack
    # more independent sequences per call instead of zero-padding — every
    # recurrence matmul only uses Bp of the MXU rows.)
    Bp = ((B + 7) // 8) * 8
    coords = input_coords.astype(jnp.float32)
    if Bp != B:
        coords = jnp.concatenate(
            [coords, jnp.zeros((Bp - B, S, 2), jnp.float32)], axis=0)

    # Time-major flattened coordinates (row = t * Bp + b), padded to 8 lanes.
    x2 = jnp.transpose(coords, (1, 0, 2)).reshape(S * Bp, 2)
    x8 = jnp.concatenate([x2, jnp.zeros((S * Bp, 6), jnp.float32)], axis=1)

    f32 = jnp.float32
    bf16 = jnp.bfloat16

    # Fuse Linear(2->E) into the encoder input projection (exact in f32).
    fused_w = jnp.dot(params["ff_w"].astype(f32),
                      params["enc_wih"].astype(f32))                 # (2, 3E)
    fused_w = jnp.concatenate(
        [fused_w, jnp.zeros((6, 3 * E), f32)], axis=0)               # (8, 3E)
    fused_b = (jnp.dot(params["ff_b"].astype(f32),
                       params["enc_wih"].astype(f32))
               + params["enc_bih"].astype(f32))                      # (1, 3E)

    # v broadcast across all 128 output columns (MXU v-reduction operand).
    vpad = jnp.broadcast_to(params["attn_v"].astype(f32).reshape(H, 1),
                            (H, LANES))

    ordered_inputs = [
        x8, fused_w, fused_b,
        params["enc_whh"].astype(bf16), params["enc_bhh"].astype(f32),
        params["dec_wih"].astype(bf16), params["dec_whh"].astype(bf16),
        params["dec_bih"].astype(f32), params["dec_bhh"].astype(f32),
        params["attn_w1"].astype(bf16), params["attn_w2"].astype(bf16),
        vpad,
    ]

    tours_p, enc_p = pl.pallas_call(
        actor_kernel,
        out_shape=(jax.ShapeDtypeStruct((Bp, S), jnp.int32),
                   jax.ShapeDtypeStruct((Bp, S, E), jnp.float32)),
        in_specs=[_vmem_spec() for _ in ordered_inputs],
        out_specs=(_vmem_spec(), _vmem_spec()),
        scratch_shapes=[
            pltpu.VMEM((S * Bp, 3 * E), jnp.float32),   # fused input projection
            pltpu.VMEM((S, Bp, E), jnp.float32),        # time-major encoder states
        ],
        compiler_params=pltpu.CompilerParams(
            # Explicit (tiny here); raise + go bf16 scratch for production
            # configs (E=256, large S/Bp) so it also fits v7x's 64 MiB VMEM.
            vmem_limit_bytes=32 * 1024 * 1024),
    )(*ordered_inputs)

    return tours_p[:B], enc_p[:B]


def init_params(key, embedding_dim=128, hidden_dim=128):
    """Deterministic synthetic parameters (PyTorch-style uniform init).
    Weight matrices are stored pre-transposed: (in_features, out_features)."""
    E, H = embedding_dim, hidden_dim
    ks = jax.random.split(key, 13)

    def u(k, shape, fan_in):
        bound = 1.0 / float(fan_in) ** 0.5
        return jax.random.uniform(k, shape, jnp.float32, -bound, bound)

    return {
        "ff_w":    u(ks[0],  (2, E), 2),
        "ff_b":    u(ks[1],  (1, E), 2),
        "enc_wih": u(ks[2],  (E, 3 * E), E),
        "enc_whh": u(ks[3],  (E, 3 * E), E),
        "enc_bih": u(ks[4],  (1, 3 * E), E),
        "enc_bhh": u(ks[5],  (1, 3 * E), E),
        "dec_wih": u(ks[6],  (E, 3 * H), H),
        "dec_whh": u(ks[7],  (H, 3 * H), H),
        "dec_bih": u(ks[8],  (1, 3 * H), H),
        "dec_bhh": u(ks[9],  (1, 3 * H), H),
        "attn_w1": u(ks[10], (E, H), H),
        "attn_w2": u(ks[11], (H, H), H),
        "attn_v":  u(ks[12], (1, H), H),
    }


if __name__ == "__main__":
    EMB = HID = 128          # small but lane-aligned stand-in for the default 256
    BATCH, SEQ = 2, 8

    key = jax.random.PRNGKey(0)
    pkey, xkey = jax.random.split(key)
    params = init_params(pkey, EMB, HID)
    input_coords = jax.random.uniform(xkey, (BATCH, SEQ, 2), jnp.float32)

    fwd = jax.jit(actor_forward, static_argnums=(2,))
    tours, encoder_outputs = fwd(params, input_coords, SEQ)
    jax.block_until_ready((tours, encoder_outputs))

    assert tours.shape == (BATCH, SEQ) and tours.dtype == jnp.int32
    assert encoder_outputs.shape == (BATCH, SEQ, EMB)
    assert bool(jnp.all(tours >= 0)) and bool(jnp.all(tours < SEQ))
    print("KERNEL_OK")
</pallas_src>

<mosaic_0001>
module attributes {stable_mosaic.version = 11 : i64} {
  func.func @actor_kernel(%arg0: memref<64x8xf32, #tpu.memory_space<vmem>>, %arg1: memref<8x384xf32, #tpu.memory_space<vmem>>, %arg2: memref<1x384xf32, #tpu.memory_space<vmem>>, %arg3: memref<128x384xbf16, #tpu.memory_space<vmem>>, %arg4: memref<1x384xf32, #tpu.memory_space<vmem>>, %arg5: memref<128x384xbf16, #tpu.memory_space<vmem>>, %arg6: memref<128x384xbf16, #tpu.memory_space<vmem>>, %arg7: memref<1x384xf32, #tpu.memory_space<vmem>>, %arg8: memref<1x384xf32, #tpu.memory_space<vmem>>, %arg9: memref<128x128xbf16, #tpu.memory_space<vmem>>, %arg10: memref<128x128xbf16, #tpu.memory_space<vmem>>, %arg11: memref<128x128xf32, #tpu.memory_space<vmem>>, %arg12: memref<8x8xi32, #tpu.memory_space<vmem>>, %arg13: memref<8x8x128xf32, #tpu.memory_space<vmem>>, %arg14: memref<64x384xf32, #tpu.memory_space<vmem>>, %arg15: memref<8x8x128xf32, #tpu.memory_space<vmem>>) attributes {dimension_semantics = [], scalar_prefetch = 0 : i64, scratch_operands = 2 : i64, tpu.core_type = #tpu.core_type<tc>} {
    %c0 = arith.constant 0 : index
    %c0_0 = arith.constant 0 : index
    %0 = vector.load %arg0[%c0, %c0_0] : memref<64x8xf32, #tpu.memory_space<vmem>>, vector<64x8xf32>
    %c0_1 = arith.constant 0 : index
    %c0_2 = arith.constant 0 : index
    %1 = vector.load %arg1[%c0_1, %c0_2] : memref<8x384xf32, #tpu.memory_space<vmem>>, vector<8x384xf32>
    %cst = arith.constant dense<0.000000e+00> : vector<64x384xf32>
    %2 = tpu.matmul %0, %1, %cst {dimension_numbers = #tpu.dot_dimension_numbers<[1], [0], [0], [1], [0, 0, 1, 1], [], []>} : vector<64x8xf32>, vector<8x384xf32>, vector<64x384xf32> -> vector<64x384xf32>
    %c0_3 = arith.constant 0 : index
    %c0_4 = arith.constant 0 : index
    %3 = vector.load %arg2[%c0_3, %c0_4] : memref<1x384xf32, #tpu.memory_space<vmem>>, vector<1x384xf32>
    %4 = vector.broadcast %3 : vector<1x384xf32> to vector<64x384xf32>
    %5 = arith.addf %2, %4 : vector<64x384xf32>
    %c0_5 = arith.constant 0 : index
    %c0_6 = arith.constant 0 : index
    %6 = vector.load %arg14[%c0_5, %c0_6] : memref<64x384xf32, #tpu.memory_space<vmem>>, vector<64x384xf32>
    tpu.vector_store %arg14[%c0_5, %c0_6], %5 {strides = array<i32>} : memref<64x384xf32, #tpu.memory_space<vmem>>, vector<64x384xf32>,
    %cst_7 = arith.constant 0.000000e+00 : f32
    %7 = vector.broadcast %cst_7 : f32 to vector<8x128xf32>
    %c0_8 = arith.constant 0 : index
    %c0_9 = arith.constant 0 : index
    %8 = vector.load %arg14[%c0_8, %c0_9] : memref<64x384xf32, #tpu.memory_space<vmem>>, vector<8x384xf32>
    %9 = arith.truncf %7 : vector<8x128xf32> to vector<8x128xbf16>
    %c0_10 = arith.constant 0 : index
    %c0_11 = arith.constant 0 : index
    %10 = vector.load %arg3[%c0_10, %c0_11] : memref<128x384xbf16, #tpu.memory_space<vmem>>, vector<128x384xbf16>
    %cst_12 = arith.constant dense<0.000000e+00> : vector<8x384xf32>
    %11 = tpu.matmul %9, %10, %cst_12 {dimension_numbers = #tpu.dot_dimension_numbers<[1], [0], [0], [1], [0, 0, 1, 1], [], []>} : vector<8x128xbf16>, vector<128x384xbf16>, vector<8x384xf32> -> vector<8x384xf32>
    %c0_13 = arith.constant 0 : index
    %c0_14 = arith.constant 0 : index
    %12 = vector.load %arg4[%c0_13, %c0_14] : memref<1x384xf32, #tpu.memory_space<vmem>>, vector<1x384xf32>
    %13 = vector.broadcast %12 : vector<1x384xf32> to vector<8x384xf32>
    %14 = arith.addf %11, %13 : vector<8x384xf32>
    %15 = vector.extract_strided_slice %8 {offsets = [0, 0], sizes = [8, 128], strides = [1, 1]} : vector<8x384xf32> to vector<8x128xf32>
    %16 = vector.extract_strided_slice %14 {offsets = [0, 0], sizes = [8, 128], strides = [1, 1]} : vector<8x384xf32> to vector<8x128xf32>
    %17 = arith.addf %15, %16 : vector<8x128xf32>
    %18 = arith.negf %17 : vector<8x128xf32>
    %19 = math.exp %18 : vector<8x128xf32>
    %cst_15 = arith.constant 1.000000e+00 : f32
    %20 = vector.broadcast %cst_15 : f32 to vector<8x128xf32>
    %21 = arith.addf %20, %19 : vector<8x128xf32>
    %22 = arith.divf %20, %21 : vector<8x128xf32>
    %23 = vector.extract_strided_slice %8 {offsets = [0, 128], sizes = [8, 128], strides = [1, 1]} : vector<8x384xf32> to vector<8x128xf32>
    %24 = vector.extract_strided_slice %14 {offsets = [0, 128], sizes = [8, 128], strides = [1, 1]} : vector<8x384xf32> to vector<8x128xf32>
    %25 = arith.addf %23, %24 : vector<8x128xf32>
    %26 = arith.negf %25 : vector<8x128xf32>
    %27 = math.exp %26 : vector<8x128xf32>
    %cst_16 = arith.constant 1.000000e+00 : f32
    %28 = vector.broadcast %cst_16 : f32 to vector<8x128xf32>
    %29 = arith.addf %28, %27 : vector<8x128xf32>
    %30 = arith.divf %28, %29 : vector<8x128xf32>
    %31 = vector.extract_strided_slice %8 {offsets = [0, 256], sizes = [8, 128], strides = [1, 1]} : vector<8x384xf32> to vector<8x128xf32>
    %32 = vector.extract_strided_slice %14 {offsets = [0, 256], sizes = [8, 128], strides = [1, 1]} : vector<8x384xf32> to vector<8x128xf32>
    %33 = arith.mulf %22, %32 : vector<8x128xf32>
    %34 = arith.addf %31, %33 : vector<8x128xf32>
    %35 = math.tanh %34 : vector<8x128xf32>
    %cst_17 = arith.constant 1.000000e+00 : f32
    %36 = vector.broadcast %cst_17 : f32 to vector<8x128xf32>
    %37 = arith.subf %36, %30 : vector<8x128xf32>
    %38 = arith.mulf %37, %35 : vector<8x128xf32>
    %39 = arith.mulf %30, %7 : vector<8x128xf32>
    %40 = arith.addf %38, %39 : vector<8x128xf32>
    %c0_18 = arith.constant 0 : index
    %c0_19 = arith.constant 0 : index
    %c0_20 = arith.constant 0 : index
    %41 = vector.load %arg15[%c0_18, %c0_19, %c0_20] : memref<8x8x128xf32, #tpu.memory_space<vmem>>, vector<1x8x128xf32>
    %42 = vector.shape_cast %41 : vector<1x8x128xf32> to vector<8x128xf32>
    %43 = vector.shape_cast %40 : vector<8x128xf32> to vector<1x8x128xf32>
    tpu.vector_store %arg15[%c0_18, %c0_19, %c0_20], %43 {strides = array<i32>} : memref<8x8x128xf32, #tpu.memory_space<vmem>>, vector<1x8x128xf32>,
    %c8 = arith.constant 8 : index
    %c0_21 = arith.constant 0 : index
    %44 = vector.load %arg14[%c8, %c0_21] : memref<64x384xf32, #tpu.memory_space<vmem>>, vector<8x384xf32>
    %45 = arith.truncf %40 : vector<8x128xf32> to vector<8x128xbf16>
    %c0_22 = arith.constant 0 : index
    %c0_23 = arith.constant 0 : index
    %46 = vector.load %arg3[%c0_22, %c0_23] : memref<128x384xbf16, #tpu.memory_space<vmem>>, vector<128x384xbf16>
    %cst_24 = arith.constant dense<0.000000e+00> : vector<8x384xf32>
    %47 = tpu.matmul %45, %46, %cst_24 {dimension_numbers = #tpu.dot_dimension_numbers<[1], [0], [0], [1], [0, 0, 1, 1], [], []>} : vector<8x128xbf16>, vector<128x384xbf16>, vector<8x384xf32> -> vector<8x384xf32>
    %c0_25 = arith.constant 0 : index
    %c0_26 = arith.constant 0 : index
    %48 = vector.load %arg4[%c0_25, %c0_26] : memref<1x384xf32, #tpu.memory_space<vmem>>, vector<1x384xf32>
    %49 = vector.broadcast %48 : vector<1x384xf32> to vector<8x384xf32>
    %50 = arith.addf %47, %49 : vector<8x384xf32>
    %51 = vector.extract_strided_slice %44 {offsets = [0, 0], sizes = [8, 128], strides = [1, 1]} : vector<8x384xf32> to vector<8x128xf32>
    %52 = vector.extract_strided_slice %50 {offsets = [0, 0], sizes = [8, 128], strides = [1, 1]} : vector<8x384xf32> to vector<8x128xf32>
    %53 = arith.addf %51, %52 : vector<8x128xf32>
    %54 = arith.negf %53 : vector<8x128xf32>
    %55 = math.exp %54 : vector<8x128xf32>
    %cst_27 = arith.constant 1.000000e+00 : f32
    %56 = vector.broadcast %cst_27 : f32 to vector<8x128xf32>
    %57 = arith.addf %56, %55 : vector<8x128xf32>
    %58 = arith.divf %56, %57 : vector<8x128xf32>
    %59 = vector.extract_strided_slice %44 {offsets = [0, 128], sizes = [8, 128], strides = [1, 1]} : vector<8x384xf32> to vector<8x128xf32>
    %60 = vector.extract_strided_slice %50 {offsets = [0, 128], sizes = [8, 128], strides = [1, 1]} : vector<8x384xf32> to vector<8x128xf32>
    %61 = arith.addf %59, %60 : vector<8x128xf32>
    %62 = arith.negf %61 : vector<8x128xf32>
    %63 = math.exp %62 : vector<8x128xf32>
    %cst_28 = arith.constant 1.000000e+00 : f32
    %64 = vector.broadcast %cst_28 : f32 to vector<8x128xf32>
    %65 = arith.addf %64, %63 : vector<8x128xf32>
    %66 = arith.divf %64, %65 : vector<8x128xf32>
    %67 = vector.extract_strided_slice %44 {offsets = [0, 256], sizes = [8, 128], strides = [1, 1]} : vector<8x384xf32> to vector<8x128xf32>
    %68 = vector.extract_strided_slice %50 {offsets = [0, 256], sizes = [8, 128], strides = [1, 1]} : vector<8x384xf32> to vector<8x128xf32>
    %69 = arith.mulf %58, %68 : vector<8x128xf32>
    %70 = arith.addf %67, %69 : vector<8x128xf32>
    %71 = math.tanh %70 : vector<8x128xf32>
    %cst_29 = arith.constant 1.000000e+00 : f32
    %72 = vector.broadcast %cst_29 : f32 to vector<8x128xf32>
    %73 = arith.subf %72, %66 : vector<8x128xf32>
    %74 = arith.mulf %73, %71 : vector<8x128xf32>
    %75 = arith.mulf %66, %40 : vector<8x128xf32>
    %76 = arith.addf %74, %75 : vector<8x128xf32>
    %c1 = arith.constant 1 : index
    %c0_30 = arith.constant 0 : index
    %c0_31 = arith.constant 0 : index
    %77 = vector.load %arg15[%c1, %c0_30, %c0_31] : memref<8x8x128xf32, #tpu.memory_space<vmem>>, vector<1x8x128xf32>
    %78 = vector.shape_cast %77 : vector<1x8x128xf32> to vector<8x128xf32>
    %79 = vector.shape_cast %76 : vector<8x128xf32> to vector<1x8x128xf32>
    tpu.vector_store %arg15[%c1, %c0_30, %c0_31], %79 {strides = array<i32>} : memref<8x8x128xf32, #tpu.memory_space<vmem>>, vector<1x8x128xf32>,
    %c16 = arith.constant 16 : index
    %c0_32 = arith.constant 0 : index
    %80 = vector.load %arg14[%c16, %c0_32] : memref<64x384xf32, #tpu.memory_space<vmem>>, vector<8x384xf32>
    %81 = arith.truncf %76 : vector<8x128xf32> to vector<8x128xbf16>
    %c0_33 = arith.constant 0 : index
    %c0_34 = arith.constant 0 : index
    %82 = vector.load %arg3[%c0_33, %c0_34] : memref<128x384xbf16, #tpu.memory_space<vmem>>, vector<128x384xbf16>
    %cst_35 = arith.constant dense<0.000000e+00> : vector<8x384xf32>
    %83 = tpu.matmul %81, %82, %cst_35 {dimension_numbers = #tpu.dot_dimension_numbers<[1], [0], [0], [1], [0, 0, 1, 1], [], []>} : vector<8x128xbf16>, vector<128x384xbf16>, vector<8x384xf32> -> vector<8x384xf32>
    %c0_36 = arith.constant 0 : index
    %c0_37 = arith.constant 0 : index
    %84 = vector.load %arg4[%c0_36, %c0_37] : memref<1x384xf32, #tpu.memory_space<vmem>>, vector<1x384xf32>
    %85 = vector.broadcast %84 : vector<1x384xf32> to vector<8x384xf32>
    %86 = arith.addf %83, %85 : vector<8x384xf32>
    %87 = vector.extract_strided_slice %80 {offsets = [0, 0], sizes = [8, 128], strides = [1, 1]} : vector<8x384xf32> to vector<8x128xf32>
    %88 = vector.extract_strided_slice %86 {offsets = [0, 0], sizes = [8, 128], strides = [1, 1]} : vector<8x384xf32> to vector<8x128xf32>
    %89 = arith.addf %87, %88 : vector<8x128xf32>
    %90 = arith.negf %89 : vector<8x128xf32>
    %91 = math.exp %90 : vector<8x128xf32>
    %cst_38 = arith.constant 1.000000e+00 : f32
    %92 = vector.broadcast %cst_38 : f32 to vector<8x128xf32>
    %93 = arith.addf %92, %91 : vector<8x128xf32>
    %94 = arith.divf %92, %93 : vector<8x128xf32>
    %95 = vector.extract_strided_slice %80 {offsets = [0, 128], sizes = [8, 128], strides = [1, 1]} : vector<8x384xf32> to vector<8x128xf32>
    %96 = vector.extract_strided_slice %86 {offsets = [0, 128], sizes = [8, 128], strides = [1, 1]} : vector<8x384xf32> to vector<8x128xf32>
    %97 = arith.addf %95, %96 : vector<8x128xf32>
    %98 = arith.negf %97 : vector<8x128xf32>
    %99 = math.exp %98 : vector<8x128xf32>
    %cst_39 = arith.constant 1.000000e+00 : f32
    %100 = vector.broadcast %cst_39 : f32 to vector<8x128xf32>
    %101 = arith.addf %100, %99 : vector<8x128xf32>
    %102 = arith.divf %100, %101 : vector<8x128xf32>
    %103 = vector.extract_strided_slice %80 {offsets = [0, 256], sizes = [8, 128], strides = [1, 1]} : vector<8x384xf32> to vector<8x128xf32>
    %104 = vector.extract_strided_slice %86 {offsets = [0, 256], sizes = [8, 128], strides = [1, 1]} : vector<8x384xf32> to vector<8x128xf32>
    %105 = arith.mulf %94, %104 : vector<8x128xf32>
    %106 = arith.addf %103, %105 : vector<8x128xf32>
    %107 = math.tanh %106 : vector<8x128xf32>
    %cst_40 = arith.constant 1.000000e+00 : f32
    %108 = vector.broadcast %cst_40 : f32 to vector<8x128xf32>
    %109 = arith.subf %108, %102 : vector<8x128xf32>
    %110 = arith.mulf %109, %107 : vector<8x128xf32>
    %111 = arith.mulf %102, %76 : vector<8x128xf32>
    %112 = arith.addf %110, %111 : vector<8x128xf32>
    %c2 = arith.constant 2 : index
    %c0_41 = arith.constant 0 : index
    %c0_42 = arith.constant 0 : index
    %113 = vector.load %arg15[%c2, %c0_41, %c0_42] : memref<8x8x128xf32, #tpu.memory_space<vmem>>, vector<1x8x128xf32>
    %114 = vector.shape_cast %113 : vector<1x8x128xf32> to vector<8x128xf32>
    %115 = vector.shape_cast %112 : vector<8x128xf32> to vector<1x8x128xf32>
    tpu.vector_store %arg15[%c2, %c0_41, %c0_42], %115 {strides = array<i32>} : memref<8x8x128xf32, #tpu.memory_space<vmem>>, vector<1x8x128xf32>,
    %c24 = arith.constant 24 : index
    %c0_43 = arith.constant 0 : index
    %116 = vector.load %arg14[%c24, %c0_43] : memref<64x384xf32, #tpu.memory_space<vmem>>, vector<8x384xf32>
    %117 = arith.truncf %112 : vector<8x128xf32> to vector<8x128xbf16>
    %c0_44 = arith.constant 0 : index
    %c0_45 = arith.constant 0 : index
    %118 = vector.load %arg3[%c0_44, %c0_45] : memref<128x384xbf16, #tpu.memory_space<vmem>>, vector<128x384xbf16>
    %cst_46 = arith.constant dense<0.000000e+00> : vector<8x384xf32>
    %119 = tpu.matmul %117, %118, %cst_46 {dimension_numbers = #tpu.dot_dimension_numbers<[1], [0], [0], [1], [0, 0, 1, 1], [], []>} : vector<8x128xbf16>, vector<128x384xbf16>, vector<8x384xf32> -> vector<8x384xf32>
    %c0_47 = arith.constant 0 : index
    %c0_48 = arith.constant 0 : index
    %120 = vector.load %arg4[%c0_47, %c0_48] : memref<1x384xf32, #tpu.memory_space<vmem>>, vector<1x384xf32>
    %121 = vector.broadcast %120 : vector<1x384xf32> to vector<8x384xf32>
    %122 = arith.addf %119, %121 : vector<8x384xf32>
    %123 = vector.extract_strided_slice %116 {offsets = [0, 0], sizes = [8, 128], strides = [1, 1]} : vector<8x384xf32> to vector<8x128xf32>
    %124 = vector.extract_strided_slice %122 {offsets = [0, 0], sizes = [8, 128], strides = [1, 1]} : vector<8x384xf32> to vector<8x128xf32>
    %125 = arith.addf %123, %124 : vector<8x128xf32>
    %126 = arith.negf %125 : vector<8x128xf32>
    %127 = math.exp %126 : vector<8x128xf32>
    %cst_49 = arith.constant 1.000000e+00 : f32
    %128 = vector.broadcast %cst_49 : f32 to vector<8x128xf32>
    %129 = arith.addf %128, %127 : vector<8x128xf32>
    %130 = arith.divf %128, %129 : vector<8x128xf32>
    %131 = vector.extract_strided_slice %116 {offsets = [0, 128], sizes = [8, 128], strides = [1, 1]} : vector<8x384xf32> to vector<8x128xf32>
    %132 = vector.extract_strided_slice %122 {offsets = [0, 128], sizes = [8, 128], strides = [1, 1]} : vector<8x384xf32> to vector<8x128xf32>
    %133 = arith.addf %131, %132 : vector<8x128xf32>
    %134 = arith.negf %133 : vector<8x128xf32>
    %135 = math.exp %134 : vector<8x128xf32>
    %cst_50 = arith.constant 1.000000e+00 : f32
    %136 = vector.broadcast %cst_50 : f32 to vector<8x128xf32>
    %137 = arith.addf %136, %135 : vector<8x128xf32>
    %138 = arith.divf %136, %137 : vector<8x128xf32>
    %139 = vector.extract_strided_slice %116 {offsets = [0, 256], sizes = [8, 128], strides = [1, 1]} : vector<8x384xf32> to vector<8x128xf32>
    %140 = vector.extract_strided_slice %122 {offsets = [0, 256], sizes = [8, 128], strides = [1, 1]} : vector<8x384xf32> to vector<8x128xf32>
    %141 = arith.mulf %130, %140 : vector<8x128xf32>
    %142 = arith.addf %139, %141 : vector<8x128xf32>
    %143 = math.tanh %142 : vector<8x128xf32>
    %cst_51 = arith.constant 1.000000e+00 : f32
    %144 = vector.broadcast %cst_51 : f32 to vector<8x128xf32>
    %145 = arith.subf %144, %138 : vector<8x128xf32>
    %146 = arith.mulf %145, %143 : vector<8x128xf32>
    %147 = arith.mulf %138, %112 : vector<8x128xf32>
    %148 = arith.addf %146, %147 : vector<8x128xf32>
    %c3 = arith.constant 3 : index
    %c0_52 = arith.constant 0 : index
    %c0_53 = arith.constant 0 : index
    %149 = vector.load %arg15[%c3, %c0_52, %c0_53] : memref<8x8x128xf32, #tpu.memory_space<vmem>>, vector<1x8x128xf32>
    %150 = vector.shape_cast %149 : vector<1x8x128xf32> to vector<8x128xf32>
    %151 = vector.shape_cast %148 : vector<8x128xf32> to vector<1x8x128xf32>
    tpu.vector_store %arg15[%c3, %c0_52, %c0_53], %151 {strides = array<i32>} : memref<8x8x128xf32, #tpu.memory_space<vmem>>, vector<1x8x128xf32>,
    %c32 = arith.constant 32 : index
    %c0_54 = arith.constant 0 : index
    %152 = vector.load %arg14[%c32, %c0_54] : memref<64x384xf32, #tpu.memory_space<vmem>>, vector<8x384xf32>
    %153 = arith.truncf %148 : vector<8x128xf32> to vector<8x128xbf16>
    %c0_55 = arith.constant 0 : index
    %c0_56 = arith.constant 0 : index
    %154 = vector.load %arg3[%c0_55, %c0_56] : memref<128x384xbf16, #tpu.memory_space<vmem>>, vector<128x384xbf16>
    %cst_57 = arith.constant dense<0.000000e+00> : vector<8x384xf32>
    %155 = tpu.matmul %153, %154, %cst_57 {dimension_numbers = #tpu.dot_dimension_numbers<[1], [0], [0], [1], [0, 0, 1, 1], [], []>} : vector<8x128xbf16>, vector<128x384xbf16>, vector<8x384xf32> -> vector<8x384xf32>
    %c0_58 = arith.constant 0 : index
    %c0_59 = arith.constant 0 : index
    %156 = vector.load %arg4[%c0_58, %c0_59] : memref<1x384xf32, #tpu.memory_space<vmem>>, vector<1x384xf32>
    %157 = vector.broadcast %156 : vector<1x384xf32> to vector<8x384xf32>
    %158 = arith.addf %155, %157 : vector<8x384xf32>
    %159 = vector.extract_strided_slice %152 {offsets = [0, 0], sizes = [8, 128], strides = [1, 1]} : vector<8x384xf32> to vector<8x128xf32>
    %160 = vector.extract_strided_slice %158 {offsets = [0, 0], sizes = [8, 128], strides = [1, 1]} : vector<8x384xf32> to vector<8x128xf32>
    %161 = arith.addf %159, %160 : vector<8x128xf32>
    %162 = arith.negf %161 : vector<8x128xf32>
    %163 = math.exp %162 : vector<8x128xf32>
    %cst_60 = arith.constant 1.000000e+00 : f32
    %164 = vector.broadcast %cst_60 : f32 to vector<8x128xf32>
    %165 = arith.addf %164, %163 : vector<8x128xf32>
    %166 = arith.divf %164, %165 : vector<8x128xf32>
    %167 = vector.extract_strided_slice %152 {offsets = [0, 128], sizes = [8, 128], strides = [1, 1]} : vector<8x384xf32> to vector<8x128xf32>
    %168 = vector.extract_strided_slice %158 {offsets = [0, 128], sizes = [8, 128], strides = [1, 1]} : vector<8x384xf32> to vector<8x128xf32>
    %169 = arith.addf %167, %168 : vector<8x128xf32>
    %170 = arith.negf %169 : vector<8x128xf32>
    %171 = math.exp %170 : vector<8x128xf32>
    %cst_61 = arith.constant 1.000000e+00 : f32
    %172 = vector.broadcast %cst_61 : f32 to vector<8x128xf32>
    %173 = arith.addf %172, %171 : vector<8x128xf32>
    %174 = arith.divf %172, %173 : vector<8x128xf32>
    %175 = vector.extract_strided_slice %152 {offsets = [0, 256], sizes = [8, 128], strides = [1, 1]} : vector<8x384xf32> to vector<8x128xf32>
    %176 = vector.extract_strided_slice %158 {offsets = [0, 256], sizes = [8, 128], strides = [1, 1]} : vector<8x384xf32> to vector<8x128xf32>
    %177 = arith.mulf %166, %176 : vector<8x128xf32>
    %178 = arith.addf %175, %177 : vector<8x128xf32>
    %179 = math.tanh %178 : vector<8x128xf32>
    %cst_62 = arith.constant 1.000000e+00 : f32
    %180 = vector.broadcast %cst_62 : f32 to vector<8x128xf32>
    %181 = arith.subf %180, %174 : vector<8x128xf32>
    %182 = arith.mulf %181, %179 : vector<8x128xf32>
    %183 = arith.mulf %174, %148 : vector<8x128xf32>
    %184 = arith.addf %182, %183 : vector<8x128xf32>
    %c4 = arith.constant 4 : index
    %c0_63 = arith.constant 0 : index
    %c0_64 = arith.constant 0 : index
    %185 = vector.load %arg15[%c4, %c0_63, %c0_64] : memref<8x8x128xf32, #tpu.memory_space<vmem>>, vector<1x8x128xf32>
    %186 = vector.shape_cast %185 : vector<1x8x128xf32> to vector<8x128xf32>
    %187 = vector.shape_cast %184 : vector<8x128xf32> to vector<1x8x128xf32>
    tpu.vector_store %arg15[%c4, %c0_63, %c0_64], %187 {strides = array<i32>} : memref<8x8x128xf32, #tpu.memory_space<vmem>>, vector<1x8x128xf32>,
    %c40 = arith.constant 40 : index
    %c0_65 = arith.constant 0 : index
    %188 = vector.load %arg14[%c40, %c0_65] : memref<64x384xf32, #tpu.memory_space<vmem>>, vector<8x384xf32>
    %189 = arith.truncf %184 : vector<8x128xf32> to vector<8x128xbf16>
    %c0_66 = arith.constant 0 : index
    %c0_67 = arith.constant 0 : index
    %190 = vector.load %arg3[%c0_66, %c0_67] : memref<128x384xbf16, #tpu.memory_space<vmem>>, vector<128x384xbf16>
    %cst_68 = arith.constant dense<0.000000e+00> : vector<8x384xf32>
    %191 = tpu.matmul %189, %190, %cst_68 {dimension_numbers = #tpu.dot_dimension_numbers<[1], [0], [0], [1], [0, 0, 1, 1], [], []>} : vector<8x128xbf16>, vector<128x384xbf16>, vector<8x384xf32> -> vector<8x384xf32>
    %c0_69 = arith.constant 0 : index
    %c0_70 = arith.constant 0 : index
    %192 = vector.load %arg4[%c0_69, %c0_70] : memref<1x384xf32, #tpu.memory_space<vmem>>, vector<1x384xf32>
    %193 = vector.broadcast %192 : vector<1x384xf32> to vector<8x384xf32>
    %194 = arith.addf %191, %193 : vector<8x384xf32>
    %195 = vector.extract_strided_slice %188 {offsets = [0, 0], sizes = [8, 128], strides = [1, 1]} : vector<8x384xf32> to vector<8x128xf32>
    %196 = vector.extract_strided_slice %194 {offsets = [0, 0], sizes = [8, 128], strides = [1, 1]} : vector<8x384xf32> to vector<8x128xf32>
    %197 = arith.addf %195, %196 : vector<8x128xf32>
    %198 = arith.negf %197 : vector<8x128xf32>
    %199 = math.exp %198 : vector<8x128xf32>
    %cst_71 = arith.constant 1.000000e+00 : f32
    %200 = vector.broadcast %cst_71 : f32 to vector<8x128xf32>
    %201 = arith.addf %200, %199 : vector<8x128xf32>
    %202 = arith.divf %200, %201 : vector<8x128xf32>
    %203 = vector.extract_strided_slice %188 {offsets = [0, 128], sizes = [8, 128], strides = [1, 1]} : vector<8x384xf32> to vector<8x128xf32>
    %204 = vector.extract_strided_slice %194 {offsets = [0, 128], sizes = [8, 128], strides = [1, 1]} : vector<8x384xf32> to vector<8x128xf32>
    %205 = arith.addf %203, %204 : vector<8x128xf32>
    %206 = arith.negf %205 : vector<8x128xf32>
    %207 = math.exp %206 : vector<8x128xf32>
    %cst_72 = arith.constant 1.000000e+00 : f32
    %208 = vector.broadcast %cst_72 : f32 to vector<8x128xf32>
    %209 = arith.addf %208, %207 : vector<8x128xf32>
    %210 = arith.divf %208, %209 : vector<8x128xf32>
    %211 = vector.extract_strided_slice %188 {offsets = [0, 256], sizes = [8, 128], strides = [1, 1]} : vector<8x384xf32> to vector<8x128xf32>
    %212 = vector.extract_strided_slice %194 {offsets = [0, 256], sizes = [8, 128], strides = [1, 1]} : vector<8x384xf32> to vector<8x128xf32>
    %213 = arith.mulf %202, %212 : vector<8x128xf32>
    %214 = arith.addf %211, %213 : vector<8x128xf32>
    %215 = math.tanh %214 : vector<8x128xf32>
    %cst_73 = arith.constant 1.000000e+00 : f32
    %216 = vector.broadcast %cst_73 : f32 to vector<8x128xf32>
    %217 = arith.subf %216, %210 : vector<8x128xf32>
    %218 = arith.mulf %217, %215 : vector<8x128xf32>
    %219 = arith.mulf %210, %184 : vector<8x128xf32>
    %220 = arith.addf %218, %219 : vector<8x128xf32>
    %c5 = arith.constant 5 : index
    %c0_74 = arith.constant 0 : index
    %c0_75 = arith.constant 0 : index
    %221 = vector.load %arg15[%c5, %c0_74, %c0_75] : memref<8x8x128xf32, #tpu.memory_space<vmem>>, vector<1x8x128xf32>
    %222 = vector.shape_cast %221 : vector<1x8x128xf32> to vector<8x128xf32>
    %223 = vector.shape_cast %220 : vector<8x128xf32> to vector<1x8x128xf32>
    tpu.vector_store %arg15[%c5, %c0_74, %c0_75], %223 {strides = array<i32>} : memref<8x8x128xf32, #tpu.memory_space<vmem>>, vector<1x8x128xf32>,
    %c48 = arith.constant 48 : index
    %c0_76 = arith.constant 0 : index
    %224 = vector.load %arg14[%c48, %c0_76] : memref<64x384xf32, #tpu.memory_space<vmem>>, vector<8x384xf32>
    %225 = arith.truncf %220 : vector<8x128xf32> to vector<8x128xbf16>
    %c0_77 = arith.constant 0 : index
    %c0_78 = arith.constant 0 : index
    %226 = vector.load %arg3[%c0_77, %c0_78] : memref<128x384xbf16, #tpu.memory_space<vmem>>, vector<128x384xbf16>
    %cst_79 = arith.constant dense<0.000000e+00> : vector<8x384xf32>
    %227 = tpu.matmul %225, %226, %cst_79 {dimension_numbers = #tpu.dot_dimension_numbers<[1], [0], [0], [1], [0, 0, 1, 1], [], []>} : vector<8x128xbf16>, vector<128x384xbf16>, vector<8x384xf32> -> vector<8x384xf32>
    %c0_80 = arith.constant 0 : index
    %c0_81 = arith.constant 0 : index
    %228 = vector.load %arg4[%c0_80, %c0_81] : memref<1x384xf32, #tpu.memory_space<vmem>>, vector<1x384xf32>
    %229 = vector.broadcast %228 : vector<1x384xf32> to vector<8x384xf32>
    %230 = arith.addf %227, %229 : vector<8x384xf32>
    %231 = vector.extract_strided_slice %224 {offsets = [0, 0], sizes = [8, 128], strides = [1, 1]} : vector<8x384xf32> to vector<8x128xf32>
    %232 = vector.extract_strided_slice %230 {offsets = [0, 0], sizes = [8, 128], strides = [1, 1]} : vector<8x384xf32> to vector<8x128xf32>
    %233 = arith.addf %231, %232 : vector<8x128xf32>
    %234 = arith.negf %233 : vector<8x128xf32>
    %235 = math.exp %234 : vector<8x128xf32>
    %cst_82 = arith.constant 1.000000e+00 : f32
    %236 = vector.broadcast %cst_82 : f32 to vector<8x128xf32>
    %237 = arith.addf %236, %235 : vector<8x128xf32>
    %238 = arith.divf %236, %237 : vector<8x128xf32>
    %239 = vector.extract_strided_slice %224 {offsets = [0, 128], sizes = [8, 128], strides = [1, 1]} : vector<8x384xf32> to vector<8x128xf32>
    %240 = vector.extract_strided_slice %230 {offsets = [0, 128], sizes = [8, 128], strides = [1, 1]} : vector<8x384xf32> to vector<8x128xf32>
    %241 = arith.addf %239, %240 : vector<8x128xf32>
    %242 = arith.negf %241 : vector<8x128xf32>
    %243 = math.exp %242 : vector<8x128xf32>
    %cst_83 = arith.constant 1.000000e+00 : f32
    %244 = vector.broadcast %cst_83 : f32 to vector<8x128xf32>
    %245 = arith.addf %244, %243 : vector<8x128xf32>
    %246 = arith.divf %244, %245 : vector<8x128xf32>
    %247 = vector.extract_strided_slice %224 {offsets = [0, 256], sizes = [8, 128], strides = [1, 1]} : vector<8x384xf32> to vector<8x128xf32>
    %248 = vector.extract_strided_slice %230 {offsets = [0, 256], sizes = [8, 128], strides = [1, 1]} : vector<8x384xf32> to vector<8x128xf32>
    %249 = arith.mulf %238, %248 : vector<8x128xf32>
    %250 = arith.addf %247, %249 : vector<8x128xf32>
    %251 = math.tanh %250 : vector<8x128xf32>
    %cst_84 = arith.constant 1.000000e+00 : f32
    %252 = vector.broadcast %cst_84 : f32 to vector<8x128xf32>
    %253 = arith.subf %252, %246 : vector<8x128xf32>
    %254 = arith.mulf %253, %251 : vector<8x128xf32>
    %255 = arith.mulf %246, %220 : vector<8x128xf32>
    %256 = arith.addf %254, %255 : vector<8x128xf32>
    %c6 = arith.constant 6 : index
    %c0_85 = arith.constant 0 : index
    %c0_86 = arith.constant 0 : index
    %257 = vector.load %arg15[%c6, %c0_85, %c0_86] : memref<8x8x128xf32, #tpu.memory_space<vmem>>, vector<1x8x128xf32>
    %258 = vector.shape_cast %257 : vector<1x8x128xf32> to vector<8x128xf32>
    %259 = vector.shape_cast %256 : vector<8x128xf32> to vector<1x8x128xf32>
    tpu.vector_store %arg15[%c6, %c0_85, %c0_86], %259 {strides = array<i32>} : memref<8x8x128xf32, #tpu.memory_space<vmem>>, vector<1x8x128xf32>,
    %c56 = arith.constant 56 : index
    %c0_87 = arith.constant 0 : index
    %260 = vector.load %arg14[%c56, %c0_87] : memref<64x384xf32, #tpu.memory_space<vmem>>, vector<8x384xf32>
    %261 = arith.truncf %256 : vector<8x128xf32> to vector<8x128xbf16>
    %c0_88 = arith.constant 0 : index
    %c0_89 = arith.constant 0 : index
    %262 = vector.load %arg3[%c0_88, %c0_89] : memref<128x384xbf16, #tpu.memory_space<vmem>>, vector<128x384xbf16>
    %cst_90 = arith.constant dense<0.000000e+00> : vector<8x384xf32>
    %263 = tpu.matmul %261, %262, %cst_90 {dimension_numbers = #tpu.dot_dimension_numbers<[1], [0], [0], [1], [0, 0, 1, 1], [], []>} : vector<8x128xbf16>, vector<128x384xbf16>, vector<8x384xf32> -> vector<8x384xf32>
    %c0_91 = arith.constant 0 : index
    %c0_92 = arith.constant 0 : index
    %264 = vector.load %arg4[%c0_91, %c0_92] : memref<1x384xf32, #tpu.memory_space<vmem>>, vector<1x384xf32>
    %265 = vector.broadcast %264 : vector<1x384xf32> to vector<8x384xf32>
    %266 = arith.addf %263, %265 : vector<8x384xf32>
    %267 = vector.extract_strided_slice %260 {offsets = [0, 0], sizes = [8, 128], strides = [1, 1]} : vector<8x384xf32> to vector<8x128xf32>
    %268 = vector.extract_strided_slice %266 {offsets = [0, 0], sizes = [8, 128], strides = [1, 1]} : vector<8x384xf32> to vector<8x128xf32>
    %269 = arith.addf %267, %268 : vector<8x128xf32>
    %270 = arith.negf %269 : vector<8x128xf32>
    %271 = math.exp %270 : vector<8x128xf32>
    %cst_93 = arith.constant 1.000000e+00 : f32
    %272 = vector.broadcast %cst_93 : f32 to vector<8x128xf32>
    %273 = arith.addf %272, %271 : vector<8x128xf32>
    %274 = arith.divf %272, %273 : vector<8x128xf32>
    %275 = vector.extract_strided_slice %260 {offsets = [0, 128], sizes = [8, 128], strides = [1, 1]} : vector<8x384xf32> to vector<8x128xf32>
    %276 = vector.extract_strided_slice %266 {offsets = [0, 128], sizes = [8, 128], strides = [1, 1]} : vector<8x384xf32> to vector<8x128xf32>
    %277 = arith.addf %275, %276 : vector<8x128xf32>
    %278 = arith.negf %277 : vector<8x128xf32>
    %279 = math.exp %278 : vector<8x128xf32>
    %cst_94 = arith.constant 1.000000e+00 : f32
    %280 = vector.broadcast %cst_94 : f32 to vector<8x128xf32>
    %281 = arith.addf %280, %279 : vector<8x128xf32>
    %282 = arith.divf %280, %281 : vector<8x128xf32>
    %283 = vector.extract_strided_slice %260 {offsets = [0, 256], sizes = [8, 128], strides = [1, 1]} : vector<8x384xf32> to vector<8x128xf32>
    %284 = vector.extract_strided_slice %266 {offsets = [0, 256], sizes = [8, 128], strides = [1, 1]} : vector<8x384xf32> to vector<8x128xf32>
    %285 = arith.mulf %274, %284 : vector<8x128xf32>
    %286 = arith.addf %283, %285 : vector<8x128xf32>
    %287 = math.tanh %286 : vector<8x128xf32>
    %cst_95 = arith.constant 1.000000e+00 : f32
    %288 = vector.broadcast %cst_95 : f32 to vector<8x128xf32>
    %289 = arith.subf %288, %282 : vector<8x128xf32>
    %290 = arith.mulf %289, %287 : vector<8x128xf32>
    %291 = arith.mulf %282, %256 : vector<8x128xf32>
    %292 = arith.addf %290, %291 : vector<8x128xf32>
    %c7 = arith.constant 7 : index
    %c0_96 = arith.constant 0 : index
    %c0_97 = arith.constant 0 : index
    %293 = vector.load %arg15[%c7, %c0_96, %c0_97] : memref<8x8x128xf32, #tpu.memory_space<vmem>>, vector<1x8x128xf32>
    %294 = vector.shape_cast %293 : vector<1x8x128xf32> to vector<8x128xf32>
    %295 = vector.shape_cast %292 : vector<8x128xf32> to vector<1x8x128xf32>
    tpu.vector_store %arg15[%c7, %c0_96, %c0_97], %295 {strides = array<i32>} : memref<8x8x128xf32, #tpu.memory_space<vmem>>, vector<1x8x128xf32>,
    %c0_98 = arith.constant 0 : index
    %c0_99 = arith.constant 0 : index
    %c0_100 = arith.constant 0 : index
    %296 = vector.load %arg15[%c0_98, %c0_99, %c0_100] : memref<8x8x128xf32, #tpu.memory_space<vmem>>, vector<1x8x128xf32>
    %297 = vector.shape_cast %296 : vector<1x8x128xf32> to vector<8x128xf32>
    %c0_101 = arith.constant 0 : index
    %c0_102 = arith.constant 0 : index
    %c0_103 = arith.constant 0 : index
    %298 = vector.load %arg13[%c0_101, %c0_102, %c0_103] : memref<8x8x128xf32, #tpu.memory_space<vmem>>, vector<8x1x128xf32>
    %299 = vector.shape_cast %298 : vector<8x1x128xf32> to vector<8x128xf32>
    %300 = vector.shape_cast %297 : vector<8x128xf32> to vector<8x1x128xf32>
    tpu.vector_store %arg13[%c0_101, %c0_102, %c0_103], %300 {strides = array<i32>} : memref<8x8x128xf32, #tpu.memory_space<vmem>>, vector<8x1x128xf32>,
    %c1_104 = arith.constant 1 : index
    %c0_105 = arith.constant 0 : index
    %c0_106 = arith.constant 0 : index
    %301 = vector.load %arg15[%c1_104, %c0_105, %c0_106] : memref<8x8x128xf32, #tpu.memory_space<vmem>>, vector<1x8x128xf32>
    %302 = vector.shape_cast %301 : vector<1x8x128xf32> to vector<8x128xf32>
    %c0_107 = arith.constant 0 : index
    %c1_108 = arith.constant 1 : index
    %c0_109 = arith.constant 0 : index
    %303 = vector.load %arg13[%c0_107, %c1_108, %c0_109] : memref<8x8x128xf32, #tpu.memory_space<vmem>>, vector<8x1x128xf32>
    %304 = vector.shape_cast %303 : vector<8x1x128xf32> to vector<8x128xf32>
    %305 = vector.shape_cast %302 : vector<8x128xf32> to vector<8x1x128xf32>
    tpu.vector_store %arg13[%c0_107, %c1_108, %c0_109], %305 {strides = array<i32>} : memref<8x8x128xf32, #tpu.memory_space<vmem>>, vector<8x1x128xf32>,
    %c2_110 = arith.constant 2 : index
    %c0_111 = arith.constant 0 : index
    %c0_112 = arith.constant 0 : index
    %306 = vector.load %arg15[%c2_110, %c0_111, %c0_112] : memref<8x8x128xf32, #tpu.memory_space<vmem>>, vector<1x8x128xf32>
    %307 = vector.shape_cast %306 : vector<1x8x128xf32> to vector<8x128xf32>
    %c0_113 = arith.constant 0 : index
    %c2_114 = arith.constant 2 : index
    %c0_115 = arith.constant 0 : index
    %308 = vector.load %arg13[%c0_113, %c2_114, %c0_115] : memref<8x8x128xf32, #tpu.memory_space<vmem>>, vector<8x1x128xf32>
    %309 = vector.shape_cast %308 : vector<8x1x128xf32> to vector<8x128xf32>
    %310 = vector.shape_cast %307 : vector<8x128xf32> to vector<8x1x128xf32>
    tpu.vector_store %arg13[%c0_113, %c2_114, %c0_115], %310 {strides = array<i32>} : memref<8x8x128xf32, #tpu.memory_space<vmem>>, vector<8x1x128xf32>,
    %c3_116 = arith.constant 3 : index
    %c0_117 = arith.constant 0 : index
    %c0_118 = arith.constant 0 : index
    %311 = vector.load %arg15[%c3_116, %c0_117, %c0_118] : memref<8x8x128xf32, #tpu.memory_space<vmem>>, vector<1x8x128xf32>
    %312 = vector.shape_cast %311 : vector<1x8x128xf32> to vector<8x128xf32>
    %c0_119 = arith.constant 0 : index
    %c3_120 = arith.constant 3 : index
    %c0_121 = arith.constant 0 : index
    %313 = vector.load %arg13[%c0_119, %c3_120, %c0_121] : memref<8x8x128xf32, #tpu.memory_space<vmem>>, vector<8x1x128xf32>
    %314 = vector.shape_cast %313 : vector<8x1x128xf32> to vector<8x128xf32>
    %315 = vector.shape_cast %312 : vector<8x128xf32> to vector<8x1x128xf32>
    tpu.vector_store %arg13[%c0_119, %c3_120, %c0_121], %315 {strides = array<i32>} : memref<8x8x128xf32, #tpu.memory_space<vmem>>, vector<8x1x128xf32>,
    %c4_122 = arith.constant 4 : index
    %c0_123 = arith.constant 0 : index
    %c0_124 = arith.constant 0 : index
    %316 = vector.load %arg15[%c4_122, %c0_123, %c0_124] : memref<8x8x128xf32, #tpu.memory_space<vmem>>, vector<1x8x128xf32>
    %317 = vector.shape_cast %316 : vector<1x8x128xf32> to vector<8x128xf32>
    %c0_125 = arith.constant 0 : index
    %c4_126 = arith.constant 4 : index
    %c0_127 = arith.constant 0 : index
    %318 = vector.load %arg13[%c0_125, %c4_126, %c0_127] : memref<8x8x128xf32, #tpu.memory_space<vmem>>, vector<8x1x128xf32>
    %319 = vector.shape_cast %318 : vector<8x1x128xf32> to vector<8x128xf32>
    %320 = vector.shape_cast %317 : vector<8x128xf32> to vector<8x1x128xf32>
    tpu.vector_store %arg13[%c0_125, %c4_126, %c0_127], %320 {strides = array<i32>} : memref<8x8x128xf32, #tpu.memory_space<vmem>>, vector<8x1x128xf32>,
    %c5_128 = arith.constant 5 : index
    %c0_129 = arith.constant 0 : index
    %c0_130 = arith.constant 0 : index
    %321 = vector.load %arg15[%c5_128, %c0_129, %c0_130] : memref<8x8x128xf32, #tpu.memory_space<vmem>>, vector<1x8x128xf32>
    %322 = vector.shape_cast %321 : vector<1x8x128xf32> to vector<8x128xf32>
    %c0_131 = arith.constant 0 : index
    %c5_132 = arith.constant 5 : index
    %c0_133 = arith.constant 0 : index
    %323 = vector.load %arg13[%c0_131, %c5_132, %c0_133] : memref<8x8x128xf32, #tpu.memory_space<vmem>>, vector<8x1x128xf32>
    %324 = vector.shape_cast %323 : vector<8x1x128xf32> to vector<8x128xf32>
    %325 = vector.shape_cast %322 : vector<8x128xf32> to vector<8x1x128xf32>
    tpu.vector_store %arg13[%c0_131, %c5_132, %c0_133], %325 {strides = array<i32>} : memref<8x8x128xf32, #tpu.memory_space<vmem>>, vector<8x1x128xf32>,
    %c6_134 = arith.constant 6 : index
    %c0_135 = arith.constant 0 : index
    %c0_136 = arith.constant 0 : index
    %326 = vector.load %arg15[%c6_134, %c0_135, %c0_136] : memref<8x8x128xf32, #tpu.memory_space<vmem>>, vector<1x8x128xf32>
    %327 = vector.shape_cast %326 : vector<1x8x128xf32> to vector<8x128xf32>
    %c0_137 = arith.constant 0 : index
    %c6_138 = arith.constant 6 : index
    %c0_139 = arith.constant 0 : index
    %328 = vector.load %arg13[%c0_137, %c6_138, %c0_139] : memref<8x8x128xf32, #tpu.memory_space<vmem>>, vector<8x1x128xf32>
    %329 = vector.shape_cast %328 : vector<8x1x128xf32> to vector<8x128xf32>
    %330 = vector.shape_cast %327 : vector<8x128xf32> to vector<8x1x128xf32>
    tpu.vector_store %arg13[%c0_137, %c6_138, %c0_139], %330 {strides = array<i32>} : memref<8x8x128xf32, #tpu.memory_space<vmem>>, vector<8x1x128xf32>,
    %c7_140 = arith.constant 7 : index
    %c0_141 = arith.constant 0 : index
    %c0_142 = arith.constant 0 : index
    %331 = vector.load %arg15[%c7_140, %c0_141, %c0_142] : memref<8x8x128xf32, #tpu.memory_space<vmem>>, vector<1x8x128xf32>
    %332 = vector.shape_cast %331 : vector<1x8x128xf32> to vector<8x128xf32>
    %c0_143 = arith.constant 0 : index
    %c7_144 = arith.constant 7 : index
    %c0_145 = arith.constant 0 : index
    %333 = vector.load %arg13[%c0_143, %c7_144, %c0_145] : memref<8x8x128xf32, #tpu.memory_space<vmem>>, vector<8x1x128xf32>
    %334 = vector.shape_cast %333 : vector<8x1x128xf32> to vector<8x128xf32>
    %335 = vector.shape_cast %332 : vector<8x128xf32> to vector<8x1x128xf32>
    tpu.vector_store %arg13[%c0_143, %c7_144, %c0_145], %335 {strides = array<i32>} : memref<8x8x128xf32, #tpu.memory_space<vmem>>, vector<8x1x128xf32>,
    %c0_146 = arith.constant 0 : index
    %c0_147 = arith.constant 0 : index
    %c0_148 = arith.constant 0 : index
    %336 = vector.load %arg15[%c0_146, %c0_147, %c0_148] : memref<8x8x128xf32, #tpu.memory_space<vmem>>, vector<8x8x128xf32>
    %337 = vector.shape_cast %336 : vector<8x8x128xf32> to vector<64x128xf32>
    %338 = arith.truncf %337 : vector<64x128xf32> to vector<64x128xbf16>
    %c0_149 = arith.constant 0 : index
    %c0_150 = arith.constant 0 : index
    %339 = vector.load %arg9[%c0_149, %c0_150] : memref<128x128xbf16, #tpu.memory_space<vmem>>, vector<128x128xbf16>
    %cst_151 = arith.constant dense<0.000000e+00> : vector<64x128xf32>
    %340 = tpu.matmul %338, %339, %cst_151 {dimension_numbers = #tpu.dot_dimension_numbers<[1], [0], [0], [1], [0, 0, 1, 1], [], []>} : vector<64x128xbf16>, vector<128x128xbf16>, vector<64x128xf32> -> vector<64x128xf32>
    %341 = vector.shape_cast %340 : vector<64x128xf32> to vector<8x8x128xf32>
    %c0_152 = arith.constant 0 : index
    %c0_153 = arith.constant 0 : index
    %c0_154 = arith.constant 0 : index
    %342 = vector.load %arg13[%c0_152, %c0_153, %c0_154] : memref<8x8x128xf32, #tpu.memory_space<vmem>>, vector<8x8x128xf32>
    %343 = tpu.iota {dimensions = array<i32: 1>} : vector<8x128xi32>
    %c8_i32 = arith.constant 8 : i32
    %344 = vector.broadcast %c8_i32 : i32 to vector<8x128xi32>
    %345 = arith.cmpi slt, %343, %344 : vector<8x128xi32>
    %346 = arith.extui %345 : vector<8x128xi1> to vector<8x128xi32>
    %347 = arith.sitofp %346 : vector<8x128xi32> to vector<8x128xf32>
    %348 = tpu.iota {dimensions = array<i32: 0>} : vector<8x1x128xi32>
    %349 = tpu.iota {dimensions = array<i32: 2>} : vector<8x1x128xi32>
    %350 = arith.cmpi eq, %348, %349 : vector<8x1x128xi32>
    %351 = arith.extui %350 : vector<8x1x128xi1> to vector<8x1x128xi32>
    %352 = arith.sitofp %351 : vector<8x1x128xi32> to vector<8x1x128xf32>
    %c0_i32 = arith.constant 0 : i32
    %353 = vector.broadcast %c0_i32 : i32 to vector<8x128xi32>
    %cst_155 = arith.constant 0.000000e+00 : f32
    %354 = vector.broadcast %cst_155 : f32 to vector<8x128xf32>
    %355 = arith.truncf %354 : vector<8x128xf32> to vector<8x128xbf16>
    %c0_156 = arith.constant 0 : index
    %c0_157 = arith.constant 0 : index
    %356 = vector.load %arg5[%c0_156, %c0_157] : memref<128x384xbf16, #tpu.memory_space<vmem>>, vector<128x384xbf16>
    %cst_158 = arith.constant dense<0.000000e+00> : vector<8x384xf32>
    %357 = tpu.matmul %355, %356, %cst_158 {dimension_numbers = #tpu.dot_dimension_numbers<[1], [0], [0], [1], [0, 0, 1, 1], [], []>} : vector<8x128xbf16>, vector<128x384xbf16>, vector<8x384xf32> -> vector<8x384xf32>
    %c0_159 = arith.constant 0 : index
    %c0_160 = arith.constant 0 : index
    %358 = vector.load %arg7[%c0_159, %c0_160] : memref<1x384xf32, #tpu.memory_space<vmem>>, vector<1x384xf32>
    %359 = vector.broadcast %358 : vector<1x384xf32> to vector<8x384xf32>
    %360 = arith.addf %357, %359 : vector<8x384xf32>
    %361 = arith.truncf %292 : vector<8x128xf32> to vector<8x128xbf16>
    %c0_161 = arith.constant 0 : index
    %c0_162 = arith.constant 0 : index
    %362 = vector.load %arg6[%c0_161, %c0_162] : memref<128x384xbf16, #tpu.memory_space<vmem>>, vector<128x384xbf16>
    %cst_163 = arith.constant dense<0.000000e+00> : vector<8x384xf32>
    %363 = tpu.matmul %361, %362, %cst_163 {dimension_numbers = #tpu.dot_dimension_numbers<[1], [0], [0], [1], [0, 0, 1, 1], [], []>} : vector<8x128xbf16>, vector<128x384xbf16>, vector<8x384xf32> -> vector<8x384xf32>
    %c0_164 = arith.constant 0 : index
    %c0_165 = arith.constant 0 : index
    %364 = vector.load %arg8[%c0_164, %c0_165] : memref<1x384xf32, #tpu.memory_space<vmem>>, vector<1x384xf32>
    %365 = vector.broadcast %364 : vector<1x384xf32> to vector<8x384xf32>
    %366 = arith.addf %363, %365 : vector<8x384xf32>
    %367 = vector.extract_strided_slice %360 {offsets = [0, 0], sizes = [8, 128], strides = [1, 1]} : vector<8x384xf32> to vector<8x128xf32>
    %368 = vector.extract_strided_slice %366 {offsets = [0, 0], sizes = [8, 128], strides = [1, 1]} : vector<8x384xf32> to vector<8x128xf32>
    %369 = arith.addf %367, %368 : vector<8x128xf32>
    %370 = arith.negf %369 : vector<8x128xf32>
    %371 = math.exp %370 : vector<8x128xf32>
    %cst_166 = arith.constant 1.000000e+00 : f32
    %372 = vector.broadcast %cst_166 : f32 to vector<8x128xf32>
    %373 = arith.addf %372, %371 : vector<8x128xf32>
    %374 = arith.divf %372, %373 : vector<8x128xf32>
    %375 = vector.extract_strided_slice %360 {offsets = [0, 128], sizes = [8, 128], strides = [1, 1]} : vector<8x384xf32> to vector<8x128xf32>
    %376 = vector.extract_strided_slice %366 {offsets = [0, 128], sizes = [8, 128], strides = [1, 1]} : vector<8x384xf32> to vector<8x128xf32>
    %377 = arith.addf %375, %376 : vector<8x128xf32>
    %378 = arith.negf %377 : vector<8x128xf32>
    %379 = math.exp %378 : vector<8x128xf32>
    %cst_167 = arith.constant 1.000000e+00 : f32
    %380 = vector.broadcast %cst_167 : f32 to vector<8x128xf32>
    %381 = arith.addf %380, %379 : vector<8x128xf32>
    %382 = arith.divf %380, %381 : vector<8x128xf32>
    %383 = vector.extract_strided_slice %360 {offsets = [0, 256], sizes = [8, 128], strides = [1, 1]} : vector<8x384xf32> to vector<8x128xf32>
    %384 = vector.extract_strided_slice %366 {offsets = [0, 256], sizes = [8, 128], strides = [1, 1]} : vector<8x384xf32> to vector<8x128xf32>
    %385 = arith.mulf %374, %384 : vector<8x128xf32>
    %386 = arith.addf %383, %385 : vector<8x128xf32>
    %387 = math.tanh %386 : vector<8x128xf32>
    %cst_168 = arith.constant 1.000000e+00 : f32
    %388 = vector.broadcast %cst_168 : f32 to vector<8x128xf32>
    %389 = arith.subf %388, %382 : vector<8x128xf32>
    %390 = arith.mulf %389, %387 : vector<8x128xf32>
    %391 = arith.mulf %382, %292 : vector<8x128xf32>
    %392 = arith.addf %390, %391 : vector<8x128xf32>
    %393 = arith.truncf %392 : vector<8x128xf32> to vector<8x128xbf16>
    %c0_169 = arith.constant 0 : index
    %c0_170 = arith.constant 0 : index
    %394 = vector.load %arg10[%c0_169, %c0_170] : memref<128x128xbf16, #tpu.memory_space<vmem>>, vector<128x128xbf16>
    %cst_171 = arith.constant dense<0.000000e+00> : vector<8x128xf32>
    %395 = tpu.matmul %393, %394, %cst_171 {dimension_numbers = #tpu.dot_dimension_numbers<[1], [0], [0], [1], [0, 0, 1, 1], [], []>} : vector<8x128xbf16>, vector<128x128xbf16>, vector<8x128xf32> -> vector<8x128xf32>
    %396 = vector.shape_cast %395 : vector<8x128xf32> to vector<1x8x128xf32>
    %397 = vector.broadcast %396 : vector<1x8x128xf32> to vector<8x8x128xf32>
    %398 = arith.addf %341, %397 : vector<8x8x128xf32>
    %399 = math.tanh %398 : vector<8x8x128xf32>
    %400 = vector.shape_cast %399 : vector<8x8x128xf32> to vector<64x128xf32>
    %c0_172 = arith.constant 0 : index
    %c0_173 = arith.constant 0 : index
    %401 = vector.load %arg11[%c0_172, %c0_173] : memref<128x128xf32, #tpu.memory_space<vmem>>, vector<128x128xf32>
    %cst_174 = arith.constant dense<0.000000e+00> : vector<64x128xf32>
    %402 = tpu.matmul %400, %401, %cst_174 {dimension_numbers = #tpu.dot_dimension_numbers<[1], [0], [0], [1], [0, 0, 1, 1], [], []>} : vector<64x128xf32>, vector<128x128xf32>, vector<64x128xf32> -> vector<64x128xf32>
    %403 = vector.shape_cast %402 : vector<64x128xf32> to vector<8x8x128xf32>
    %404 = vector.broadcast %352 : vector<8x1x128xf32> to vector<8x8x128xf32>
    %405 = arith.mulf %403, %404 : vector<8x8x128xf32>
    %cst_175 = arith.constant dense<0.000000e+00> : vector<8x128xf32>
    %406 = vector.multi_reduction <add>, %405, %cst_175 [0] : vector<8x8x128xf32> to vector<8x128xf32>
    %cst_176 = arith.constant 0.000000e+00 : f32
    %407 = vector.broadcast %cst_176 : f32 to vector<8x128xf32>
    %408 = arith.cmpf ogt, %347, %407 : vector<8x128xf32>
    %cst_177 = arith.constant -1.000000e+09 : f32
    %409 = vector.broadcast %cst_177 : f32 to vector<8x128xf32>
    %410 = arith.select %408, %406, %409 : vector<8x128xi1>, vector<8x128xf32>
    %cst_178 = arith.constant dense<0xFF800000> : vector<8xf32>
    %411 = vector.multi_reduction <maximumf>, %410, %cst_178 [1] : vector<8x128xf32> to vector<8xf32>
    %412 = vector.shape_cast %411 : vector<8xf32> to vector<8x1xf32>
    %413 = vector.broadcast %412 : vector<8x1xf32> to vector<8x128xf32>
    %414 = arith.cmpf oeq, %410, %413 : vector<8x128xf32>
    %c128_i32 = arith.constant 128 : i32
    %415 = vector.broadcast %c128_i32 : i32 to vector<8x128xi32>
    %416 = arith.select %414, %343, %415 : vector<8x128xi1>, vector<8x128xi32>
    %cst_179 = arith.constant dense<2147483647> : vector<8xi32>
    %417 = vector.multi_reduction <minsi>, %416, %cst_179 [1] : vector<8x128xi32> to vector<8xi32>
    %418 = vector.shape_cast %417 : vector<8xi32> to vector<8x1xi32>
    %c0_i32_180 = arith.constant 0 : i32
    %419 = vector.broadcast %c0_i32_180 : i32 to vector<8x128xi32>
    %420 = arith.cmpi eq, %343, %419 : vector<8x128xi32>
    %421 = vector.shape_cast %418 : vector<8x1xi32> to vector<8x1xi32>
    %422 = vector.broadcast %421 : vector<8x1xi32> to vector<8x128xi32>
    %423 = arith.select %420, %422, %353 : vector<8x128xi1>, vector<8x128xi32>
    %424 = vector.broadcast %418 : vector<8x1xi32> to vector<8x128xi32>
    %425 = arith.cmpi eq, %343, %424 : vector<8x128xi32>
    %cst_181 = arith.constant 0.000000e+00 : f32
    %426 = vector.broadcast %cst_181 : f32 to vector<8x128xf32>
    %427 = arith.select %425, %426, %347 : vector<8x128xi1>, vector<8x128xf32>
    %428 = vector.extract_strided_slice %425 {offsets = [0, 0], sizes = [8, 8], strides = [1, 1]} : vector<8x128xi1> to vector<8x8xi1>
    %429 = arith.extui %428 : vector<8x8xi1> to vector<8x8xi32>
    %430 = arith.sitofp %429 : vector<8x8xi32> to vector<8x8xf32>
    %431 = vector.shape_cast %430 : vector<8x8xf32> to vector<8x8x1xf32>
    %432 = vector.broadcast %431 : vector<8x8x1xf32> to vector<8x8x128xf32>
    %433 = arith.mulf %432, %342 : vector<8x8x128xf32>
    %cst_182 = arith.constant dense<0.000000e+00> : vector<8x128xf32>
    %434 = vector.multi_reduction <add>, %433, %cst_182 [1] : vector<8x8x128xf32> to vector<8x128xf32>
    %435 = arith.truncf %434 : vector<8x128xf32> to vector<8x128xbf16>
    %c0_183 = arith.constant 0 : index
    %c0_184 = arith.constant 0 : index
    %436 = vector.load %arg5[%c0_183, %c0_184] : memref<128x384xbf16, #tpu.memory_space<vmem>>, vector<128x384xbf16>
    %cst_185 = arith.constant dense<0.000000e+00> : vector<8x384xf32>
    %437 = tpu.matmul %435, %436, %cst_185 {dimension_numbers = #tpu.dot_dimension_numbers<[1], [0], [0], [1], [0, 0, 1, 1], [], []>} : vector<8x128xbf16>, vector<128x384xbf16>, vector<8x384xf32> -> vector<8x384xf32>
    %c0_186 = arith.constant 0 : index
    %c0_187 = arith.constant 0 : index
    %438 = vector.load %arg7[%c0_186, %c0_187] : memref<1x384xf32, #tpu.memory_space<vmem>>, vector<1x384xf32>
    %439 = vector.broadcast %438 : vector<1x384xf32> to vector<8x384xf32>
    %440 = arith.addf %437, %439 : vector<8x384xf32>
    %441 = arith.truncf %392 : vector<8x128xf32> to vector<8x128xbf16>
    %c0_188 = arith.constant 0 : index
    %c0_189 = arith.constant 0 : index
    %442 = vector.load %arg6[%c0_188, %c0_189] : memref<128x384xbf16, #tpu.memory_space<vmem>>, vector<128x384xbf16>
    %cst_190 = arith.constant dense<0.000000e+00> : vector<8x384xf32>
    %443 = tpu.matmul %441, %442, %cst_190 {dimension_numbers = #tpu.dot_dimension_numbers<[1], [0], [0], [1], [0, 0, 1, 1], [], []>} : vector<8x128xbf16>, vector<128x384xbf16>, vector<8x384xf32> -> vector<8x384xf32>
    %c0_191 = arith.constant 0 : index
    %c0_192 = arith.constant 0 : index
    %444 = vector.load %arg8[%c0_191, %c0_192] : memref<1x384xf32, #tpu.memory_space<vmem>>, vector<1x384xf32>
    %445 = vector.broadcast %444 : vector<1x384xf32> to vector<8x384xf32>
    %446 = arith.addf %443, %445 : vector<8x384xf32>
    %447 = vector.extract_strided_slice %440 {offsets = [0, 0], sizes = [8, 128], strides = [1, 1]} : vector<8x384xf32> to vector<8x128xf32>
    %448 = vector.extract_strided_slice %446 {offsets = [0, 0], sizes = [8, 128], strides = [1, 1]} : vector<8x384xf32> to vector<8x128xf32>
    %449 = arith.addf %447, %448 : vector<8x128xf32>
    %450 = arith.negf %449 : vector<8x128xf32>
    %451 = math.exp %450 : vector<8x128xf32>
    %cst_193 = arith.constant 1.000000e+00 : f32
    %452 = vector.broadcast %cst_193 : f32 to vector<8x128xf32>
    %453 = arith.addf %452, %451 : vector<8x128xf32>
    %454 = arith.divf %452, %453 : vector<8x128xf32>
    %455 = vector.extract_strided_slice %440 {offsets = [0, 128], sizes = [8, 128], strides = [1, 1]} : vector<8x384xf32> to vector<8x128xf32>
    %456 = vector.extract_strided_slice %446 {offsets = [0, 128], sizes = [8, 128], strides = [1, 1]} : vector<8x384xf32> to vector<8x128xf32>
    %457 = arith.addf %455, %456 : vector<8x128xf32>
    %458 = arith.negf %457 : vector<8x128xf32>
    %459 = math.exp %458 : vector<8x128xf32>
    %cst_194 = arith.constant 1.000000e+00 : f32
    %460 = vector.broadcast %cst_194 : f32 to vector<8x128xf32>
    %461 = arith.addf %460, %459 : vector<8x128xf32>
    %462 = arith.divf %460, %461 : vector<8x128xf32>
    %463 = vector.extract_strided_slice %440 {offsets = [0, 256], sizes = [8, 128], strides = [1, 1]} : vector<8x384xf32> to vector<8x128xf32>
    %464 = vector.extract_strided_slice %446 {offsets = [0, 256], sizes = [8, 128], strides = [1, 1]} : vector<8x384xf32> to vector<8x128xf32>
    %465 = arith.mulf %454, %464 : vector<8x128xf32>
    %466 = arith.addf %463, %465 : vector<8x128xf32>
    %467 = math.tanh %466 : vector<8x128xf32>
    %cst_195 = arith.constant 1.000000e+00 : f32
    %468 = vector.broadcast %cst_195 : f32 to vector<8x128xf32>
    %469 = arith.subf %468, %462 : vector<8x128xf32>
    %470 = arith.mulf %469, %467 : vector<8x128xf32>
    %471 = arith.mulf %462, %392 : vector<8x128xf32>
    %472 = arith.addf %470, %471 : vector<8x128xf32>
    %473 = arith.truncf %472 : vector<8x128xf32> to vector<8x128xbf16>
    %c0_196 = arith.constant 0 : index
    %c0_197 = arith.constant 0 : index
    %474 = vector.load %arg10[%c0_196, %c0_197] : memref<128x128xbf16, #tpu.memory_space<vmem>>, vector<128x128xbf16>
    %cst_198 = arith.constant dense<0.000000e+00> : vector<8x128xf32>
    %475 = tpu.matmul %473, %474, %cst_198 {dimension_numbers = #tpu.dot_dimension_numbers<[1], [0], [0], [1], [0, 0, 1, 1], [], []>} : vector<8x128xbf16>, vector<128x128xbf16>, vector<8x128xf32> -> vector<8x128xf32>
    %476 = vector.shape_cast %475 : vector<8x128xf32> to vector<1x8x128xf32>
    %477 = vector.broadcast %476 : vector<1x8x128xf32> to vector<8x8x128xf32>
    %478 = arith.addf %341, %477 : vector<8x8x128xf32>
    %479 = math.tanh %478 : vector<8x8x128xf32>
    %480 = vector.shape_cast %479 : vector<8x8x128xf32> to vector<64x128xf32>
    %c0_199 = arith.constant 0 : index
    %c0_200 = arith.constant 0 : index
    %481 = vector.load %arg11[%c0_199, %c0_200] : memref<128x128xf32, #tpu.memory_space<vmem>>, vector<128x128xf32>
    %cst_201 = arith.constant dense<0.000000e+00> : vector<64x128xf32>
    %482 = tpu.matmul %480, %481, %cst_201 {dimension_numbers = #tpu.dot_dimension_numbers<[1], [0], [0], [1], [0, 0, 1, 1], [], []>} : vector<64x128xf32>, vector<128x128xf32>, vector<64x128xf32> -> vector<64x128xf32>
    %483 = vector.shape_cast %482 : vector<64x128xf32> to vector<8x8x128xf32>
    %484 = vector.broadcast %352 : vector<8x1x128xf32> to vector<8x8x128xf32>
    %485 = arith.mulf %483, %484 : vector<8x8x128xf32>
    %cst_202 = arith.constant dense<0.000000e+00> : vector<8x128xf32>
    %486 = vector.multi_reduction <add>, %485, %cst_202 [0] : vector<8x8x128xf32> to vector<8x128xf32>
    %cst_203 = arith.constant 0.000000e+00 : f32
    %487 = vector.broadcast %cst_203 : f32 to vector<8x128xf32>
    %488 = arith.cmpf ogt, %427, %487 : vector<8x128xf32>
    %cst_204 = arith.constant -1.000000e+09 : f32
    %489 = vector.broadcast %cst_204 : f32 to vector<8x128xf32>
    %490 = arith.select %488, %486, %489 : vector<8x128xi1>, vector<8x128xf32>
    %cst_205 = arith.constant dense<0xFF800000> : vector<8xf32>
    %491 = vector.multi_reduction <maximumf>, %490, %cst_205 [1] : vector<8x128xf32> to vector<8xf32>
    %492 = vector.shape_cast %491 : vector<8xf32> to vector<8x1xf32>
    %493 = vector.broadcast %492 : vector<8x1xf32> to vector<8x128xf32>
    %494 = arith.cmpf oeq, %490, %493 : vector<8x128xf32>
    %c128_i32_206 = arith.constant 128 : i32
    %495 = vector.broadcast %c128_i32_206 : i32 to vector<8x128xi32>
    %496 = arith.select %494, %343, %495 : vector<8x128xi1>, vector<8x128xi32>
    %cst_207 = arith.constant dense<2147483647> : vector<8xi32>
    %497 = vector.multi_reduction <minsi>, %496, %cst_207 [1] : vector<8x128xi32> to vector<8xi32>
    %498 = vector.shape_cast %497 : vector<8xi32> to vector<8x1xi32>
    %c1_i32 = arith.constant 1 : i32
    %499 = vector.broadcast %c1_i32 : i32 to vector<8x128xi32>
    %500 = arith.cmpi eq, %343, %499 : vector<8x128xi32>
    %501 = vector.shape_cast %498 : vector<8x1xi32> to vector<8x1xi32>
    %502 = vector.broadcast %501 : vector<8x1xi32> to vector<8x128xi32>
    %503 = arith.select %500, %502, %423 : vector<8x128xi1>, vector<8x128xi32>
    %504 = vector.broadcast %498 : vector<8x1xi32> to vector<8x128xi32>
    %505 = arith.cmpi eq, %343, %504 : vector<8x128xi32>
    %cst_208 = arith.constant 0.000000e+00 : f32
    %506 = vector.broadcast %cst_208 : f32 to vector<8x128xf32>
    %507 = arith.select %505, %506, %427 : vector<8x128xi1>, vector<8x128xf32>
    %508 = vector.extract_strided_slice %505 {offsets = [0, 0], sizes = [8, 8], strides = [1, 1]} : vector<8x128xi1> to vector<8x8xi1>
    %509 = arith.extui %508 : vector<8x8xi1> to vector<8x8xi32>
    %510 = arith.sitofp %509 : vector<8x8xi32> to vector<8x8xf32>
    %511 = vector.shape_cast %510 : vector<8x8xf32> to vector<8x8x1xf32>
    %512 = vector.broadcast %511 : vector<8x8x1xf32> to vector<8x8x128xf32>
    %513 = arith.mulf %512, %342 : vector<8x8x128xf32>
    %cst_209 = arith.constant dense<0.000000e+00> : vector<8x128xf32>
    %514 = vector.multi_reduction <add>, %513, %cst_209 [1] : vector<8x8x128xf32> to vector<8x128xf32>
    %515 = arith.truncf %514 : vector<8x128xf32> to vector<8x128xbf16>
    %c0_210 = arith.constant 0 : index
    %c0_211 = arith.constant 0 : index
    %516 = vector.load %arg5[%c0_210, %c0_211] : memref<128x384xbf16, #tpu.memory_space<vmem>>, vector<128x384xbf16>
    %cst_212 = arith.constant dense<0.000000e+00> : vector<8x384xf32>
    %517 = tpu.matmul %515, %516, %cst_212 {dimension_numbers = #tpu.dot_dimension_numbers<[1], [0], [0], [1], [0, 0, 1, 1], [], []>} : vector<8x128xbf16>, vector<128x384xbf16>, vector<8x384xf32> -> vector<8x384xf32>
    %c0_213 = arith.constant 0 : index
    %c0_214 = arith.constant 0 : index
    %518 = vector.load %arg7[%c0_213, %c0_214] : memref<1x384xf32, #tpu.memory_space<vmem>>, vector<1x384xf32>
    %519 = vector.broadcast %518 : vector<1x384xf32> to vector<8x384xf32>
    %520 = arith.addf %517, %519 : vector<8x384xf32>
    %521 = arith.truncf %472 : vector<8x128xf32> to vector<8x128xbf16>
    %c0_215 = arith.constant 0 : index
    %c0_216 = arith.constant 0 : index
    %522 = vector.load %arg6[%c0_215, %c0_216] : memref<128x384xbf16, #tpu.memory_space<vmem>>, vector<128x384xbf16>
    %cst_217 = arith.constant dense<0.000000e+00> : vector<8x384xf32>
    %523 = tpu.matmul %521, %522, %cst_217 {dimension_numbers = #tpu.dot_dimension_numbers<[1], [0], [0], [1], [0, 0, 1, 1], [], []>} : vector<8x128xbf16>, vector<128x384xbf16>, vector<8x384xf32> -> vector<8x384xf32>
    %c0_218 = arith.constant 0 : index
    %c0_219 = arith.constant 0 : index
    %524 = vector.load %arg8[%c0_218, %c0_219] : memref<1x384xf32, #tpu.memory_space<vmem>>, vector<1x384xf32>
    %525 = vector.broadcast %524 : vector<1x384xf32> to vector<8x384xf32>
    %526 = arith.addf %523, %525 : vector<8x384xf32>
    %527 = vector.extract_strided_slice %520 {offsets = [0, 0], sizes = [8, 128], strides = [1, 1]} : vector<8x384xf32> to vector<8x128xf32>
    %528 = vector.extract_strided_slice %526 {offsets = [0, 0], sizes = [8, 128], strides = [1, 1]} : vector<8x384xf32> to vector<8x128xf32>
    %529 = arith.addf %527, %528 : vector<8x128xf32>
    %530 = arith.negf %529 : vector<8x128xf32>
    %531 = math.exp %530 : vector<8x128xf32>
    %cst_220 = arith.constant 1.000000e+00 : f32
    %532 = vector.broadcast %cst_220 : f32 to vector<8x128xf32>
    %533 = arith.addf %532, %531 : vector<8x128xf32>
    %534 = arith.divf %532, %533 : vector<8x128xf32>
    %535 = vector.extract_strided_slice %520 {offsets = [0, 128], sizes = [8, 128], strides = [1, 1]} : vector<8x384xf32> to vector<8x128xf32>
    %536 = vector.extract_strided_slice %526 {offsets = [0, 128], sizes = [8, 128], strides = [1, 1]} : vector<8x384xf32> to vector<8x128xf32>
    %537 = arith.addf %535, %536 : vector<8x128xf32>
    %538 = arith.negf %537 : vector<8x128xf32>
    %539 = math.exp %538 : vector<8x128xf32>
    %cst_221 = arith.constant 1.000000e+00 : f32
    %540 = vector.broadcast %cst_221 : f32 to vector<8x128xf32>
    %541 = arith.addf %540, %539 : vector<8x128xf32>
    %542 = arith.divf %540, %541 : vector<8x128xf32>
    %543 = vector.extract_strided_slice %520 {offsets = [0, 256], sizes = [8, 128], strides = [1, 1]} : vector<8x384xf32> to vector<8x128xf32>
    %544 = vector.extract_strided_slice %526 {offsets = [0, 256], sizes = [8, 128], strides = [1, 1]} : vector<8x384xf32> to vector<8x128xf32>
    %545 = arith.mulf %534, %544 : vector<8x128xf32>
    %546 = arith.addf %543, %545 : vector<8x128xf32>
    %547 = math.tanh %546 : vector<8x128xf32>
    %cst_222 = arith.constant 1.000000e+00 : f32
    %548 = vector.broadcast %cst_222 : f32 to vector<8x128xf32>
    %549 = arith.subf %548, %542 : vector<8x128xf32>
    %550 = arith.mulf %549, %547 : vector<8x128xf32>
    %551 = arith.mulf %542, %472 : vector<8x128xf32>
    %552 = arith.addf %550, %551 : vector<8x128xf32>
    %553 = arith.truncf %552 : vector<8x128xf32> to vector<8x128xbf16>
    %c0_223 = arith.constant 0 : index
    %c0_224 = arith.constant 0 : index
    %554 = vector.load %arg10[%c0_223, %c0_224] : memref<128x128xbf16, #tpu.memory_space<vmem>>, vector<128x128xbf16>
    %cst_225 = arith.constant dense<0.000000e+00> : vector<8x128xf32>
    %555 = tpu.matmul %553, %554, %cst_225 {dimension_numbers = #tpu.dot_dimension_numbers<[1], [0], [0], [1], [0, 0, 1, 1], [], []>} : vector<8x128xbf16>, vector<128x128xbf16>, vector<8x128xf32> -> vector<8x128xf32>
    %556 = vector.shape_cast %555 : vector<8x128xf32> to vector<1x8x128xf32>
    %557 = vector.broadcast %556 : vector<1x8x128xf32> to vector<8x8x128xf32>
    %558 = arith.addf %341, %557 : vector<8x8x128xf32>
    %559 = math.tanh %558 : vector<8x8x128xf32>
    %560 = vector.shape_cast %559 : vector<8x8x128xf32> to vector<64x128xf32>
    %c0_226 = arith.constant 0 : index
    %c0_227 = arith.constant 0 : index
    %561 = vector.load %arg11[%c0_226, %c0_227] : memref<128x128xf32, #tpu.memory_space<vmem>>, vector<128x128xf32>
    %cst_228 = arith.constant dense<0.000000e+00> : vector<64x128xf32>
    %562 = tpu.matmul %560, %561, %cst_228 {dimension_numbers = #tpu.dot_dimension_numbers<[1], [0], [0], [1], [0, 0, 1, 1], [], []>} : vector<64x128xf32>, vector<128x128xf32>, vector<64x128xf32> -> vector<64x128xf32>
    %563 = vector.shape_cast %562 : vector<64x128xf32> to vector<8x8x128xf32>
    %564 = vector.broadcast %352 : vector<8x1x128xf32> to vector<8x8x128xf32>
    %565 = arith.mulf %563, %564 : vector<8x8x128xf32>
    %cst_229 = arith.constant dense<0.000000e+00> : vector<8x128xf32>
    %566 = vector.multi_reduction <add>, %565, %cst_229 [0] : vector<8x8x128xf32> to vector<8x128xf32>
    %cst_230 = arith.constant 0.000000e+00 : f32
    %567 = vector.broadcast %cst_230 : f32 to vector<8x128xf32>
    %568 = arith.cmpf ogt, %507, %567 : vector<8x128xf32>
    %cst_231 = arith.constant -1.000000e+09 : f32
    %569 = vector.broadcast %cst_231 : f32 to vector<8x128xf32>
    %570 = arith.select %568, %566, %569 : vector<8x128xi1>, vector<8x128xf32>
    %cst_232 = arith.constant dense<0xFF800000> : vector<8xf32>
    %571 = vector.multi_reduction <maximumf>, %570, %cst_232 [1] : vector<8x128xf32> to vector<8xf32>
    %572 = vector.shape_cast %571 : vector<8xf32> to vector<8x1xf32>
    %573 = vector.broadcast %572 : vector<8x1xf32> to vector<8x128xf32>
    %574 = arith.cmpf oeq, %570, %573 : vector<8x128xf32>
    %c128_i32_233 = arith.constant 128 : i32
    %575 = vector.broadcast %c128_i32_233 : i32 to vector<8x128xi32>
    %576 = arith.select %574, %343, %575 : vector<8x128xi1>, vector<8x128xi32>
    %cst_234 = arith.constant dense<2147483647> : vector<8xi32>
    %577 = vector.multi_reduction <minsi>, %576, %cst_234 [1] : vector<8x128xi32> to vector<8xi32>
    %578 = vector.shape_cast %577 : vector<8xi32> to vector<8x1xi32>
    %c2_i32 = arith.constant 2 : i32
    %579 = vector.broadcast %c2_i32 : i32 to vector<8x128xi32>
    %580 = arith.cmpi eq, %343, %579 : vector<8x128xi32>
    %581 = vector.shape_cast %578 : vector<8x1xi32> to vector<8x1xi32>
    %582 = vector.broadcast %581 : vector<8x1xi32> to vector<8x128xi32>
    %583 = arith.select %580, %582, %503 : vector<8x128xi1>, vector<8x128xi32>
    %584 = vector.broadcast %578 : vector<8x1xi32> to vector<8x128xi32>
    %585 = arith.cmpi eq, %343, %584 : vector<8x128xi32>
    %cst_235 = arith.constant 0.000000e+00 : f32
    %586 = vector.broadcast %cst_235 : f32 to vector<8x128xf32>
    %587 = arith.select %585, %586, %507 : vector<8x128xi1>, vector<8x128xf32>
    %588 = vector.extract_strided_slice %585 {offsets = [0, 0], sizes = [8, 8], strides = [1, 1]} : vector<8x128xi1> to vector<8x8xi1>
    %589 = arith.extui %588 : vector<8x8xi1> to vector<8x8xi32>
    %590 = arith.sitofp %589 : vector<8x8xi32> to vector<8x8xf32>
    %591 = vector.shape_cast %590 : vector<8x8xf32> to vector<8x8x1xf32>
    %592 = vector.broadcast %591 : vector<8x8x1xf32> to vector<8x8x128xf32>
    %593 = arith.mulf %592, %342 : vector<8x8x128xf32>
    %cst_236 = arith.constant dense<0.000000e+00> : vector<8x128xf32>
    %594 = vector.multi_reduction <add>, %593, %cst_236 [1] : vector<8x8x128xf32> to vector<8x128xf32>
    %595 = arith.truncf %594 : vector<8x128xf32> to vector<8x128xbf16>
    %c0_237 = arith.constant 0 : index
    %c0_238 = arith.constant 0 : index
    %596 = vector.load %arg5[%c0_237, %c0_238] : memref<128x384xbf16, #tpu.memory_space<vmem>>, vector<128x384xbf16>
    %cst_239 = arith.constant dense<0.000000e+00> : vector<8x384xf32>
    %597 = tpu.matmul %595, %596, %cst_239 {dimension_numbers = #tpu.dot_dimension_numbers<[1], [0], [0], [1], [0, 0, 1, 1], [], []>} : vector<8x128xbf16>, vector<128x384xbf16>, vector<8x384xf32> -> vector<8x384xf32>
    %c0_240 = arith.constant 0 : index
    %c0_241 = arith.constant 0 : index
    %598 = vector.load %arg7[%c0_240, %c0_241] : memref<1x384xf32, #tpu.memory_space<vmem>>, vector<1x384xf32>
    %599 = vector.broadcast %598 : vector<1x384xf32> to vector<8x384xf32>
    %600 = arith.addf %597, %599 : vector<8x384xf32>
    %601 = arith.truncf %552 : vector<8x128xf32> to vector<8x128xbf16>
    %c0_242 = arith.constant 0 : index
    %c0_243 = arith.constant 0 : index
    %602 = vector.load %arg6[%c0_242, %c0_243] : memref<128x384xbf16, #tpu.memory_space<vmem>>, vector<128x384xbf16>
    %cst_244 = arith.constant dense<0.000000e+00> : vector<8x384xf32>
    %603 = tpu.matmul %601, %602, %cst_244 {dimension_numbers = #tpu.dot_dimension_numbers<[1], [0], [0], [1], [0, 0, 1, 1], [], []>} : vector<8x128xbf16>, vector<128x384xbf16>, vector<8x384xf32> -> vector<8x384xf32>
    %c0_245 = arith.constant 0 : index
    %c0_246 = arith.constant 0 : index
    %604 = vector.load %arg8[%c0_245, %c0_246] : memref<1x384xf32, #tpu.memory_space<vmem>>, vector<1x384xf32>
    %605 = vector.broadcast %604 : vector<1x384xf32> to vector<8x384xf32>
    %606 = arith.addf %603, %605 : vector<8x384xf32>
    %607 = vector.extract_strided_slice %600 {offsets = [0, 0], sizes = [8, 128], strides = [1, 1]} : vector<8x384xf32> to vector<8x128xf32>
    %608 = vector.extract_strided_slice %606 {offsets = [0, 0], sizes = [8, 128], strides = [1, 1]} : vector<8x384xf32> to vector<8x128xf32>
    %609 = arith.addf %607, %608 : vector<8x128xf32>
    %610 = arith.negf %609 : vector<8x128xf32>
    %611 = math.exp %610 : vector<8x128xf32>
    %cst_247 = arith.constant 1.000000e+00 : f32
    %612 = vector.broadcast %cst_247 : f32 to vector<8x128xf32>
    %613 = arith.addf %612, %611 : vector<8x128xf32>
    %614 = arith.divf %612, %613 : vector<8x128xf32>
    %615 = vector.extract_strided_slice %600 {offsets = [0, 128], sizes = [8, 128], strides = [1, 1]} : vector<8x384xf32> to vector<8x128xf32>
    %616 = vector.extract_strided_slice %606 {offsets = [0, 128], sizes = [8, 128], strides = [1, 1]} : vector<8x384xf32> to vector<8x128xf32>
    %617 = arith.addf %615, %616 : vector<8x128xf32>
    %618 = arith.negf %617 : vector<8x128xf32>
    %619 = math.exp %618 : vector<8x128xf32>
    %cst_248 = arith.constant 1.000000e+00 : f32
    %620 = vector.broadcast %cst_248 : f32 to vector<8x128xf32>
    %621 = arith.addf %620, %619 : vector<8x128xf32>
    %622 = arith.divf %620, %621 : vector<8x128xf32>
    %623 = vector.extract_strided_slice %600 {offsets = [0, 256], sizes = [8, 128], strides = [1, 1]} : vector<8x384xf32> to vector<8x128xf32>
    %624 = vector.extract_strided_slice %606 {offsets = [0, 256], sizes = [8, 128], strides = [1, 1]} : vector<8x384xf32> to vector<8x128xf32>
    %625 = arith.mulf %614, %624 : vector<8x128xf32>
    %626 = arith.addf %623, %625 : vector<8x128xf32>
    %627 = math.tanh %626 : vector<8x128xf32>
    %cst_249 = arith.constant 1.000000e+00 : f32
    %628 = vector.broadcast %cst_249 : f32 to vector<8x128xf32>
    %629 = arith.subf %628, %622 : vector<8x128xf32>
    %630 = arith.mulf %629, %627 : vector<8x128xf32>
    %631 = arith.mulf %622, %552 : vector<8x128xf32>
    %632 = arith.addf %630, %631 : vector<8x128xf32>
    %633 = arith.truncf %632 : vector<8x128xf32> to vector<8x128xbf16>
    %c0_250 = arith.constant 0 : index
    %c0_251 = arith.constant 0 : index
    %634 = vector.load %arg10[%c0_250, %c0_251] : memref<128x128xbf16, #tpu.memory_space<vmem>>, vector<128x128xbf16>
    %cst_252 = arith.constant dense<0.000000e+00> : vector<8x128xf32>
    %635 = tpu.matmul %633, %634, %cst_252 {dimension_numbers = #tpu.dot_dimension_numbers<[1], [0], [0], [1], [0, 0, 1, 1], [], []>} : vector<8x128xbf16>, vector<128x128xbf16>, vector<8x128xf32> -> vector<8x128xf32>
    %636 = vector.shape_cast %635 : vector<8x128xf32> to vector<1x8x128xf32>
    %637 = vector.broadcast %636 : vector<1x8x128xf32> to vector<8x8x128xf32>
    %638 = arith.addf %341, %637 : vector<8x8x128xf32>
    %639 = math.tanh %638 : vector<8x8x128xf32>
    %640 = vector.shape_cast %639 : vector<8x8x128xf32> to vector<64x128xf32>
    %c0_253 = arith.constant 0 : index
    %c0_254 = arith.constant 0 : index
    %641 = vector.load %arg11[%c0_253, %c0_254] : memref<128x128xf32, #tpu.memory_space<vmem>>, vector<128x128xf32>
    %cst_255 = arith.constant dense<0.000000e+00> : vector<64x128xf32>
    %642 = tpu.matmul %640, %641, %cst_255 {dimension_numbers = #tpu.dot_dimension_numbers<[1], [0], [0], [1], [0, 0, 1, 1], [], []>} : vector<64x128xf32>, vector<128x128xf32>, vector<64x128xf32> -> vector<64x128xf32>
    %643 = vector.shape_cast %642 : vector<64x128xf32> to vector<8x8x128xf32>
    %644 = vector.broadcast %352 : vector<8x1x128xf32> to vector<8x8x128xf32>
    %645 = arith.mulf %643, %644 : vector<8x8x128xf32>
    %cst_256 = arith.constant dense<0.000000e+00> : vector<8x128xf32>
    %646 = vector.multi_reduction <add>, %645, %cst_256 [0] : vector<8x8x128xf32> to vector<8x128xf32>
    %cst_257 = arith.constant 0.000000e+00 : f32
    %647 = vector.broadcast %cst_257 : f32 to vector<8x128xf32>
    %648 = arith.cmpf ogt, %587, %647 : vector<8x128xf32>
    %cst_258 = arith.constant -1.000000e+09 : f32
    %649 = vector.broadcast %cst_258 : f32 to vector<8x128xf32>
    %650 = arith.select %648, %646, %649 : vector<8x128xi1>, vector<8x128xf32>
    %cst_259 = arith.constant dense<0xFF800000> : vector<8xf32>
    %651 = vector.multi_reduction <maximumf>, %650, %cst_259 [1] : vector<8x128xf32> to vector<8xf32>
    %652 = vector.shape_cast %651 : vector<8xf32> to vector<8x1xf32>
    %653 = vector.broadcast %652 : vector<8x1xf32> to vector<8x128xf32>
    %654 = arith.cmpf oeq, %650, %653 : vector<8x128xf32>
    %c128_i32_260 = arith.constant 128 : i32
    %655 = vector.broadcast %c128_i32_260 : i32 to vector<8x128xi32>
    %656 = arith.select %654, %343, %655 : vector<8x128xi1>, vector<8x128xi32>
    %cst_261 = arith.constant dense<2147483647> : vector<8xi32>
    %657 = vector.multi_reduction <minsi>, %656, %cst_261 [1] : vector<8x128xi32> to vector<8xi32>
    %658 = vector.shape_cast %657 : vector<8xi32> to vector<8x1xi32>
    %c3_i32 = arith.constant 3 : i32
    %659 = vector.broadcast %c3_i32 : i32 to vector<8x128xi32>
    %660 = arith.cmpi eq, %343, %659 : vector<8x128xi32>
    %661 = vector.shape_cast %658 : vector<8x1xi32> to vector<8x1xi32>
    %662 = vector.broadcast %661 : vector<8x1xi32> to vector<8x128xi32>
    %663 = arith.select %660, %662, %583 : vector<8x128xi1>, vector<8x128xi32>
    %664 = vector.broadcast %658 : vector<8x1xi32> to vector<8x128xi32>
    %665 = arith.cmpi eq, %343, %664 : vector<8x128xi32>
    %cst_262 = arith.constant 0.000000e+00 : f32
    %666 = vector.broadcast %cst_262 : f32 to vector<8x128xf32>
    %667 = arith.select %665, %666, %587 : vector<8x128xi1>, vector<8x128xf32>
    %668 = vector.extract_strided_slice %665 {offsets = [0, 0], sizes = [8, 8], strides = [1, 1]} : vector<8x128xi1> to vector<8x8xi1>
    %669 = arith.extui %668 : vector<8x8xi1> to vector<8x8xi32>
    %670 = arith.sitofp %669 : vector<8x8xi32> to vector<8x8xf32>
    %671 = vector.shape_cast %670 : vector<8x8xf32> to vector<8x8x1xf32>
    %672 = vector.broadcast %671 : vector<8x8x1xf32> to vector<8x8x128xf32>
    %673 = arith.mulf %672, %342 : vector<8x8x128xf32>
    %cst_263 = arith.constant dense<0.000000e+00> : vector<8x128xf32>
    %674 = vector.multi_reduction <add>, %673, %cst_263 [1] : vector<8x8x128xf32> to vector<8x128xf32>
    %675 = arith.truncf %674 : vector<8x128xf32> to vector<8x128xbf16>
    %c0_264 = arith.constant 0 : index
    %c0_265 = arith.constant 0 : index
    %676 = vector.load %arg5[%c0_264, %c0_265] : memref<128x384xbf16, #tpu.memory_space<vmem>>, vector<128x384xbf16>
    %cst_266 = arith.constant dense<0.000000e+00> : vector<8x384xf32>
    %677 = tpu.matmul %675, %676, %cst_266 {dimension_numbers = #tpu.dot_dimension_numbers<[1], [0], [0], [1], [0, 0, 1, 1], [], []>} : vector<8x128xbf16>, vector<128x384xbf16>, vector<8x384xf32> -> vector<8x384xf32>
    %c0_267 = arith.constant 0 : index
    %c0_268 = arith.constant 0 : index
    %678 = vector.load %arg7[%c0_267, %c0_268] : memref<1x384xf32, #tpu.memory_space<vmem>>, vector<1x384xf32>
    %679 = vector.broadcast %678 : vector<1x384xf32> to vector<8x384xf32>
    %680 = arith.addf %677, %679 : vector<8x384xf32>
    %681 = arith.truncf %632 : vector<8x128xf32> to vector<8x128xbf16>
    %c0_269 = arith.constant 0 : index
    %c0_270 = arith.constant 0 : index
    %682 = vector.load %arg6[%c0_269, %c0_270] : memref<128x384xbf16, #tpu.memory_space<vmem>>, vector<128x384xbf16>
    %cst_271 = arith.constant dense<0.000000e+00> : vector<8x384xf32>
    %683 = tpu.matmul %681, %682, %cst_271 {dimension_numbers = #tpu.dot_dimension_numbers<[1], [0], [0], [1], [0, 0, 1, 1], [], []>} : vector<8x128xbf16>, vector<128x384xbf16>, vector<8x384xf32> -> vector<8x384xf32>
    %c0_272 = arith.constant 0 : index
    %c0_273 = arith.constant 0 : index
    %684 = vector.load %arg8[%c0_272, %c0_273] : memref<1x384xf32, #tpu.memory_space<vmem>>, vector<1x384xf32>
    %685 = vector.broadcast %684 : vector<1x384xf32> to vector<8x384xf32>
    %686 = arith.addf %683, %685 : vector<8x384xf32>
    %687 = vector.extract_strided_slice %680 {offsets = [0, 0], sizes = [8, 128], strides = [1, 1]} : vector<8x384xf32> to vector<8x128xf32>
    %688 = vector.extract_strided_slice %686 {offsets = [0, 0], sizes = [8, 128], strides = [1, 1]} : vector<8x384xf32> to vector<8x128xf32>
    %689 = arith.addf %687, %688 : vector<8x128xf32>
    %690 = arith.negf %689 : vector<8x128xf32>
    %691 = math.exp %690 : vector<8x128xf32>
    %cst_274 = arith.constant 1.000000e+00 : f32
    %692 = vector.broadcast %cst_274 : f32 to vector<8x128xf32>
    %693 = arith.addf %692, %691 : vector<8x128xf32>
    %694 = arith.divf %692, %693 : vector<8x128xf32>
    %695 = vector.extract_strided_slice %680 {offsets = [0, 128], sizes = [8, 128], strides = [1, 1]} : vector<8x384xf32> to vector<8x128xf32>
    %696 = vector.extract_strided_slice %686 {offsets = [0, 128], sizes = [8, 128], strides = [1, 1]} : vector<8x384xf32> to vector<8x128xf32>
    %697 = arith.addf %695, %696 : vector<8x128xf32>
    %698 = arith.negf %697 : vector<8x128xf32>
    %699 = math.exp %698 : vector<8x128xf32>
    %cst_275 = arith.constant 1.000000e+00 : f32
    %700 = vector.broadcast %cst_275 : f32 to vector<8x128xf32>
    %701 = arith.addf %700, %699 : vector<8x128xf32>
    %702 = arith.divf %700, %701 : vector<8x128xf32>
    %703 = vector.extract_strided_slice %680 {offsets = [0, 256], sizes = [8, 128], strides = [1, 1]} : vector<8x384xf32> to vector<8x128xf32>
    %704 = vector.extract_strided_slice %686 {offsets = [0, 256], sizes = [8, 128], strides = [1, 1]} : vector<8x384xf32> to vector<8x128xf32>
    %705 = arith.mulf %694, %704 : vector<8x128xf32>
    %706 = arith.addf %703, %705 : vector<8x128xf32>
    %707 = math.tanh %706 : vector<8x128xf32>
    %cst_276 = arith.constant 1.000000e+00 : f32
    %708 = vector.broadcast %cst_276 : f32 to vector<8x128xf32>
    %709 = arith.subf %708, %702 : vector<8x128xf32>
    %710 = arith.mulf %709, %707 : vector<8x128xf32>
    %711 = arith.mulf %702, %632 : vector<8x128xf32>
    %712 = arith.addf %710, %711 : vector<8x128xf32>
    %713 = arith.truncf %712 : vector<8x128xf32> to vector<8x128xbf16>
    %c0_277 = arith.constant 0 : index
    %c0_278 = arith.constant 0 : index
    %714 = vector.load %arg10[%c0_277, %c0_278] : memref<128x128xbf16, #tpu.memory_space<vmem>>, vector<128x128xbf16>
    %cst_279 = arith.constant dense<0.000000e+00> : vector<8x128xf32>
    %715 = tpu.matmul %713, %714, %cst_279 {dimension_numbers = #tpu.dot_dimension_numbers<[1], [0], [0], [1], [0, 0, 1, 1], [], []>} : vector<8x128xbf16>, vector<128x128xbf16>, vector<8x128xf32> -> vector<8x128xf32>
    %716 = vector.shape_cast %715 : vector<8x128xf32> to vector<1x8x128xf32>
    %717 = vector.broadcast %716 : vector<1x8x128xf32> to vector<8x8x128xf32>
    %718 = arith.addf %341, %717 : vector<8x8x128xf32>
    %719 = math.tanh %718 : vector<8x8x128xf32>
    %720 = vector.shape_cast %719 : vector<8x8x128xf32> to vector<64x128xf32>
    %c0_280 = arith.constant 0 : index
    %c0_281 = arith.constant 0 : index
    %721 = vector.load %arg11[%c0_280, %c0_281] : memref<128x128xf32, #tpu.memory_space<vmem>>, vector<128x128xf32>
    %cst_282 = arith.constant dense<0.000000e+00> : vector<64x128xf32>
    %722 = tpu.matmul %720, %721, %cst_282 {dimension_numbers = #tpu.dot_dimension_numbers<[1], [0], [0], [1], [0, 0, 1, 1], [], []>} : vector<64x128xf32>, vector<128x128xf32>, vector<64x128xf32> -> vector<64x128xf32>
    %723 = vector.shape_cast %722 : vector<64x128xf32> to vector<8x8x128xf32>
    %724 = vector.broadcast %352 : vector<8x1x128xf32> to vector<8x8x128xf32>
    %725 = arith.mulf %723, %724 : vector<8x8x128xf32>
    %cst_283 = arith.constant dense<0.000000e+00> : vector<8x128xf32>
    %726 = vector.multi_reduction <add>, %725, %cst_283 [0] : vector<8x8x128xf32> to vector<8x128xf32>
    %cst_284 = arith.constant 0.000000e+00 : f32
    %727 = vector.broadcast %cst_284 : f32 to vector<8x128xf32>
    %728 = arith.cmpf ogt, %667, %727 : vector<8x128xf32>
    %cst_285 = arith.constant -1.000000e+09 : f32
    %729 = vector.broadcast %cst_285 : f32 to vector<8x128xf32>
    %730 = arith.select %728, %726, %729 : vector<8x128xi1>, vector<8x128xf32>
    %cst_286 = arith.constant dense<0xFF800000> : vector<8xf32>
    %731 = vector.multi_reduction <maximumf>, %730, %cst_286 [1] : vector<8x128xf32> to vector<8xf32>
    %732 = vector.shape_cast %731 : vector<8xf32> to vector<8x1xf32>
    %733 = vector.broadcast %732 : vector<8x1xf32> to vector<8x128xf32>
    %734 = arith.cmpf oeq, %730, %733 : vector<8x128xf32>
    %c128_i32_287 = arith.constant 128 : i32
    %735 = vector.broadcast %c128_i32_287 : i32 to vector<8x128xi32>
    %736 = arith.select %734, %343, %735 : vector<8x128xi1>, vector<8x128xi32>
    %cst_288 = arith.constant dense<2147483647> : vector<8xi32>
    %737 = vector.multi_reduction <minsi>, %736, %cst_288 [1] : vector<8x128xi32> to vector<8xi32>
    %738 = vector.shape_cast %737 : vector<8xi32> to vector<8x1xi32>
    %c4_i32 = arith.constant 4 : i32
    %739 = vector.broadcast %c4_i32 : i32 to vector<8x128xi32>
    %740 = arith.cmpi eq, %343, %739 : vector<8x128xi32>
    %741 = vector.shape_cast %738 : vector<8x1xi32> to vector<8x1xi32>
    %742 = vector.broadcast %741 : vector<8x1xi32> to vector<8x128xi32>
    %743 = arith.select %740, %742, %663 : vector<8x128xi1>, vector<8x128xi32>
    %744 = vector.broadcast %738 : vector<8x1xi32> to vector<8x128xi32>
    %745 = arith.cmpi eq, %343, %744 : vector<8x128xi32>
    %cst_289 = arith.constant 0.000000e+00 : f32
    %746 = vector.broadcast %cst_289 : f32 to vector<8x128xf32>
    %747 = arith.select %745, %746, %667 : vector<8x128xi1>, vector<8x128xf32>
    %748 = vector.extract_strided_slice %745 {offsets = [0, 0], sizes = [8, 8], strides = [1, 1]} : vector<8x128xi1> to vector<8x8xi1>
    %749 = arith.extui %748 : vector<8x8xi1> to vector<8x8xi32>
    %750 = arith.sitofp %749 : vector<8x8xi32> to vector<8x8xf32>
    %751 = vector.shape_cast %750 : vector<8x8xf32> to vector<8x8x1xf32>
    %752 = vector.broadcast %751 : vector<8x8x1xf32> to vector<8x8x128xf32>
    %753 = arith.mulf %752, %342 : vector<8x8x128xf32>
    %cst_290 = arith.constant dense<0.000000e+00> : vector<8x128xf32>
    %754 = vector.multi_reduction <add>, %753, %cst_290 [1] : vector<8x8x128xf32> to vector<8x128xf32>
    %755 = arith.truncf %754 : vector<8x128xf32> to vector<8x128xbf16>
    %c0_291 = arith.constant 0 : index
    %c0_292 = arith.constant 0 : index
    %756 = vector.load %arg5[%c0_291, %c0_292] : memref<128x384xbf16, #tpu.memory_space<vmem>>, vector<128x384xbf16>
    %cst_293 = arith.constant dense<0.000000e+00> : vector<8x384xf32>
    %757 = tpu.matmul %755, %756, %cst_293 {dimension_numbers = #tpu.dot_dimension_numbers<[1], [0], [0], [1], [0, 0, 1, 1], [], []>} : vector<8x128xbf16>, vector<128x384xbf16>, vector<8x384xf32> -> vector<8x384xf32>
    %c0_294 = arith.constant 0 : index
    %c0_295 = arith.constant 0 : index
    %758 = vector.load %arg7[%c0_294, %c0_295] : memref<1x384xf32, #tpu.memory_space<vmem>>, vector<1x384xf32>
    %759 = vector.broadcast %758 : vector<1x384xf32> to vector<8x384xf32>
    %760 = arith.addf %757, %759 : vector<8x384xf32>
    %761 = arith.truncf %712 : vector<8x128xf32> to vector<8x128xbf16>
    %c0_296 = arith.constant 0 : index
    %c0_297 = arith.constant 0 : index
    %762 = vector.load %arg6[%c0_296, %c0_297] : memref<128x384xbf16, #tpu.memory_space<vmem>>, vector<128x384xbf16>
    %cst_298 = arith.constant dense<0.000000e+00> : vector<8x384xf32>
    %763 = tpu.matmul %761, %762, %cst_298 {dimension_numbers = #tpu.dot_dimension_numbers<[1], [0], [0], [1], [0, 0, 1, 1], [], []>} : vector<8x128xbf16>, vector<128x384xbf16>, vector<8x384xf32> -> vector<8x384xf32>
    %c0_299 = arith.constant 0 : index
    %c0_300 = arith.constant 0 : index
    %764 = vector.load %arg8[%c0_299, %c0_300] : memref<1x384xf32, #tpu.memory_space<vmem>>, vector<1x384xf32>
    %765 = vector.broadcast %764 : vector<1x384xf32> to vector<8x384xf32>
    %766 = arith.addf %763, %765 : vector<8x384xf32>
    %767 = vector.extract_strided_slice %760 {offsets = [0, 0], sizes = [8, 128], strides = [1, 1]} : vector<8x384xf32> to vector<8x128xf32>
    %768 = vector.extract_strided_slice %766 {offsets = [0, 0], sizes = [8, 128], strides = [1, 1]} : vector<8x384xf32> to vector<8x128xf32>
    %769 = arith.addf %767, %768 : vector<8x128xf32>
    %770 = arith.negf %769 : vector<8x128xf32>
    %771 = math.exp %770 : vector<8x128xf32>
    %cst_301 = arith.constant 1.000000e+00 : f32
    %772 = vector.broadcast %cst_301 : f32 to vector<8x128xf32>
    %773 = arith.addf %772, %771 : vector<8x128xf32>
    %774 = arith.divf %772, %773 : vector<8x128xf32>
    %775 = vector.extract_strided_slice %760 {offsets = [0, 128], sizes = [8, 128], strides = [1, 1]} : vector<8x384xf32> to vector<8x128xf32>
    %776 = vector.extract_strided_slice %766 {offsets = [0, 128], sizes = [8, 128], strides = [1, 1]} : vector<8x384xf32> to vector<8x128xf32>
    %777 = arith.addf %775, %776 : vector<8x128xf32>
    %778 = arith.negf %777 : vector<8x128xf32>
    %779 = math.exp %778 : vector<8x128xf32>
    %cst_302 = arith.constant 1.000000e+00 : f32
    %780 = vector.broadcast %cst_302 : f32 to vector<8x128xf32>
    %781 = arith.addf %780, %779 : vector<8x128xf32>
    %782 = arith.divf %780, %781 : vector<8x128xf32>
    %783 = vector.extract_strided_slice %760 {offsets = [0, 256], sizes = [8, 128], strides = [1, 1]} : vector<8x384xf32> to vector<8x128xf32>
    %784 = vector.extract_strided_slice %766 {offsets = [0, 256], sizes = [8, 128], strides = [1, 1]} : vector<8x384xf32> to vector<8x128xf32>
    %785 = arith.mulf %774, %784 : vector<8x128xf32>
    %786 = arith.addf %783, %785 : vector<8x128xf32>
    %787 = math.tanh %786 : vector<8x128xf32>
    %cst_303 = arith.constant 1.000000e+00 : f32
    %788 = vector.broadcast %cst_303 : f32 to vector<8x128xf32>
    %789 = arith.subf %788, %782 : vector<8x128xf32>
    %790 = arith.mulf %789, %787 : vector<8x128xf32>
    %791 = arith.mulf %782, %712 : vector<8x128xf32>
    %792 = arith.addf %790, %791 : vector<8x128xf32>
    %793 = arith.truncf %792 : vector<8x128xf32> to vector<8x128xbf16>
    %c0_304 = arith.constant 0 : index
    %c0_305 = arith.constant 0 : index
    %794 = vector.load %arg10[%c0_304, %c0_305] : memref<128x128xbf16, #tpu.memory_space<vmem>>, vector<128x128xbf16>
    %cst_306 = arith.constant dense<0.000000e+00> : vector<8x128xf32>
    %795 = tpu.matmul %793, %794, %cst_306 {dimension_numbers = #tpu.dot_dimension_numbers<[1], [0], [0], [1], [0, 0, 1, 1], [], []>} : vector<8x128xbf16>, vector<128x128xbf16>, vector<8x128xf32> -> vector<8x128xf32>
    %796 = vector.shape_cast %795 : vector<8x128xf32> to vector<1x8x128xf32>
    %797 = vector.broadcast %796 : vector<1x8x128xf32> to vector<8x8x128xf32>
    %798 = arith.addf %341, %797 : vector<8x8x128xf32>
    %799 = math.tanh %798 : vector<8x8x128xf32>
    %800 = vector.shape_cast %799 : vector<8x8x128xf32> to vector<64x128xf32>
    %c0_307 = arith.constant 0 : index
    %c0_308 = arith.constant 0 : index
    %801 = vector.load %arg11[%c0_307, %c0_308] : memref<128x128xf32, #tpu.memory_space<vmem>>, vector<128x128xf32>
    %cst_309 = arith.constant dense<0.000000e+00> : vector<64x128xf32>
    %802 = tpu.matmul %800, %801, %cst_309 {dimension_numbers = #tpu.dot_dimension_numbers<[1], [0], [0], [1], [0, 0, 1, 1], [], []>} : vector<64x128xf32>, vector<128x128xf32>, vector<64x128xf32> -> vector<64x128xf32>
    %803 = vector.shape_cast %802 : vector<64x128xf32> to vector<8x8x128xf32>
    %804 = vector.broadcast %352 : vector<8x1x128xf32> to vector<8x8x128xf32>
    %805 = arith.mulf %803, %804 : vector<8x8x128xf32>
    %cst_310 = arith.constant dense<0.000000e+00> : vector<8x128xf32>
    %806 = vector.multi_reduction <add>, %805, %cst_310 [0] : vector<8x8x128xf32> to vector<8x128xf32>
    %cst_311 = arith.constant 0.000000e+00 : f32
    %807 = vector.broadcast %cst_311 : f32 to vector<8x128xf32>
    %808 = arith.cmpf ogt, %747, %807 : vector<8x128xf32>
    %cst_312 = arith.constant -1.000000e+09 : f32
    %809 = vector.broadcast %cst_312 : f32 to vector<8x128xf32>
    %810 = arith.select %808, %806, %809 : vector<8x128xi1>, vector<8x128xf32>
    %cst_313 = arith.constant dense<0xFF800000> : vector<8xf32>
    %811 = vector.multi_reduction <maximumf>, %810, %cst_313 [1] : vector<8x128xf32> to vector<8xf32>
    %812 = vector.shape_cast %811 : vector<8xf32> to vector<8x1xf32>
    %813 = vector.broadcast %812 : vector<8x1xf32> to vector<8x128xf32>
    %814 = arith.cmpf oeq, %810, %813 : vector<8x128xf32>
    %c128_i32_314 = arith.constant 128 : i32
    %815 = vector.broadcast %c128_i32_314 : i32 to vector<8x128xi32>
    %816 = arith.select %814, %343, %815 : vector<8x128xi1>, vector<8x128xi32>
    %cst_315 = arith.constant dense<2147483647> : vector<8xi32>
    %817 = vector.multi_reduction <minsi>, %816, %cst_315 [1] : vector<8x128xi32> to vector<8xi32>
    %818 = vector.shape_cast %817 : vector<8xi32> to vector<8x1xi32>
    %c5_i32 = arith.constant 5 : i32
    %819 = vector.broadcast %c5_i32 : i32 to vector<8x128xi32>
    %820 = arith.cmpi eq, %343, %819 : vector<8x128xi32>
    %821 = vector.shape_cast %818 : vector<8x1xi32> to vector<8x1xi32>
    %822 = vector.broadcast %821 : vector<8x1xi32> to vector<8x128xi32>
    %823 = arith.select %820, %822, %743 : vector<8x128xi1>, vector<8x128xi32>
    %824 = vector.broadcast %818 : vector<8x1xi32> to vector<8x128xi32>
    %825 = arith.cmpi eq, %343, %824 : vector<8x128xi32>
    %cst_316 = arith.constant 0.000000e+00 : f32
    %826 = vector.broadcast %cst_316 : f32 to vector<8x128xf32>
    %827 = arith.select %825, %826, %747 : vector<8x128xi1>, vector<8x128xf32>
    %828 = vector.extract_strided_slice %825 {offsets = [0, 0], sizes = [8, 8], strides = [1, 1]} : vector<8x128xi1> to vector<8x8xi1>
    %829 = arith.extui %828 : vector<8x8xi1> to vector<8x8xi32>
    %830 = arith.sitofp %829 : vector<8x8xi32> to vector<8x8xf32>
    %831 = vector.shape_cast %830 : vector<8x8xf32> to vector<8x8x1xf32>
    %832 = vector.broadcast %831 : vector<8x8x1xf32> to vector<8x8x128xf32>
    %833 = arith.mulf %832, %342 : vector<8x8x128xf32>
    %cst_317 = arith.constant dense<0.000000e+00> : vector<8x128xf32>
    %834 = vector.multi_reduction <add>, %833, %cst_317 [1] : vector<8x8x128xf32> to vector<8x128xf32>
    %835 = arith.truncf %834 : vector<8x128xf32> to vector<8x128xbf16>
    %c0_318 = arith.constant 0 : index
    %c0_319 = arith.constant 0 : index
    %836 = vector.load %arg5[%c0_318, %c0_319] : memref<128x384xbf16, #tpu.memory_space<vmem>>, vector<128x384xbf16>
    %cst_320 = arith.constant dense<0.000000e+00> : vector<8x384xf32>
    %837 = tpu.matmul %835, %836, %cst_320 {dimension_numbers = #tpu.dot_dimension_numbers<[1], [0], [0], [1], [0, 0, 1, 1], [], []>} : vector<8x128xbf16>, vector<128x384xbf16>, vector<8x384xf32> -> vector<8x384xf32>
    %c0_321 = arith.constant 0 : index
    %c0_322 = arith.constant 0 : index
    %838 = vector.load %arg7[%c0_321, %c0_322] : memref<1x384xf32, #tpu.memory_space<vmem>>, vector<1x384xf32>
    %839 = vector.broadcast %838 : vector<1x384xf32> to vector<8x384xf32>
    %840 = arith.addf %837, %839 : vector<8x384xf32>
    %841 = arith.truncf %792 : vector<8x128xf32> to vector<8x128xbf16>
    %c0_323 = arith.constant 0 : index
    %c0_324 = arith.constant 0 : index
    %842 = vector.load %arg6[%c0_323, %c0_324] : memref<128x384xbf16, #tpu.memory_space<vmem>>, vector<128x384xbf16>
    %cst_325 = arith.constant dense<0.000000e+00> : vector<8x384xf32>
    %843 = tpu.matmul %841, %842, %cst_325 {dimension_numbers = #tpu.dot_dimension_numbers<[1], [0], [0], [1], [0, 0, 1, 1], [], []>} : vector<8x128xbf16>, vector<128x384xbf16>, vector<8x384xf32> -> vector<8x384xf32>
    %c0_326 = arith.constant 0 : index
    %c0_327 = arith.constant 0 : index
    %844 = vector.load %arg8[%c0_326, %c0_327] : memref<1x384xf32, #tpu.memory_space<vmem>>, vector<1x384xf32>
    %845 = vector.broadcast %844 : vector<1x384xf32> to vector<8x384xf32>
    %846 = arith.addf %843, %845 : vector<8x384xf32>
    %847 = vector.extract_strided_slice %840 {offsets = [0, 0], sizes = [8, 128], strides = [1, 1]} : vector<8x384xf32> to vector<8x128xf32>
    %848 = vector.extract_strided_slice %846 {offsets = [0, 0], sizes = [8, 128], strides = [1, 1]} : vector<8x384xf32> to vector<8x128xf32>
    %849 = arith.addf %847, %848 : vector<8x128xf32>
    %850 = arith.negf %849 : vector<8x128xf32>
    %851 = math.exp %850 : vector<8x128xf32>
    %cst_328 = arith.constant 1.000000e+00 : f32
    %852 = vector.broadcast %cst_328 : f32 to vector<8x128xf32>
    %853 = arith.addf %852, %851 : vector<8x128xf32>
    %854 = arith.divf %852, %853 : vector<8x128xf32>
    %855 = vector.extract_strided_slice %840 {offsets = [0, 128], sizes = [8, 128], strides = [1, 1]} : vector<8x384xf32> to vector<8x128xf32>
    %856 = vector.extract_strided_slice %846 {offsets = [0, 128], sizes = [8, 128], strides = [1, 1]} : vector<8x384xf32> to vector<8x128xf32>
    %857 = arith.addf %855, %856 : vector<8x128xf32>
    %858 = arith.negf %857 : vector<8x128xf32>
    %859 = math.exp %858 : vector<8x128xf32>
    %cst_329 = arith.constant 1.000000e+00 : f32
    %860 = vector.broadcast %cst_329 : f32 to vector<8x128xf32>
    %861 = arith.addf %860, %859 : vector<8x128xf32>
    %862 = arith.divf %860, %861 : vector<8x128xf32>
    %863 = vector.extract_strided_slice %840 {offsets = [0, 256], sizes = [8, 128], strides = [1, 1]} : vector<8x384xf32> to vector<8x128xf32>
    %864 = vector.extract_strided_slice %846 {offsets = [0, 256], sizes = [8, 128], strides = [1, 1]} : vector<8x384xf32> to vector<8x128xf32>
    %865 = arith.mulf %854, %864 : vector<8x128xf32>
    %866 = arith.addf %863, %865 : vector<8x128xf32>
    %867 = math.tanh %866 : vector<8x128xf32>
    %cst_330 = arith.constant 1.000000e+00 : f32
    %868 = vector.broadcast %cst_330 : f32 to vector<8x128xf32>
    %869 = arith.subf %868, %862 : vector<8x128xf32>
    %870 = arith.mulf %869, %867 : vector<8x128xf32>
    %871 = arith.mulf %862, %792 : vector<8x128xf32>
    %872 = arith.addf %870, %871 : vector<8x128xf32>
    %873 = arith.truncf %872 : vector<8x128xf32> to vector<8x128xbf16>
    %c0_331 = arith.constant 0 : index
    %c0_332 = arith.constant 0 : index
    %874 = vector.load %arg10[%c0_331, %c0_332] : memref<128x128xbf16, #tpu.memory_space<vmem>>, vector<128x128xbf16>
    %cst_333 = arith.constant dense<0.000000e+00> : vector<8x128xf32>
    %875 = tpu.matmul %873, %874, %cst_333 {dimension_numbers = #tpu.dot_dimension_numbers<[1], [0], [0], [1], [0, 0, 1, 1], [], []>} : vector<8x128xbf16>, vector<128x128xbf16>, vector<8x128xf32> -> vector<8x128xf32>
    %876 = vector.shape_cast %875 : vector<8x128xf32> to vector<1x8x128xf32>
    %877 = vector.broadcast %876 : vector<1x8x128xf32> to vector<8x8x128xf32>
    %878 = arith.addf %341, %877 : vector<8x8x128xf32>
    %879 = math.tanh %878 : vector<8x8x128xf32>
    %880 = vector.shape_cast %879 : vector<8x8x128xf32> to vector<64x128xf32>
    %c0_334 = arith.constant 0 : index
    %c0_335 = arith.constant 0 : index
    %881 = vector.load %arg11[%c0_334, %c0_335] : memref<128x128xf32, #tpu.memory_space<vmem>>, vector<128x128xf32>
    %cst_336 = arith.constant dense<0.000000e+00> : vector<64x128xf32>
    %882 = tpu.matmul %880, %881, %cst_336 {dimension_numbers = #tpu.dot_dimension_numbers<[1], [0], [0], [1], [0, 0, 1, 1], [], []>} : vector<64x128xf32>, vector<128x128xf32>, vector<64x128xf32> -> vector<64x128xf32>
    %883 = vector.shape_cast %882 : vector<64x128xf32> to vector<8x8x128xf32>
    %884 = vector.broadcast %352 : vector<8x1x128xf32> to vector<8x8x128xf32>
    %885 = arith.mulf %883, %884 : vector<8x8x128xf32>
    %cst_337 = arith.constant dense<0.000000e+00> : vector<8x128xf32>
    %886 = vector.multi_reduction <add>, %885, %cst_337 [0] : vector<8x8x128xf32> to vector<8x128xf32>
    %cst_338 = arith.constant 0.000000e+00 : f32
    %887 = vector.broadcast %cst_338 : f32 to vector<8x128xf32>
    %888 = arith.cmpf ogt, %827, %887 : vector<8x128xf32>
    %cst_339 = arith.constant -1.000000e+09 : f32
    %889 = vector.broadcast %cst_339 : f32 to vector<8x128xf32>
    %890 = arith.select %888, %886, %889 : vector<8x128xi1>, vector<8x128xf32>
    %cst_340 = arith.constant dense<0xFF800000> : vector<8xf32>
    %891 = vector.multi_reduction <maximumf>, %890, %cst_340 [1] : vector<8x128xf32> to vector<8xf32>
    %892 = vector.shape_cast %891 : vector<8xf32> to vector<8x1xf32>
    %893 = vector.broadcast %892 : vector<8x1xf32> to vector<8x128xf32>
    %894 = arith.cmpf oeq, %890, %893 : vector<8x128xf32>
    %c128_i32_341 = arith.constant 128 : i32
    %895 = vector.broadcast %c128_i32_341 : i32 to vector<8x128xi32>
    %896 = arith.select %894, %343, %895 : vector<8x128xi1>, vector<8x128xi32>
    %cst_342 = arith.constant dense<2147483647> : vector<8xi32>
    %897 = vector.multi_reduction <minsi>, %896, %cst_342 [1] : vector<8x128xi32> to vector<8xi32>
    %898 = vector.shape_cast %897 : vector<8xi32> to vector<8x1xi32>
    %c6_i32 = arith.constant 6 : i32
    %899 = vector.broadcast %c6_i32 : i32 to vector<8x128xi32>
    %900 = arith.cmpi eq, %343, %899 : vector<8x128xi32>
    %901 = vector.shape_cast %898 : vector<8x1xi32> to vector<8x1xi32>
    %902 = vector.broadcast %901 : vector<8x1xi32> to vector<8x128xi32>
    %903 = arith.select %900, %902, %823 : vector<8x128xi1>, vector<8x128xi32>
    %904 = vector.broadcast %898 : vector<8x1xi32> to vector<8x128xi32>
    %905 = arith.cmpi eq, %343, %904 : vector<8x128xi32>
    %cst_343 = arith.constant 0.000000e+00 : f32
    %906 = vector.broadcast %cst_343 : f32 to vector<8x128xf32>
    %907 = arith.select %905, %906, %827 : vector<8x128xi1>, vector<8x128xf32>
    %908 = vector.extract_strided_slice %905 {offsets = [0, 0], sizes = [8, 8], strides = [1, 1]} : vector<8x128xi1> to vector<8x8xi1>
    %909 = arith.extui %908 : vector<8x8xi1> to vector<8x8xi32>
    %910 = arith.sitofp %909 : vector<8x8xi32> to vector<8x8xf32>
    %911 = vector.shape_cast %910 : vector<8x8xf32> to vector<8x8x1xf32>
    %912 = vector.broadcast %911 : vector<8x8x1xf32> to vector<8x8x128xf32>
    %913 = arith.mulf %912, %342 : vector<8x8x128xf32>
    %cst_344 = arith.constant dense<0.000000e+00> : vector<8x128xf32>
    %914 = vector.multi_reduction <add>, %913, %cst_344 [1] : vector<8x8x128xf32> to vector<8x128xf32>
    %915 = arith.truncf %914 : vector<8x128xf32> to vector<8x128xbf16>
    %c0_345 = arith.constant 0 : index
    %c0_346 = arith.constant 0 : index
    %916 = vector.load %arg5[%c0_345, %c0_346] : memref<128x384xbf16, #tpu.memory_space<vmem>>, vector<128x384xbf16>
    %cst_347 = arith.constant dense<0.000000e+00> : vector<8x384xf32>
    %917 = tpu.matmul %915, %916, %cst_347 {dimension_numbers = #tpu.dot_dimension_numbers<[1], [0], [0], [1], [0, 0, 1, 1], [], []>} : vector<8x128xbf16>, vector<128x384xbf16>, vector<8x384xf32> -> vector<8x384xf32>
    %c0_348 = arith.constant 0 : index
    %c0_349 = arith.constant 0 : index
    %918 = vector.load %arg7[%c0_348, %c0_349] : memref<1x384xf32, #tpu.memory_space<vmem>>, vector<1x384xf32>
    %919 = vector.broadcast %918 : vector<1x384xf32> to vector<8x384xf32>
    %920 = arith.addf %917, %919 : vector<8x384xf32>
    %921 = arith.truncf %872 : vector<8x128xf32> to vector<8x128xbf16>
    %c0_350 = arith.constant 0 : index
    %c0_351 = arith.constant 0 : index
    %922 = vector.load %arg6[%c0_350, %c0_351] : memref<128x384xbf16, #tpu.memory_space<vmem>>, vector<128x384xbf16>
    %cst_352 = arith.constant dense<0.000000e+00> : vector<8x384xf32>
    %923 = tpu.matmul %921, %922, %cst_352 {dimension_numbers = #tpu.dot_dimension_numbers<[1], [0], [0], [1], [0, 0, 1, 1], [], []>} : vector<8x128xbf16>, vector<128x384xbf16>, vector<8x384xf32> -> vector<8x384xf32>
    %c0_353 = arith.constant 0 : index
    %c0_354 = arith.constant 0 : index
    %924 = vector.load %arg8[%c0_353, %c0_354] : memref<1x384xf32, #tpu.memory_space<vmem>>, vector<1x384xf32>
    %925 = vector.broadcast %924 : vector<1x384xf32> to vector<8x384xf32>
    %926 = arith.addf %923, %925 : vector<8x384xf32>
    %927 = vector.extract_strided_slice %920 {offsets = [0, 0], sizes = [8, 128], strides = [1, 1]} : vector<8x384xf32> to vector<8x128xf32>
    %928 = vector.extract_strided_slice %926 {offsets = [0, 0], sizes = [8, 128], strides = [1, 1]} : vector<8x384xf32> to vector<8x128xf32>
    %929 = arith.addf %927, %928 : vector<8x128xf32>
    %930 = arith.negf %929 : vector<8x128xf32>
    %931 = math.exp %930 : vector<8x128xf32>
    %cst_355 = arith.constant 1.000000e+00 : f32
    %932 = vector.broadcast %cst_355 : f32 to vector<8x128xf32>
    %933 = arith.addf %932, %931 : vector<8x128xf32>
    %934 = arith.divf %932, %933 : vector<8x128xf32>
    %935 = vector.extract_strided_slice %920 {offsets = [0, 128], sizes = [8, 128], strides = [1, 1]} : vector<8x384xf32> to vector<8x128xf32>
    %936 = vector.extract_strided_slice %926 {offsets = [0, 128], sizes = [8, 128], strides = [1, 1]} : vector<8x384xf32> to vector<8x128xf32>
    %937 = arith.addf %935, %936 : vector<8x128xf32>
    %938 = arith.negf %937 : vector<8x128xf32>
    %939 = math.exp %938 : vector<8x128xf32>
    %cst_356 = arith.constant 1.000000e+00 : f32
    %940 = vector.broadcast %cst_356 : f32 to vector<8x128xf32>
    %941 = arith.addf %940, %939 : vector<8x128xf32>
    %942 = arith.divf %940, %941 : vector<8x128xf32>
    %943 = vector.extract_strided_slice %920 {offsets = [0, 256], sizes = [8, 128], strides = [1, 1]} : vector<8x384xf32> to vector<8x128xf32>
    %944 = vector.extract_strided_slice %926 {offsets = [0, 256], sizes = [8, 128], strides = [1, 1]} : vector<8x384xf32> to vector<8x128xf32>
    %945 = arith.mulf %934, %944 : vector<8x128xf32>
    %946 = arith.addf %943, %945 : vector<8x128xf32>
    %947 = math.tanh %946 : vector<8x128xf32>
    %cst_357 = arith.constant 1.000000e+00 : f32
    %948 = vector.broadcast %cst_357 : f32 to vector<8x128xf32>
    %949 = arith.subf %948, %942 : vector<8x128xf32>
    %950 = arith.mulf %949, %947 : vector<8x128xf32>
    %951 = arith.mulf %942, %872 : vector<8x128xf32>
    %952 = arith.addf %950, %951 : vector<8x128xf32>
    %953 = arith.truncf %952 : vector<8x128xf32> to vector<8x128xbf16>
    %c0_358 = arith.constant 0 : index
    %c0_359 = arith.constant 0 : index
    %954 = vector.load %arg10[%c0_358, %c0_359] : memref<128x128xbf16, #tpu.memory_space<vmem>>, vector<128x128xbf16>
    %cst_360 = arith.constant dense<0.000000e+00> : vector<8x128xf32>
    %955 = tpu.matmul %953, %954, %cst_360 {dimension_numbers = #tpu.dot_dimension_numbers<[1], [0], [0], [1], [0, 0, 1, 1], [], []>} : vector<8x128xbf16>, vector<128x128xbf16>, vector<8x128xf32> -> vector<8x128xf32>
    %956 = vector.shape_cast %955 : vector<8x128xf32> to vector<1x8x128xf32>
    %957 = vector.broadcast %956 : vector<1x8x128xf32> to vector<8x8x128xf32>
    %958 = arith.addf %341, %957 : vector<8x8x128xf32>
    %959 = math.tanh %958 : vector<8x8x128xf32>
    %960 = vector.shape_cast %959 : vector<8x8x128xf32> to vector<64x128xf32>
    %c0_361 = arith.constant 0 : index
    %c0_362 = arith.constant 0 : index
    %961 = vector.load %arg11[%c0_361, %c0_362] : memref<128x128xf32, #tpu.memory_space<vmem>>, vector<128x128xf32>
    %cst_363 = arith.constant dense<0.000000e+00> : vector<64x128xf32>
    %962 = tpu.matmul %960, %961, %cst_363 {dimension_numbers = #tpu.dot_dimension_numbers<[1], [0], [0], [1], [0, 0, 1, 1], [], []>} : vector<64x128xf32>, vector<128x128xf32>, vector<64x128xf32> -> vector<64x128xf32>
    %963 = vector.shape_cast %962 : vector<64x128xf32> to vector<8x8x128xf32>
    %964 = vector.broadcast %352 : vector<8x1x128xf32> to vector<8x8x128xf32>
    %965 = arith.mulf %963, %964 : vector<8x8x128xf32>
    %cst_364 = arith.constant dense<0.000000e+00> : vector<8x128xf32>
    %966 = vector.multi_reduction <add>, %965, %cst_364 [0] : vector<8x8x128xf32> to vector<8x128xf32>
    %cst_365 = arith.constant 0.000000e+00 : f32
    %967 = vector.broadcast %cst_365 : f32 to vector<8x128xf32>
    %968 = arith.cmpf ogt, %907, %967 : vector<8x128xf32>
    %cst_366 = arith.constant -1.000000e+09 : f32
    %969 = vector.broadcast %cst_366 : f32 to vector<8x128xf32>
    %970 = arith.select %968, %966, %969 : vector<8x128xi1>, vector<8x128xf32>
    %cst_367 = arith.constant dense<0xFF800000> : vector<8xf32>
    %971 = vector.multi_reduction <maximumf>, %970, %cst_367 [1] : vector<8x128xf32> to vector<8xf32>
    %972 = vector.shape_cast %971 : vector<8xf32> to vector<8x1xf32>
    %973 = vector.broadcast %972 : vector<8x1xf32> to vector<8x128xf32>
    %974 = arith.cmpf oeq, %970, %973 : vector<8x128xf32>
    %c128_i32_368 = arith.constant 128 : i32
    %975 = vector.broadcast %c128_i32_368 : i32 to vector<8x128xi32>
    %976 = arith.select %974, %343, %975 : vector<8x128xi1>, vector<8x128xi32>
    %cst_369 = arith.constant dense<2147483647> : vector<8xi32>
    %977 = vector.multi_reduction <minsi>, %976, %cst_369 [1] : vector<8x128xi32> to vector<8xi32>
    %978 = vector.shape_cast %977 : vector<8xi32> to vector<8x1xi32>
    %c7_i32 = arith.constant 7 : i32
    %979 = vector.broadcast %c7_i32 : i32 to vector<8x128xi32>
    %980 = arith.cmpi eq, %343, %979 : vector<8x128xi32>
    %981 = vector.shape_cast %978 : vector<8x1xi32> to vector<8x1xi32>
    %982 = vector.broadcast %981 : vector<8x1xi32> to vector<8x128xi32>
    %983 = arith.select %980, %982, %903 : vector<8x128xi1>, vector<8x128xi32>
    %984 = vector.extract_strided_slice %983 {offsets = [0, 0], sizes = [8, 8], strides = [1, 1]} : vector<8x128xi32> to vector<8x8xi32>
    %c0_370 = arith.constant 0 : index
    %c0_371 = arith.constant 0 : index
    %985 = vector.load %arg12[%c0_370, %c0_371] : memref<8x8xi32, #tpu.memory_space<vmem>>, vector<8x8xi32>
    tpu.vector_store %arg12[%c0_370, %c0_371], %984 {strides = array<i32>} : memref<8x8xi32, #tpu.memory_space<vmem>>, vector<8x8xi32>,
    return
  }
}

</mosaic_0001>

<bundles_post_ra>
// kernel: actor_forward.1
= control target key start
LH: loop header
LB: loop body
LE: loop exit
PB: predicated region body
PF: predicated region fallthrough
CT: control target
= control target key end

     0   :  { %vm14876_vm0 = vcmask 64512   ;;  %v14820_v3 = vmov 0.0   ;;  %v14822_v23 = vmov 0   ;;  %vm10793_vm1 = vmmov 0   ;;  %s14805_s1 = inlined_call_operand.vmem [shape: f32[8,384], index: 1, kind: input, shape index: {}]   ;;  %s14806_s0 = inlined_call_operand.vmem [shape: f32[64,8], index: 0, kind: input, shape index: {}]   ;;  %s14807_s3 = inlined_call_operand.vmem [shape: bf16[128,384], index: 3, kind: input, shape index: {}]   ;;  %s14808_s2 = inlined_call_operand.vmem [shape: f32[1,384], index: 2, kind: input, shape index: {}]   ;;  %s14809_s4 = inlined_call_operand.vmem [shape: f32[1,384], index: 4, kind: input, shape index: {}]   ;;  %s14810_s13 = inlined_call_operand.vmem [shape: f32[8,8,128], index: 13, kind: output, shape index: {1}]   ;;  %s14811_s9 = inlined_call_operand.vmem [shape: bf16[128,128], index: 9, kind: input, shape index: {}]   ;;  %s14812_s5 = inlined_call_operand.vmem [shape: bf16[128,384], index: 5, kind: input, shape index: {}]   ;;  %s14813_s6 = inlined_call_operand.vmem [shape: bf16[128,384], index: 6, kind: input, shape index: {}]   ;;  %s14814_s10 = inlined_call_operand.vmem [shape: bf16[128,128], index: 10, kind: input, shape index: {}]   ;;  %s14815_s11 = inlined_call_operand.vmem [shape: f32[128,128], index: 11, kind: input, shape index: {}]   ;;  %s14816_s7 = inlined_call_operand.vmem [shape: f32[1,384], index: 7, kind: input, shape index: {}]   ;;  %s14817_s8 = inlined_call_operand.vmem [shape: f32[1,384], index: 8, kind: input, shape index: {}]   ;;  %s14818_s12 = inlined_call_operand.vmem [shape: s32[8,8], index: 12, kind: output, shape index: {0}]  }
   0x1   :  { %v54_v0 = vld [vmem:[%s14805_s1 + $0x10] sm:$0xff]  ;;  %v44_v1 = vld [vmem:[%s14806_s0] sm:$0xff]  ;;  %v45_v2 = vld [vmem:[%s14806_s0 + $0x8] sm:$0xff]  ;;  %161 = vmatprep.mubr.f32.mxu0 %v14820_v3  ;;  %v14819_v45 = vlaneseq  ;;  %vm4287_vm15 = vcmask 1041409  }
   0x2   :  { %8726 = vmatprep.subr.mxu1 %v54_v0  ;;  %8728 = vmatprep.mubr.msk.f32.mxu1 %vm14876_vm0, %v44_v1  ;;  %v10879_v4 = vld [vmem:[%s14807_s3] ss:$12 sps:$4 sm:$0xff]   ;;  %v10884_v5 = vld [vmem:[%s14807_s3 + $0x4] ss:$12 sps:$4 sm:$0xff]   ;;  %v10890_v6 = vld [vmem:[%s14807_s3 + $0x1c] ss:$12 sps:$4 sm:$0xff]  }
   0x3   :  { %8727 = vmatpush3.msra.mxu1 %v54_v0  ;;  %v10897_v7 = vld [vmem:[%s14807_s3 + $0x18] ss:$12 sps:$4 sm:$0xff]   ;;  %v10903_v8 = vld [vmem:[%s14807_s3 + $0x34] ss:$12 sps:$4 sm:$0xff]   ;;  %v10916_v11 = vld [vmem:[%s14807_s3 + $0x30] ss:$12 sps:$4 sm:$0xff]  }
   0x4   :  { %8729 = vmatmul.mubr.msk.f32.vlgmr.msra.gmra.mrb[0].mxu1 %vm14876_vm0, %v45_v2  ;;  %519 = vmatprep.subr.bf16.mxu1 %v10884_v5  ;;  %v46_v9 = vld [vmem:[%s14806_s0 + $0x10] sm:$0xff]  ;;  %v47_v10 = vld [vmem:[%s14806_s0 + $0x18] sm:$0xff]  ;;  %v48_v12 = vld [vmem:[%s14806_s0 + $0x20] sm:$0xff]  ;;  %v11117_v46 = vshrl.u32 %v14819_v45, 7 }
   0x5   :  { %520 = vmatpush1.bf16.msra.mxu1 %v10879_v4  ;;  %8731 = vmatprep.mubr.msk.f32.mxu1 %vm14876_vm0, %v46_v9  ;;  %v10925_v13 = vld [vmem:[%s14807_s3 + $0x4c] ss:$12 sps:$4 sm:$0xff]   ;;  %v10935_v15 = vld [vmem:[%s14806_s0 + $0x30] sm:$0xff]  ;;  %v52_v19 = vld [vmem:[%s14805_s1] sm:$0xff] }
   0x6   :  { %521 = vmatprep.subr.bf16.mxu1 %v10890_v6  ;;  %v49_v14 = vld [vmem:[%s14806_s0 + $0x28] sm:$0xff]  ;;  %v10946_v17 = vld [vmem:[%s14807_s3 + $0x64] ss:$12 sps:$4 sm:$0xff]   ;;  %v10961_v20 = vld [vmem:[%s14806_s0 + $0x38] sm:$0xff]  ;;  %v11120_v47 = vsub.s32 2, %v11117_v46  ;;  %v11146_v61 = vsub.s32 0, %v11117_v46 }
   0x7   :  { %v10941_v16 = vld [vmem:[%s14807_s3 + $0x48] ss:$12 sps:$4 sm:$0xff]   ;;  %v10967_v21 = vld [vmem:[%s14807_s3 + $0x60] ss:$12 sps:$4 sm:$0xff]   ;;  %v10986_v24 = vld [vmem:[%s14807_s3 + $0x78] ss:$12 sps:$4 sm:$0xff]  }
   0x8   :  { %8732 = vmatmul.mubr.msk.f32.gmra.mrb[2].mxu1 %vm14876_vm0, %v47_v10  ;;  %v53_v18 = vld [vmem:[%s14805_s1 + $0x8] sm:$0xff]  ;;  %v10993_v25 = vld [vmem:[%s14807_s3 + $0x94] ss:$12 sps:$4 sm:$0xff]   ;;  %v10999_v26 = vld [vmem:[%s14807_s3 + $0x90] ss:$12 sps:$4 sm:$0xff]   ;;  %15023 = vst [vmem:[#allocation4_spill] sm:$0xff] %v11120_v47 }
   0x9   :  { %522 = vmatpush1.bf16.msra.mxu1 %v10897_v7  ;;  %8734 = vmatprep.mubr.msk.f32.mxu1 %vm14876_vm0, %v48_v12  ;;  %v10974_v22 = vld [vmem:[%s14807_s3 + $0x7c] ss:$12 sps:$4 sm:$0xff]   ;;  %v11005_v27 = vld [vmem:[%s14807_s3 + $0xac] ss:$12 sps:$4 sm:$0xff]   ;;  %v55_v48 = vld [vmem:[%s14808_s2] sm:$0x7] }
   0xa   :  { %523 = vmatprep.subr.bf16.mxu1 %v10903_v8  ;;  %97 = vmatprep.subr.mxu0 %v53_v18  ;;  %v11015_v28 = vld [vmem:[%s14807_s3 + $0xa8] ss:$12 sps:$4 sm:$0xff]   ;;  %v10105_v30 = vld [vmem:[%s14807_s3 + $0x20] ss:$12 sps:$4 sm:$0xff]   ;;  %v10106_v31 = vld [vmem:[%s14807_s3 + $0x38] ss:$12 sps:$4 sm:$0xff]   ;;  %v11126_v49 = vrot.slane %v55_v48, %v11120_v47 }
   0xb   :  { %98 = vmatpush1.msra.mxu0 %v52_v19  ;;  %v10104_v29 = vld [vmem:[%s14807_s3 + $0x8] ss:$12 sps:$4 sm:$0xff]   ;;  %v10107_v32 = vld [vmem:[%s14807_s3 + $0x50] ss:$12 sps:$4 sm:$0xff]   ;;  %v10109_v34 = vld [vmem:[%s14807_s3 + $0x80] ss:$12 sps:$4 sm:$0xff]  }
   0xc   :  { %8735 = vmatmul.mubr.msk.f32.gmra.mrb[4].mxu1 %vm14876_vm0, %v49_v14  ;;  %7873 = vmatmul.mubr.msk.f32.vlgmr.msra.gmra.mrb[0].mxu0 %vm14876_vm0, %v44_v1  ;;  %v10108_v33 = vld [vmem:[%s14807_s3 + $0x68] ss:$12 sps:$4 sm:$0xff]   ;;  %v10110_v35 = vld [vmem:[%s14807_s3 + $0x98] ss:$12 sps:$4 sm:$0xff]   ;;  %v10111_v36 = vld [vmem:[%s14807_s3 + $0xb0] ss:$12 sps:$4 sm:$0xff]  }
   0xd   :  { %524 = vmatpush1.bf16.msra.mxu1 %v10916_v11  ;;  %8737 = vmatprep.mubr.msk.f32.mxu1 %vm14876_vm0, %v10935_v15  ;;  %v10112_v37 = vld [vmem:[%s14807_s3 + $0x8] ss:$12 sps:$4 sm:$0xff]   ;;  %v10113_v38 = vld [vmem:[%s14807_s3 + $0x20] ss:$12 sps:$4 sm:$0xff]   ;;  %v10114_v39 = vld [vmem:[%s14807_s3 + $0x38] ss:$12 sps:$4 sm:$0xff]  }
   0xe   :  { %525 = vmatprep.subr.bf16.mxu1 %v10925_v13  ;;  %803 = vmatprep.subr.bf16.mxu0 %v10884_v5  ;;  %v10115_v40 = vld [vmem:[%s14807_s3 + $0x50] ss:$12 sps:$4 sm:$0xff]   ;;  %v10116_v41 = vld [vmem:[%s14807_s3 + $0x68] ss:$12 sps:$4 sm:$0xff]   ;;  %v10117_v42 = vld [vmem:[%s14807_s3 + $0x80] ss:$12 sps:$4 sm:$0xff]  }
   0xf   :  { %804 = vmatpush1.bf16.msra.mxu0 %v10879_v4  ;;  %167 = vmatprep.mubr.f32.mxu0 %v14820_v3  ;;  %v10118_v43 = vld [vmem:[%s14807_s3 + $0x98] ss:$12 sps:$4 sm:$0xff]   ;;  %v10119_v44 = vld [vmem:[%s14807_s3 + $0xb0] ss:$12 sps:$4 sm:$0xff]   ;;  %15024 = vst [vmem:[#allocation5_spill] sm:$0xff] %v11146_v61  ;;  %v11149_v63 = vsub.s32 1, %v11117_v46 }
  0x10   :  { %8738 = vmatmul.mubr.msk.f32.gmra.mrb[6].mxu1 %vm14876_vm0, %v10961_v20  ;;  %7874 = vmatmul.mubr.msk.f32.gmra.mrb[2].mxu0 %vm14876_vm0, %v45_v2 }
  0x11   :  { %526 = vmatpush1.bf16.msra.mxu1 %v10941_v16  ;;  %551 = vmatprep.mubr.bf16.mxu1 %v14822_v23  ;;  %15025 = vst [vmem:[#allocation6_spill] sm:$0xff] %v11149_v63 }
  0x12   :  { %527 = vmatprep.subr.bf16.mxu1 %v10946_v17  ;;  %805 = vmatprep.subr.bf16.mxu0 %v10890_v6 }
  0x13   :  { %173 = vmatprep.mubr.f32.mxu0 %v14820_v3  ;;  %806 = vmatpush1.bf16.msra.mxu0 %v10897_v7 }
  0x14   :  { %7875 = vmatmul.mubr.msk.f32.gmra.mrb[4].mxu0 %vm14876_vm0, %v46_v9  ;;  %807 = vmatprep.subr.bf16.mxu0 %v10903_v8 }
  0x15   :  { %528 = vmatpush1.bf16.msra.mxu1 %v10967_v21  ;;  %179 = vmatprep.mubr.f32.mxu0 %v14820_v3 }
  0x16   :  { %529 = vmatprep.subr.bf16.mxu1 %v10974_v22 }
  0x17   :  { %808 = vmatpush1.bf16.msra.mxu0 %v10916_v11 }
  0x18   :  { %7876 = vmatmul.mubr.msk.f32.gmra.mrb[6].mxu0 %vm14876_vm0, %v47_v10  ;;  %809 = vmatprep.subr.bf16.mxu0 %v10925_v13  ;;  %v60_v10 = vrot.slane %v55_v48, %v11146_v61 }
  0x19   :  { %530 = vmatpush1.bf16.msra.mxu1 %v10986_v24  ;;  %185 = vmatprep.mubr.f32.mxu0 %v14820_v3 }
  0x1a   :  { %531 = vmatprep.subr.bf16.mxu1 %v10993_v25 }
  0x1b   :  { %810 = vmatpush1.bf16.msra.mxu0 %v10941_v16 }
  0x1c   :  { %7877 = vmatmul.mubr.msk.f32.gmra.mrb[8].mxu0 %vm14876_vm0, %v48_v12  ;;  %811 = vmatprep.subr.bf16.mxu0 %v10946_v17  ;;  %v64_v12 = vrot.slane %v55_v48, %v11149_v63 }
  0x1d   :  { %532 = vmatpush1.bf16.msra.mxu1 %v10999_v26  ;;  %191 = vmatprep.mubr.f32.mxu0 %v14820_v3 }
  0x1e   :  { %533 = vmatprep.subr.bf16.mxu1 %v11005_v27 }
  0x1f   :  { %812 = vmatpush1.bf16.msra.mxu0 %v10967_v21 }
  0x20   :  { %7878 = vmatmul.mubr.msk.f32.gmra.mrb[10].mxu0 %vm14876_vm0, %v49_v14  ;;  %813 = vmatprep.subr.bf16.mxu0 %v10974_v22 }
  0x21   :  { %534 = vmatpush1.bf16.msra.mxu1 %v11015_v28  ;;  %197 = vmatprep.mubr.f32.mxu0 %v14820_v3 }
  0x22   :  { %8740 = vmatprep.subr.bf16.mxu1 %v14820_v3 }
  0x23   :  { %814 = vmatpush1.bf16.msra.mxu0 %v10986_v24 }
  0x24   :  { %552 = vmatmul.mubr.bf16.vlgmr.msra.gmra.mrb[8].mxu1 %v14822_v23  ;;  %815 = vmatprep.subr.bf16.mxu0 %v10993_v25 }
  0x25   :  { %8741 = vmatpush3.bf16.msra.mxu1 %v10104_v29  ;;  %8756 = vmatprep.mubr.msk.bf16.mxu1 %vm10793_vm1, %v14820_v3 }
  0x26   :  { %8742 = vmatprep.subr.bf16.mxu1 %v14820_v3  ;;  %7879 = vmatmul.mubr.msk.f32.gmra.mrb[12].mxu0 %vm14876_vm0, %v10935_v15 }
  0x27   :  { %203 = vmatprep.mubr.f32.mxu0 %v14820_v3  ;;  %816 = vmatpush1.bf16.msra.mxu0 %v10999_v26 }
  0x28   :  { %817 = vmatprep.subr.bf16.mxu0 %v11005_v27 }
  0x29   :  { %8743 = vmatpush3.bf16.msra.mxu1 %v10105_v30 }
  0x2a   :  { %8744 = vmatprep.subr.bf16.mxu1 %v14820_v3  ;;  %7880 = vmatmul.mubr.msk.f32.gmra.mrb[14].mxu0 %vm14876_vm0, %v10961_v20  ;;  %vm4297_vm0 = vcmask 1046534  }
  0x2b   :  { %835 = vmatprep.mubr.bf16.mxu0 %v14822_v23  ;;  %818 = vmatpush1.bf16.msra.mxu0 %v11015_v28 }
  0x2c   :  { %1088 = vmatprep.subr.bf16.mxu0 %v10884_v5 }
  0x2d   :  { %8745 = vmatpush3.bf16.msra.mxu1 %v10106_v31 }
  0x2e   :  { %8746 = vmatprep.subr.bf16.mxu1 %v14820_v3 }
  0x31   :  { %8747 = vmatpush3.bf16.msra.mxu1 %v10107_v32 }
  0x32   :  { %8748 = vmatprep.subr.bf16.mxu1 %v14820_v3 }
  0x35   :  { %8749 = vmatpush3.bf16.msra.mxu1 %v10108_v33  ;;  %v374_v33 = vld [vmem:[%s14809_s4] sm:$0x7] }
  0x36   :  { %8750 = vmatprep.subr.bf16.mxu1 %v14820_v3 }
  0x39   :  { %8751 = vmatpush3.bf16.msra.mxu1 %v10109_v34 }
  0x3a   :  { %8752 = vmatprep.subr.bf16.mxu1 %v14820_v3 }
  0x3d   :  { %8753 = vmatpush3.bf16.msra.mxu1 %v10110_v35 }
  0x3e   :  { %8754 = vmatprep.subr.bf16.mxu1 %v14820_v3 }
  0x41   :  { %8755 = vmatpush3.bf16.msra.mxu1 %v10111_v36 }
  0x42   :  { %8760 = vmatprep.subr.bf16.mxu1 %v14820_v3 }
  0x44   :  { %8757 = vmatmul.mubr.bf16.vlgmr.msra.gmra.mrb[12].mxu1 %v14822_v23 }
  0x45   :  { %8776 = vmatprep.mubr.msk.bf16.mxu1 %vm10793_vm1, %v14820_v3  ;;  %8761 = vmatpush3.bf16.msra.mxu1 %v10112_v37  ;;  %v379_v37 = vrot.slane %v374_v33, %v11146_v61 }
  0x46   :  { %8762 = vmatprep.subr.bf16.mxu1 %v14820_v3 }
  0x49   :  { %8763 = vmatpush3.bf16.msra.mxu1 %v10113_v38 }
  0x4a   :  { %8764 = vmatprep.subr.bf16.mxu1 %v14820_v3 }
  0x4d   :  { %8765 = vmatpush3.bf16.msra.mxu1 %v10114_v39  ;;  %v383_v39 = vrot.slane %v374_v33, %v11149_v63 }
  0x4e   :  { %8766 = vmatprep.subr.bf16.mxu1 %v14820_v3 }
  0x51   :  { %8767 = vmatpush3.bf16.msra.mxu1 %v10115_v40 }
  0x52   :  { %8768 = vmatprep.subr.bf16.mxu1 %v14820_v3 }
  0x55   :  { %8769 = vmatpush3.bf16.msra.mxu1 %v10116_v41 }
  0x56   :  { %8770 = vmatprep.subr.bf16.mxu1 %v14820_v3 }
  0x59   :  { %8771 = vmatpush3.bf16.msra.mxu1 %v10117_v42 }
  0x5a   :  { %8772 = vmatprep.subr.bf16.mxu1 %v14820_v3 }
  0x5d   :  { %8773 = vmatpush3.bf16.msra.mxu1 %v10118_v43 }
  0x5e   :  { %8774 = vmatprep.subr.bf16.mxu1 %v14820_v3 }
  0x61   :  { %8775 = vmatpush3.bf16.msra.mxu1 %v10119_v44 }
  0x62   :  { %8780 = vmatprep.subr.bf16.mxu1 %v14820_v3 }
  0xd7   :  { %v8730_v50 = vpop.f32.mrb[0].mxu1 }
  0xd8   :  { %v11129_v51 = vadd.f32 %v8730_v50, %v11126_v49  ;;  %v11131_v52 = vpop.f32.mrb[1].mxu1 }
  0xdb   :  { %v8733_v53 = vpop.f32.mrb[2].mxu1 }
  0xdc   :  { %v11134_v54 = vadd.f32 %v8733_v53, %v11126_v49  ;;  %v286_v55 = vpop.f32.mrb[3].mxu1 }
  0xdd   :  { %v11137_v56 = vadd.f32 %v286_v55, %v11126_v49 }
  0xdf   :  { %v8736_v57 = vpop.f32.mrb[4].mxu1  ;;  %v163_v62 = vpop.f32.mrb[0].mxu0 }
  0xe0   :  { %v11140_v58 = vadd.f32 %v8736_v57, %v11126_v49  ;;  %v296_v59 = vpop.f32.mrb[5].mxu1  ;;  %v165_v1 = vpop.f32.mrb[1].mxu0  ;;  %v164_v42 = vadd.f32 %v163_v62, %v60_v10 }
  0xe1   :  { %v11143_v60 = vadd.f32 %v296_v59, %v11126_v49  ;;  %v166_v48 = vadd.f32 %v165_v1, %v64_v12 }
  0xe3   :  { %v8739_v0 = vpop.f32.mrb[6].mxu1  ;;  %v169_v14 = vpop.f32.mrb[2].mxu0 }
  0xe4   :  { %v11152_v2 = vadd.f32 %v8739_v0, %v11126_v49  ;;  %v306_v5 = vpop.f32.mrb[7].mxu1  ;;  %v11159_v15 = vadd.f32 %v169_v14, %v60_v10  ;;  %v171_v18 = vpop.f32.mrb[3].mxu0 }
  0xe5   :  { %v11155_v9 = vadd.f32 %v306_v5, %v11126_v49  ;;  %v11161_v19 = vadd.f32 %v171_v18, %v64_v12 }
  0xe7   :  { %v175_v20 = vpop.f32.mrb[4].mxu0 }
  0xe8   :  { %v11163_v29 = vadd.f32 %v175_v20, %v60_v10  ;;  %v177_v30 = vpop.f32.mrb[5].mxu0 }
  0xe9   :  { %v11165_v31 = vadd.f32 %v177_v30, %v64_v12 }
  0xeb   :  { %v181_v32 = vpop.f32.mrb[6].mxu0 }
  0xec   :  { %v11170_v34 = vadd.f32 %v181_v32, %v60_v10  ;;  %v183_v35 = vpop.f32.mrb[7].mxu0 }
  0xed   :  { %v11172_v36 = vadd.f32 %v183_v35, %v64_v12 }
  0xef   :  { %v187_v38 = vpop.f32.mrb[8].mxu0 }
  0xf0   :  { %v11176_v40 = vadd.f32 %v187_v38, %v60_v10  ;;  %v189_v41 = vpop.f32.mrb[9].mxu0 }
  0xf1   :  { %v11178_v43 = vadd.f32 %v189_v41, %v64_v12 }
  0xf3   :  { %v193_v59 = vpop.f32.mrb[10].mxu0 }
  0xf4   :  { %v11180_v14 = vadd.f32 %v193_v59, %v60_v10  ;;  %v195_v18 = vpop.f32.mrb[11].mxu0 }
  0xf5   :  { %v11182_v30 = vadd.f32 %v195_v18, %v64_v12 }
  0xf7   :  { %v553_v44 = vpop.f32.mrb[8].mxu1 }
  0xf8   :  { %v554_v50 = vadd.f32 %v553_v44, %v379_v37  ;;  %v555_v53 = vpop.f32.mrb[9].mxu1 }
  0xf9   :  { %v556_v55 = vadd.f32 %v555_v53, %v383_v39  ;;  %v557_v57 = vpop.f32.mrb[10].mxu1  ;;  %v199_v35 = vpop.f32.mrb[12].mxu0 }
  0xfa   :  { %v600_v0 = vadd.f32 %v554_v50, %v164_v42  ;;  %v558_v5 = vpop.f32.mrb[11].mxu1  ;;  %v11184_v62 = vadd.f32 %v199_v35, %v60_v10  ;;  %v201_v38 = vpop.f32.mrb[13].mxu0 }
  0xfb   :  { %v607_v20 = vadd.f32 %v556_v55, %v166_v48  ;;  %v11186_v1 = vadd.f32 %v201_v38, %v64_v12  ;;  %v387_v55 = vrot.slane %v374_v33, %v11120_v47  ;;  %v10794_v38 = vmov 1966171168  }
  0xfc   :  { %v7913_v32 = vmul.f32 -1.442695, %v600_v0 }
  0xfd   :  { %v205_v37 = vpop.f32.mrb[14].mxu0  ;;  %v7914_v44 = vmul.f32 -1.442695, %v607_v20 }
  0xfe   :  { %10296 = vpow2.f32 %v7913_v32  ;;  %v11188_v39 = vadd.f32 %v205_v37, %v60_v10  ;;  %v207_v41 = vpop.f32.mrb[15].mxu0  ;;  %v277_v10 = vadd.f32 %v11131_v52, %v11126_v49  ;;  %v2621_v37 = vunpack.c.l.s4 %v10794_v38 }
  0xff   :  { %v11190_v42 = vadd.f32 %v207_v41, %v64_v12  ;;  %10298 = vpow2.f32 %v7914_v44 }
 0x100   :  { %v2622_v44 = vunpack.c.0.s8 %v2621_v37 }
 0x108   :  { %v10297_v50 = vpop.eup %10296 }
 0x109   :  { %v604_v48 = vadd.f32 1.0, %v10297_v50  ;;  %v10299_v53 = vpop.eup %10298 }
 0x10a   :  { %v611_v57 = vadd.f32 1.0, %v10299_v53 }
 0x10b   :  { %10300 = vrcp.f32 %v604_v48  ;;  %v11196_v48 = vsub.s32 %v2622_v44, %v11117_v46 }
 0x10c   :  { %10302 = vrcp.f32 %v611_v57 }
 0x115   :  { %v10301_v18 = vpop.eup %10300 }
 0x116   :  { %v10303_v41 = vpop.eup %10302 }
 0x117   :  { %v594_v59 = vpop.f32.mrb[12].mxu1  ;;  %v617_v50 = vsub.f32 1.0, %v10303_v41  ;;  %v619_v53 = vmul.f32 0.0, %v10303_v41 }
 0x118   :  { %v595_v0 = vadd.f32 %v594_v59, %v387_v55  ;;  %v8758_v5 = vpop.f32.mrb[13].mxu1 }
 0x119   :  { %v597_v32 = vpop.f32.mrb[14].mxu1 }
 0x11a   :  { %v614_v12 = vmul.f32 %v10301_v18, %v595_v0  ;;  %v8759_v35 = vpop.f32.mrb[15].mxu1 }
 0x11c   :  { %v615_v20 = vadd.f32 %v614_v12, %v277_v10 }
 0x11e   :  { %10304 = vtanh.f32 %v615_v20 }
 0x128   :  { %v10305_v33 = vpop.eup %10304 }
 0x129   :  { %v618_v55 = vmul.f32 %v10305_v33, %v617_v50 }
 0x12b   :  { %v11198_v59 = vadd.f32 %v619_v53, %v618_v55 }
 0x12d   :  { %v2619_v49 = vcombine.high %v11198_v59, %v11198_v59  ;;  %v2626_v52 = vrot.slane %v11198_v59, %v11196_v48  ;;  %v625_v57 = vpack.c.bf16 %v11198_v59, %v11198_v59 }
 0x12f   :  { %v2633_v0 = vrot.slane %v2619_v49, %v11196_v48  ;;  %v2634_v5 = vcombine.high %v2626_v52, %v2626_v52  ;;  %v2642_v18 = vrot.slane %v2626_v52, %v11196_v48  ;;  %8097 = vst.sshfl [vmem:[%s14810_s13] sm:$0x1 pattern:$0x73625140] %v2626_v52  ;;  %836 = vmatmul.mubr.bf16.vlgmr.msra.gmra.mrb[16].mxu0 %v625_v57 }
 0x130   :  { %8777 = vmatmul.mubr.bf16.vlgmr.msra.gmra.mrb[16].mxu1 %v625_v57  ;;  %1089 = vmatpush1.bf16.msra.mxu0 %v10879_v4 }
 0x131   :  { %1120 = vmatprep.mubr.bf16.mxu0 %v14822_v23  ;;  %v2635_v32 = vcombine.high %v2633_v0, %v2633_v0  ;;  %v2649_v10 = vrot.slane %v2633_v0, %v11196_v48  ;;  %v2656_v12 = vrot.slane %v2634_v5, %v11196_v48  ;;  %v2664_v35 = vcombine.high %v2642_v18, %v2642_v18 }
 0x132   :  { %8098 = vst.sshfl [vmem:[%s14810_s13 + $0x8] sm:$0x1 pattern:$0x73625140] %v2634_v5  ;;  %1090 = vmatprep.subr.bf16.mxu0 %v10890_v6  ;;  %8796 = vmatprep.mubr.msk.bf16.mxu1 %vm10793_vm1, %v14820_v3  ;;  %v10120_v6 = vld [vmem:[%s14807_s3 + $0x8] ss:$12 sps:$4 sm:$0xff]  }
 0x133   :  { %8099 = vst.sshfl [vmem:[%s14810_s13 + $0x20] sm:$0x1 pattern:$0x73625140] %v2633_v0  ;;  %v2663_v4 = vrot.slane %v2635_v32, %v11196_v48  ;;  %v2665_v20 = vcombine.high %v2649_v10, %v2649_v10  ;;  %v2666_v38 = vcombine.high %v2656_v12, %v2656_v12  ;;  %2678 = vst [vmem:[%s14810_s13 + $0x10] sm:$0x1] %v2664_v35  ;;  %8781 = vmatpush3.bf16.msra.mxu1 %v10120_v6 }
 0x134   :  { %8100 = vst.sshfl [vmem:[%s14810_s13 + $0x28] sm:$0x1 pattern:$0x73625140] %v2635_v32  ;;  %1091 = vmatpush1.bf16.msra.mxu0 %v10897_v7  ;;  %8782 = vmatprep.subr.bf16.mxu1 %v14820_v3  ;;  %v10121_v7 = vld [vmem:[%s14807_s3 + $0x20] ss:$12 sps:$4 sm:$0xff]  }
 0x135   :  { %v2667_v37 = vcombine.high %v2663_v4, %v2663_v4  ;;  %2679 = vst [vmem:[%s14810_s13 + $0x18] sm:$0x1] %v2666_v38  ;;  %2682 = vst [vmem:[%s14810_s13 + $0x30] sm:$0x1] %v2665_v20  ;;  %1092 = vmatprep.subr.bf16.mxu0 %v10903_v8  ;;  %v10122_v8 = vld [vmem:[%s14807_s3 + $0x38] ss:$12 sps:$4 sm:$0xff]  }
 0x137   :  { %2683 = vst [vmem:[%s14810_s13 + $0x38] sm:$0x1] %v2667_v37  ;;  %8783 = vmatpush3.bf16.msra.mxu1 %v10121_v7 }
 0x138   :  { %1093 = vmatpush1.bf16.msra.mxu0 %v10916_v11  ;;  %8784 = vmatprep.subr.bf16.mxu1 %v14820_v3  ;;  %v10123_v11 = vld [vmem:[%s14807_s3 + $0x50] ss:$12 sps:$4 sm:$0xff]  }
 0x139   :  { %1094 = vmatprep.subr.bf16.mxu0 %v10925_v13  ;;  %v10124_v13 = vld [vmem:[%s14807_s3 + $0x68] ss:$12 sps:$4 sm:$0xff]  }
 0x13b   :  { %8785 = vmatpush3.bf16.msra.mxu1 %v10122_v8 }
 0x13c   :  { %1095 = vmatpush1.bf16.msra.mxu0 %v10941_v16  ;;  %8786 = vmatprep.subr.bf16.mxu1 %v14820_v3  ;;  %v10125_v16 = vld [vmem:[%s14807_s3 + $0x80] ss:$12 sps:$4 sm:$0xff]  }
 0x13d   :  { %1096 = vmatprep.subr.bf16.mxu0 %v10946_v17  ;;  %v10126_v17 = vld [vmem:[%s14807_s3 + $0x98] ss:$12 sps:$4 sm:$0xff]  }
 0x13f   :  { %8787 = vmatpush3.bf16.msra.mxu1 %v10123_v11 }
 0x140   :  { %1097 = vmatpush1.bf16.msra.mxu0 %v10967_v21  ;;  %8788 = vmatprep.subr.bf16.mxu1 %v14820_v3  ;;  %v10127_v21 = vld [vmem:[%s14807_s3 + $0xb0] ss:$12 sps:$4 sm:$0xff]  }
 0x141   :  { %1098 = vmatprep.subr.bf16.mxu0 %v10974_v22  ;;  %v658_v22 = vld [vmem:[%s14809_s4] sm:$0x7] }
 0x142   :  { %v671_v12 = vrot.slane %v658_v22, %v11120_v47 }
 0x143   :  { %8789 = vmatpush3.bf16.msra.mxu1 %v10124_v13 }
 0x144   :  { %1099 = vmatpush1.bf16.msra.mxu0 %v10986_v24  ;;  %8790 = vmatprep.subr.bf16.mxu1 %v14820_v3  ;;  %v663_v24 = vrot.slane %v658_v22, %v11146_v61 }
 0x145   :  { %1100 = vmatprep.subr.bf16.mxu0 %v10993_v25  ;;  %v667_v25 = vrot.slane %v658_v22, %v11149_v63 }
 0x147   :  { %8791 = vmatpush3.bf16.msra.mxu1 %v10125_v16 }
 0x148   :  { %1101 = vmatpush1.bf16.msra.mxu0 %v10999_v26  ;;  %8792 = vmatprep.subr.bf16.mxu1 %v14820_v3 }
 0x149   :  { %1102 = vmatprep.subr.bf16.mxu0 %v11005_v27 }
 0x14b   :  { %8793 = vmatpush3.bf16.msra.mxu1 %v10126_v17 }
 0x14c   :  { %1103 = vmatpush1.bf16.msra.mxu0 %v11015_v28  ;;  %8794 = vmatprep.subr.bf16.mxu1 %v14820_v3 }
 0x14f   :  { %8795 = vmatpush3.bf16.msra.mxu1 %v10127_v21 }
 0x150   :  { %8800 = vmatprep.subr.bf16.mxu1 %v14820_v3 }
 0x202   :  { %v837_v26 = vpop.f32.mrb[16].mxu0 }
 0x203   :  { %v878_v27 = vpop.f32.mrb[16].mxu1  ;;  %v838_v28 = vadd.f32 %v837_v26, %v663_v24  ;;  %v839_v41 = vpop.f32.mrb[17].mxu0 }
 0x204   :  { %v8778_v44 = vpop.f32.mrb[17].mxu1  ;;  %v840_v50 = vadd.f32 %v839_v41, %v667_v25  ;;  %v841_v33 = vpop.f32.mrb[18].mxu0  ;;  %v879_v4 = vadd.f32 %v878_v27, %v671_v12  ;;  %v10143_v12 = vld [vmem:[%s14807_s3 + $0x50] ss:$12 sps:$4 sm:$0xff]  }
 0x205   :  { %v881_v53 = vpop.f32.mrb[18].mxu1  ;;  %v884_v55 = vadd.f32 %v838_v28, %v11159_v15  ;;  %v842_v49 = vpop.f32.mrb[19].mxu0  ;;  %v11338_v33 = vld [vmem:[%s14807_s3 + $0x4] ss:$12 sps:$4 sm:$0xff]  }
 0x206   :  { %v8779_v52 = vpop.f32.mrb[19].mxu1  ;;  %v891_v57 = vadd.f32 %v840_v50, %v11161_v19  ;;  %v11343_v53 = vld [vmem:[%s14807_s3] ss:$12 sps:$4 sm:$0xff]   ;;  %1373 = vmatprep.subr.bf16.mxu0 %v11338_v33  ;;  %v11353_v49 = vld [vmem:[%s14807_s3 + $0x1c] ss:$12 sps:$4 sm:$0xff]  }
 0x207   :  { %v7939_v0 = vmul.f32 -1.442695, %v884_v55  ;;  %v10131_v55 = vld [vmem:[%s14807_s3 + $0x8] ss:$12 sps:$4 sm:$0xff]   ;;  %v11359_v52 = vld [vmem:[%s14807_s3 + $0x18] ss:$12 sps:$4 sm:$0xff]  }
 0x208   :  { %v7940_v5 = vmul.f32 -1.442695, %v891_v57  ;;  %v10135_v57 = vld [vmem:[%s14807_s3 + $0x20] ss:$12 sps:$4 sm:$0xff]  }
 0x209   :  { %10306 = vpow2.f32 %v7939_v0  ;;  %v11369_v0 = vld [vmem:[%s14807_s3 + $0x34] ss:$12 sps:$4 sm:$0xff]  }
 0x20a   :  { %10308 = vpow2.f32 %v7940_v5  ;;  %v11375_v5 = vld [vmem:[%s14807_s3 + $0x30] ss:$12 sps:$4 sm:$0xff]  }
 0x213   :  { %v10307_v18 = vpop.eup %10306 }
 0x214   :  { %v888_v32 = vadd.f32 1.0, %v10307_v18  ;;  %v10309_v10 = vpop.eup %10308  ;;  %v10139_v18 = vld [vmem:[%s14807_s3 + $0x38] ss:$12 sps:$4 sm:$0xff]  }
 0x215   :  { %v895_v35 = vadd.f32 1.0, %v10309_v10  ;;  %v11391_v10 = vld [vmem:[%s14807_s3 + $0x48] ss:$12 sps:$4 sm:$0xff]  }
 0x216   :  { %10310 = vrcp.f32 %v888_v32  ;;  %v11385_v32 = vld [vmem:[%s14807_s3 + $0x4c] ss:$12 sps:$4 sm:$0xff]  }
 0x217   :  { %10312 = vrcp.f32 %v895_v35  ;;  %v11401_v35 = vld [vmem:[%s14807_s3 + $0x64] ss:$12 sps:$4 sm:$0xff]  }
 0x220   :  { %v10311_v20 = vpop.eup %10310 }
 0x221   :  { %v898_v38 = vmul.f32 %v10311_v20, %v879_v4  ;;  %v10313_v37 = vpop.eup %10312  ;;  %v11407_v4 = vld [vmem:[%s14807_s3 + $0x60] ss:$12 sps:$4 sm:$0xff]   ;;  %v10147_v20 = vld [vmem:[%s14807_s3 + $0x68] ss:$12 sps:$4 sm:$0xff]  }
 0x222   :  { %v901_v19 = vsub.f32 1.0, %v10313_v37  ;;  %v903_v8 = vmul.f32 %v10313_v37, %v11198_v59  ;;  %v10151_v37 = vld [vmem:[%s14807_s3 + $0x80] ss:$12 sps:$4 sm:$0xff]  }
 0x223   :  { %v899_v15 = vadd.f32 %v898_v38, %v11129_v51  ;;  %v11417_v38 = vld [vmem:[%s14807_s3 + $0x7c] ss:$12 sps:$4 sm:$0xff]  }
 0x225   :  { %10314 = vtanh.f32 %v899_v15  ;;  %v11423_v15 = vld [vmem:[%s14807_s3 + $0x78] ss:$12 sps:$4 sm:$0xff]  }
 0x22f   :  { %v10315_v6 = vpop.eup %10314 }
 0x230   :  { %v902_v7 = vmul.f32 %v10315_v6, %v901_v19  ;;  %v11433_v19 = vld [vmem:[%s14807_s3 + $0x94] ss:$12 sps:$4 sm:$0xff]   ;;  %v11439_v6 = vld [vmem:[%s14807_s3 + $0x90] ss:$12 sps:$4 sm:$0xff]  }
 0x232   :  { %v11295_v11 = vadd.f32 %v903_v8, %v902_v7  ;;  %v10155_v7 = vld [vmem:[%s14807_s3 + $0x98] ss:$12 sps:$4 sm:$0xff]  }
 0x233   :  { %v11449_v8 = vld [vmem:[%s14807_s3 + $0xac] ss:$12 sps:$4 sm:$0xff]  }
 0x234   :  { %v2686_v13 = vcombine.high %v11295_v11, %v11295_v11  ;;  %v2693_v16 = vrot.slane %v11295_v11, %v11196_v48  ;;  %v910_v17 = vpack.c.bf16 %v11295_v11, %v11295_v11 }
 0x236   :  { %v2700_v51 = vrot.slane %v2686_v13, %v11196_v48  ;;  %v2701_v21 = vcombine.high %v2693_v16, %v2693_v16  ;;  %v2709_v22 = vrot.slane %v2693_v16, %v11196_v48  ;;  %8101 = vst.sshfl [vmem:[%s14810_s13 + $0x1] sm:$0x1 pattern:$0x73625140] %v2693_v16  ;;  %1121 = vmatmul.mubr.bf16.vlgmr.msra.gmra.mrb[20].mxu0 %v910_v17  ;;  %v11455_v13 = vld [vmem:[%s14807_s3 + $0xa8] ss:$12 sps:$4 sm:$0xff]  }
 0x237   :  { %8797 = vmatmul.mubr.bf16.vlgmr.msra.gmra.mrb[20].mxu1 %v910_v17  ;;  %1405 = vmatprep.mubr.bf16.mxu0 %v14822_v23  ;;  %v10159_v16 = vld [vmem:[%s14807_s3 + $0xb0] ss:$12 sps:$4 sm:$0xff]   ;;  %v943_v17 = vld [vmem:[%s14809_s4] sm:$0x7] }
 0x238   :  { %8816 = vmatprep.mubr.msk.bf16.mxu1 %vm10793_vm1, %v14820_v3  ;;  %v2702_v24 = vcombine.high %v2700_v51, %v2700_v51  ;;  %v2716_v25 = vrot.slane %v2700_v51, %v11196_v48  ;;  %v2723_v26 = vrot.slane %v2701_v21, %v11196_v48  ;;  %v2731_v27 = vcombine.high %v2709_v22, %v2709_v22 }
 0x239   :  { %8102 = vst.sshfl [vmem:[%s14810_s13 + $0x9] sm:$0x1 pattern:$0x73625140] %v2701_v21  ;;  %1374 = vmatpush1.bf16.msra.mxu0 %v11343_v53  ;;  %8801 = vmatpush3.bf16.msra.mxu1 %v10131_v55  ;;  %v952_v21 = vrot.slane %v943_v17, %v11149_v63 }
 0x23a   :  { %8103 = vst.sshfl [vmem:[%s14810_s13 + $0x21] sm:$0x1 pattern:$0x73625140] %v2700_v51  ;;  %v2730_v28 = vrot.slane %v2702_v24, %v11196_v48  ;;  %v2732_v41 = vcombine.high %v2716_v25, %v2716_v25  ;;  %v2733_v44 = vcombine.high %v2723_v26, %v2723_v26  ;;  %2745 = vst [vmem:[%s14810_s13 + $0x11] sm:$0x1] %v2731_v27  ;;  %8802 = vmatprep.subr.bf16.mxu1 %v14820_v3 }
 0x23b   :  { %8104 = vst.sshfl [vmem:[%s14810_s13 + $0x29] sm:$0x1 pattern:$0x73625140] %v2702_v24  ;;  %1375 = vmatprep.subr.bf16.mxu0 %v11353_v49  ;;  %v948_v51 = vrot.slane %v943_v17, %v11146_v61 }
 0x23c   :  { %v2734_v50 = vcombine.high %v2730_v28, %v2730_v28  ;;  %2746 = vst [vmem:[%s14810_s13 + $0x19] sm:$0x1] %v2733_v44  ;;  %2749 = vst [vmem:[%s14810_s13 + $0x31] sm:$0x1] %v2732_v41 }
 0x23d   :  { %1376 = vmatpush1.bf16.msra.mxu0 %v11359_v52  ;;  %8803 = vmatpush3.bf16.msra.mxu1 %v10135_v57 }
 0x23e   :  { %2750 = vst [vmem:[%s14810_s13 + $0x39] sm:$0x1] %v2734_v50  ;;  %8804 = vmatprep.subr.bf16.mxu1 %v14820_v3  ;;  %1377 = vmatprep.subr.bf16.mxu0 %v11369_v0 }
 0x241   :  { %1378 = vmatpush1.bf16.msra.mxu0 %v11375_v5  ;;  %8805 = vmatpush3.bf16.msra.mxu1 %v10139_v18 }
 0x242   :  { %8806 = vmatprep.subr.bf16.mxu1 %v14820_v3  ;;  %1379 = vmatprep.subr.bf16.mxu0 %v11385_v32 }
 0x245   :  { %1380 = vmatpush1.bf16.msra.mxu0 %v11391_v10  ;;  %8807 = vmatpush3.bf16.msra.mxu1 %v10143_v12 }
 0x246   :  { %8808 = vmatprep.subr.bf16.mxu1 %v14820_v3  ;;  %1381 = vmatprep.subr.bf16.mxu0 %v11401_v35 }
 0x249   :  { %1382 = vmatpush1.bf16.msra.mxu0 %v11407_v4  ;;  %8809 = vmatpush3.bf16.msra.mxu1 %v10147_v20 }
 0x24a   :  { %8810 = vmatprep.subr.bf16.mxu1 %v14820_v3  ;;  %1383 = vmatprep.subr.bf16.mxu0 %v11417_v38 }
 0x24d   :  { %1384 = vmatpush1.bf16.msra.mxu0 %v11423_v15  ;;  %8811 = vmatpush3.bf16.msra.mxu1 %v10151_v37 }
 0x24e   :  { %8812 = vmatprep.subr.bf16.mxu1 %v14820_v3  ;;  %1385 = vmatprep.subr.bf16.mxu0 %v11433_v19 }
 0x251   :  { %1386 = vmatpush1.bf16.msra.mxu0 %v11439_v6  ;;  %8813 = vmatpush3.bf16.msra.mxu1 %v10155_v7 }
 0x252   :  { %8814 = vmatprep.subr.bf16.mxu1 %v14820_v3  ;;  %1387 = vmatprep.subr.bf16.mxu0 %v11449_v8 }
 0x255   :  { %1388 = vmatpush1.bf16.msra.mxu0 %v11455_v13  ;;  %8815 = vmatpush3.bf16.msra.mxu1 %v10159_v16 }
 0x256   :  { %1658 = vmatprep.subr.bf16.mxu0 %v11338_v33  ;;  %8820 = vmatprep.subr.bf16.mxu1 %v14820_v3 }
 0x309   :  { %v1122_v22 = vpop.f32.mrb[20].mxu0 }
 0x30a   :  { %v1163_v24 = vpop.f32.mrb[20].mxu1  ;;  %v1123_v25 = vadd.f32 %v1122_v22, %v948_v51  ;;  %v1124_v26 = vpop.f32.mrb[21].mxu0  ;;  %v956_v51 = vrot.slane %v943_v17, %v11120_v47 }
 0x30b   :  { %v8798_v27 = vpop.f32.mrb[21].mxu1  ;;  %v1125_v28 = vadd.f32 %v1124_v26, %v952_v21  ;;  %v1126_v41 = vpop.f32.mrb[22].mxu0 }
 0x30c   :  { %v1166_v44 = vpop.f32.mrb[22].mxu1  ;;  %v1169_v50 = vadd.f32 %v1123_v25, %v11163_v29  ;;  %v1127_v55 = vpop.f32.mrb[23].mxu0  ;;  %v1164_v21 = vadd.f32 %v1163_v24, %v956_v51 }
 0x30d   :  { %v8799_v57 = vpop.f32.mrb[23].mxu1  ;;  %v1176_v18 = vadd.f32 %v1125_v28, %v11165_v31 }
 0x30e   :  { %v7965_v12 = vmul.f32 -1.442695, %v1169_v50 }
 0x30f   :  { %v7966_v20 = vmul.f32 -1.442695, %v1176_v18 }
 0x310   :  { %10316 = vpow2.f32 %v7965_v12 }
 0x311   :  { %10318 = vpow2.f32 %v7966_v20 }
 0x31a   :  { %v10317_v37 = vpop.eup %10316 }
 0x31b   :  { %v1173_v7 = vadd.f32 1.0, %v10317_v37  ;;  %v10319_v16 = vpop.eup %10318 }
 0x31c   :  { %v1180_v22 = vadd.f32 1.0, %v10319_v16 }
 0x31d   :  { %10320 = vrcp.f32 %v1173_v7 }
 0x31e   :  { %10322 = vrcp.f32 %v1180_v22 }
 0x327   :  { %v10321_v26 = vpop.eup %10320 }
 0x328   :  { %v1183_v27 = vmul.f32 %v10321_v26, %v1164_v21  ;;  %v10323_v25 = vpop.eup %10322  ;;  %v10160_v26 = vld [vmem:[%s14807_s3 + $0x8] ss:$12 sps:$4 sm:$0xff]  }
 0x329   :  { %v1186_v31 = vsub.f32 1.0, %v10323_v25  ;;  %v1188_v44 = vmul.f32 %v10323_v25, %v11295_v11  ;;  %v10163_v25 = vld [vmem:[%s14807_s3 + $0x50] ss:$12 sps:$4 sm:$0xff]  }
 0x32a   :  { %v1184_v29 = vadd.f32 %v1183_v27, %v11137_v56  ;;  %v10161_v27 = vld [vmem:[%s14807_s3 + $0x20] ss:$12 sps:$4 sm:$0xff]  }
 0x32c   :  { %10324 = vtanh.f32 %v1184_v29  ;;  %v10162_v29 = vld [vmem:[%s14807_s3 + $0x38] ss:$12 sps:$4 sm:$0xff]  }
 0x336   :  { %v10325_v28 = vpop.eup %10324 }
 0x337   :  { %v1187_v41 = vmul.f32 %v10325_v28, %v1186_v31  ;;  %v10164_v31 = vld [vmem:[%s14807_s3 + $0x68] ss:$12 sps:$4 sm:$0xff]   ;;  %v10165_v28 = vld [vmem:[%s14807_s3 + $0x80] ss:$12 sps:$4 sm:$0xff]  }
 0x339   :  { %v11474_v50 = vadd.f32 %v1188_v44, %v1187_v41  ;;  %v10166_v41 = vld [vmem:[%s14807_s3 + $0x98] ss:$12 sps:$4 sm:$0xff]   ;;  %v10167_v44 = vld [vmem:[%s14807_s3 + $0xb0] ss:$12 sps:$4 sm:$0xff]  }
 0x33b   :  { %v2753_v55 = vcombine.high %v11474_v50, %v11474_v50  ;;  %v2760_v17 = vrot.slane %v11474_v50, %v11196_v48  ;;  %v1195_v24 = vpack.c.bf16 %v11474_v50, %v11474_v50 }
 0x33d   :  { %v2767_v56 = vrot.slane %v2753_v55, %v11196_v48  ;;  %v2768_v57 = vcombine.high %v2760_v17, %v2760_v17  ;;  %v2776_v18 = vrot.slane %v2760_v17, %v11196_v48  ;;  %8105 = vst.sshfl [vmem:[%s14810_s13 + $0x2] sm:$0x1 pattern:$0x73625140] %v2760_v17  ;;  %1406 = vmatmul.mubr.bf16.vlgmr.msra.gmra.mrb[24].mxu0 %v1195_v24  ;;  %v1228_v55 = vld [vmem:[%s14809_s4] sm:$0x7] }
 0x33e   :  { %8817 = vmatmul.mubr.bf16.vlgmr.msra.gmra.mrb[24].mxu1 %v1195_v24  ;;  %1659 = vmatpush1.bf16.msra.mxu0 %v11343_v53  ;;  %v1233_v17 = vrot.slane %v1228_v55, %v11146_v61  ;;  %v1237_v24 = vrot.slane %v1228_v55, %v11149_v63 }
 0x33f   :  { %1690 = vmatprep.mubr.bf16.mxu0 %v14822_v23  ;;  %v2769_v12 = vcombine.high %v2767_v56, %v2767_v56  ;;  %v2783_v20 = vrot.slane %v2767_v56, %v11196_v48  ;;  %v2790_v37 = vrot.slane %v2768_v57, %v11196_v48  ;;  %v2798_v7 = vcombine.high %v2776_v18, %v2776_v18 }
 0x340   :  { %8106 = vst.sshfl [vmem:[%s14810_s13 + $0xa] sm:$0x1 pattern:$0x73625140] %v2768_v57  ;;  %1660 = vmatprep.subr.bf16.mxu0 %v11353_v49  ;;  %8836 = vmatprep.mubr.msk.bf16.mxu1 %vm10793_vm1, %v14820_v3 }
 0x341   :  { %8107 = vst.sshfl [vmem:[%s14810_s13 + $0x22] sm:$0x1 pattern:$0x73625140] %v2767_v56  ;;  %v2797_v16 = vrot.slane %v2769_v12, %v11196_v48  ;;  %v2799_v51 = vcombine.high %v2783_v20, %v2783_v20  ;;  %v2800_v22 = vcombine.high %v2790_v37, %v2790_v37  ;;  %2812 = vst [vmem:[%s14810_s13 + $0x12] sm:$0x1] %v2798_v7  ;;  %8821 = vmatpush3.bf16.msra.mxu1 %v10160_v26 }
 0x342   :  { %8108 = vst.sshfl [vmem:[%s14810_s13 + $0x2a] sm:$0x1 pattern:$0x73625140] %v2769_v12  ;;  %1661 = vmatpush1.bf16.msra.mxu0 %v11359_v52  ;;  %8822 = vmatprep.subr.bf16.mxu1 %v14820_v3 }
 0x343   :  { %v2801_v21 = vcombine.high %v2797_v16, %v2797_v16  ;;  %2813 = vst [vmem:[%s14810_s13 + $0x1a] sm:$0x1] %v2800_v22  ;;  %2816 = vst [vmem:[%s14810_s13 + $0x32] sm:$0x1] %v2799_v51  ;;  %1662 = vmatprep.subr.bf16.mxu0 %v11369_v0 }
 0x345   :  { %2817 = vst [vmem:[%s14810_s13 + $0x3a] sm:$0x1] %v2801_v21  ;;  %8823 = vmatpush3.bf16.msra.mxu1 %v10161_v27 }
 0x346   :  { %1663 = vmatpush1.bf16.msra.mxu0 %v11375_v5  ;;  %8824 = vmatprep.subr.bf16.mxu1 %v14820_v3 }
 0x347   :  { %1664 = vmatprep.subr.bf16.mxu0 %v11385_v32 }
 0x349   :  { %8825 = vmatpush3.bf16.msra.mxu1 %v10162_v29 }
 0x34a   :  { %1665 = vmatpush1.bf16.msra.mxu0 %v11391_v10  ;;  %8826 = vmatprep.subr.bf16.mxu1 %v14820_v3 }
 0x34b   :  { %1666 = vmatprep.subr.bf16.mxu0 %v11401_v35 }
 0x34d   :  { %8827 = vmatpush3.bf16.msra.mxu1 %v10163_v25 }
 0x34e   :  { %1667 = vmatpush1.bf16.msra.mxu0 %v11407_v4  ;;  %8828 = vmatprep.subr.bf16.mxu1 %v14820_v3 }
 0x34f   :  { %1668 = vmatprep.subr.bf16.mxu0 %v11417_v38 }
 0x351   :  { %8829 = vmatpush3.bf16.msra.mxu1 %v10164_v31 }
 0x352   :  { %1669 = vmatpush1.bf16.msra.mxu0 %v11423_v15  ;;  %8830 = vmatprep.subr.bf16.mxu1 %v14820_v3 }
 0x353   :  { %1670 = vmatprep.subr.bf16.mxu0 %v11433_v19 }
 0x355   :  { %8831 = vmatpush3.bf16.msra.mxu1 %v10165_v28 }
 0x356   :  { %1671 = vmatpush1.bf16.msra.mxu0 %v11439_v6  ;;  %8832 = vmatprep.subr.bf16.mxu1 %v14820_v3 }
 0x357   :  { %1672 = vmatprep.subr.bf16.mxu0 %v11449_v8 }
 0x359   :  { %8833 = vmatpush3.bf16.msra.mxu1 %v10166_v41  ;;  %v1241_v41 = vrot.slane %v1228_v55, %v11120_v47 }
 0x35a   :  { %1673 = vmatpush1.bf16.msra.mxu0 %v11455_v13  ;;  %8834 = vmatprep.subr.bf16.mxu1 %v14820_v3 }
 0x35b   :  { %1943 = vmatprep.subr.bf16.mxu0 %v11338_v33 }
 0x35d   :  { %8835 = vmatpush3.bf16.msra.mxu1 %v10167_v44 }
 0x35e   :  { %8840 = vmatprep.subr.bf16.mxu1 %v14820_v3 }
 0x410   :  { %v1407_v56 = vpop.f32.mrb[24].mxu0 }
 0x411   :  { %v1448_v57 = vpop.f32.mrb[24].mxu1  ;;  %v1408_v18 = vadd.f32 %v1407_v56, %v1233_v17  ;;  %v1409_v12 = vpop.f32.mrb[25].mxu0 }
 0x412   :  { %v8818_v20 = vpop.f32.mrb[25].mxu1  ;;  %v1410_v37 = vadd.f32 %v1409_v12, %v1237_v24  ;;  %v1411_v7 = vpop.f32.mrb[26].mxu0  ;;  %v1449_v17 = vadd.f32 %v1448_v57, %v1241_v41 }
 0x413   :  { %v1451_v16 = vpop.f32.mrb[26].mxu1  ;;  %v1454_v51 = vadd.f32 %v1408_v18, %v11170_v34  ;;  %v1412_v22 = vpop.f32.mrb[27].mxu0 }
 0x414   :  { %v8819_v21 = vpop.f32.mrb[27].mxu1  ;;  %v1461_v26 = vadd.f32 %v1410_v37, %v11172_v36 }
 0x415   :  { %v7991_v27 = vmul.f32 -1.442695, %v1454_v51 }
 0x416   :  { %v7992_v29 = vmul.f32 -1.442695, %v1461_v26 }
 0x417   :  { %10326 = vpow2.f32 %v7991_v27 }
 0x418   :  { %10328 = vpow2.f32 %v7992_v29 }
 0x421   :  { %v10327_v25 = vpop.eup %10326 }
 0x422   :  { %v1458_v31 = vadd.f32 1.0, %v10327_v25  ;;  %v10329_v28 = vpop.eup %10328 }
 0x423   :  { %v1465_v44 = vadd.f32 1.0, %v10329_v28 }
 0x424   :  { %10330 = vrcp.f32 %v1458_v31 }
 0x425   :  { %10332 = vrcp.f32 %v1465_v44  ;;  %v10168_v44 = vld [vmem:[%s14807_s3 + $0x8] ss:$12 sps:$4 sm:$0xff]  }
 0x42e   :  { %v10331_v24 = vpop.eup %10330 }
 0x42f   :  { %v1468_v56 = vmul.f32 %v10331_v24, %v1449_v17  ;;  %v10333_v18 = vpop.eup %10332  ;;  %v10169_v17 = vld [vmem:[%s14807_s3 + $0x20] ss:$12 sps:$4 sm:$0xff]   ;;  %v10170_v24 = vld [vmem:[%s14807_s3 + $0x38] ss:$12 sps:$4 sm:$0xff]  }
 0x430   :  { %v1471_v36 = vsub.f32 1.0, %v10333_v18  ;;  %v1473_v37 = vmul.f32 %v10333_v18, %v11474_v50  ;;  %v10174_v18 = vld [vmem:[%s14807_s3 + $0x98] ss:$12 sps:$4 sm:$0xff]  }
 0x431   :  { %v1469_v34 = vadd.f32 %v1468_v56, %v11134_v54  ;;  %v10172_v56 = vld [vmem:[%s14807_s3 + $0x68] ss:$12 sps:$4 sm:$0xff]  }
 0x433   :  { %10334 = vtanh.f32 %v1469_v34  ;;  %v10173_v34 = vld [vmem:[%s14807_s3 + $0x80] ss:$12 sps:$4 sm:$0xff]  }
 0x43d   :  { %v10335_v12 = vpop.eup %10334 }
 0x43e   :  { %v1472_v20 = vmul.f32 %v10335_v12, %v1471_v36  ;;  %v10175_v36 = vld [vmem:[%s14807_s3 + $0xb0] ss:$12 sps:$4 sm:$0xff]   ;;  %v1513_v12 = vld [vmem:[%s14809_s4] sm:$0x7] }
 0x440   :  { %v11572_v7 = vadd.f32 %v1473_v37, %v1472_v20  ;;  %v1518_v20 = vrot.slane %v1513_v12, %v11146_v61  ;;  %v1522_v37 = vrot.slane %v1513_v12, %v11149_v63 }
 0x442   :  { %v2820_v16 = vcombine.high %v11572_v7, %v11572_v7  ;;  %v2827_v55 = vrot.slane %v11572_v7, %v11196_v48  ;;  %v1480_v57 = vpack.c.bf16 %v11572_v7, %v11572_v7 }
 0x444   :  { %v2834_v54 = vrot.slane %v2820_v16, %v11196_v48  ;;  %v2835_v51 = vcombine.high %v2827_v55, %v2827_v55  ;;  %v2843_v22 = vrot.slane %v2827_v55, %v11196_v48  ;;  %8109 = vst.sshfl [vmem:[%s14810_s13 + $0x3] sm:$0x1 pattern:$0x73625140] %v2827_v55  ;;  %1691 = vmatmul.mubr.bf16.vlgmr.msra.gmra.mrb[28].mxu0 %v1480_v57 }
 0x445   :  { %8837 = vmatmul.mubr.bf16.vlgmr.msra.gmra.mrb[28].mxu1 %v1480_v57  ;;  %1944 = vmatpush1.bf16.msra.mxu0 %v11343_v53 }
 0x446   :  { %1975 = vmatprep.mubr.bf16.mxu0 %v14822_v23  ;;  %v2836_v21 = vcombine.high %v2834_v54, %v2834_v54  ;;  %v2850_v26 = vrot.slane %v2834_v54, %v11196_v48  ;;  %v2857_v27 = vrot.slane %v2835_v51, %v11196_v48  ;;  %v2865_v29 = vcombine.high %v2843_v22, %v2843_v22 }
 0x447   :  { %8110 = vst.sshfl [vmem:[%s14810_s13 + $0xb] sm:$0x1 pattern:$0x73625140] %v2835_v51  ;;  %1945 = vmatprep.subr.bf16.mxu0 %v11353_v49  ;;  %8856 = vmatprep.mubr.msk.bf16.mxu1 %vm10793_vm1, %v14820_v3 }
 0x448   :  { %8111 = vst.sshfl [vmem:[%s14810_s13 + $0x23] sm:$0x1 pattern:$0x73625140] %v2834_v54  ;;  %v2864_v25 = vrot.slane %v2836_v21, %v11196_v48  ;;  %v2866_v31 = vcombine.high %v2850_v26, %v2850_v26  ;;  %v2867_v28 = vcombine.high %v2857_v27, %v2857_v27  ;;  %2879 = vst [vmem:[%s14810_s13 + $0x13] sm:$0x1] %v2865_v29  ;;  %8841 = vmatpush3.bf16.msra.mxu1 %v10168_v44 }
 0x449   :  { %8112 = vst.sshfl [vmem:[%s14810_s13 + $0x2b] sm:$0x1 pattern:$0x73625140] %v2836_v21  ;;  %1946 = vmatpush1.bf16.msra.mxu0 %v11359_v52  ;;  %8842 = vmatprep.subr.bf16.mxu1 %v14820_v3 }
 0x44a   :  { %v2868_v41 = vcombine.high %v2864_v25, %v2864_v25  ;;  %2880 = vst [vmem:[%s14810_s13 + $0x1b] sm:$0x1] %v2867_v28  ;;  %2883 = vst [vmem:[%s14810_s13 + $0x33] sm:$0x1] %v2866_v31  ;;  %1947 = vmatprep.subr.bf16.mxu0 %v11369_v0 }
 0x44c   :  { %2884 = vst [vmem:[%s14810_s13 + $0x3b] sm:$0x1] %v2868_v41  ;;  %8843 = vmatpush3.bf16.msra.mxu1 %v10169_v17 }
 0x44d   :  { %1948 = vmatpush1.bf16.msra.mxu0 %v11375_v5  ;;  %8844 = vmatprep.subr.bf16.mxu1 %v14820_v3 }
 0x44e   :  { %1949 = vmatprep.subr.bf16.mxu0 %v11385_v32 }
 0x450   :  { %8845 = vmatpush3.bf16.msra.mxu1 %v10170_v24 }
 0x451   :  { %1950 = vmatpush1.bf16.msra.mxu0 %v11391_v10  ;;  %8846 = vmatprep.subr.bf16.mxu1 %v14820_v3 }
 0x452   :  { %1951 = vmatprep.subr.bf16.mxu0 %v11401_v35 }
 0x455   :  { %1952 = vmatpush1.bf16.msra.mxu0 %v11407_v4 }
 0x456   :  { %1953 = vmatprep.subr.bf16.mxu0 %v11417_v38 }
 0x459   :  { %1954 = vmatpush1.bf16.msra.mxu0 %v11423_v15 }
 0x45a   :  { %1955 = vmatprep.subr.bf16.mxu0 %v11433_v19 }
 0x45d   :  { %1956 = vmatpush1.bf16.msra.mxu0 %v11439_v6 }
 0x45e   :  { %1957 = vmatprep.subr.bf16.mxu0 %v11449_v8 }
 0x461   :  { %1958 = vmatpush1.bf16.msra.mxu0 %v11455_v13 }
 0x462   :  { %2228 = vmatprep.subr.bf16.mxu0 %v11338_v33  ;;  %v10171_v33 = vld [vmem:[%s14807_s3 + $0x50] ss:$12 sps:$4 sm:$0xff]  }
 0x463   :  { %8847 = vmatpush3.bf16.msra.mxu1 %v10171_v33  ;;  %v1526_v33 = vrot.slane %v1513_v12, %v11120_v47 }
 0x464   :  { %8848 = vmatprep.subr.bf16.mxu1 %v14820_v3 }
 0x467   :  { %8849 = vmatpush3.bf16.msra.mxu1 %v10172_v56 }
 0x468   :  { %8850 = vmatprep.subr.bf16.mxu1 %v14820_v3 }
 0x46b   :  { %8851 = vmatpush3.bf16.msra.mxu1 %v10173_v34 }
 0x46c   :  { %8852 = vmatprep.subr.bf16.mxu1 %v14820_v3 }
 0x46f   :  { %8853 = vmatpush3.bf16.msra.mxu1 %v10174_v18 }
 0x470   :  { %8854 = vmatprep.subr.bf16.mxu1 %v14820_v3 }
 0x473   :  { %8855 = vmatpush3.bf16.msra.mxu1 %v10175_v36 }
 0x474   :  { %8860 = vmatprep.subr.bf16.mxu1 %v14820_v3 }
 0x517   :  { %v1692_v16 = vpop.f32.mrb[28].mxu0 }
 0x518   :  { %v1733_v55 = vpop.f32.mrb[28].mxu1  ;;  %v1693_v57 = vadd.f32 %v1692_v16, %v1518_v20  ;;  %v1694_v54 = vpop.f32.mrb[29].mxu0 }
 0x519   :  { %v8838_v51 = vpop.f32.mrb[29].mxu1  ;;  %v1695_v22 = vadd.f32 %v1694_v54, %v1522_v37  ;;  %v1696_v21 = vpop.f32.mrb[30].mxu0  ;;  %v1734_v34 = vadd.f32 %v1733_v55, %v1526_v33 }
 0x51a   :  { %v1736_v26 = vpop.f32.mrb[30].mxu1  ;;  %v1739_v27 = vadd.f32 %v1693_v57, %v11176_v40  ;;  %v1697_v29 = vpop.f32.mrb[31].mxu0 }
 0x51b   :  { %v8839_v25 = vpop.f32.mrb[31].mxu1  ;;  %v1746_v31 = vadd.f32 %v1695_v22, %v11178_v43 }
 0x51c   :  { %v8017_v28 = vmul.f32 -1.442695, %v1739_v27 }
 0x51d   :  { %v8018_v41 = vmul.f32 -1.442695, %v1746_v31 }
 0x51e   :  { %10336 = vpow2.f32 %v8017_v28 }
 0x51f   :  { %10338 = vpow2.f32 %v8018_v41 }
 0x528   :  { %v10337_v44 = vpop.eup %10336 }
 0x529   :  { %v1743_v17 = vadd.f32 1.0, %v10337_v44  ;;  %v10339_v24 = vpop.eup %10338 }
 0x52a   :  { %v1750_v56 = vadd.f32 1.0, %v10339_v24 }
 0x52b   :  { %10340 = vrcp.f32 %v1743_v17 }
 0x52c   :  { %10342 = vrcp.f32 %v1750_v56 }
 0x535   :  { %v10341_v18 = vpop.eup %10340 }
 0x536   :  { %v1753_v36 = vmul.f32 %v10341_v18, %v1734_v34  ;;  %v10343_v20 = vpop.eup %10342 }
 0x537   :  { %v1756_v43 = vsub.f32 1.0, %v10343_v20  ;;  %v1758_v57 = vmul.f32 %v10343_v20, %v11572_v7 }
 0x538   :  { %v1754_v40 = vadd.f32 %v1753_v36, %v11143_v60 }
 0x53a   :  { %10344 = vtanh.f32 %v1754_v40 }
 0x544   :  { %v10345_v37 = vpop.eup %10344 }
 0x545   :  { %v1757_v16 = vmul.f32 %v10345_v37, %v1756_v43 }
 0x547   :  { %v11670_v54 = vadd.f32 %v1758_v57, %v1757_v16 }
 0x549   :  { %v2887_v51 = vcombine.high %v11670_v54, %v11670_v54  ;;  %v2894_v12 = vrot.slane %v11670_v54, %v11196_v48  ;;  %v1765_v55 = vpack.c.bf16 %v11670_v54, %v11670_v54 }
 0x54b   :  { %v2901_v60 = vrot.slane %v2887_v51, %v11196_v48  ;;  %v2902_v22 = vcombine.high %v2894_v12, %v2894_v12  ;;  %v2910_v21 = vrot.slane %v2894_v12, %v11196_v48  ;;  %8113 = vst.sshfl [vmem:[%s14810_s13 + $0x4] sm:$0x1 pattern:$0x73625140] %v2894_v12  ;;  %1976 = vmatmul.mubr.bf16.vlgmr.msra.gmra.mrb[32].mxu0 %v1765_v55 }
 0x54c   :  { %8857 = vmatmul.mubr.bf16.vlgmr.msra.gmra.mrb[32].mxu1 %v1765_v55  ;;  %2229 = vmatpush1.bf16.msra.mxu0 %v11343_v53 }
 0x54d   :  { %2260 = vmatprep.mubr.bf16.mxu0 %v14822_v23  ;;  %v2903_v26 = vcombine.high %v2901_v60, %v2901_v60  ;;  %v2917_v27 = vrot.slane %v2901_v60, %v11196_v48  ;;  %v2924_v29 = vrot.slane %v2902_v22, %v11196_v48  ;;  %v2932_v25 = vcombine.high %v2910_v21, %v2910_v21 }
 0x54e   :  { %8114 = vst.sshfl [vmem:[%s14810_s13 + $0xc] sm:$0x1 pattern:$0x73625140] %v2902_v22  ;;  %2230 = vmatprep.subr.bf16.mxu0 %v11353_v49  ;;  %8876 = vmatprep.mubr.msk.bf16.mxu1 %vm10793_vm1, %v14820_v3  ;;  %v10176_v49 = vld [vmem:[%s14807_s3 + $0x8] ss:$12 sps:$4 sm:$0xff]  }
 0x54f   :  { %8115 = vst.sshfl [vmem:[%s14810_s13 + $0x24] sm:$0x1 pattern:$0x73625140] %v2901_v60  ;;  %v2931_v53 = vrot.slane %v2903_v26, %v11196_v48  ;;  %v2933_v31 = vcombine.high %v2917_v27, %v2917_v27  ;;  %v2934_v28 = vcombine.high %v2924_v29, %v2924_v29  ;;  %2946 = vst [vmem:[%s14810_s13 + $0x14] sm:$0x1] %v2932_v25  ;;  %8861 = vmatpush3.bf16.msra.mxu1 %v10176_v49 }
 0x550   :  { %8116 = vst.sshfl [vmem:[%s14810_s13 + $0x2c] sm:$0x1 pattern:$0x73625140] %v2903_v26  ;;  %2231 = vmatpush1.bf16.msra.mxu0 %v11359_v52  ;;  %8862 = vmatprep.subr.bf16.mxu1 %v14820_v3  ;;  %v10177_v52 = vld [vmem:[%s14807_s3 + $0x20] ss:$12 sps:$4 sm:$0xff]  }
 0x551   :  { %v2935_v41 = vcombine.high %v2931_v53, %v2931_v53  ;;  %2947 = vst [vmem:[%s14810_s13 + $0x1c] sm:$0x1] %v2934_v28  ;;  %2950 = vst [vmem:[%s14810_s13 + $0x34] sm:$0x1] %v2933_v31  ;;  %2232 = vmatprep.subr.bf16.mxu0 %v11369_v0  ;;  %v10178_v0 = vld [vmem:[%s14807_s3 + $0x38] ss:$12 sps:$4 sm:$0xff]  }
 0x553   :  { %2951 = vst [vmem:[%s14810_s13 + $0x3c] sm:$0x1] %v2935_v41  ;;  %8863 = vmatpush3.bf16.msra.mxu1 %v10177_v52 }
 0x554   :  { %2233 = vmatpush1.bf16.msra.mxu0 %v11375_v5  ;;  %8864 = vmatprep.subr.bf16.mxu1 %v14820_v3  ;;  %v10179_v5 = vld [vmem:[%s14807_s3 + $0x50] ss:$12 sps:$4 sm:$0xff]  }
 0x555   :  { %2234 = vmatprep.subr.bf16.mxu0 %v11385_v32  ;;  %v10180_v32 = vld [vmem:[%s14807_s3 + $0x68] ss:$12 sps:$4 sm:$0xff]  }
 0x557   :  { %8865 = vmatpush3.bf16.msra.mxu1 %v10178_v0 }
 0x558   :  { %2235 = vmatpush1.bf16.msra.mxu0 %v11391_v10  ;;  %8866 = vmatprep.subr.bf16.mxu1 %v14820_v3  ;;  %v10181_v10 = vld [vmem:[%s14807_s3 + $0x80] ss:$12 sps:$4 sm:$0xff]  }
 0x559   :  { %2236 = vmatprep.subr.bf16.mxu0 %v11401_v35  ;;  %v10182_v35 = vld [vmem:[%s14807_s3 + $0x98] ss:$12 sps:$4 sm:$0xff]  }
 0x55b   :  { %8867 = vmatpush3.bf16.msra.mxu1 %v10179_v5 }
 0x55c   :  { %2237 = vmatpush1.bf16.msra.mxu0 %v11407_v4  ;;  %8868 = vmatprep.subr.bf16.mxu1 %v14820_v3  ;;  %v10183_v4 = vld [vmem:[%s14807_s3 + $0xb0] ss:$12 sps:$4 sm:$0xff]  }
 0x55d   :  { %2238 = vmatprep.subr.bf16.mxu0 %v11417_v38  ;;  %v1798_v38 = vld [vmem:[%s14809_s4] sm:$0x7] }
 0x55e   :  { %v1811_v51 = vrot.slane %v1798_v38, %v11120_v47 }
 0x55f   :  { %8869 = vmatpush3.bf16.msra.mxu1 %v10180_v32 }
 0x560   :  { %2239 = vmatpush1.bf16.msra.mxu0 %v11423_v15  ;;  %8870 = vmatprep.subr.bf16.mxu1 %v14820_v3  ;;  %v1803_v15 = vrot.slane %v1798_v38, %v11146_v61 }
 0x561   :  { %2240 = vmatprep.subr.bf16.mxu0 %v11433_v19  ;;  %v1807_v19 = vrot.slane %v1798_v38, %v11149_v63 }
 0x563   :  { %8871 = vmatpush3.bf16.msra.mxu1 %v10181_v10 }
 0x564   :  { %2241 = vmatpush1.bf16.msra.mxu0 %v11439_v6  ;;  %8872 = vmatprep.subr.bf16.mxu1 %v14820_v3 }
 0x565   :  { %2242 = vmatprep.subr.bf16.mxu0 %v11449_v8 }
 0x567   :  { %8873 = vmatpush3.bf16.msra.mxu1 %v10182_v35 }
 0x568   :  { %2243 = vmatpush1.bf16.msra.mxu0 %v11455_v13  ;;  %8874 = vmatprep.subr.bf16.mxu1 %v14820_v3 }
 0x56b   :  { %8875 = vmatpush3.bf16.msra.mxu1 %v10183_v4 }
 0x56c   :  { %8880 = vmatprep.subr.bf16.mxu1 %v14820_v3 }
 0x61e   :  { %v1977_v6 = vpop.f32.mrb[32].mxu0 }
 0x61f   :  { %v2018_v8 = vpop.f32.mrb[32].mxu1  ;;  %v1978_v13 = vadd.f32 %v1977_v6, %v1803_v15  ;;  %v1979_v44 = vpop.f32.mrb[33].mxu0  ;;  %v10186_v15 = vld [vmem:[%s14807_s3 + $0x4] ss:$12 sps:$4 sm:$0xff]   ;;  %v10187_v6 = vld [vmem:[%s14807_s3 + $0x8] ss:$12 sps:$4 sm:$0xff]  }
 0x620   :  { %v8858_v17 = vpop.f32.mrb[33].mxu1  ;;  %v1980_v24 = vadd.f32 %v1979_v44, %v1807_v19  ;;  %v1981_v33 = vpop.f32.mrb[34].mxu0  ;;  %v2019_v55 = vadd.f32 %v2018_v8, %v1811_v51  ;;  %v10184_v19 = vld [vmem:[%s14807_s3] ss:$12 sps:$4 sm:$0xff]   ;;  %2513 = vmatprep.subr.bf16.mxu0 %v10186_v15  ;;  %v10190_v8 = vld [vmem:[%s14807_s3 + $0x1c] ss:$12 sps:$4 sm:$0xff]  }
 0x621   :  { %v2021_v56 = vpop.f32.mrb[34].mxu1  ;;  %v2024_v34 = vadd.f32 %v1978_v13, %v11180_v14  ;;  %v1982_v18 = vpop.f32.mrb[35].mxu0  ;;  %v10188_v13 = vld [vmem:[%s14807_s3 + $0x18] ss:$12 sps:$4 sm:$0xff]   ;;  %v10191_v44 = vld [vmem:[%s14807_s3 + $0x20] ss:$12 sps:$4 sm:$0xff]  }
 0x622   :  { %v8859_v36 = vpop.f32.mrb[35].mxu1  ;;  %v2031_v40 = vadd.f32 %v1980_v24, %v11182_v30  ;;  %v10194_v17 = vld [vmem:[%s14807_s3 + $0x34] ss:$12 sps:$4 sm:$0xff]   ;;  %v10192_v24 = vld [vmem:[%s14807_s3 + $0x30] ss:$12 sps:$4 sm:$0xff]  }
 0x623   :  { %v8043_v20 = vmul.f32 -1.442695, %v2024_v34  ;;  %v10195_v33 = vld [vmem:[%s14807_s3 + $0x38] ss:$12 sps:$4 sm:$0xff]   ;;  %v10196_v34 = vld [vmem:[%s14807_s3 + $0x48] ss:$12 sps:$4 sm:$0xff]  }
 0x624   :  { %v8044_v43 = vmul.f32 -1.442695, %v2031_v40  ;;  %v10198_v56 = vld [vmem:[%s14807_s3 + $0x4c] ss:$12 sps:$4 sm:$0xff]   ;;  %v10199_v18 = vld [vmem:[%s14807_s3 + $0x50] ss:$12 sps:$4 sm:$0xff]  }
 0x625   :  { %10346 = vpow2.f32 %v8043_v20  ;;  %v10202_v36 = vld [vmem:[%s14807_s3 + $0x64] ss:$12 sps:$4 sm:$0xff]   ;;  %v10200_v40 = vld [vmem:[%s14807_s3 + $0x60] ss:$12 sps:$4 sm:$0xff]   ;;  %v10203_v20 = vld [vmem:[%s14807_s3 + $0x68] ss:$12 sps:$4 sm:$0xff]  }
 0x626   :  { %10348 = vpow2.f32 %v8044_v43  ;;  %v10206_v43 = vld [vmem:[%s14807_s3 + $0x7c] ss:$12 sps:$4 sm:$0xff]  }
 0x627   :  { %v10208_v51 = vld [vmem:[%s14807_s3 + $0x90] ss:$12 sps:$4 sm:$0xff]  }
 0x62f   :  { %v10347_v37 = vpop.eup %10346 }
 0x630   :  { %v2028_v16 = vadd.f32 1.0, %v10347_v37  ;;  %v10349_v57 = vpop.eup %10348  ;;  %v10204_v37 = vld [vmem:[%s14807_s3 + $0x78] ss:$12 sps:$4 sm:$0xff]  }
 0x631   :  { %v2035_v12 = vadd.f32 1.0, %v10349_v57  ;;  %v10210_v57 = vld [vmem:[%s14807_s3 + $0x94] ss:$12 sps:$4 sm:$0xff]  }
 0x632   :  { %10350 = vrcp.f32 %v2028_v16  ;;  %v10207_v16 = vld [vmem:[%s14807_s3 + $0x80] ss:$12 sps:$4 sm:$0xff]  }
 0x633   :  { %10352 = vrcp.f32 %v2035_v12  ;;  %v10211_v12 = vld [vmem:[%s14807_s3 + $0x98] ss:$12 sps:$4 sm:$0xff]  }
 0x63c   :  { %v10351_v60 = vpop.eup %10350 }
 0x63d   :  { %v2038_v22 = vmul.f32 %v10351_v60, %v2019_v55  ;;  %v10353_v21 = vpop.eup %10352  ;;  %v10214_v55 = vld [vmem:[%s14807_s3 + $0xac] ss:$12 sps:$4 sm:$0xff]   ;;  %v10212_v60 = vld [vmem:[%s14807_s3 + $0xa8] ss:$12 sps:$4 sm:$0xff]  }
 0x63e   :  { %v2041_v30 = vsub.f32 1.0, %v10353_v21  ;;  %v2043_v29 = vmul.f32 %v10353_v21, %v11670_v54  ;;  %v11892_v21 = vld [vmem:[%s14812_s5 + $0x4] ss:$12 sps:$4 sm:$0xff]  }
 0x63f   :  { %v2039_v14 = vadd.f32 %v2038_v22, %v11140_v58  ;;  %v10215_v22 = vld [vmem:[%s14807_s3 + $0xb0] ss:$12 sps:$4 sm:$0xff]  }
 0x641   :  { %10354 = vtanh.f32 %v2039_v14  ;;  %v10216_v14 = vld [vmem:[%s14811_s9] sm:$0xff]  }
 0x64b   :  { %v10355_v26 = vpop.eup %10354 }
 0x64c   :  { %v2042_v27 = vmul.f32 %v10355_v26, %v2041_v30  ;;  %v2083_v30 = vld [vmem:[%s14809_s4] sm:$0x7] }
 0x64d   :  { %v2088_v26 = vrot.slane %v2083_v30, %v11146_v61 }
 0x64e   :  { %v11767_v25 = vadd.f32 %v2043_v29, %v2042_v27  ;;  %v2092_v27 = vrot.slane %v2083_v30, %v11149_v63 }
 0x650   :  { %v2954_v53 = vcombine.high %v11767_v25, %v11767_v25  ;;  %v2961_v31 = vrot.slane %v11767_v25, %v11196_v48  ;;  %v2050_v28 = vpack.c.bf16 %v11767_v25, %v11767_v25 }
 0x652   :  { %v2968_v58 = vrot.slane %v2954_v53, %v11196_v48  ;;  %v2969_v41 = vcombine.high %v2961_v31, %v2961_v31  ;;  %v2977_v49 = vrot.slane %v2961_v31, %v11196_v48  ;;  %8117 = vst.sshfl [vmem:[%s14810_s13 + $0x5] sm:$0x1 pattern:$0x73625140] %v2961_v31  ;;  %2261 = vmatmul.mubr.bf16.vlgmr.msra.gmra.mrb[36].mxu0 %v2050_v28 }
 0x653   :  { %8877 = vmatmul.mubr.bf16.vlgmr.msra.gmra.mrb[36].mxu1 %v2050_v28  ;;  %2545 = vmatprep.mubr.bf16.mxu0 %v14822_v23 }
 0x654   :  { %8896 = vmatprep.mubr.msk.bf16.mxu1 %vm10793_vm1, %v14820_v3  ;;  %v2970_v52 = vcombine.high %v2968_v58, %v2968_v58  ;;  %v2984_v0 = vrot.slane %v2968_v58, %v11196_v48  ;;  %v2991_v5 = vrot.slane %v2969_v41, %v11196_v48  ;;  %v2999_v32 = vcombine.high %v2977_v49, %v2977_v49 }
 0x655   :  { %8118 = vst.sshfl [vmem:[%s14810_s13 + $0xd] sm:$0x1 pattern:$0x73625140] %v2969_v41  ;;  %2514 = vmatpush1.bf16.msra.mxu0 %v10184_v19  ;;  %8881 = vmatpush3.bf16.msra.mxu1 %v10187_v6  ;;  %v2096_v6 = vrot.slane %v2083_v30, %v11120_v47 }
 0x656   :  { %8119 = vst.sshfl [vmem:[%s14810_s13 + $0x25] sm:$0x1 pattern:$0x73625140] %v2968_v58  ;;  %v2998_v10 = vrot.slane %v2970_v52, %v11196_v48  ;;  %v3000_v35 = vcombine.high %v2984_v0, %v2984_v0  ;;  %v3001_v4 = vcombine.high %v2991_v5, %v2991_v5  ;;  %3013 = vst [vmem:[%s14810_s13 + $0x15] sm:$0x1] %v2999_v32  ;;  %8882 = vmatprep.subr.bf16.mxu1 %v14820_v3 }
 0x657   :  { %8120 = vst.sshfl [vmem:[%s14810_s13 + $0x2d] sm:$0x1 pattern:$0x73625140] %v2970_v52  ;;  %2515 = vmatprep.subr.bf16.mxu0 %v10190_v8 }
 0x658   :  { %v3002_v38 = vcombine.high %v2998_v10, %v2998_v10  ;;  %3014 = vst [vmem:[%s14810_s13 + $0x1d] sm:$0x1] %v3001_v4  ;;  %3017 = vst [vmem:[%s14810_s13 + $0x35] sm:$0x1] %v3000_v35 }
 0x659   :  { %2516 = vmatpush1.bf16.msra.mxu0 %v10188_v13  ;;  %8883 = vmatpush3.bf16.msra.mxu1 %v10191_v44 }
 0x65a   :  { %3018 = vst [vmem:[%s14810_s13 + $0x3d] sm:$0x1] %v3002_v38  ;;  %8884 = vmatprep.subr.bf16.mxu1 %v14820_v3  ;;  %2517 = vmatprep.subr.bf16.mxu0 %v10194_v17 }
 0x65d   :  { %2518 = vmatpush1.bf16.msra.mxu0 %v10192_v24  ;;  %8885 = vmatpush3.bf16.msra.mxu1 %v10195_v33 }
 0x65e   :  { %8886 = vmatprep.subr.bf16.mxu1 %v14820_v3  ;;  %2519 = vmatprep.subr.bf16.mxu0 %v10198_v56 }
 0x661   :  { %2520 = vmatpush1.bf16.msra.mxu0 %v10196_v34  ;;  %8887 = vmatpush3.bf16.msra.mxu1 %v10199_v18 }
 0x662   :  { %8888 = vmatprep.subr.bf16.mxu1 %v14820_v3  ;;  %2521 = vmatprep.subr.bf16.mxu0 %v10202_v36 }
 0x665   :  { %2522 = vmatpush1.bf16.msra.mxu0 %v10200_v40  ;;  %8889 = vmatpush3.bf16.msra.mxu1 %v10203_v20 }
 0x666   :  { %8890 = vmatprep.subr.bf16.mxu1 %v14820_v3  ;;  %2523 = vmatprep.subr.bf16.mxu0 %v10206_v43  ;;  %v3161_v43 = vpack.c.bf16 %v11295_v11, %v11198_v59  ;;  %v11931_v59 = vld [vmem:[%s14812_s5 + $0x1c] ss:$12 sps:$4 sm:$0xff]  }
 0x669   :  { %2524 = vmatpush1.bf16.msra.mxu0 %v10204_v37  ;;  %8891 = vmatpush3.bf16.msra.mxu1 %v10207_v16  ;;  %v11921_v37 = vld [vmem:[%s14812_s5] ss:$12 sps:$4 sm:$0xff]  }
 0x66a   :  { %8892 = vmatprep.subr.bf16.mxu1 %v14820_v3  ;;  %2525 = vmatprep.subr.bf16.mxu0 %v10210_v57 }
 0x66d   :  { %2526 = vmatpush1.bf16.msra.mxu0 %v10208_v51  ;;  %8893 = vmatpush3.bf16.msra.mxu1 %v10211_v12 }
 0x66e   :  { %8894 = vmatprep.subr.bf16.mxu1 %v14820_v3  ;;  %2527 = vmatprep.subr.bf16.mxu0 %v10214_v55 }
 0x671   :  { %2528 = vmatpush1.bf16.msra.mxu0 %v10212_v60  ;;  %8895 = vmatpush3.bf16.msra.mxu1 %v10215_v22  ;;  %v10218_v22 = vld [vmem:[%s14811_s9 + $0x10] sm:$0xff]  }
 0x672   :  { %8900 = vmatprep.subr.bf16.mxu0 %v10216_v14  ;;  %3508 = vmatprep.subr.bf16.mxu1 %v11892_v21 }
 0x725   :  { %v2262_v29 = vpop.f32.mrb[36].mxu0 }
 0x726   :  { %v2303_v53 = vpop.f32.mrb[36].mxu1  ;;  %v2263_v31 = vadd.f32 %v2262_v29, %v2088_v26  ;;  %v2264_v28 = vpop.f32.mrb[37].mxu0  ;;  %v11962_v29 = vld [vmem:[%s14812_s5 + $0x34] ss:$12 sps:$4 sm:$0xff]  }
 0x727   :  { %v8878_v58 = vpop.f32.mrb[37].mxu1  ;;  %v2265_v41 = vadd.f32 %v2264_v28, %v2092_v27  ;;  %v2266_v49 = vpop.f32.mrb[38].mxu0  ;;  %v2304_v13 = vadd.f32 %v2303_v53, %v2096_v6  ;;  %v11977_v28 = vld [vmem:[%s14812_s5 + $0x30] ss:$12 sps:$4 sm:$0xff]   ;;  %v10250_v6 = vld [vmem:[%s14813_s6] ss:$12 sps:$4 sm:$0xff]  }
 0x728   :  { %v2306_v52 = vpop.f32.mrb[38].mxu1  ;;  %v2309_v0 = vadd.f32 %v2263_v31, %v11184_v62  ;;  %v2267_v5 = vpop.f32.mrb[39].mxu0  ;;  %v10219_v31 = vld [vmem:[%s14811_s9 + $0x18] sm:$0xff]   ;;  %v10220_v58 = vld [vmem:[%s14811_s9 + $0x20] sm:$0xff]   ;;  %v10222_v49 = vld [vmem:[%s14811_s9 + $0x30] sm:$0xff]  }
 0x729   :  { %v8879_v32 = vpop.f32.mrb[39].mxu1  ;;  %v2316_v10 = vadd.f32 %v2265_v41, %v11186_v1  ;;  %v10221_v41 = vld [vmem:[%s14811_s9 + $0x28] sm:$0xff]   ;;  %v10223_v52 = vld [vmem:[%s14811_s9 + $0x38] sm:$0xff]   ;;  %v3163_v5 = vpack.c.bf16 %v11767_v25, %v11670_v54 }
 0x72a   :  { %v8069_v35 = vmul.f32 -1.442695, %v2309_v0  ;;  %v3162_v0 = vpack.c.bf16 %v11572_v7, %v11474_v50  ;;  %v12004_v32 = vld [vmem:[%s14812_s5 + $0x4c] ss:$12 sps:$4 sm:$0xff]   ;;  %v12016_v50 = vld [vmem:[%s14812_s5 + $0x64] ss:$12 sps:$4 sm:$0xff]  }
 0x72b   :  { %v8070_v4 = vmul.f32 -1.442695, %v2316_v10  ;;  %v12009_v10 = vld [vmem:[%s14812_s5 + $0x48] ss:$12 sps:$4 sm:$0xff]   ;;  %v12021_v7 = vld [vmem:[%s14812_s5 + $0x60] ss:$12 sps:$4 sm:$0xff]  }
 0x72c   :  { %10356 = vpow2.f32 %v8069_v35  ;;  %v12028_v54 = vld [vmem:[%s14812_s5 + $0x7c] ss:$12 sps:$4 sm:$0xff]   ;;  %v12040_v35 = vld [vmem:[%s14812_s5 + $0x94] ss:$12 sps:$4 sm:$0xff]  }
 0x72d   :  { %10358 = vpow2.f32 %v8070_v4  ;;  %v12045_v4 = vld [vmem:[%s14812_s5 + $0x90] ss:$12 sps:$4 sm:$0xff]  }
 0x736   :  { %v10357_v38 = vpop.eup %10356 }
 0x737   :  { %v2313_v15 = vadd.f32 1.0, %v10357_v38  ;;  %v10359_v19 = vpop.eup %10358  ;;  %v12052_v38 = vld [vmem:[%s14812_s5 + $0xac] ss:$12 sps:$4 sm:$0xff]  }
 0x738   :  { %v2320_v8 = vadd.f32 1.0, %v10359_v19  ;;  %v12064_v19 = vld [vmem:[%s14813_s6 + $0x4] ss:$12 sps:$4 sm:$0xff]  }
 0x739   :  { %10360 = vrcp.f32 %v2313_v15  ;;  %v12057_v15 = vld [vmem:[%s14812_s5 + $0xa8] ss:$12 sps:$4 sm:$0xff]  }
 0x73a   :  { %10362 = vrcp.f32 %v2320_v8  ;;  %v10251_v8 = vld [vmem:[%s14813_s6 + $0x1c] ss:$12 sps:$4 sm:$0xff]  }
 0x743   :  { %v10361_v44 = vpop.eup %10360 }
 0x744   :  { %v2323_v17 = vmul.f32 %v10361_v44, %v2304_v13  ;;  %v10363_v24 = vpop.eup %10362  ;;  %v10253_v13 = vld [vmem:[%s14813_s6 + $0x18] ss:$12 sps:$4 sm:$0xff]   ;;  %v12081_v44 = vld [vmem:[%s14812_s5 + $0x8] ss:$12 sps:$4 sm:$0xff]  }
 0x745   :  { %v2326_v1 = vsub.f32 1.0, %v10363_v24  ;;  %v2328_v34 = vmul.f32 %v10363_v24, %v11767_v25  ;;  %v12033_v25 = vld [vmem:[%s14812_s5 + $0x78] ss:$12 sps:$4 sm:$0xff]   ;;  %v12094_v24 = vld [vmem:[%s14812_s5 + $0x20] ss:$12 sps:$4 sm:$0xff]  }
 0x746   :  { %v2324_v62 = vadd.f32 %v2323_v17, %v11155_v9  ;;  %v10217_v9 = vld [vmem:[%s14811_s9 + $0x8] sm:$0xff]   ;;  %v10255_v17 = vld [vmem:[%s14813_s6 + $0x34] ss:$12 sps:$4 sm:$0xff]  }
 0x748   :  { %10364 = vtanh.f32 %v2324_v62  ;;  %v10257_v62 = vld [vmem:[%s14813_s6 + $0x30] ss:$12 sps:$4 sm:$0xff]  }
 0x752   :  { %v10365_v33 = vpop.eup %10364 }
 0x753   :  { %v2327_v56 = vmul.f32 %v10365_v33, %v2326_v1  ;;  %v10259_v1 = vld [vmem:[%s14813_s6 + $0x4c] ss:$12 sps:$4 sm:$0xff]   ;;  %v10261_v33 = vld [vmem:[%s14813_s6 + $0x48] ss:$12 sps:$4 sm:$0xff]  }
 0x755   :  { %v11905_v18 = vadd.f32 %v2328_v34, %v2327_v56  ;;  %v12107_v56 = vld [vmem:[%s14812_s5 + $0x38] ss:$12 sps:$4 sm:$0xff]  }
 0x756   :  { %v10263_v34 = vld [vmem:[%s14813_s6 + $0x64] ss:$12 sps:$4 sm:$0xff]  }
 0x757   :  { %v3021_v36 = vcombine.high %v11905_v18, %v11905_v18  ;;  %v3028_v40 = vrot.slane %v11905_v18, %v11196_v48  ;;  %v2335_v20 = vpack.c.bf16 %v11905_v18, %v11905_v18 }
 0x759   :  { %v3035_v16 = vrot.slane %v3021_v36, %v11196_v48  ;;  %v3036_v57 = vcombine.high %v3028_v40, %v3028_v40  ;;  %v3044_v51 = vrot.slane %v3028_v40, %v11196_v48  ;;  %8121 = vst.sshfl [vmem:[%s14810_s13 + $0x6] sm:$0x1 pattern:$0x73625140] %v3028_v40  ;;  %2546 = vmatmul.mubr.bf16.vlgmr.msra.gmra.mrb[40].mxu0 %v2335_v20  ;;  %v10265_v36 = vld [vmem:[%s14813_s6 + $0x60] ss:$12 sps:$4 sm:$0xff]  }
 0x75a   :  { %8897 = vmatmul.mubr.bf16.vlgmr.msra.gmra.mrb[40].mxu1 %v2335_v20  ;;  %8901 = vmatpush3.bf16.msra.mxu0 %v10216_v14  ;;  %v11948_v14 = vld [vmem:[%s14812_s5 + $0x18] ss:$12 sps:$4 sm:$0xff]   ;;  %v10267_v40 = vld [vmem:[%s14813_s6 + $0x7c] ss:$12 sps:$4 sm:$0xff]  }
 0x75b   :  { %8916 = vmatprep.mubr.bf16.mxu0 %v3161_v43  ;;  %v3037_v11 = vcombine.high %v3035_v16, %v3035_v16  ;;  %v3051_v12 = vrot.slane %v3035_v16, %v11196_v48  ;;  %v3058_v55 = vrot.slane %v3036_v57, %v11196_v48  ;;  %v3066_v60 = vcombine.high %v3044_v51, %v3044_v51  ;;  %v12122_v20 = vld [vmem:[%s14812_s5 + $0x50] ss:$12 sps:$4 sm:$0xff]   ;;  %v10271_v43 = vld [vmem:[%s14813_s6 + $0x94] ss:$12 sps:$4 sm:$0xff]   ;;  %v10275_v51 = vld [vmem:[%s14813_s6 + $0xac] ss:$12 sps:$4 sm:$0xff]  }
 0x75c   :  { %8122 = vst.sshfl [vmem:[%s14810_s13 + $0xe] sm:$0x1 pattern:$0x73625140] %v3036_v57  ;;  %8902 = vmatprep.subr.bf16.mxu0 %v10217_v9  ;;  %3509 = vmatpush1.bf16.msra.mxu1 %v11921_v37  ;;  %v10273_v57 = vld [vmem:[%s14813_s6 + $0x90] ss:$12 sps:$4 sm:$0xff]  }
 0x75d   :  { %8123 = vst.sshfl [vmem:[%s14810_s13 + $0x26] sm:$0x1 pattern:$0x73625140] %v3035_v16  ;;  %3540 = vmatprep.mubr.bf16.mxu1 %v14822_v23  ;;  %v3065_v30 = vrot.slane %v3037_v11, %v11196_v48  ;;  %v3067_v26 = vcombine.high %v3051_v12, %v3051_v12  ;;  %v3068_v27 = vcombine.high %v3058_v55, %v3058_v55  ;;  %3080 = vst [vmem:[%s14810_s13 + $0x16] sm:$0x1] %v3066_v60 }
 0x75e   :  { %8124 = vst.sshfl [vmem:[%s14810_s13 + $0x2e] sm:$0x1 pattern:$0x73625140] %v3037_v11  ;;  %3510 = vmatprep.subr.bf16.mxu1 %v11931_v59  ;;  %8903 = vmatpush3.bf16.msra.mxu0 %v10217_v9  ;;  %v10269_v9 = vld [vmem:[%s14813_s6 + $0x78] ss:$12 sps:$4 sm:$0xff]  }
 0x75f   :  { %v3069_v53 = vcombine.high %v3065_v30, %v3065_v30  ;;  %3081 = vst [vmem:[%s14810_s13 + $0x1e] sm:$0x1] %v3068_v27  ;;  %3084 = vst [vmem:[%s14810_s13 + $0x36] sm:$0x1] %v3067_v26  ;;  %8904 = vmatprep.subr.bf16.mxu0 %v10218_v22  ;;  %v12135_v16 = vld [vmem:[%s14812_s5 + $0x68] ss:$12 sps:$4 sm:$0xff]  }
 0x760   :  { %3511 = vmatpush1.bf16.msra.mxu1 %v11948_v14  ;;  %v12148_v11 = vld [vmem:[%s14812_s5 + $0x80] ss:$12 sps:$4 sm:$0xff]   ;;  %v10277_v12 = vld [vmem:[%s14813_s6 + $0xa8] ss:$12 sps:$4 sm:$0xff]   ;;  %v12159_v55 = vld [vmem:[%s14812_s5 + $0x98] ss:$12 sps:$4 sm:$0xff]  }
 0x761   :  { %3085 = vst [vmem:[%s14810_s13 + $0x3e] sm:$0x1] %v3069_v53  ;;  %3512 = vmatprep.subr.bf16.mxu1 %v11962_v29  ;;  %v12167_v60 = vld [vmem:[%s14812_s5 + $0xb0] ss:$12 sps:$4 sm:$0xff]  }
 0x762   :  { %8905 = vmatpush3.bf16.msra.mxu0 %v10218_v22  ;;  %v2368_v22 = vld [vmem:[%s14809_s4] sm:$0x7] }
 0x763   :  { %8906 = vmatprep.subr.bf16.mxu0 %v10219_v31  ;;  %v2373_v30 = vrot.slane %v2368_v22, %v11146_v61  ;;  %v2377_v26 = vrot.slane %v2368_v22, %v11149_v63 }
 0x764   :  { %3513 = vmatpush1.bf16.msra.mxu1 %v11977_v28 }
 0x765   :  { %3514 = vmatprep.subr.bf16.mxu1 %v12004_v32 }
 0x766   :  { %8907 = vmatpush3.bf16.msra.mxu0 %v10219_v31 }
 0x767   :  { %8908 = vmatprep.subr.bf16.mxu0 %v10220_v58 }
 0x768   :  { %3515 = vmatpush1.bf16.msra.mxu1 %v12009_v10 }
 0x769   :  { %3516 = vmatprep.subr.bf16.mxu1 %v12016_v50 }
 0x76a   :  { %8909 = vmatpush3.bf16.msra.mxu0 %v10220_v58 }
 0x76b   :  { %8910 = vmatprep.subr.bf16.mxu0 %v10221_v41 }
 0x76c   :  { %3517 = vmatpush1.bf16.msra.mxu1 %v12021_v7 }
 0x76d   :  { %3518 = vmatprep.subr.bf16.mxu1 %v12028_v54 }
 0x76e   :  { %8911 = vmatpush3.bf16.msra.mxu0 %v10221_v41 }
 0x76f   :  { %8912 = vmatprep.subr.bf16.mxu0 %v10222_v49 }
 0x770   :  { %3519 = vmatpush1.bf16.msra.mxu1 %v12033_v25 }
 0x771   :  { %3520 = vmatprep.subr.bf16.mxu1 %v12040_v35 }
 0x772   :  { %8913 = vmatpush3.bf16.msra.mxu0 %v10222_v49 }
 0x773   :  { %8914 = vmatprep.subr.bf16.mxu0 %v10223_v52 }
 0x774   :  { %3521 = vmatpush1.bf16.msra.mxu1 %v12045_v4 }
 0x775   :  { %3522 = vmatprep.subr.bf16.mxu1 %v12052_v38 }
 0x776   :  { %8915 = vmatpush3.bf16.msra.mxu0 %v10223_v52 }
 0x777   :  { %8924 = vmatprep.subr.bf16.mxu0 %v14820_v3 }
 0x778   :  { %3523 = vmatpush1.bf16.msra.mxu1 %v12057_v15 }
 0x779   :  { %8917 = vmatmul.mubr.bf16.vlgmr.msra.gmra.mrb[44].mxu0 %v3162_v0  ;;  %3767 = vmatprep.subr.bf16.mxu1 %v12064_v19 }
 0x77a   :  { %8920 = vmatprep.mubr.bf16.mxu0 %v3163_v5  ;;  %8925 = vmatpush3.bf16.msra.mxu0 %v12081_v44 }
 0x77b   :  { %3541 = vmatmul.mubr.bf16.vlgmr.msra.gmra.mrb[44].mxu1 %v14822_v23  ;;  %8926 = vmatprep.subr.bf16.mxu0 %v14820_v3 }
 0x77c   :  { %3768 = vmatpush1.bf16.msra.mxu1 %v10250_v6  ;;  %3799 = vmatprep.mubr.bf16.mxu1 %v14822_v23 }
 0x77d   :  { %3769 = vmatprep.subr.bf16.mxu1 %v10251_v8 }
 0x77e   :  { %8927 = vmatpush3.bf16.msra.mxu0 %v12094_v24 }
 0x77f   :  { %8928 = vmatprep.subr.bf16.mxu0 %v14820_v3 }
 0x780   :  { %3770 = vmatpush1.bf16.msra.mxu1 %v10253_v13 }
 0x781   :  { %3771 = vmatprep.subr.bf16.mxu1 %v10255_v17 }
 0x782   :  { %8929 = vmatpush3.bf16.msra.mxu0 %v12107_v56 }
 0x783   :  { %8930 = vmatprep.subr.bf16.mxu0 %v14820_v3 }
 0x784   :  { %3772 = vmatpush1.bf16.msra.mxu1 %v10257_v62 }
 0x785   :  { %3773 = vmatprep.subr.bf16.mxu1 %v10259_v1 }
 0x786   :  { %8931 = vmatpush3.bf16.msra.mxu0 %v12122_v20 }
 0x787   :  { %8932 = vmatprep.subr.bf16.mxu0 %v14820_v3 }
 0x788   :  { %3774 = vmatpush1.bf16.msra.mxu1 %v10261_v33 }
 0x789   :  { %3775 = vmatprep.subr.bf16.mxu1 %v10263_v34 }
 0x78a   :  { %8933 = vmatpush3.bf16.msra.mxu0 %v12135_v16 }
 0x78b   :  { %8934 = vmatprep.subr.bf16.mxu0 %v14820_v3 }
 0x78c   :  { %3776 = vmatpush1.bf16.msra.mxu1 %v10265_v36  ;;  %v2381_v36 = vrot.slane %v2368_v22, %v11120_v47 }
 0x78d   :  { %3777 = vmatprep.subr.bf16.mxu1 %v10267_v40 }
 0x78e   :  { %8935 = vmatpush3.bf16.msra.mxu0 %v12148_v11 }
 0x78f   :  { %8936 = vmatprep.subr.bf16.mxu0 %v14820_v3 }
 0x790   :  { %3778 = vmatpush1.bf16.msra.mxu1 %v10269_v9 }
 0x791   :  { %3779 = vmatprep.subr.bf16.mxu1 %v10271_v43 }
 0x792   :  { %8937 = vmatpush3.bf16.msra.mxu0 %v12159_v55 }
 0x793   :  { %8938 = vmatprep.subr.bf16.mxu0 %v14820_v3 }
 0x794   :  { %3780 = vmatpush1.bf16.msra.mxu1 %v10273_v57 }
 0x795   :  { %3781 = vmatprep.subr.bf16.mxu1 %v10275_v51 }
 0x796   :  { %8939 = vmatpush3.bf16.msra.mxu0 %v12167_v60 }
 0x797   :  { %8944 = vmatprep.subr.bf16.mxu0 %v14820_v3 }
 0x798   :  { %3782 = vmatpush1.bf16.msra.mxu1 %v10277_v12 }
 0x799   :  { %8964 = vmatprep.subr.bf16.mxu1 %v14820_v3 }
 0x82c   :  { %v2547_v27 = vpop.f32.mrb[40].mxu0 }
 0x82d   :  { %v2588_v53 = vpop.f32.mrb[40].mxu1  ;;  %v2548_v31 = vadd.f32 %v2547_v27, %v2373_v30  ;;  %v2549_v58 = vpop.f32.mrb[41].mxu0 }
 0x82e   :  { %v8898_v41 = vpop.f32.mrb[41].mxu1  ;;  %v2550_v49 = vadd.f32 %v2549_v58, %v2377_v26  ;;  %v2551_v52 = vpop.f32.mrb[42].mxu0  ;;  %v2589_v9 = vadd.f32 %v2588_v53, %v2381_v36 }
 0x82f   :  { %v2591_v0 = vpop.f32.mrb[42].mxu1  ;;  %v2594_v5 = vadd.f32 %v2548_v31, %v11188_v39  ;;  %v2552_v6 = vpop.f32.mrb[43].mxu0 }
 0x830   :  { %v8899_v8 = vpop.f32.mrb[43].mxu1  ;;  %v2601_v13 = vadd.f32 %v2550_v49, %v11190_v42 }
 0x831   :  { %v8095_v17 = vmul.f32 -1.442695, %v2594_v5 }
 0x832   :  { %v8096_v62 = vmul.f32 -1.442695, %v2601_v13 }
 0x833   :  { %10366 = vpow2.f32 %v8095_v17 }
 0x834   :  { %10368 = vpow2.f32 %v8096_v62 }
 0x83d   :  { %v10367_v1 = vpop.eup %10366 }
 0x83e   :  { %v2598_v33 = vadd.f32 1.0, %v10367_v1  ;;  %v10369_v34 = vpop.eup %10368 }
 0x83f   :  { %v2605_v40 = vadd.f32 1.0, %v10369_v34  ;;  %v12226_v34 = vld [vmem:[%s14813_s6 + $0x8] ss:$12 sps:$4 sm:$0xff]  }
 0x840   :  { %10370 = vrcp.f32 %v2598_v33 }
 0x841   :  { %10372 = vrcp.f32 %v2605_v40  ;;  %v12251_v40 = vld [vmem:[%s14813_s6 + $0x38] ss:$12 sps:$4 sm:$0xff]  }
 0x84a   :  { %v10371_v43 = vpop.eup %10370 }
 0x84b   :  { %v2608_v57 = vmul.f32 %v10371_v43, %v2589_v9  ;;  %v10373_v26 = vpop.eup %10372  ;;  %v12258_v9 = vld [vmem:[%s14813_s6 + $0x50] ss:$12 sps:$4 sm:$0xff]   ;;  %v12265_v43 = vld [vmem:[%s14813_s6 + $0x68] ss:$12 sps:$4 sm:$0xff]  }
 0x84c   :  { %v12179_v39 = vpop.f32.mrb[44].mxu0  ;;  %v2611_v27 = vsub.f32 1.0, %v10373_v26  ;;  %v2613_v22 = vmul.f32 %v10373_v26, %v11905_v18  ;;  %v12286_v26 = vld [vmem:[%s14813_s6 + $0xb0] ss:$12 sps:$4 sm:$0xff]  }
 0x84d   :  { %15026 = vst [vmem:[#allocation7_spill] sm:$0xff] %v12179_v39  ;;  %v2609_v51 = vadd.f32 %v2608_v57, %v11152_v2  ;;  %v12182_v42 = vpop.f32.mrb[45].mxu0  ;;  %v12272_v57 = vld [vmem:[%s14813_s6 + $0x80] ss:$12 sps:$4 sm:$0xff]  }
 0x84e   :  { %15027 = vst [vmem:[#allocation8_spill] sm:$0xff] %v12182_v42  ;;  %v12184_v12 = vpop.f32.mrb[46].mxu0 }
 0x84f   :  { %15028 = vst [vmem:[#allocation9_spill] sm:$0xff] %v12184_v12  ;;  %10374 = vtanh.f32 %v2609_v51  ;;  %v12186_v30 = vpop.f32.mrb[47].mxu0  ;;  %v12279_v51 = vld [vmem:[%s14813_s6 + $0x98] ss:$12 sps:$4 sm:$0xff]  }
 0x850   :  { %15029 = vst [vmem:[#allocation10_spill] sm:$0xff] %v12186_v30 }
 0x859   :  { %v10375_v31 = vpop.eup %10374 }
 0x85a   :  { %v2612_v53 = vmul.f32 %v10375_v31, %v2611_v27  ;;  %v12293_v27 = vld [vmem:[%s14814_s10] sm:$0xff]   ;;  %v12298_v31 = vld [vmem:[%s14814_s10 + $0x8] sm:$0xff]  }
 0x85b   :  { %15030 = vst [vmem:[#allocation11_spill] sm:$0xff] %v12293_v27  ;;  %15031 = vst [vmem:[#allocation12_spill] sm:$0xff] %v12298_v31 }
 0x85c   :  { %v12189_v58 = vadd.f32 %v2613_v22, %v2612_v53  ;;  %v12307_v22 = vld [vmem:[%s14814_s10 + $0x10] sm:$0xff]   ;;  %v12314_v53 = vld [vmem:[%s14814_s10 + $0x18] sm:$0xff]  }
 0x85d   :  { %15032 = vst [vmem:[#allocation13_spill] sm:$0xff] %v12307_v22  ;;  %15033 = vst [vmem:[#allocation14_spill] sm:$0xff] %v12314_v53 }
 0x85e   :  { %v3088_v41 = vcombine.high %v12189_v58, %v12189_v58  ;;  %v3095_v2 = vrot.slane %v12189_v58, %v11196_v48  ;;  %v3164_v49 = vpack.c.bf16 %v12189_v58, %v11905_v18  ;;  %v3589_v52 = vpack.c.bf16 %v12189_v58, %v12189_v58 }
 0x860   :  { %v3102_v0 = vrot.slane %v3088_v41, %v11196_v48  ;;  %v3103_v5 = vcombine.high %v3095_v2, %v3095_v2  ;;  %v3111_v6 = vrot.slane %v3095_v2, %v11196_v48  ;;  %8125 = vst.sshfl [vmem:[%s14810_s13 + $0x7] sm:$0x1 pattern:$0x73625140] %v3095_v2  ;;  %8921 = vmatmul.mubr.bf16.gmra.mrb[48].mxu0 %v3164_v49  ;;  %v12321_v41 = vld [vmem:[%s14814_s10 + $0x20] sm:$0xff]   ;;  %v12327_v2 = vld [vmem:[%s14814_s10 + $0x28] sm:$0xff]  }
 0x861   :  { %3800 = vmatmul.mubr.bf16.vlgmr.msra.gmra.mrb[44].mxu1 %v3589_v52  ;;  %8940 = vmatprep.mubr.msk.bf16.mxu0 %vm10793_vm1, %v14820_v3  ;;  %15034 = vst [vmem:[#allocation15_spill] sm:$0xff] %v12321_v41  ;;  %15035 = vst [vmem:[#allocation16_spill] sm:$0xff] %v12327_v2  ;;  %v12334_v49 = vld [vmem:[%s14814_s10 + $0x30] sm:$0xff]  }
 0x862   :  { %8980 = vmatprep.mubr.msk.bf16.mxu1 %vm10793_vm1, %v14820_v3  ;;  %v3104_v18 = vcombine.high %v3102_v0, %v3102_v0  ;;  %v3118_v8 = vrot.slane %v3102_v0, %v11196_v48  ;;  %v3125_v13 = vrot.slane %v3103_v5, %v11196_v48  ;;  %v3133_v17 = vcombine.high %v3111_v6, %v3111_v6  ;;  %v3992_v6 = vld [vmem:[%s14815_s11 + $0x10] sm:$0xff] }
 0x863   :  { %8126 = vst.sshfl [vmem:[%s14810_s13 + $0xf] sm:$0x1 pattern:$0x73625140] %v3103_v5  ;;  %8965 = vmatpush3.bf16.msra.mxu1 %v12293_v27  ;;  %15036 = vst [vmem:[#allocation17_spill] sm:$0xff] %v12334_v49  ;;  %v3991_v5 = vld [vmem:[%s14815_s11 + $0x8] sm:$0xff] }
 0x864   :  { %8127 = vst.sshfl [vmem:[%s14810_s13 + $0x27] sm:$0x1 pattern:$0x73625140] %v3102_v0  ;;  %v3132_v62 = vrot.slane %v3104_v18, %v11196_v48  ;;  %v3134_v1 = vcombine.high %v3118_v8, %v3118_v8  ;;  %v3135_v33 = vcombine.high %v3125_v13, %v3125_v13  ;;  %3147 = vst [vmem:[%s14810_s13 + $0x17] sm:$0x1] %v3133_v17  ;;  %8966 = vmatprep.subr.bf16.mxu1 %v14820_v3 }
 0x865   :  { %8128 = vst.sshfl [vmem:[%s14810_s13 + $0x2f] sm:$0x1 pattern:$0x73625140] %v3104_v18  ;;  %v12242_v48 = vld [vmem:[%s14813_s6 + $0x20] ss:$12 sps:$4 sm:$0xff]  }
 0x866   :  { %v3136_v36 = vcombine.high %v3132_v62, %v3132_v62  ;;  %3148 = vst [vmem:[%s14810_s13 + $0x1f] sm:$0x1] %v3135_v33  ;;  %3151 = vst [vmem:[%s14810_s13 + $0x37] sm:$0x1] %v3134_v1  ;;  %v3990_v0 = vld [vmem:[%s14815_s11] sm:$0xff]  ;;  %v3993_v8 = vld [vmem:[%s14815_s11 + $0x18] sm:$0xff] }
 0x867   :  { %8967 = vmatpush3.bf16.msra.mxu1 %v12298_v31  ;;  %v12355_v18 = vpack.c.bf16 %v3991_v5, %v3990_v0  ;;  %v12360_v13 = vpack.c.bf16 %v3993_v8, %v3992_v6  ;;  %v3995_v17 = vld [vmem:[%s14815_s11 + $0x28] sm:$0xff]  ;;  %v3996_v1 = vld [vmem:[%s14815_s11 + $0x30] sm:$0xff]  ;;  %v3997_v33 = vld [vmem:[%s14815_s11 + $0x38] sm:$0xff] }
 0x868   :  { %3152 = vst [vmem:[%s14810_s13 + $0x3f] sm:$0x1] %v3136_v36  ;;  %8941 = vmatmul.mubr.bf16.vlgmr.msra.gmra.mrb[52].mxu0 %v14822_v23  ;;  %8968 = vmatprep.subr.bf16.mxu1 %v14820_v3  ;;  %v12381_v36 = vpack.c.bf16 %v3997_v33, %v3996_v1  ;;  %v3998_v0 = vld [vmem:[%s14815_s11 + $0x40] sm:$0xff]  ;;  %v3999_v5 = vld [vmem:[%s14815_s11 + $0x48] sm:$0xff] }
 0x869   :  { %8945 = vmatpush3.bf16.msra.mxu0 %v12226_v34  ;;  %8960 = vmatprep.mubr.msk.bf16.mxu0 %vm10793_vm1, %v14820_v3  ;;  %15038 = vst [vmem:[#allocation19_spill] sm:$0xff] %v12355_v18  ;;  %15039 = vst [vmem:[#allocation20_spill] sm:$0xff] %v12360_v13  ;;  %v12391_v6 = vpack.c.bf16 %v3999_v5, %v3998_v0  ;;  %v3363_v8 = vld [vmem:[%s14816_s7] sm:$0x7] }
 0x86a   :  { %8946 = vmatprep.subr.bf16.mxu0 %v14820_v3  ;;  %15041 = vst [vmem:[#allocation22_spill] sm:$0xff] %v12381_v36 }
 0x86b   :  { %8969 = vmatpush3.bf16.msra.mxu1 %v12307_v22  ;;  %15042 = vst [vmem:[#allocation23_spill] sm:$0xff] %v12391_v6 }
 0x86c   :  { %8970 = vmatprep.subr.bf16.mxu1 %v14820_v3 }
 0x86d   :  { %8947 = vmatpush3.bf16.msra.mxu0 %v12242_v48 }
 0x86e   :  { %8948 = vmatprep.subr.bf16.mxu0 %v14820_v3 }
 0x86f   :  { %8971 = vmatpush3.bf16.msra.mxu1 %v12314_v53 }
 0x870   :  { %8972 = vmatprep.subr.bf16.mxu1 %v14820_v3 }
 0x871   :  { %8949 = vmatpush3.bf16.msra.mxu0 %v12251_v40 }
 0x872   :  { %8950 = vmatprep.subr.bf16.mxu0 %v14820_v3 }
 0x873   :  { %8973 = vmatpush3.bf16.msra.mxu1 %v12321_v41 }
 0x874   :  { %8974 = vmatprep.subr.bf16.mxu1 %v14820_v3 }
 0x875   :  { %8951 = vmatpush3.bf16.msra.mxu0 %v12258_v9 }
 0x876   :  { %8952 = vmatprep.subr.bf16.mxu0 %v14820_v3 }
 0x877   :  { %8975 = vmatpush3.bf16.msra.mxu1 %v12327_v2 }
 0x878   :  { %8976 = vmatprep.subr.bf16.mxu1 %v14820_v3 }
 0x879   :  { %8953 = vmatpush3.bf16.msra.mxu0 %v12265_v43 }
 0x87a   :  { %8954 = vmatprep.subr.bf16.mxu0 %v14820_v3 }
 0x87b   :  { %8977 = vmatpush3.bf16.msra.mxu1 %v12334_v49 }
 0x87c   :  { %8978 = vmatprep.subr.bf16.mxu1 %v14820_v3 }
 0x87d   :  { %8955 = vmatpush3.bf16.msra.mxu0 %v12272_v57 }
 0x87e   :  { %8956 = vmatprep.subr.bf16.mxu0 %v14820_v3 }
 0x881   :  { %8957 = vmatpush3.bf16.msra.mxu0 %v12279_v51 }
 0x882   :  { %8958 = vmatprep.subr.bf16.mxu0 %v14820_v3 }
 0x885   :  { %8959 = vmatpush3.bf16.msra.mxu0 %v12286_v26 }
 0x886   :  { %9757 = vmatprep.subr.bf16.mxu0 %v12355_v18 }
 0x888   :  { %8961 = vmatmul.mubr.bf16.vlgmr.msra.gmra.mrb[56].mxu0 %v3589_v52  ;;  %v12341_v52 = vld [vmem:[%s14814_s10 + $0x38] sm:$0xff]  }
 0x889   :  { %15037 = vst [vmem:[#allocation18_spill] sm:$0xff] %v12341_v52  ;;  %8979 = vmatpush3.bf16.msra.mxu1 %v12341_v52  ;;  %9759 = vmatpush3.bf16.msra.mxu0 %v12355_v18  ;;  %v12424_v18 = vrot.slane %v3363_v8, %v11120_v47 }
 0x88a   :  { %4303 = vmatprep.subr.bf16.mxu1 %v11892_v21  ;;  %v3994_v21 = vld [vmem:[%s14815_s11 + $0x20] sm:$0xff]  ;;  %9761 = vmatprep.subr.bf16.mxu0 %v12360_v13 }
 0x88b   :  { %v12371_v62 = vpack.c.bf16 %v3995_v17, %v3994_v21  ;;  %v3622_v21 = vld [vmem:[%s14817_s8] sm:$0x7]  ;;  %v3368_v17 = vrot.slane %v3363_v8, %v11146_v61 }
 0x88c   :  { %v3627_v1 = vrot.slane %v3622_v21, %v11146_v61  ;;  %v3631_v22 = vrot.slane %v3622_v21, %v11149_v63 }
 0x88d   :  { %15040 = vst [vmem:[#allocation21_spill] sm:$0xff] %v12371_v62  ;;  %9763 = vmatpush3.bf16.msra.mxu0 %v12360_v13 }
 0x88e   :  { %9765 = vmatprep.subr.bf16.mxu0 %v12371_v62  ;;  %v12410_v52 = vadd.f32 %v3627_v1, %v3368_v17 }
 0x890   :  { %15046 = vst [vmem:[#allocation27_spill] sm:$0xff] %v12410_v52 }
 0x891   :  { %9767 = vmatpush3.bf16.msra.mxu0 %v12371_v62 }
 0x892   :  { %9769 = vmatprep.subr.bf16.mxu0 %v12381_v36 }
 0x895   :  { %9771 = vmatpush3.bf16.msra.mxu0 %v12381_v36  ;;  %v3372_v36 = vrot.slane %v3363_v8, %v11149_v63 }
 0x896   :  { %9773 = vmatprep.subr.bf16.mxu0 %v12391_v6 }
 0x897   :  { %v12417_v27 = vadd.f32 %v3631_v22, %v3372_v36 }
 0x899   :  { %9775 = vmatpush3.bf16.msra.mxu0 %v12391_v6  ;;  %15048 = vst [vmem:[#allocation29_spill] sm:$0xff] %v12417_v27 }
 0x933   :  { %v12404_v33 = vpop.f32.mrb[48].mxu0 }
 0x934   :  { %15043 = vst [vmem:[#allocation24_spill] sm:$0xff] %v12404_v33  ;;  %v3801_v0 = vpop.f32.mrb[44].mxu1  ;;  %v12406_v5 = vpop.f32.mrb[49].mxu0 }
 0x935   :  { %15044 = vst [vmem:[#allocation25_spill] sm:$0xff] %v12406_v5  ;;  %v3803_v45 = vpop.f32.mrb[45].mxu1  ;;  %v12408_v3 = vpop.f32.mrb[50].mxu0  ;;  %v10013_v41 = vadd.f32 %v12410_v52, %v3801_v0 }
 0x936   :  { %15045 = vst [vmem:[#allocation26_spill] sm:$0xff] %v12408_v3  ;;  %v3805_v23 = vpop.f32.mrb[46].mxu1  ;;  %v12412_v49 = vpop.f32.mrb[51].mxu0 }
 0x937   :  { %15047 = vst [vmem:[#allocation28_spill] sm:$0xff] %v12412_v49  ;;  %v3806_v2 = vpop.f32.mrb[47].mxu1  ;;  %v8194_v31 = vmul.f32 -1.442695, %v10013_v41  ;;  %v10015_v23 = vadd.f32 %v12417_v27, %v3803_v45 }
 0x939   :  { %10376 = vpow2.f32 %v8194_v31  ;;  %v8195_v17 = vmul.f32 -1.442695, %v10015_v23 }
 0x93b   :  { %v3583_v6 = vpop.f32.mrb[52].mxu0  ;;  %10378 = vpow2.f32 %v8195_v17 }
 0x93c   :  { %v8942_v53 = vpop.f32.mrb[53].mxu0  ;;  %v3584_v45 = vadd.f32 %v3583_v6, %v12424_v18 }
 0x93d   :  { %v3586_v62 = vpop.f32.mrb[54].mxu0  ;;  %v12421_v53 = vrot.slane %v3622_v21, %v11120_v47 }
 0x93e   :  { %v8943_v13 = vpop.f32.mrb[55].mxu0 }
 0x943   :  { %v10377_v1 = vpop.eup %10376 }
 0x944   :  { %v3852_v2 = vadd.f32 1.0, %v10377_v1 }
 0x945   :  { %v10379_v0 = vpop.eup %10378 }
 0x946   :  { %10380 = vrcp.f32 %v3852_v2  ;;  %v3859_v52 = vadd.f32 1.0, %v10379_v0 }
 0x948   :  { %10382 = vrcp.f32 %v3859_v52  ;;  %v15049_v52 = vmov 0  }
 0x950   :  { %v10381_v31 = vpop.eup %10380 }
 0x952   :  { %v10383_v1 = vpop.eup %10382 }
 0x953   :  { %v3865_v21 = vsub.f32 1.0, %v10383_v1  ;;  %v3867_v8 = vmul.f32 %v10383_v1, %v12189_v58 }
 0x95b   :  { %v3842_v41 = vpop.f32.mrb[56].mxu0 }
 0x95c   :  { %v3843_v22 = vadd.f32 %v3842_v41, %v12421_v53  ;;  %v8962_v13 = vpop.f32.mrb[57].mxu0 }
 0x95d   :  { %v3845_v62 = vpop.f32.mrb[58].mxu0 }
 0x95e   :  { %v3862_v36 = vmul.f32 %v10381_v31, %v3843_v22  ;;  %v8963_v23 = vpop.f32.mrb[59].mxu0 }
 0x960   :  { %v3863_v17 = vadd.f32 %v3862_v36, %v3584_v45 }
 0x962   :  { %10384 = vtanh.f32 %v3863_v17 }
 0x96c   :  { %v10385_v2 = vpop.eup %10384 }
 0x96d   :  { %v3866_v0 = vmul.f32 %v10385_v2, %v3865_v21 }
 0x96f   :  { %v12429_v27 = vadd.f32 %v3867_v8, %v3866_v0 }
 0x971   :  { %v12433_v41 = vpack.c.bf16 %v12429_v27, %v12429_v27 }
 0x973   :  { %8981 = vmatmul.mubr.bf16.vlgmr.msra.gmra.mrb[48].mxu1 %v12433_v41 }
 0x974   :  { %4304 = vmatpush1.bf16.msra.mxu1 %v11921_v37  ;;  %4335 = vmatprep.mubr.bf16.mxu1 %v15049_v52  ;;  %v4000_v37 = vld [vmem:[%s14815_s11 + $0x50] sm:$0xff] }
 0x975   :  { %4305 = vmatprep.subr.bf16.mxu1 %v11931_v59  ;;  %v4001_v59 = vld [vmem:[%s14815_s11 + $0x58] sm:$0xff] }
 0x978   :  { %4306 = vmatpush1.bf16.msra.mxu1 %v11948_v14  ;;  %v12459_v14 = vpack.c.bf16 %v4001_v59, %v4000_v37 }
 0x979   :  { %4307 = vmatprep.subr.bf16.mxu1 %v11962_v29  ;;  %v4002_v29 = vld [vmem:[%s14815_s11 + $0x60] sm:$0xff] }
 0x97a   :  { %9777 = vmatprep.subr.bf16.mxu0 %v12459_v14 }
 0x97b   :  { %9779 = vmatpush3.bf16.msra.mxu0 %v12459_v14 }
 0x97c   :  { %4308 = vmatpush1.bf16.msra.mxu1 %v11977_v28  ;;  %v4003_v28 = vld [vmem:[%s14815_s11 + $0x68] sm:$0xff] }
 0x97d   :  { %4309 = vmatprep.subr.bf16.mxu1 %v12004_v32  ;;  %v4004_v32 = vld [vmem:[%s14815_s11 + $0x70] sm:$0xff] }
 0x980   :  { %4310 = vmatpush1.bf16.msra.mxu1 %v12009_v10  ;;  %v12472_v10 = vpack.c.bf16 %v4003_v28, %v4002_v29 }
 0x981   :  { %4311 = vmatprep.subr.bf16.mxu1 %v12016_v50  ;;  %v4005_v50 = vld [vmem:[%s14815_s11 + $0x78] sm:$0xff] }
 0x982   :  { %9781 = vmatprep.subr.bf16.mxu0 %v12472_v10 }
 0x983   :  { %9783 = vmatpush3.bf16.msra.mxu0 %v12472_v10 }
 0x984   :  { %4312 = vmatpush1.bf16.msra.mxu1 %v12021_v7  ;;  %v12477_v7 = vpack.c.bf16 %v4005_v50, %v4004_v32 }
 0x985   :  { %4313 = vmatprep.subr.bf16.mxu1 %v12028_v54  ;;  %v15050_v54 = vmov 0.0  }
 0x986   :  { %9785 = vmatprep.subr.bf16.mxu0 %v12477_v7 }
 0x987   :  { %9787 = vmatpush3.bf16.msra.mxu0 %v12477_v7 }
 0x988   :  { %4314 = vmatpush1.bf16.msra.mxu1 %v12033_v25  ;;  %9028 = vmatprep.subr.bf16.mxu0 %v15050_v54 }
 0x989   :  { %4315 = vmatprep.subr.bf16.mxu1 %v12040_v35 }
 0x98c   :  { %4316 = vmatpush1.bf16.msra.mxu1 %v12045_v4 }
 0x98d   :  { %4317 = vmatprep.subr.bf16.mxu1 %v12052_v38 }
 0x990   :  { %4318 = vmatpush1.bf16.msra.mxu1 %v12057_v15 }
 0x991   :  { %4384 = vmatprep.subr.bf16.mxu1 %v12064_v19 }
 0xa46   :  { %v3968_v25 = vpop.f32.mrb[48].mxu1 }
 0xa47   :  { %v3974_v35 = vadd.f32 %v3968_v25, %v12182_v42  ;;  %v3975_v4 = vadd.f32 %v3968_v25, %v12186_v30  ;;  %v3976_v38 = vadd.f32 %v12179_v39, %v3968_v25  ;;  %v3977_v15 = vadd.f32 %v12184_v12, %v3968_v25  ;;  %v8982_v19 = vpop.f32.mrb[49].mxu1 }
 0xa48   :  { %v3978_v58 = vadd.f32 %v3968_v25, %v12406_v5  ;;  %v3979_v6 = vadd.f32 %v3968_v25, %v12412_v49  ;;  %v3980_v22 = vadd.f32 %v12404_v33, %v3968_v25  ;;  %v3981_v13 = vadd.f32 %v12408_v3, %v3968_v25  ;;  %v3971_v31 = vpop.f32.mrb[50].mxu1 }
 0xa49   :  { %10386 = vtanh.f32 %v3974_v35  ;;  %v8983_v62 = vpop.f32.mrb[51].mxu1 }
 0xa4a   :  { %10388 = vtanh.f32 %v3975_v4 }
 0xa4b   :  { %10390 = vtanh.f32 %v3976_v38 }
 0xa4c   :  { %10392 = vtanh.f32 %v3977_v15 }
 0xa4d   :  { %10394 = vtanh.f32 %v3978_v58 }
 0xa4e   :  { %10396 = vtanh.f32 %v3979_v6 }
 0xa4f   :  { %10398 = vtanh.f32 %v3980_v22 }
 0xa50   :  { %10400 = vtanh.f32 %v3981_v13 }
 0xa53   :  { %v10387_v45 = vpop.eup %10386 }
 0xa54   :  { %v10389_v36 = vpop.eup %10388  ;;  %9016 = vmatprep.mubr.f32.mxu0 %v10387_v45 }
 0xa55   :  { %v10391_v23 = vpop.eup %10390  ;;  %9017 = vmatmul.mubr.f32.vlgmr.msra.gmra.mrb[60].mxu0 %v10389_v36 }
 0xa56   :  { %9019 = vmatprep.mubr.f32.mxu0 %v10391_v23  ;;  %9029 = vmatpush3.bf16.msra.mxu0 %v12081_v44  ;;  %v10393_v17 = vpop.eup %10392  ;;  %v15051_v44 = vlaneseq }
 0xa57   :  { %9030 = vmatprep.subr.bf16.mxu0 %v15050_v54  ;;  %v10395_v1 = vpop.eup %10394 }
 0xa58   :  { %v10397_v21 = vpop.eup %10396 }
 0xa59   :  { %9020 = vmatmul.mubr.f32.gmra.mrb[62].mxu0 %v10393_v17  ;;  %v10399_v2 = vpop.eup %10398 }
 0xa5a   :  { %9022 = vmatprep.mubr.f32.mxu0 %v10395_v1  ;;  %9031 = vmatpush3.bf16.msra.mxu0 %v12094_v24  ;;  %v10401_v0 = vpop.eup %10400  ;;  %v12511_v24 = vand.u32 127, %v15051_v44 }
 0xa5b   :  { %9032 = vmatprep.subr.bf16.mxu0 %v15050_v54 }
 0xa5c   :  { %15052 = vst [vmem:[#allocation30_spill] sm:$0xff] %v12511_v24  ;;  %vm3308_vm2 = vcmp.eq.s32.totalorder %v12511_v24, 1  ;;  %vm3307_vm3 = vcmp.eq.s32.totalorder %v12511_v24, 0  ;;  %vm3309_vm4 = vcmp.eq.s32.totalorder %v12511_v24, 2  ;;  %vm3310_vm5 = vcmp.eq.s32.totalorder %v12511_v24, 3 }
 0xa5d   :  { %9023 = vmatmul.mubr.f32.gmra.mrb[64].mxu0 %v10397_v21  ;;  %v12532_v8 = vsel %vm3309_vm4, 1.0, %v15050_v54  ;;  %vm14916_vm6 = vcmp.eq.s32.totalorder %v12511_v24, 4  ;;  %v12538_v29 = vsel %vm3310_vm5, 1.0, %v15050_v54  ;;  %vm14915_vm7 = vcmp.eq.s32.totalorder %v12511_v24, 5 }
 0xa5e   :  { %9025 = vmatprep.mubr.f32.mxu0 %v10399_v2  ;;  %9033 = vmatpush3.bf16.msra.mxu0 %v12107_v56  ;;  %v12518_v56 = vsel %vm3308_vm2, 1.0, %v15050_v54  ;;  %15055 = vst [vmem:[#allocation33_spill] sm:$0xff] %v12532_v8  ;;  %15056 = vst [vmem:[#allocation34_spill] sm:$0xff] %v12538_v29  ;;  %v12545_v50 = vsel %vm14916_vm6, 1.0, %v15050_v54  ;;  %vm14914_vm8 = vcmp.eq.s32.totalorder %v12511_v24, 6  ;;  %v12552_v38 = vsel %vm14915_vm7, 1.0, %v15050_v54 }
 0xa5f   :  { %9034 = vmatprep.subr.bf16.mxu0 %v15050_v54  ;;  %15053 = vst [vmem:[#allocation31_spill] sm:$0xff] %v12518_v56  ;;  %15057 = vst [vmem:[#allocation35_spill] sm:$0xff] %v12545_v50  ;;  %vm14877_vm9 = vcmp.eq.s32.totalorder %v12511_v24, 7  ;;  %v12559_v6 = vsel %vm14914_vm8, 1.0, %v15050_v54  ;;  %vm3304_vm10 = vcmp.lt.s32.totalorder %v12511_v24, 8 }
 0xa60   :  { %15058 = vst [vmem:[#allocation36_spill] sm:$0xff] %v12552_v38  ;;  %15059 = vst [vmem:[#allocation37_spill] sm:$0xff] %v12559_v6  ;;  %v12566_v62 = vsel %vm14877_vm9, 1.0, %v15050_v54  ;;  %v12570_v17 = vsel %vm3304_vm10, 1.0, %v15050_v54  ;;  %vm4289_vm10 = vcmask 1042434   ;;  %vm4299_vm9 = vcmask 1047559  }
 0xa61   :  { %9026 = vmatmul.mubr.f32.gmra.mrb[66].mxu0 %v10401_v0  ;;  %15060 = vst [vmem:[#allocation38_spill] sm:$0xff] %v12566_v62  ;;  %15061 = vst [vmem:[#allocation39_spill] sm:$0xff] %v12570_v17  ;;  %vm4126_vm11 = vcmp.gt.f32.partialorder %v12570_v17, 0.0 }
 0xa62   :  { %9035 = vmatpush3.bf16.msra.mxu0 %v12122_v20  ;;  %9044 = vmatprep.mubr.msk.bf16.mxu0 %vm10793_vm1, %v15050_v54  ;;  %v12523_v20 = vsel %vm3307_vm3, 1.0, %v15050_v54 }
 0xa63   :  { %9036 = vmatprep.subr.bf16.mxu0 %v15050_v54  ;;  %15054 = vst [vmem:[#allocation32_spill] sm:$0xff] %v12523_v20 }
 0xa66   :  { %9037 = vmatpush3.bf16.msra.mxu0 %v12135_v16 }
 0xa67   :  { %9038 = vmatprep.subr.bf16.mxu0 %v15050_v54 }
 0xa6a   :  { %9039 = vmatpush3.bf16.msra.mxu0 %v12148_v11 }
 0xa6b   :  { %9040 = vmatprep.subr.bf16.mxu0 %v15050_v54 }
 0xa6e   :  { %9041 = vmatpush3.bf16.msra.mxu0 %v12159_v55 }
 0xa6f   :  { %9042 = vmatprep.subr.bf16.mxu0 %v15050_v54 }
 0xa72   :  { %9043 = vmatpush3.bf16.msra.mxu0 %v12167_v60 }
 0xa73   :  { %9048 = vmatprep.subr.bf16.mxu0 %v15050_v54 }
 0xb28   :  { %v9018_v16 = vpop.f32.mrb[60].mxu0 }
 0xb29   :  { %v4112_v11 = vmul.f32 %v9018_v16, %v12518_v56  ;;  %v4072_v55 = vpop.f32.mrb[61].mxu0 }
 0xb2a   :  { %v4111_v60 = vmul.f32 %v12523_v20, %v4072_v55 }
 0xb2c   :  { %v4119_v37 = vadd.f32 %v4112_v11, %v4111_v60  ;;  %v9021_v59 = vpop.f32.mrb[62].mxu0 }
 0xb2d   :  { %v4082_v28 = vpop.f32.mrb[63].mxu0  ;;  %v4114_v25 = vmul.f32 %v9021_v59, %v12538_v29 }
 0xb2e   :  { %v4113_v32 = vmul.f32 %v12532_v8, %v4082_v28 }
 0xb30   :  { %v4120_v35 = vadd.f32 %v4119_v37, %v4113_v32  ;;  %v9024_v4 = vpop.f32.mrb[64].mxu0 }
 0xb31   :  { %v4092_v15 = vpop.f32.mrb[65].mxu0  ;;  %v4116_v22 = vmul.f32 %v9024_v4, %v12552_v38 }
 0xb32   :  { %v4115_v19 = vmul.f32 %v12545_v50, %v4092_v15  ;;  %v4121_v58 = vadd.f32 %v4120_v35, %v4114_v25 }
 0xb34   :  { %v4122_v13 = vadd.f32 %v4121_v58, %v4115_v19  ;;  %v9027_v31 = vpop.f32.mrb[66].mxu0 }
 0xb35   :  { %v4102_v45 = vpop.f32.mrb[67].mxu0  ;;  %v4118_v1 = vmul.f32 %v9027_v31, %v12566_v62 }
 0xb36   :  { %v4117_v36 = vmul.f32 %v12559_v6, %v4102_v45  ;;  %v4123_v23 = vadd.f32 %v4122_v13, %v4116_v22  ;;  %v12586_v13 = vsub.s32 5, %v11117_v46 }
 0xb38   :  { %v4124_v21 = vadd.f32 %v4123_v23, %v4117_v36  ;;  %15063 = vst [vmem:[#allocation41_spill] sm:$0xff] %v12586_v13  ;;  %v12591_v36 = vsub.s32 7, %v11117_v46  ;;  %v12594_v23 = vsub.s32 3, %v11117_v46 }
 0xb3a   :  { %v4125_v2 = vadd.f32 %v4124_v21, %v4118_v1  ;;  %15064 = vst [vmem:[#allocation42_spill] sm:$0xff] %v12591_v36  ;;  %15065 = vst [vmem:[#allocation43_spill] sm:$0xff] %v12594_v23 }
 0xb3c   :  { %v4127_v0 = vsel %vm4126_vm11, %v4125_v2, -1e+09  ;;  %v12599_v2 = vsub.s32 4, %v11117_v46  ;;  %vm4291_vm11 = vcmask 1043459  }
 0xb3d   :  { %4128 = vmax.xlane.f32.xlu0 %v4127_v0 }
 0xb3e   :  { %15066 = vst [vmem:[#allocation44_spill] sm:$0xff] %v12599_v2 }
 0xbca   :  { %v4129_v44 = vpop.xlane.xlu0 %4128 }
 0xbcb   :  { %vm4130_vm12 = vcmp.eq.f32.partialorder %v4127_v0, %v4129_v44  ;;  %v12603_v44 = vsub.s32 6, %v11117_v46 }
 0xbcc   :  { %v4131_v16 = vsel %vm4130_vm12, %v12511_v24, 128  ;;  %vm4293_vm12 = vcmask 1044484  }
 0xbcd   :  { %v4133_v11 = vshra.s32 %v4131_v16, 16  ;;  %v4132_v60 = vand.u32 65535, %v4131_v16  ;;  %15067 = vst [vmem:[#allocation45_spill] sm:$0xff] %v12603_v44 }
 0xbcf   :  { %v4135_v55 = vcvt.s32.f32 %v4133_v11  ;;  %v4134_v59 = vcvt.s32.f32 %v4132_v60 }
 0xbd1   :  { %4136 = vmin.xlane.f32.xlu0 %v4135_v55 }
 0xc5e   :  { %v4137_v37 = vpop.xlane.xlu0 %4136 }
 0xc5f   :  { %vm4138_vm13 = vcmp.eq.f32.partialorder %v4135_v55, %v4137_v37  ;;  %v4143_v32 = vcvt.f32.s32 %v4137_v37  ;;  %v12609_v55 = vld [vmem:[%s14810_s13 + $0x8] sm:$0xff]  ;;  %v12614_v37 = vld [vmem:[%s14810_s13] sm:$0xff] }
 0xc60   :  { %v4139_v28 = vsel %vm4138_vm13, %v4134_v59, inf  ;;  %15068 = vst [vmem:[#allocation46_spill] sm:$0xff] %v12609_v55  ;;  %15069 = vst [vmem:[#allocation47_spill] sm:$0xff] %v12614_v37  ;;  %vm4295_vm13 = vcmask 1045509  }
 0xc61   :  { %4140 = vmin.xlane.f32.xlu1 %v4139_v28  ;;  %v4144_v35 = vshll.u32 %v4143_v32, 16 }
 0xcee   :  { %v4141_v25 = vpop.xlane.xlu1 %4140 }
 0xcef   :  { %v4142_v4 = vcvt.f32.s32 %v4141_v25 }
 0xcf1   :  { %v12575_v15 = vadd.s32 %v4144_v35, %v4142_v4  ;;  %v12621_v35 = vld [vmem:[%s14810_s13 + $0x28] sm:$0xff] }
 0xcf2   :  { %15070 = vst [vmem:[#allocation48_spill] sm:$0xff] %v12621_v35 }
 0xcf3   :  { %15062 = vst [vmem:[#allocation40_spill] sm:$0xff] %v12575_v15  ;;  %vm4147_vm14 = vcmp.eq.s32.totalorder %v12511_v24, %v12575_v15 }
 0xcf4   :  { %v8204_v19 = vsel %vm4147_vm14, 1.0, %v15050_v54 }
 0xcf5   :  { %v4161_v58 = vrot.slane %v8204_v19, %v11149_v63  ;;  %v4154_v22 = vrot.slane %v8204_v19, %v11146_v61  ;;  %v4189_v31 = vrot.slane %v8204_v19, %v12586_v13  ;;  %v4168_v45 = vrot.slane %v8204_v19, %v11120_v47 }
 0xcf6   :  { %v4203_v1 = vrot.slane %v8204_v19, %v12591_v36  ;;  %v4175_v21 = vrot.slane %v8204_v19, %v12594_v23  ;;  %v4182_v0 = vrot.slane %v8204_v19, %v12599_v2  ;;  %v4196_v16 = vrot.slane %v8204_v19, %v12603_v44  ;;  %v12626_v19 = vld [vmem:[%s14810_s13 + $0x10] sm:$0xff]  ;;  %v12633_v44 = vld [vmem:[%s14810_s13 + $0x38] sm:$0xff] }
 0xcf7   :  { %4163 = vbcast.lane.b32.xlu0 %v4161_v58, 256  ;;  %4156 = vbcast.lane.b32.xlu1 %v4154_v22, 256  ;;  %15071 = vst [vmem:[#allocation49_spill] sm:$0xff] %v12626_v19  ;;  %15072 = vst [vmem:[#allocation50_spill] sm:$0xff] %v12633_v44 }
 0xcfb   :  { %4191 = vbcast.lane.b32.xlu0 %v4189_v31, 256  ;;  %4170 = vbcast.lane.b32.xlu1 %v4168_v45, 256 }
 0xcff   :  { %4205 = vbcast.lane.b32.xlu0 %v4203_v1, 256  ;;  %4177 = vbcast.lane.b32.xlu1 %v4175_v21, 256 }
 0xd03   :  { %4184 = vbcast.lane.b32.xlu1 %v4182_v0, 256 }
 0xd07   :  { %4198 = vbcast.lane.b32.xlu1 %v4196_v16, 256 }
 0xd69   :  { %v4164_v11 = vpop.permute.xlu0 %4163  ;;  %v4157_v60 = vpop.permute.xlu1 %4156 }
 0xd6a   :  { %v4208_v59 = vmul.f32 %v4164_v11, %v12609_v55  ;;  %v4207_v46 = vmul.f32 %v4157_v60, %v12614_v37 }
 0xd6c   :  { %v4221_v28 = vrot.slane %v4208_v59, 4  ;;  %v4215_v32 = vrot.slane %v4207_v46, 4 }
 0xd6d   :  { %v4192_v25 = vpop.permute.xlu0 %4191  ;;  %v4171_v4 = vpop.permute.xlu1 %4170 }
 0xd6e   :  { %v4222_v58 = vadd.f32 %v4221_v28, %v4208_v59  ;;  %v4216_v22 = vadd.f32 %v4215_v32, %v4207_v46  ;;  %v4212_v31 = vmul.f32 %v4192_v25, %v12621_v35  ;;  %v4209_v45 = vmul.f32 %v4171_v4, %v12626_v19  ;;  %v12638_v59 = vld [vmem:[%s14810_s13 + $0x18] sm:$0xff] }
 0xd6f   :  { %15073 = vst [vmem:[#allocation51_spill] sm:$0xff] %v12638_v59 }
 0xd70   :  { %v4223_v1 = vrot.slane %v4222_v58, 2  ;;  %v4217_v21 = vrot.slane %v4216_v22, 2  ;;  %v4245_v0 = vrot.slane %v4212_v31, 4  ;;  %v4227_v16 = vrot.slane %v4209_v45, 4 }
 0xd71   :  { %v4206_v11 = vpop.permute.xlu0 %4205  ;;  %v4178_v60 = vpop.permute.xlu1 %4177 }
 0xd72   :  { %v4224_v37 = vadd.f32 %v4223_v1, %v4222_v58  ;;  %v4218_v55 = vadd.f32 %v4217_v21, %v4216_v22  ;;  %v4246_v36 = vadd.f32 %v4245_v0, %v4212_v31  ;;  %v4228_v13 = vadd.f32 %v4227_v16, %v4209_v45  ;;  %v12645_v21 = vld [vmem:[%s14810_s13 + $0x20] sm:$0xff] }
 0xd73   :  { %v4214_v46 = vmul.f32 %v4206_v11, %v12633_v44  ;;  %v4210_v28 = vmul.f32 %v4178_v60, %v12638_v59  ;;  %15074 = vst [vmem:[#allocation52_spill] sm:$0xff] %v12645_v21 }
 0xd74   :  { %v4229_v32 = vrot.slane %v4228_v13, 2  ;;  %v4225_v22 = vrot.slane %v4224_v37, 1  ;;  %v4219_v31 = vrot.slane %v4218_v55, 1  ;;  %v4247_v45 = vrot.slane %v4246_v36, 2 }
 0xd75   :  { %v4257_v25 = vrot.slane %v4214_v46, 4  ;;  %v4233_v4 = vrot.slane %v4210_v28, 4  ;;  %v4185_v58 = vpop.permute.xlu1 %4184 }
 0xd76   :  { %v4230_v1 = vadd.f32 %v4229_v32, %v4228_v13  ;;  %v4211_v35 = vmul.f32 %v4185_v58, %v12645_v21  ;;  %v4226_v23 = vadd.f32 %v4225_v22, %v4224_v37  ;;  %v4220_v2 = vadd.f32 %v4219_v31, %v4218_v55  ;;  %v12651_v13 = vld [vmem:[%s14810_s13 + $0x30] sm:$0xff] }
 0xd77   :  { %v4258_v0 = vadd.f32 %v4257_v25, %v4214_v46  ;;  %v4234_v16 = vadd.f32 %v4233_v4, %v4210_v28  ;;  %v4248_v47 = vadd.f32 %v4247_v45, %v4246_v36 }
 0xd78   :  { %v4231_v11 = vrot.slane %v4230_v1, 1  ;;  %v4239_v59 = vrot.slane %v4211_v35, 4  ;;  %v4264_v21 = vpack.c.bf16 %v4226_v23, %v4226_v23  ;;  %v4263_v15 = vpack.c.bf16 %v4220_v2, %v4220_v2 }
 0xd79   :  { %v4259_v44 = vrot.slane %v4258_v0, 2  ;;  %v4235_v60 = vrot.slane %v4234_v16, 2  ;;  %v4199_v19 = vpop.permute.xlu1 %4198  ;;  %v4249_v24 = vrot.slane %v4248_v47, 1 }
 0xd7a   :  { %v4232_v32 = vadd.f32 %v4231_v11, %v4230_v1  ;;  %v4240_v63 = vadd.f32 %v4239_v59, %v4211_v35  ;;  %v4213_v46 = vmul.f32 %v4199_v19, %v12651_v13  ;;  %v4280_v1 = vunpack.c.l.b16 %v4264_v21 }
 0xd7b   :  { %v4236_v61 = vadd.f32 %v4235_v60, %v4234_v16  ;;  %v4260_v28 = vadd.f32 %v4259_v44, %v4258_v0  ;;  %v4279_v16 = vunpack.c.l.b16 %v4263_v15  ;;  %v4250_v35 = vadd.f32 %v4249_v24, %v4248_v47 }
 0xd7c   :  { %v4241_v4 = vrot.slane %v4240_v63, 2  ;;  %v4251_v58 = vrot.slane %v4213_v46, 4  ;;  %v4265_v37 = vpack.c.bf16 %v4232_v32, %v4232_v32 }
 0xd7d   :  { %v4237_v25 = vrot.slane %v4236_v61, 1  ;;  %v4261_v31 = vrot.slane %v4260_v28, 1 }
 0xd7e   :  { %v4242_v36 = vadd.f32 %v4241_v4, %v4240_v63  ;;  %v4252_v22 = vadd.f32 %v4251_v58, %v4213_v46  ;;  %v4281_v19 = vunpack.c.l.b16 %v4265_v37  ;;  %v4268_v63 = vpack.c.bf16 %v4250_v35, %v4250_v35  ;;  %v12751_v35 = vld [vmem:[%s14813_s6 + $0x90] ss:$12 sps:$4 sm:$0xff]  }
 0xd7f   :  { %v4238_v55 = vadd.f32 %v4237_v25, %v4236_v61  ;;  %v4262_v0 = vadd.f32 %v4261_v31, %v4260_v28  ;;  %v4288_v61 = vsel %vm4287_vm15, %v4280_v1, %v4279_v16  ;;  %v12695_v31 = vld [vmem:[%s14813_s6 + $0x30] ss:$12 sps:$4 sm:$0xff]   ;;  %v12723_v1 = vld [vmem:[%s14813_s6 + $0x60] ss:$12 sps:$4 sm:$0xff]   ;;  %v12737_v16 = vld [vmem:[%s14813_s6 + $0x78] ss:$12 sps:$4 sm:$0xff]  }
 0xd80   :  { %v4243_v17 = vrot.slane %v4242_v36, 1  ;;  %v4253_v62 = vrot.slane %v4252_v22, 2  ;;  %v4290_v60 = vsel %vm4289_vm10, %v4281_v19, %v4288_v61  ;;  %v12765_v19 = vld [vmem:[%s14813_s6 + $0xa8] ss:$12 sps:$4 sm:$0xff]   ;;  %v15084_v61 = vld [vmem:[#allocation15_spill] sm:$0xff] }
 0xd81   :  { %v4266_v45 = vpack.c.bf16 %v4238_v55, %v4238_v55  ;;  %v4270_v15 = vpack.c.bf16 %v4262_v0, %v4262_v0  ;;  %v12664_v55 = vld [vmem:[%s14813_s6] ss:$12 sps:$4 sm:$0xff]  }
 0xd82   :  { %v4244_v44 = vadd.f32 %v4243_v17, %v4242_v36  ;;  %v4254_v59 = vadd.f32 %v4253_v62, %v4252_v22  ;;  %v4284_v17 = vunpack.c.l.b16 %v4268_v63  ;;  %v12671_v36 = vld [vmem:[%s14813_s6 + $0x1c] ss:$12 sps:$4 sm:$0xff]   ;;  %v12681_v22 = vld [vmem:[%s14813_s6 + $0x18] ss:$12 sps:$4 sm:$0xff]  }
 0xd83   :  { %v4282_v23 = vunpack.c.l.b16 %v4266_v45  ;;  %v4286_v28 = vunpack.c.l.b16 %v4270_v15  ;;  %v12709_v45 = vld [vmem:[%s14813_s6 + $0x48] ss:$12 sps:$4 sm:$0xff]   ;;  %v15085_v63 = vld [vmem:[#allocation16_spill] sm:$0xff] }
 0xd84   :  { %v4267_v2 = vpack.c.bf16 %v4244_v44, %v4244_v44  ;;  %v4255_v11 = vrot.slane %v4254_v59, 1  ;;  %v15076_v44 = vld [vmem:[#allocation11_spill] sm:$0xff]  ;;  %v15079_v0 = vld [vmem:[#allocation21_spill] sm:$0xff] }
 0xd85   :  { %v4292_v47 = vsel %vm4291_vm11, %v4282_v23, %v4290_v60  ;;  %v15081_v23 = vld [vmem:[#allocation22_spill] sm:$0xff]  ;;  %v15086_v60 = vld [vmem:[#allocation17_spill] sm:$0xff] }
 0xd86   :  { %v4283_v32 = vunpack.c.l.b16 %v4267_v2  ;;  %v4256_v21 = vadd.f32 %v4255_v11, %v4254_v59  ;;  %v15077_v59 = vld [vmem:[#allocation20_spill] sm:$0xff]  ;;  %v15082_v2 = vld [vmem:[#allocation14_spill] sm:$0xff]  ;;  %v15083_v11 = vld [vmem:[#allocation23_spill] sm:$0xff] }
 0xd88   :  { %v4294_v24 = vsel %vm4293_vm12, %v4283_v32, %v4292_v47  ;;  %v4269_v62 = vpack.c.bf16 %v4256_v21, %v4256_v21  ;;  %v15087_v32 = vld [vmem:[#allocation18_spill] sm:$0xff] }
 0xd89   :  { %v4296_v25 = vsel %vm4295_vm13, %v4284_v17, %v4294_v24  ;;  %v12808_v21 = vld [vmem:[%s14812_s5 + $0x4] ss:$12 sps:$4 sm:$0xff]  }
 0xd8a   :  { %v4285_v46 = vunpack.c.l.b16 %v4269_v62 }
 0xd8c   :  { %v4298_v4 = vsel %vm4297_vm0, %v4285_v46, %v4296_v25 }
 0xd8d   :  { %v4300_v58 = vsel %vm4299_vm9, %v4286_v28, %v4298_v4  ;;  %v15089_v28 = vld [vmem:[#allocation27_spill] sm:$0xff] }
 0xd8e   :  { %v4301_v37 = vpack.c.b16 %v4300_v58, %v4300_v58 }
 0xd90   :  { %4336 = vmatmul.mubr.bf16.vlgmr.msra.gmra.mrb[52].mxu1 %v4301_v37  ;;  %9045 = vmatmul.mubr.bf16.vlgmr.msra.gmra.mrb[68].mxu0 %v4301_v37 }
 0xd91   :  { %4385 = vmatpush1.bf16.msra.mxu1 %v12664_v55  ;;  %9049 = vmatpush3.bf16.msra.mxu0 %v12226_v34  ;;  %v12688_v34 = vld [vmem:[%s14813_s6 + $0x34] ss:$12 sps:$4 sm:$0xff]  }
 0xd92   :  { %4386 = vmatprep.subr.bf16.mxu1 %v12671_v36  ;;  %9050 = vmatprep.subr.bf16.mxu0 %v15050_v54 }
 0xd93   :  { %4416 = vmatprep.mubr.bf16.mxu1 %v15049_v52  ;;  %9064 = vmatprep.mubr.msk.bf16.mxu0 %vm10793_vm1, %v15050_v54 }
 0xd95   :  { %4387 = vmatpush1.bf16.msra.mxu1 %v12681_v22  ;;  %9051 = vmatpush3.bf16.msra.mxu0 %v12242_v48  ;;  %v12702_v48 = vld [vmem:[%s14813_s6 + $0x4c] ss:$12 sps:$4 sm:$0xff]  }
 0xd96   :  { %4388 = vmatprep.subr.bf16.mxu1 %v12688_v34  ;;  %9052 = vmatprep.subr.bf16.mxu0 %v15050_v54 }
 0xd99   :  { %4389 = vmatpush1.bf16.msra.mxu1 %v12695_v31  ;;  %9053 = vmatpush3.bf16.msra.mxu0 %v12251_v40  ;;  %v12716_v40 = vld [vmem:[%s14813_s6 + $0x64] ss:$12 sps:$4 sm:$0xff]  }
 0xd9a   :  { %4390 = vmatprep.subr.bf16.mxu1 %v12702_v48  ;;  %9054 = vmatprep.subr.bf16.mxu0 %v15050_v54 }
 0xd9d   :  { %4391 = vmatpush1.bf16.msra.mxu1 %v12709_v45  ;;  %9055 = vmatpush3.bf16.msra.mxu0 %v12258_v9  ;;  %v12730_v9 = vld [vmem:[%s14813_s6 + $0x7c] ss:$12 sps:$4 sm:$0xff]  }
 0xd9e   :  { %4392 = vmatprep.subr.bf16.mxu1 %v12716_v40  ;;  %9056 = vmatprep.subr.bf16.mxu0 %v15050_v54 }
 0xda1   :  { %4393 = vmatpush1.bf16.msra.mxu1 %v12723_v1  ;;  %9057 = vmatpush3.bf16.msra.mxu0 %v12265_v43  ;;  %v12744_v43 = vld [vmem:[%s14813_s6 + $0x94] ss:$12 sps:$4 sm:$0xff]  }
 0xda2   :  { %4394 = vmatprep.subr.bf16.mxu1 %v12730_v9  ;;  %9058 = vmatprep.subr.bf16.mxu0 %v15050_v54 }
 0xda5   :  { %4395 = vmatpush1.bf16.msra.mxu1 %v12737_v16  ;;  %9059 = vmatpush3.bf16.msra.mxu0 %v12272_v57  ;;  %v12758_v57 = vld [vmem:[%s14813_s6 + $0xac] ss:$12 sps:$4 sm:$0xff]  }
 0xda6   :  { %4396 = vmatprep.subr.bf16.mxu1 %v12744_v43  ;;  %9060 = vmatprep.subr.bf16.mxu0 %v15050_v54 }
 0xda9   :  { %4397 = vmatpush1.bf16.msra.mxu1 %v12751_v35  ;;  %9061 = vmatpush3.bf16.msra.mxu0 %v12279_v51  ;;  %v15075_v51 = vld [vmem:[#allocation19_spill] sm:$0xff] }
 0xdaa   :  { %4398 = vmatprep.subr.bf16.mxu1 %v12758_v57  ;;  %9062 = vmatprep.subr.bf16.mxu0 %v15050_v54  ;;  %15088 = vst [vmem:[#allocation19_spill] sm:$0xff] %v12808_v21 }
 0xdad   :  { %4399 = vmatpush1.bf16.msra.mxu1 %v12765_v19  ;;  %9063 = vmatpush3.bf16.msra.mxu0 %v12286_v26  ;;  %v15078_v26 = vld [vmem:[#allocation12_spill] sm:$0xff] }
 0xdae   :  { %9068 = vmatprep.subr.bf16.mxu1 %v15050_v54  ;;  %9789 = vmatprep.subr.bf16.mxu0 %v15075_v51 }
 0xdb0   :  { %4417 = vmatmul.mubr.bf16.vlgmr.msra.gmra.mrb[52].mxu1 %v12433_v41  ;;  %9065 = vmatmul.mubr.bf16.vlgmr.msra.gmra.mrb[72].mxu0 %v12433_v41  ;;  %v15080_v41 = vld [vmem:[#allocation13_spill] sm:$0xff] }
 0xdb1   :  { %9069 = vmatpush3.bf16.msra.mxu1 %v15076_v44  ;;  %9084 = vmatprep.mubr.msk.bf16.mxu1 %vm10793_vm1, %v15050_v54 }
 0xdb2   :  { %9070 = vmatprep.subr.bf16.mxu1 %v15050_v54  ;;  %9791 = vmatpush3.bf16.msra.mxu0 %v15075_v51 }
 0xdb3   :  { %9793 = vmatprep.subr.bf16.mxu0 %v15077_v59 }
 0xdb5   :  { %9071 = vmatpush3.bf16.msra.mxu1 %v15078_v26 }
 0xdb6   :  { %9072 = vmatprep.subr.bf16.mxu1 %v15050_v54  ;;  %9795 = vmatpush3.bf16.msra.mxu0 %v15077_v59 }
 0xdb7   :  { %9797 = vmatprep.subr.bf16.mxu0 %v15079_v0 }
 0xdb9   :  { %9073 = vmatpush3.bf16.msra.mxu1 %v15080_v41 }
 0xdba   :  { %9074 = vmatprep.subr.bf16.mxu1 %v15050_v54  ;;  %9799 = vmatpush3.bf16.msra.mxu0 %v15079_v0 }
 0xdbb   :  { %9801 = vmatprep.subr.bf16.mxu0 %v15081_v23 }
 0xdbd   :  { %9075 = vmatpush3.bf16.msra.mxu1 %v15082_v2 }
 0xdbe   :  { %9076 = vmatprep.subr.bf16.mxu1 %v15050_v54  ;;  %9803 = vmatpush3.bf16.msra.mxu0 %v15081_v23 }
 0xdbf   :  { %9805 = vmatprep.subr.bf16.mxu0 %v15083_v11 }
 0xdc1   :  { %9077 = vmatpush3.bf16.msra.mxu1 %v15084_v61  ;;  %v15090_v61 = vld [vmem:[#allocation29_spill] sm:$0xff] }
 0xdc2   :  { %9078 = vmatprep.subr.bf16.mxu1 %v15050_v54  ;;  %9807 = vmatpush3.bf16.msra.mxu0 %v15083_v11 }
 0xdc3   :  { %9809 = vmatprep.subr.bf16.mxu0 %v12459_v14 }
 0xdc5   :  { %9079 = vmatpush3.bf16.msra.mxu1 %v15085_v63 }
 0xdc6   :  { %9080 = vmatprep.subr.bf16.mxu1 %v15050_v54  ;;  %9811 = vmatpush3.bf16.msra.mxu0 %v12459_v14 }
 0xdc7   :  { %9813 = vmatprep.subr.bf16.mxu0 %v12472_v10 }
 0xdc9   :  { %9081 = vmatpush3.bf16.msra.mxu1 %v15086_v60 }
 0xdca   :  { %9082 = vmatprep.subr.bf16.mxu1 %v15050_v54  ;;  %9815 = vmatpush3.bf16.msra.mxu0 %v12472_v10 }
 0xdcb   :  { %9817 = vmatprep.subr.bf16.mxu0 %v12477_v7 }
 0xdcd   :  { %9083 = vmatpush3.bf16.msra.mxu1 %v15087_v32 }
 0xdce   :  { %9819 = vmatpush3.bf16.msra.mxu0 %v12477_v7  ;;  %4833 = vmatprep.subr.bf16.mxu1 %v12808_v21 }
 0xdcf   :  { %9132 = vmatprep.subr.bf16.mxu0 %v15050_v54 }
 0xe63   :  { %v4378_v15 = vpop.f32.mrb[68].mxu0 }
 0xe64   :  { %v9046_v47 = vpop.f32.mrb[69].mxu0 }
 0xe65   :  { %v4381_v24 = vpop.f32.mrb[70].mxu0 }
 0xe66   :  { %v9047_v62 = vpop.f32.mrb[71].mxu0 }
 0xe83   :  { %v4418_v17 = vpop.f32.mrb[52].mxu1  ;;  %v4459_v46 = vpop.f32.mrb[72].mxu0 }
 0xe84   :  { %v10017_v25 = vadd.f32 %v15089_v28, %v4418_v17  ;;  %v4420_v4 = vpop.f32.mrb[53].mxu1  ;;  %v9066_v58 = vpop.f32.mrb[73].mxu0  ;;  %v4460_v21 = vadd.f32 %v4459_v46, %v12421_v53  ;;  %v12846_v46 = vld [vmem:[%s14812_s5 + $0x34] ss:$12 sps:$4 sm:$0xff]  }
 0xe85   :  { %v4422_v37 = vpop.f32.mrb[54].mxu1  ;;  %v4462_v44 = vpop.f32.mrb[74].mxu0  ;;  %v10019_v63 = vadd.f32 %v15090_v61, %v4420_v4  ;;  %v4379_v58 = vadd.f32 %v4378_v15, %v12424_v18  ;;  %v12840_v15 = vld [vmem:[%s14812_s5 + $0x18] ss:$12 sps:$4 sm:$0xff]   ;;  %15094 = vst [vmem:[#allocation21_spill] sm:$0xff] %v12846_v46 }
 0xe86   :  { %v8205_v26 = vmul.f32 -1.442695, %v10017_v25  ;;  %v4423_v41 = vpop.f32.mrb[55].mxu1  ;;  %v9067_v2 = vpop.f32.mrb[75].mxu0  ;;  %15093 = vst [vmem:[#allocation12_spill] sm:$0xff] %v12840_v15 }
 0xe87   :  { %v8206_v60 = vmul.f32 -1.442695, %v10019_v63 }
 0xe88   :  { %10402 = vpow2.f32 %v8205_v26 }
 0xe89   :  { %10404 = vpow2.f32 %v8206_v60 }
 0xe92   :  { %v10403_v32 = vpop.eup %10402 }
 0xe93   :  { %v4469_v47 = vadd.f32 1.0, %v10403_v32  ;;  %v10405_v24 = vpop.eup %10404  ;;  %v12852_v32 = vld [vmem:[%s14812_s5 + $0x30] ss:$12 sps:$4 sm:$0xff]  }
 0xe94   :  { %v4476_v62 = vadd.f32 1.0, %v10405_v24  ;;  %15095 = vst [vmem:[#allocation13_spill] sm:$0xff] %v12852_v32  ;;  %v12864_v24 = vld [vmem:[%s14812_s5 + $0x48] ss:$12 sps:$4 sm:$0xff]  }
 0xe95   :  { %10406 = vrcp.f32 %v4469_v47  ;;  %v12858_v47 = vld [vmem:[%s14812_s5 + $0x4c] ss:$12 sps:$4 sm:$0xff]   ;;  %15097 = vst [vmem:[#allocation14_spill] sm:$0xff] %v12864_v24 }
 0xe96   :  { %10408 = vrcp.f32 %v4476_v62  ;;  %15096 = vst [vmem:[#allocation22_spill] sm:$0xff] %v12858_v47  ;;  %v12870_v62 = vld [vmem:[%s14812_s5 + $0x64] ss:$12 sps:$4 sm:$0xff]  }
 0xe97   :  { %15098 = vst [vmem:[#allocation23_spill] sm:$0xff] %v12870_v62 }
 0xe9f   :  { %v10407_v17 = vpop.eup %10406 }
 0xea0   :  { %v4479_v37 = vmul.f32 %v10407_v17, %v4460_v21  ;;  %v10409_v44 = vpop.eup %10408  ;;  %v12827_v21 = vld [vmem:[%s14812_s5] ss:$12 sps:$4 sm:$0xff]  }
 0xea1   :  { %v4482_v41 = vsub.f32 1.0, %v10409_v44  ;;  %v4484_v2 = vmul.f32 %v10409_v44, %v12429_v27  ;;  %15091 = vst [vmem:[#allocation11_spill] sm:$0xff] %v12827_v21  ;;  %v12834_v27 = vld [vmem:[%s14812_s5 + $0x1c] ss:$12 sps:$4 sm:$0xff]   ;;  %v12876_v17 = vld [vmem:[%s14812_s5 + $0x60] ss:$12 sps:$4 sm:$0xff]  }
 0xea2   :  { %v4480_v25 = vadd.f32 %v4479_v37, %v4379_v58  ;;  %15092 = vst [vmem:[#allocation20_spill] sm:$0xff] %v12834_v27  ;;  %15099 = vst [vmem:[#allocation15_spill] sm:$0xff] %v12876_v17  ;;  %v12882_v58 = vld [vmem:[%s14812_s5 + $0x7c] ss:$12 sps:$4 sm:$0xff]   ;;  %v12888_v37 = vld [vmem:[%s14812_s5 + $0x78] ss:$12 sps:$4 sm:$0xff]  }
 0xea3   :  { %15100 = vst [vmem:[#allocation16_spill] sm:$0xff] %v12882_v58  ;;  %15101 = vst [vmem:[#allocation17_spill] sm:$0xff] %v12888_v37  ;;  %v12900_v44 = vld [vmem:[%s14812_s5 + $0x90] ss:$12 sps:$4 sm:$0xff]  }
 0xea4   :  { %10410 = vtanh.f32 %v4480_v25  ;;  %v12894_v25 = vld [vmem:[%s14812_s5 + $0x94] ss:$12 sps:$4 sm:$0xff]   ;;  %15103 = vst [vmem:[#allocation27_spill] sm:$0xff] %v12900_v44 }
 0xea5   :  { %15102 = vst [vmem:[#allocation18_spill] sm:$0xff] %v12894_v25 }
 0xeae   :  { %v10411_v4 = vpop.eup %10410 }
 0xeaf   :  { %v4483_v26 = vmul.f32 %v10411_v4, %v4482_v41  ;;  %v12906_v41 = vld [vmem:[%s14812_s5 + $0xac] ss:$12 sps:$4 sm:$0xff]   ;;  %v12912_v4 = vld [vmem:[%s14812_s5 + $0xa8] ss:$12 sps:$4 sm:$0xff]  }
 0xeb0   :  { %15104 = vst [vmem:[#allocation29_spill] sm:$0xff] %v12906_v41  ;;  %15105 = vst [vmem:[#allocation53_spill] sm:$0xff] %v12912_v4 }
 0xeb1   :  { %v12817_v63 = vadd.f32 %v4484_v2, %v4483_v26  ;;  %v12918_v26 = vld [vmem:[%s14813_s6 + $0x4] ss:$12 sps:$4 sm:$0xff]  }
 0xeb2   :  { %15106 = vst [vmem:[#allocation54_spill] sm:$0xff] %v12918_v26 }
 0xeb3   :  { %v12821_v60 = vpack.c.bf16 %v12817_v63, %v12817_v63 }
 0xeb5   :  { %9085 = vmatmul.mubr.bf16.vlgmr.msra.gmra.mrb[56].mxu1 %v12821_v60 }
 0xeb6   :  { %4834 = vmatpush1.bf16.msra.mxu1 %v12827_v21  ;;  %4865 = vmatprep.mubr.bf16.mxu1 %v15049_v52 }
 0xeb7   :  { %4835 = vmatprep.subr.bf16.mxu1 %v12834_v27 }
 0xeba   :  { %4836 = vmatpush1.bf16.msra.mxu1 %v12840_v15 }
 0xebb   :  { %4837 = vmatprep.subr.bf16.mxu1 %v12846_v46 }
 0xebe   :  { %4838 = vmatpush1.bf16.msra.mxu1 %v12852_v32 }
 0xebf   :  { %4839 = vmatprep.subr.bf16.mxu1 %v12858_v47 }
 0xec2   :  { %4840 = vmatpush1.bf16.msra.mxu1 %v12864_v24 }
 0xec3   :  { %4841 = vmatprep.subr.bf16.mxu1 %v12870_v62 }
 0xec6   :  { %4842 = vmatpush1.bf16.msra.mxu1 %v12876_v17 }
 0xec7   :  { %4843 = vmatprep.subr.bf16.mxu1 %v12882_v58 }
 0xeca   :  { %4844 = vmatpush1.bf16.msra.mxu1 %v12888_v37 }
 0xecb   :  { %4845 = vmatprep.subr.bf16.mxu1 %v12894_v25 }
 0xece   :  { %4846 = vmatpush1.bf16.msra.mxu1 %v12900_v44 }
 0xecf   :  { %4847 = vmatprep.subr.bf16.mxu1 %v12906_v41 }
 0xed2   :  { %4848 = vmatpush1.bf16.msra.mxu1 %v12912_v4 }
 0xed3   :  { %4914 = vmatprep.subr.bf16.mxu1 %v12918_v26 }
 0xf88   :  { %v4521_v2 = vpop.f32.mrb[56].mxu1 }
 0xf89   :  { %v4527_v44 = vadd.f32 %v4521_v2, %v12182_v42  ;;  %v4528_v25 = vadd.f32 %v4521_v2, %v12186_v30  ;;  %v4529_v41 = vadd.f32 %v12179_v39, %v4521_v2  ;;  %v4530_v37 = vadd.f32 %v12184_v12, %v4521_v2  ;;  %v9086_v58 = vpop.f32.mrb[57].mxu1 }
 0xf8a   :  { %v4531_v17 = vadd.f32 %v4521_v2, %v12406_v5  ;;  %v4532_v4 = vadd.f32 %v4521_v2, %v12412_v49  ;;  %v4533_v62 = vadd.f32 %v12404_v33, %v4521_v2  ;;  %v4534_v24 = vadd.f32 %v12408_v3, %v4521_v2  ;;  %v4524_v47 = vpop.f32.mrb[58].mxu1  ;;  %v12932_v2 = vld [vmem:[%s14812_s5 + $0x8] ss:$12 sps:$4 sm:$0xff]  }
 0xf8b   :  { %10412 = vtanh.f32 %v4527_v44  ;;  %v9087_v26 = vpop.f32.mrb[59].mxu1  ;;  %15107 = vst [vmem:[#allocation55_spill] sm:$0xff] %v12932_v2  ;;  %v12962_v44 = vld [vmem:[%s14812_s5 + $0x68] ss:$12 sps:$4 sm:$0xff]  }
 0xf8c   :  { %10414 = vtanh.f32 %v4528_v25  ;;  %v12953_v25 = vld [vmem:[%s14812_s5 + $0x50] ss:$12 sps:$4 sm:$0xff]   ;;  %15111 = vst [vmem:[#allocation59_spill] sm:$0xff] %v12962_v44 }
 0xf8d   :  { %10416 = vtanh.f32 %v4529_v41  ;;  %15110 = vst [vmem:[#allocation58_spill] sm:$0xff] %v12953_v25  ;;  %v12969_v41 = vld [vmem:[%s14812_s5 + $0x80] ss:$12 sps:$4 sm:$0xff]   ;;  %v12983_v26 = vld [vmem:[%s14812_s5 + $0xb0] ss:$12 sps:$4 sm:$0xff]  }
 0xf8e   :  { %10418 = vtanh.f32 %v4530_v37  ;;  %15112 = vst [vmem:[#allocation60_spill] sm:$0xff] %v12969_v41  ;;  %15114 = vst [vmem:[#allocation62_spill] sm:$0xff] %v12983_v26 }
 0xf8f   :  { %10420 = vtanh.f32 %v4531_v17 }
 0xf90   :  { %10422 = vtanh.f32 %v4532_v4  ;;  %v12976_v4 = vld [vmem:[%s14812_s5 + $0x98] ss:$12 sps:$4 sm:$0xff]  }
 0xf91   :  { %10424 = vtanh.f32 %v4533_v62  ;;  %v12946_v62 = vld [vmem:[%s14812_s5 + $0x38] ss:$12 sps:$4 sm:$0xff]   ;;  %15113 = vst [vmem:[#allocation61_spill] sm:$0xff] %v12976_v4 }
 0xf92   :  { %10426 = vtanh.f32 %v4534_v24  ;;  %15109 = vst [vmem:[#allocation57_spill] sm:$0xff] %v12946_v62 }
 0xf95   :  { %v10413_v39 = vpop.eup %10412 }
 0xf96   :  { %v10415_v12 = vpop.eup %10414  ;;  %9120 = vmatprep.mubr.f32.mxu0 %v10413_v39  ;;  %v12939_v39 = vld [vmem:[%s14812_s5 + $0x20] ss:$12 sps:$4 sm:$0xff]  }
 0xf97   :  { %v10417_v58 = vpop.eup %10416  ;;  %9121 = vmatmul.mubr.f32.vlgmr.msra.gmra.mrb[76].mxu0 %v10415_v12  ;;  %15108 = vst [vmem:[#allocation56_spill] sm:$0xff] %v12939_v39 }
 0xf98   :  { %9123 = vmatprep.mubr.f32.mxu0 %v10417_v58  ;;  %9133 = vmatpush3.bf16.msra.mxu0 %v12932_v2  ;;  %v10419_v47 = vpop.eup %10418 }
 0xf99   :  { %9134 = vmatprep.subr.bf16.mxu0 %v15050_v54  ;;  %v10421_v17 = vpop.eup %10420 }
 0xf9a   :  { %v10423_v12 = vpop.eup %10422 }
 0xf9b   :  { %9124 = vmatmul.mubr.f32.gmra.mrb[78].mxu0 %v10419_v47  ;;  %v10425_v24 = vpop.eup %10424 }
 0xf9c   :  { %9126 = vmatprep.mubr.f32.mxu0 %v10421_v17  ;;  %9135 = vmatpush3.bf16.msra.mxu0 %v12939_v39  ;;  %v10427_v37 = vpop.eup %10426 }
 0xf9d   :  { %9136 = vmatprep.subr.bf16.mxu0 %v15050_v54 }
 0xf9f   :  { %9127 = vmatmul.mubr.f32.gmra.mrb[80].mxu0 %v10423_v12 }
 0xfa0   :  { %9129 = vmatprep.mubr.f32.mxu0 %v10425_v24  ;;  %9137 = vmatpush3.bf16.msra.mxu0 %v12946_v62 }
 0xfa1   :  { %9138 = vmatprep.subr.bf16.mxu0 %v15050_v54 }
 0xfa3   :  { %9130 = vmatmul.mubr.f32.gmra.mrb[82].mxu0 %v10427_v37 }
 0xfa4   :  { %9139 = vmatpush3.bf16.msra.mxu0 %v12953_v25  ;;  %9148 = vmatprep.mubr.msk.bf16.mxu0 %vm10793_vm1, %v15050_v54 }
 0xfa5   :  { %9140 = vmatprep.subr.bf16.mxu0 %v15050_v54 }
 0xfa8   :  { %9141 = vmatpush3.bf16.msra.mxu0 %v12962_v44 }
 0xfa9   :  { %9142 = vmatprep.subr.bf16.mxu0 %v15050_v54 }
 0xfac   :  { %9143 = vmatpush3.bf16.msra.mxu0 %v12969_v41 }
 0xfad   :  { %9144 = vmatprep.subr.bf16.mxu0 %v15050_v54 }
 0xfb0   :  { %9145 = vmatpush3.bf16.msra.mxu0 %v12976_v4 }
 0xfb1   :  { %9146 = vmatprep.subr.bf16.mxu0 %v15050_v54 }
 0xfb4   :  { %9147 = vmatpush3.bf16.msra.mxu0 %v12983_v26 }
 0xfb5   :  { %9152 = vmatprep.subr.bf16.mxu0 %v15050_v54 }
0x106a   :  { %v9122_v58 = vpop.f32.mrb[76].mxu0 }
0x106b   :  { %v4649_v47 = vmul.f32 %v9122_v58, %v12518_v56  ;;  %v4609_v17 = vpop.f32.mrb[77].mxu0 }
0x106c   :  { %v4648_v12 = vmul.f32 %v12523_v20, %v4609_v17 }
0x106e   :  { %v4656_v24 = vadd.f32 %v4649_v47, %v4648_v12  ;;  %v9125_v37 = vpop.f32.mrb[78].mxu0  ;;  %v15115_v12 = vld [vmem:[#allocation38_spill] sm:$0xff] }
0x106f   :  { %v4619_v4 = vpop.f32.mrb[79].mxu0  ;;  %v4651_v44 = vmul.f32 %v9125_v37, %v12538_v29  ;;  %v15118_v37 = vld [vmem:[#allocation40_spill] sm:$0xff] }
0x1070   :  { %v4650_v41 = vmul.f32 %v12532_v8, %v4619_v4  ;;  %v15116_v4 = vld [vmem:[#allocation39_spill] sm:$0xff]  ;;  %v15117_v8 = vld [vmem:[#allocation30_spill] sm:$0xff] }
0x1072   :  { %v4657_v25 = vadd.f32 %v4656_v24, %v4650_v41  ;;  %v9128_v62 = vpop.f32.mrb[80].mxu0  ;;  %v12999_v41 = vsel %vm4147_vm14, 0.0, %v15116_v4  ;;  %v4146_v4 = vsel %vm3307_vm3, %v15118_v37, 0  ;;  %v15124_v37 = vld [vmem:[#allocation4_spill] sm:$0xff] }
0x1073   :  { %v4629_v39 = vpop.f32.mrb[81].mxu0  ;;  %v4653_v3 = vmul.f32 %v9128_v62, %v12552_v38  ;;  %15119 = vst [vmem:[#allocation39_spill] sm:$0xff] %v12999_v41  ;;  %vm4663_vm8 = vcmp.gt.f32.partialorder %v12999_v41, 0.0 }
0x1074   :  { %v4652_v26 = vmul.f32 %v12545_v50, %v4629_v39  ;;  %v4658_v2 = vadd.f32 %v4657_v25, %v4651_v44 }
0x1076   :  { %v4659_v33 = vadd.f32 %v4658_v2, %v4652_v26  ;;  %v9131_v58 = vpop.f32.mrb[82].mxu0 }
0x1077   :  { %v4639_v56 = vpop.f32.mrb[83].mxu0  ;;  %v4655_v20 = vmul.f32 %v9131_v58, %v15115_v12  ;;  %v15133_v12 = vld [vmem:[#allocation52_spill] sm:$0xff] }
0x1078   :  { %v4654_v17 = vmul.f32 %v12559_v6, %v4639_v56  ;;  %v4660_v47 = vadd.f32 %v4659_v33, %v4653_v3 }
0x107a   :  { %v4661_v49 = vadd.f32 %v4660_v47, %v4654_v17 }
0x107c   :  { %v4662_v24 = vadd.f32 %v4661_v49, %v4655_v20 }
0x107e   :  { %v4664_v39 = vsel %vm4663_vm8, %v4662_v24, -1e+09 }
0x107f   :  { %4665 = vmax.xlane.f32.xlu1 %v4664_v39 }
0x110c   :  { %v4666_v2 = vpop.xlane.xlu1 %4665 }
0x110d   :  { %vm4667_vm7 = vcmp.eq.f32.partialorder %v4664_v39, %v4666_v2  ;;  %v15122_v2 = vld [vmem:[#allocation6_spill] sm:$0xff] }
0x110e   :  { %v4668_v62 = vsel %vm4667_vm7, %v15117_v8, 128 }
0x110f   :  { %v4670_v56 = vshra.s32 %v4668_v62, 16  ;;  %v4669_v33 = vand.u32 65535, %v4668_v62 }
0x1111   :  { %v4672_v3 = vcvt.s32.f32 %v4670_v56  ;;  %v4671_v44 = vcvt.s32.f32 %v4669_v33  ;;  %v15123_v56 = vld [vmem:[#allocation5_spill] sm:$0xff] }
0x1113   :  { %4673 = vmin.xlane.f32.xlu0 %v4672_v3 }
0x11a0   :  { %v4674_v25 = vpop.xlane.xlu0 %4673 }
0x11a1   :  { %vm4675_vm6 = vcmp.eq.f32.partialorder %v4672_v3, %v4674_v25  ;;  %v4680_v58 = vcvt.f32.s32 %v4674_v25  ;;  %v15125_v25 = vld [vmem:[#allocation44_spill] sm:$0xff] }
0x11a2   :  { %v4676_v26 = vsel %vm4675_vm6, %v4671_v44, inf }
0x11a3   :  { %4677 = vmin.xlane.f32.xlu0 %v4676_v26  ;;  %v4681_v49 = vshll.u32 %v4680_v58, 16  ;;  %v15126_v26 = vld [vmem:[#allocation43_spill] sm:$0xff] }
0x1230   :  { %v4678_v17 = vpop.xlane.xlu0 %4677 }
0x1231   :  { %v4679_v20 = vcvt.f32.s32 %v4678_v17  ;;  %v15127_v17 = vld [vmem:[#allocation45_spill] sm:$0xff] }
0x1233   :  { %v13003_v47 = vadd.s32 %v4681_v49, %v4679_v20  ;;  %v15128_v20 = vld [vmem:[#allocation41_spill] sm:$0xff] }
0x1235   :  { %15120 = vst [vmem:[#allocation40_spill] sm:$0xff] %v13003_v47  ;;  %v13011_v24 = vsel %vm3308_vm2, %v13003_v47, %v4146_v4  ;;  %vm4684_vm7 = vcmp.eq.s32.totalorder %v15117_v8, %v13003_v47  ;;  %v15131_v47 = vld [vmem:[#allocation47_spill] sm:$0xff] }
0x1236   :  { %15121 = vst [vmem:[#allocation63_spill] sm:$0xff] %v13011_v24  ;;  %v8207_v39 = vsel %vm4684_vm7, 1.0, %v15050_v54 }
0x1237   :  { %v4698_v62 = vrot.slane %v8207_v39, %v15122_v2  ;;  %v4691_v3 = vrot.slane %v8207_v39, %v15123_v56  ;;  %v4705_v33 = vrot.slane %v8207_v39, %v15124_v37  ;;  %v4719_v44 = vrot.slane %v8207_v39, %v15125_v25  ;;  %v15129_v2 = vld [vmem:[#allocation42_spill] sm:$0xff] }
0x1238   :  { %v4712_v58 = vrot.slane %v8207_v39, %v15126_v26  ;;  %v4733_v49 = vrot.slane %v8207_v39, %v15127_v17  ;;  %v4726_v4 = vrot.slane %v8207_v39, %v15128_v20  ;;  %v4740_v24 = vrot.slane %v8207_v39, %v15129_v2  ;;  %v15130_v56 = vld [vmem:[#allocation46_spill] sm:$0xff] }
0x1239   :  { %4700 = vbcast.lane.b32.xlu1 %v4698_v62, 256  ;;  %4693 = vbcast.lane.b32.xlu0 %v4691_v3, 256 }
0x123d   :  { %4707 = vbcast.lane.b32.xlu1 %v4705_v33, 256  ;;  %4721 = vbcast.lane.b32.xlu0 %v4719_v44, 256 }
0x1241   :  { %4714 = vbcast.lane.b32.xlu1 %v4712_v58, 256  ;;  %4735 = vbcast.lane.b32.xlu0 %v4733_v49, 256  ;;  %v15132_v58 = vld [vmem:[#allocation49_spill] sm:$0xff] }
0x1245   :  { %4728 = vbcast.lane.b32.xlu1 %v4726_v4, 256 }
0x1249   :  { %4742 = vbcast.lane.b32.xlu1 %v4740_v24, 256 }
0x12ab   :  { %v4701_v62 = vpop.permute.xlu1 %4700  ;;  %v4694_v3 = vpop.permute.xlu0 %4693 }
0x12ac   :  { %v4745_v37 = vmul.f32 %v4701_v62, %v15130_v56  ;;  %v4744_v25 = vmul.f32 %v4694_v3, %v15131_v47  ;;  %v15134_v3 = vld [vmem:[#allocation51_spill] sm:$0xff] }
0x12ae   :  { %v4758_v33 = vrot.slane %v4745_v37, 4  ;;  %v4752_v44 = vrot.slane %v4744_v25, 4 }
0x12af   :  { %v4708_v8 = vpop.permute.xlu1 %4707  ;;  %v4722_v26 = vpop.permute.xlu0 %4721 }
0x12b0   :  { %v4759_v41 = vadd.f32 %v4758_v33, %v4745_v37  ;;  %v4753_v17 = vadd.f32 %v4752_v44, %v4744_v25  ;;  %v4746_v49 = vmul.f32 %v4708_v8, %v15132_v58  ;;  %v4748_v20 = vmul.f32 %v4722_v26, %v15133_v12 }
0x12b2   :  { %v4760_v4 = vrot.slane %v4759_v41, 2  ;;  %v4754_v6 = vrot.slane %v4753_v17, 2  ;;  %v4764_v39 = vrot.slane %v4746_v49, 4  ;;  %v4776_v24 = vrot.slane %v4748_v20, 4 }
0x12b3   :  { %v4715_v2 = vpop.permute.xlu1 %4714  ;;  %v4736_v38 = vpop.permute.xlu0 %4735 }
0x12b4   :  { %v4761_v50 = vadd.f32 %v4760_v4, %v4759_v41  ;;  %v4755_v56 = vadd.f32 %v4754_v6, %v4753_v17  ;;  %v4765_v62 = vadd.f32 %v4764_v39, %v4746_v49  ;;  %v4777_v47 = vadd.f32 %v4776_v24, %v4748_v20  ;;  %v15135_v6 = vld [vmem:[#allocation48_spill] sm:$0xff] }
0x12b5   :  { %v4747_v29 = vmul.f32 %v4715_v2, %v15134_v3  ;;  %v4750_v5 = vmul.f32 %v4736_v38, %v12651_v13 }
0x12b6   :  { %v4762_v37 = vrot.slane %v4761_v50, 1  ;;  %v4756_v25 = vrot.slane %v4755_v56, 1  ;;  %v4766_v33 = vrot.slane %v4765_v62, 2  ;;  %v4778_v8 = vrot.slane %v4777_v47, 2 }
0x12b7   :  { %v4770_v44 = vrot.slane %v4747_v29, 4  ;;  %v4788_v12 = vrot.slane %v4750_v5, 4  ;;  %v4729_v26 = vpop.permute.xlu1 %4728 }
0x12b8   :  { %v4763_v58 = vadd.f32 %v4762_v37, %v4761_v50  ;;  %v4757_v30 = vadd.f32 %v4756_v25, %v4755_v56  ;;  %v4767_v42 = vadd.f32 %v4766_v33, %v4765_v62  ;;  %v4779_v32 = vadd.f32 %v4778_v8, %v4777_v47  ;;  %v15136_v50 = vld [vmem:[#allocation50_spill] sm:$0xff] }
0x12b9   :  { %v4771_v46 = vadd.f32 %v4770_v44, %v4747_v29  ;;  %v4789_v41 = vadd.f32 %v4788_v12, %v4750_v5  ;;  %v4749_v17 = vmul.f32 %v4729_v26, %v15135_v6 }
0x12ba   :  { %v4768_v20 = vrot.slane %v4767_v42, 1  ;;  %v4801_v13 = vpack.c.bf16 %v4763_v58, %v4763_v58  ;;  %v4800_v39 = vpack.c.bf16 %v4757_v30, %v4757_v30  ;;  %v4780_v3 = vrot.slane %v4779_v32, 1 }
0x12bb   :  { %v4772_v49 = vrot.slane %v4771_v46, 2  ;;  %v4790_v2 = vrot.slane %v4789_v41, 2  ;;  %v4782_v4 = vrot.slane %v4749_v17, 4  ;;  %v4743_v38 = vpop.permute.xlu1 %4742 }
0x12bc   :  { %v4769_v24 = vadd.f32 %v4768_v20, %v4767_v42  ;;  %v4751_v56 = vmul.f32 %v4743_v38, %v15136_v50  ;;  %v4817_v37 = vunpack.c.l.b16 %v4801_v13  ;;  %v4781_v25 = vadd.f32 %v4780_v3, %v4779_v32 }
0x12bd   :  { %v4773_v15 = vadd.f32 %v4772_v49, %v4771_v46  ;;  %v4791_v27 = vadd.f32 %v4790_v2, %v4789_v41  ;;  %v4783_v21 = vadd.f32 %v4782_v4, %v4749_v17  ;;  %v4816_v8 = vunpack.c.l.b16 %v4800_v39 }
0x12be   :  { %v4802_v62 = vpack.c.bf16 %v4769_v24, %v4769_v24  ;;  %v4794_v5 = vrot.slane %v4751_v56, 4  ;;  %v4804_v46 = vpack.c.bf16 %v4781_v25, %v4781_v25 }
0x12bf   :  { %v4774_v47 = vrot.slane %v4773_v15, 1  ;;  %v4784_v29 = vrot.slane %v4783_v21, 2  ;;  %v4792_v33 = vrot.slane %v4791_v27, 1  ;;  %v4824_v17 = vsel %vm4287_vm15, %v4817_v37, %v4816_v8  ;;  %v13046_v37 = vld [vmem:[%s14813_s6 + $0x8] ss:$12 sps:$4 sm:$0xff]  }
0x12c0   :  { %v4795_v26 = vadd.f32 %v4794_v5, %v4751_v56  ;;  %v4818_v58 = vunpack.c.l.b16 %v4802_v62 }
0x12c1   :  { %v4775_v44 = vadd.f32 %v4774_v47, %v4773_v15  ;;  %v4785_v12 = vadd.f32 %v4784_v29, %v4783_v21  ;;  %v4793_v41 = vadd.f32 %v4792_v33, %v4791_v27  ;;  %v4820_v15 = vunpack.c.l.b16 %v4804_v46 }
0x12c2   :  { %v4796_v6 = vrot.slane %v4795_v26, 2  ;;  %v4825_v4 = vsel %vm4289_vm10, %v4818_v58, %v4824_v17 }
0x12c3   :  { %v4803_v30 = vpack.c.bf16 %v4775_v44, %v4775_v44  ;;  %v4786_v42 = vrot.slane %v4785_v12, 1  ;;  %v4806_v21 = vpack.c.bf16 %v4793_v41, %v4793_v41 }
0x12c4   :  { %v4797_v2 = vadd.f32 %v4796_v6, %v4795_v26 }
0x12c5   :  { %v4819_v20 = vunpack.c.l.b16 %v4803_v30  ;;  %v4787_v49 = vadd.f32 %v4786_v42, %v4785_v12  ;;  %v4822_v56 = vunpack.c.l.b16 %v4806_v21 }
0x12c6   :  { %v4798_v13 = vrot.slane %v4797_v2, 1 }
0x12c7   :  { %v4826_v32 = vsel %vm4291_vm11, %v4819_v20, %v4825_v4  ;;  %v4805_v38 = vpack.c.bf16 %v4787_v49, %v4787_v49 }
0x12c8   :  { %v4799_v24 = vadd.f32 %v4798_v13, %v4797_v2  ;;  %v4827_v3 = vsel %vm4293_vm12, %v4820_v15, %v4826_v32 }
0x12c9   :  { %v4821_v39 = vunpack.c.l.b16 %v4805_v38 }
0x12ca   :  { %v4807_v27 = vpack.c.bf16 %v4799_v24, %v4799_v24 }
0x12cb   :  { %v4828_v50 = vsel %vm4295_vm13, %v4821_v39, %v4827_v3 }
0x12cc   :  { %v4823_v62 = vunpack.c.l.b16 %v4807_v27  ;;  %v4829_v47 = vsel %vm4297_vm0, %v4822_v56, %v4828_v50 }
0x12ce   :  { %v4830_v29 = vsel %vm4299_vm9, %v4823_v62, %v4829_v47 }
0x12cf   :  { %v4831_v5 = vpack.c.b16 %v4830_v29, %v4830_v29 }
0x12d1   :  { %4866 = vmatmul.mubr.bf16.vlgmr.msra.gmra.mrb[60].mxu1 %v4831_v5  ;;  %9149 = vmatmul.mubr.bf16.vlgmr.msra.gmra.mrb[84].mxu0 %v4831_v5 }
0x12d2   :  { %4915 = vmatpush1.bf16.msra.mxu1 %v12664_v55  ;;  %9153 = vmatpush3.bf16.msra.mxu0 %v13046_v37  ;;  %v13058_v55 = vld [vmem:[%s14813_s6 + $0x20] ss:$12 sps:$4 sm:$0xff]  }
0x12d3   :  { %4916 = vmatprep.subr.bf16.mxu1 %v12671_v36  ;;  %9154 = vmatprep.subr.bf16.mxu0 %v15050_v54  ;;  %v13067_v36 = vld [vmem:[%s14813_s6 + $0x38] ss:$12 sps:$4 sm:$0xff]  }
0x12d4   :  { %4946 = vmatprep.mubr.bf16.mxu1 %v15049_v52  ;;  %9168 = vmatprep.mubr.msk.bf16.mxu0 %vm10793_vm1, %v15050_v54 }
0x12d6   :  { %4917 = vmatpush1.bf16.msra.mxu1 %v12681_v22  ;;  %9155 = vmatpush3.bf16.msra.mxu0 %v13058_v55  ;;  %v13076_v22 = vld [vmem:[%s14813_s6 + $0x50] ss:$12 sps:$4 sm:$0xff]  }
0x12d7   :  { %4918 = vmatprep.subr.bf16.mxu1 %v12688_v34  ;;  %9156 = vmatprep.subr.bf16.mxu0 %v15050_v54  ;;  %v13085_v34 = vld [vmem:[%s14813_s6 + $0x68] ss:$12 sps:$4 sm:$0xff]  }
0x12da   :  { %4919 = vmatpush1.bf16.msra.mxu1 %v12695_v31  ;;  %9157 = vmatpush3.bf16.msra.mxu0 %v13067_v36  ;;  %v13094_v31 = vld [vmem:[%s14813_s6 + $0x80] ss:$12 sps:$4 sm:$0xff]  }
0x12db   :  { %4920 = vmatprep.subr.bf16.mxu1 %v12702_v48  ;;  %9158 = vmatprep.subr.bf16.mxu0 %v15050_v54  ;;  %v13103_v48 = vld [vmem:[%s14813_s6 + $0x98] ss:$12 sps:$4 sm:$0xff]  }
0x12de   :  { %4921 = vmatpush1.bf16.msra.mxu1 %v12709_v45  ;;  %9159 = vmatpush3.bf16.msra.mxu0 %v13076_v22  ;;  %v13112_v45 = vld [vmem:[%s14813_s6 + $0xb0] ss:$12 sps:$4 sm:$0xff]  }
0x12df   :  { %4922 = vmatprep.subr.bf16.mxu1 %v12716_v40  ;;  %9160 = vmatprep.subr.bf16.mxu0 %v15050_v54  ;;  %v13122_v40 = vld [vmem:[%s14814_s10] sm:$0xff]  }
0x12e2   :  { %4923 = vmatpush1.bf16.msra.mxu1 %v12723_v1  ;;  %9161 = vmatpush3.bf16.msra.mxu0 %v13085_v34  ;;  %v13133_v1 = vld [vmem:[%s14814_s10 + $0x8] sm:$0xff]  }
0x12e3   :  { %4924 = vmatprep.subr.bf16.mxu1 %v12730_v9  ;;  %9162 = vmatprep.subr.bf16.mxu0 %v15050_v54  ;;  %v13142_v9 = vld [vmem:[%s14814_s10 + $0x10] sm:$0xff]  }
0x12e6   :  { %4925 = vmatpush1.bf16.msra.mxu1 %v12737_v16  ;;  %9163 = vmatpush3.bf16.msra.mxu0 %v13094_v31  ;;  %v13151_v16 = vld [vmem:[%s14814_s10 + $0x18] sm:$0xff]  }
0x12e7   :  { %4926 = vmatprep.subr.bf16.mxu1 %v12744_v43  ;;  %9164 = vmatprep.subr.bf16.mxu0 %v15050_v54  ;;  %v13160_v43 = vld [vmem:[%s14814_s10 + $0x20] sm:$0xff]  }
0x12ea   :  { %4927 = vmatpush1.bf16.msra.mxu1 %v12751_v35  ;;  %9165 = vmatpush3.bf16.msra.mxu0 %v13103_v48  ;;  %v13169_v35 = vld [vmem:[%s14814_s10 + $0x28] sm:$0xff]  }
0x12eb   :  { %4928 = vmatprep.subr.bf16.mxu1 %v12758_v57  ;;  %9166 = vmatprep.subr.bf16.mxu0 %v15050_v54  ;;  %v13178_v57 = vld [vmem:[%s14814_s10 + $0x30] sm:$0xff]  }
0x12ee   :  { %4929 = vmatpush1.bf16.msra.mxu1 %v12765_v19  ;;  %9167 = vmatpush3.bf16.msra.mxu0 %v13112_v45  ;;  %v13187_v19 = vld [vmem:[%s14814_s10 + $0x38] sm:$0xff]  }
0x12ef   :  { %9172 = vmatprep.subr.bf16.mxu1 %v15050_v54  ;;  %9821 = vmatprep.subr.bf16.mxu0 %v15075_v51 }
0x12f1   :  { %4947 = vmatmul.mubr.bf16.vlgmr.msra.gmra.mrb[60].mxu1 %v12821_v60  ;;  %9169 = vmatmul.mubr.bf16.vlgmr.msra.gmra.mrb[88].mxu0 %v12821_v60  ;;  %v15137_v60 = vld [vmem:[#allocation19_spill] sm:$0xff] }
0x12f2   :  { %9173 = vmatpush3.bf16.msra.mxu1 %v13122_v40  ;;  %9188 = vmatprep.mubr.msk.bf16.mxu1 %vm10793_vm1, %v15050_v54 }
0x12f3   :  { %9174 = vmatprep.subr.bf16.mxu1 %v15050_v54  ;;  %9823 = vmatpush3.bf16.msra.mxu0 %v15075_v51 }
0x12f4   :  { %9825 = vmatprep.subr.bf16.mxu0 %v15077_v59 }
0x12f6   :  { %9175 = vmatpush3.bf16.msra.mxu1 %v13133_v1 }
0x12f7   :  { %9176 = vmatprep.subr.bf16.mxu1 %v15050_v54  ;;  %9827 = vmatpush3.bf16.msra.mxu0 %v15077_v59 }
0x12f8   :  { %9829 = vmatprep.subr.bf16.mxu0 %v15079_v0 }
0x12fa   :  { %9177 = vmatpush3.bf16.msra.mxu1 %v13142_v9 }
0x12fb   :  { %9178 = vmatprep.subr.bf16.mxu1 %v15050_v54  ;;  %9831 = vmatpush3.bf16.msra.mxu0 %v15079_v0 }
0x12fc   :  { %9833 = vmatprep.subr.bf16.mxu0 %v15081_v23 }
0x12fe   :  { %9179 = vmatpush3.bf16.msra.mxu1 %v13151_v16 }
0x12ff   :  { %9180 = vmatprep.subr.bf16.mxu1 %v15050_v54  ;;  %9835 = vmatpush3.bf16.msra.mxu0 %v15081_v23 }
0x1300   :  { %9837 = vmatprep.subr.bf16.mxu0 %v15083_v11 }
0x1302   :  { %9181 = vmatpush3.bf16.msra.mxu1 %v13160_v43 }
0x1303   :  { %9182 = vmatprep.subr.bf16.mxu1 %v15050_v54  ;;  %9839 = vmatpush3.bf16.msra.mxu0 %v15083_v11 }
0x1304   :  { %9841 = vmatprep.subr.bf16.mxu0 %v12459_v14 }
0x1306   :  { %9183 = vmatpush3.bf16.msra.mxu1 %v13169_v35 }
0x1307   :  { %9184 = vmatprep.subr.bf16.mxu1 %v15050_v54  ;;  %9843 = vmatpush3.bf16.msra.mxu0 %v12459_v14 }
0x1308   :  { %9845 = vmatprep.subr.bf16.mxu0 %v12472_v10 }
0x130a   :  { %9185 = vmatpush3.bf16.msra.mxu1 %v13178_v57 }
0x130b   :  { %9186 = vmatprep.subr.bf16.mxu1 %v15050_v54  ;;  %9847 = vmatpush3.bf16.msra.mxu0 %v12472_v10 }
0x130c   :  { %9849 = vmatprep.subr.bf16.mxu0 %v12477_v7 }
0x130e   :  { %9187 = vmatpush3.bf16.msra.mxu1 %v13187_v19 }
0x130f   :  { %9851 = vmatpush3.bf16.msra.mxu0 %v12477_v7  ;;  %5363 = vmatprep.subr.bf16.mxu1 %v15137_v60  ;;  %v15139_v60 = vld [vmem:[#allocation11_spill] sm:$0xff] }
0x1310   :  { %9236 = vmatprep.subr.bf16.mxu0 %v15050_v54 }
0x13a4   :  { %v4908_v25 = vpop.f32.mrb[84].mxu0 }
0x13a5   :  { %v9150_v33 = vpop.f32.mrb[85].mxu0  ;;  %v4909_v39 = vadd.f32 %v4908_v25, %v12424_v18  ;;  %v15140_v25 = vld [vmem:[#allocation20_spill] sm:$0xff] }
0x13a6   :  { %v4911_v8 = vpop.f32.mrb[86].mxu0  ;;  %v15141_v33 = vld [vmem:[#allocation12_spill] sm:$0xff] }
0x13a7   :  { %v9151_v44 = vpop.f32.mrb[87].mxu0  ;;  %v15142_v8 = vld [vmem:[#allocation21_spill] sm:$0xff] }
0x13a8   :  { %v15143_v44 = vld [vmem:[#allocation13_spill] sm:$0xff] }
0x13c4   :  { %v4948_v12 = vpop.f32.mrb[60].mxu1  ;;  %v4989_v26 = vpop.f32.mrb[88].mxu0 }
0x13c5   :  { %v10021_v58 = vadd.f32 %v15089_v28, %v4948_v12  ;;  %v4950_v30 = vpop.f32.mrb[61].mxu1  ;;  %v9170_v42 = vpop.f32.mrb[89].mxu0  ;;  %v4990_v15 = vadd.f32 %v4989_v26, %v12421_v53  ;;  %v15145_v12 = vld [vmem:[#allocation14_spill] sm:$0xff]  ;;  %v15146_v26 = vld [vmem:[#allocation23_spill] sm:$0xff] }
0x13c6   :  { %v4952_v6 = vpop.f32.mrb[62].mxu1  ;;  %v4992_v46 = vpop.f32.mrb[90].mxu0  ;;  %v10023_v49 = vadd.f32 %v15090_v61, %v4950_v30  ;;  %v15148_v30 = vld [vmem:[#allocation16_spill] sm:$0xff]  ;;  %v15149_v42 = vld [vmem:[#allocation17_spill] sm:$0xff] }
0x13c7   :  { %v8208_v41 = vmul.f32 -1.442695, %v10021_v58  ;;  %v4953_v17 = vpop.f32.mrb[63].mxu1  ;;  %v9171_v20 = vpop.f32.mrb[91].mxu0  ;;  %v15147_v58 = vld [vmem:[#allocation15_spill] sm:$0xff]  ;;  %v15150_v6 = vld [vmem:[#allocation18_spill] sm:$0xff] }
0x13c8   :  { %v8209_v2 = vmul.f32 -1.442695, %v10023_v49  ;;  %v15151_v46 = vld [vmem:[#allocation27_spill] sm:$0xff]  ;;  %v15153_v17 = vld [vmem:[#allocation53_spill] sm:$0xff]  ;;  %v15154_v20 = vld [vmem:[#allocation54_spill] sm:$0xff] }
0x13c9   :  { %10428 = vpow2.f32 %v8208_v41  ;;  %v15152_v41 = vld [vmem:[#allocation29_spill] sm:$0xff] }
0x13ca   :  { %10430 = vpow2.f32 %v8209_v2  ;;  %v15155_v2 = vld [vmem:[#allocation8_spill] sm:$0xff] }
0x13d3   :  { %v10429_v4 = vpop.eup %10428 }
0x13d4   :  { %v4999_v32 = vadd.f32 1.0, %v10429_v4  ;;  %v10431_v38 = vpop.eup %10430 }
0x13d5   :  { %v5006_v13 = vadd.f32 1.0, %v10431_v38 }
0x13d6   :  { %10432 = vrcp.f32 %v4999_v32  ;;  %v15156_v32 = vld [vmem:[#allocation10_spill] sm:$0xff] }
0x13d7   :  { %10434 = vrcp.f32 %v5006_v13  ;;  %v15157_v13 = vld [vmem:[#allocation7_spill] sm:$0xff] }
0x13e0   :  { %v10433_v21 = vpop.eup %10432 }
0x13e1   :  { %v5009_v24 = vmul.f32 %v10433_v21, %v4990_v15  ;;  %v10435_v50 = vpop.eup %10434  ;;  %v15158_v21 = vld [vmem:[#allocation9_spill] sm:$0xff] }
0x13e2   :  { %v5012_v27 = vsub.f32 1.0, %v10435_v50  ;;  %v5014_v47 = vmul.f32 %v10435_v50, %v12817_v63  ;;  %v15144_v63 = vld [vmem:[#allocation22_spill] sm:$0xff] }
0x13e3   :  { %v5010_v3 = vadd.f32 %v5009_v24, %v4909_v39 }
0x13e5   :  { %10436 = vtanh.f32 %v5010_v3  ;;  %v15159_v3 = vld [vmem:[#allocation25_spill] sm:$0xff] }
0x13ef   :  { %v10437_v56 = vpop.eup %10436 }
0x13f0   :  { %v5013_v62 = vmul.f32 %v10437_v56, %v5012_v27  ;;  %v15160_v27 = vld [vmem:[#allocation28_spill] sm:$0xff] }
0x13f2   :  { %v13198_v29 = vadd.f32 %v5014_v47, %v5013_v62  ;;  %v15161_v62 = vld [vmem:[#allocation24_spill] sm:$0xff] }
0x13f4   :  { %15138 = vst [vmem:[#allocation46_spill] sm:$0xff] %v13198_v29  ;;  %v13202_v5 = vpack.c.bf16 %v13198_v29, %v13198_v29 }
0x13f6   :  { %9189 = vmatmul.mubr.bf16.vlgmr.msra.gmra.mrb[64].mxu1 %v13202_v5 }
0x13f7   :  { %5364 = vmatpush1.bf16.msra.mxu1 %v15139_v60  ;;  %5395 = vmatprep.mubr.bf16.mxu1 %v15049_v52  ;;  %v15162_v60 = vld [vmem:[#allocation26_spill] sm:$0xff] }
0x13f8   :  { %5365 = vmatprep.subr.bf16.mxu1 %v15140_v25 }
0x13fb   :  { %5366 = vmatpush1.bf16.msra.mxu1 %v15141_v33 }
0x13fc   :  { %5367 = vmatprep.subr.bf16.mxu1 %v15142_v8 }
0x13ff   :  { %5368 = vmatpush1.bf16.msra.mxu1 %v15143_v44 }
0x1400   :  { %5369 = vmatprep.subr.bf16.mxu1 %v15144_v63 }
0x1403   :  { %5370 = vmatpush1.bf16.msra.mxu1 %v15145_v12 }
0x1404   :  { %5371 = vmatprep.subr.bf16.mxu1 %v15146_v26  ;;  %v15163_v26 = vld [vmem:[#allocation55_spill] sm:$0xff] }
0x1407   :  { %5372 = vmatpush1.bf16.msra.mxu1 %v15147_v58 }
0x1408   :  { %5373 = vmatprep.subr.bf16.mxu1 %v15148_v30 }
0x140b   :  { %5374 = vmatpush1.bf16.msra.mxu1 %v15149_v42  ;;  %v15164_v42 = vld [vmem:[#allocation56_spill] sm:$0xff] }
0x140c   :  { %5375 = vmatprep.subr.bf16.mxu1 %v15150_v6 }
0x140f   :  { %5376 = vmatpush1.bf16.msra.mxu1 %v15151_v46 }
0x1410   :  { %5377 = vmatprep.subr.bf16.mxu1 %v15152_v41  ;;  %v15165_v41 = vld [vmem:[#allocation57_spill] sm:$0xff] }
0x1413   :  { %5378 = vmatpush1.bf16.msra.mxu1 %v15153_v17 }
0x1414   :  { %5444 = vmatprep.subr.bf16.mxu1 %v15154_v20  ;;  %v15166_v20 = vld [vmem:[#allocation58_spill] sm:$0xff] }
0x14c9   :  { %v5051_v49 = vpop.f32.mrb[64].mxu1 }
0x14ca   :  { %v5057_v4 = vadd.f32 %v5051_v49, %v15155_v2  ;;  %v5058_v38 = vadd.f32 %v5051_v49, %v15156_v32  ;;  %v5059_v15 = vadd.f32 %v15157_v13, %v5051_v49  ;;  %v5060_v39 = vadd.f32 %v15158_v21, %v5051_v49  ;;  %v9190_v24 = vpop.f32.mrb[65].mxu1 }
0x14cb   :  { %v5061_v50 = vadd.f32 %v5051_v49, %v15159_v3  ;;  %v5062_v56 = vadd.f32 %v5051_v49, %v15160_v27  ;;  %v5063_v47 = vadd.f32 %v15161_v62, %v5051_v49  ;;  %v5064_v25 = vadd.f32 %v15162_v60, %v5051_v49  ;;  %v5054_v33 = vpop.f32.mrb[66].mxu1  ;;  %v15167_v49 = vld [vmem:[#allocation59_spill] sm:$0xff] }
0x14cc   :  { %10438 = vtanh.f32 %v5057_v4  ;;  %v9191_v8 = vpop.f32.mrb[67].mxu1  ;;  %v15168_v4 = vld [vmem:[#allocation60_spill] sm:$0xff]  ;;  %v15171_v24 = vld [vmem:[#allocation31_spill] sm:$0xff] }
0x14cd   :  { %10440 = vtanh.f32 %v5058_v38  ;;  %v15169_v38 = vld [vmem:[#allocation61_spill] sm:$0xff] }
0x14ce   :  { %10442 = vtanh.f32 %v5059_v15  ;;  %v15170_v15 = vld [vmem:[#allocation62_spill] sm:$0xff] }
0x14cf   :  { %10444 = vtanh.f32 %v5060_v39 }
0x14d0   :  { %10446 = vtanh.f32 %v5061_v50 }
0x14d1   :  { %10448 = vtanh.f32 %v5062_v56 }
0x14d2   :  { %10450 = vtanh.f32 %v5063_v47  ;;  %v15172_v47 = vld [vmem:[#allocation32_spill] sm:$0xff] }
0x14d3   :  { %10452 = vtanh.f32 %v5064_v25 }
0x14d6   :  { %v10439_v44 = vpop.eup %10438 }
0x14d7   :  { %v10441_v63 = vpop.eup %10440  ;;  %9224 = vmatprep.mubr.f32.mxu0 %v10439_v44 }
0x14d8   :  { %v10443_v12 = vpop.eup %10442  ;;  %9225 = vmatmul.mubr.f32.vlgmr.msra.gmra.mrb[92].mxu0 %v10441_v63  ;;  %v15173_v63 = vld [vmem:[#allocation33_spill] sm:$0xff] }
0x14d9   :  { %9227 = vmatprep.mubr.f32.mxu0 %v10443_v12  ;;  %9237 = vmatpush3.bf16.msra.mxu0 %v15163_v26  ;;  %v10445_v58 = vpop.eup %10444  ;;  %v15174_v26 = vld [vmem:[#allocation34_spill] sm:$0xff] }
0x14da   :  { %9238 = vmatprep.subr.bf16.mxu0 %v15050_v54  ;;  %v10447_v30 = vpop.eup %10446 }
0x14db   :  { %v10449_v6 = vpop.eup %10448 }
0x14dc   :  { %9228 = vmatmul.mubr.f32.gmra.mrb[94].mxu0 %v10445_v58  ;;  %v10451_v46 = vpop.eup %10450 }
0x14dd   :  { %9230 = vmatprep.mubr.f32.mxu0 %v10447_v30  ;;  %9239 = vmatpush3.bf16.msra.mxu0 %v15164_v42  ;;  %v10453_v17 = vpop.eup %10452 }
0x14de   :  { %9240 = vmatprep.subr.bf16.mxu0 %v15050_v54 }
0x14e0   :  { %9231 = vmatmul.mubr.f32.gmra.mrb[96].mxu0 %v10449_v6 }
0x14e1   :  { %9233 = vmatprep.mubr.f32.mxu0 %v10451_v46  ;;  %9241 = vmatpush3.bf16.msra.mxu0 %v15165_v41  ;;  %v15175_v46 = vld [vmem:[#allocation35_spill] sm:$0xff] }
0x14e2   :  { %9242 = vmatprep.subr.bf16.mxu0 %v15050_v54 }
0x14e4   :  { %9234 = vmatmul.mubr.f32.gmra.mrb[98].mxu0 %v10453_v17 }
0x14e5   :  { %9243 = vmatpush3.bf16.msra.mxu0 %v15166_v20  ;;  %9252 = vmatprep.mubr.msk.bf16.mxu0 %vm10793_vm1, %v15050_v54  ;;  %v15176_v20 = vld [vmem:[#allocation36_spill] sm:$0xff] }
0x14e6   :  { %9244 = vmatprep.subr.bf16.mxu0 %v15050_v54 }
0x14e9   :  { %9245 = vmatpush3.bf16.msra.mxu0 %v15167_v49 }
0x14ea   :  { %9246 = vmatprep.subr.bf16.mxu0 %v15050_v54 }
0x14ed   :  { %9247 = vmatpush3.bf16.msra.mxu0 %v15168_v4 }
0x14ee   :  { %9248 = vmatprep.subr.bf16.mxu0 %v15050_v54 }
0x14f1   :  { %9249 = vmatpush3.bf16.msra.mxu0 %v15169_v38 }
0x14f2   :  { %9250 = vmatprep.subr.bf16.mxu0 %v15050_v54 }
0x14f5   :  { %9251 = vmatpush3.bf16.msra.mxu0 %v15170_v15 }
0x14f6   :  { %9256 = vmatprep.subr.bf16.mxu0 %v15050_v54 }
0x15ab   :  { %v9226_v39 = vpop.f32.mrb[92].mxu0 }
0x15ac   :  { %v5179_v50 = vmul.f32 %v9226_v39, %v15171_v24  ;;  %v5139_v56 = vpop.f32.mrb[93].mxu0  ;;  %v15177_v39 = vld [vmem:[#allocation37_spill] sm:$0xff] }
0x15ad   :  { %v5178_v25 = vmul.f32 %v15172_v47, %v5139_v56 }
0x15af   :  { %v5186_v33 = vadd.f32 %v5179_v50, %v5178_v25  ;;  %v9229_v8 = vpop.f32.mrb[94].mxu0  ;;  %v15178_v25 = vld [vmem:[#allocation38_spill] sm:$0xff] }
0x15b0   :  { %v5149_v44 = vpop.f32.mrb[95].mxu0  ;;  %v5181_v58 = vmul.f32 %v9229_v8, %v15174_v26 }
0x15b1   :  { %v5180_v12 = vmul.f32 %v15173_v63, %v5149_v44  ;;  %v15179_v44 = vld [vmem:[#allocation39_spill] sm:$0xff]  ;;  %v15180_v63 = vld [vmem:[#allocation30_spill] sm:$0xff] }
0x15b3   :  { %v5187_v30 = vadd.f32 %v5186_v33, %v5180_v12  ;;  %v9232_v42 = vpop.f32.mrb[96].mxu0  ;;  %v13260_v33 = vsel %vm4684_vm7, 0.0, %v15179_v44  ;;  %v15184_v44 = vld [vmem:[#allocation63_spill] sm:$0xff] }
0x15b4   :  { %v5159_v6 = vpop.f32.mrb[97].mxu0  ;;  %v5183_v49 = vmul.f32 %v9232_v42, %v15176_v20  ;;  %15182 = vst [vmem:[#allocation47_spill] sm:$0xff] %v13260_v33  ;;  %vm5193_vm2 = vcmp.gt.f32.partialorder %v13260_v33, 0.0 }
0x15b5   :  { %v5182_v41 = vmul.f32 %v15175_v46, %v5159_v6  ;;  %v5188_v17 = vadd.f32 %v5187_v30, %v5181_v58  ;;  %v13325_v46 = vld [vmem:[%s14810_s13 + $0x30] sm:$0xff] }
0x15b6   :  { %15200 = vst [vmem:[#allocation12_spill] sm:$0xff] %v13325_v46 }
0x15b7   :  { %v5189_v4 = vadd.f32 %v5188_v17, %v5182_v41  ;;  %v9235_v38 = vpop.f32.mrb[98].mxu0 }
0x15b8   :  { %v5169_v15 = vpop.f32.mrb[99].mxu0  ;;  %v5185_v47 = vmul.f32 %v9235_v38, %v15178_v25 }
0x15b9   :  { %v5184_v56 = vmul.f32 %v15177_v39, %v5169_v15  ;;  %v5190_v50 = vadd.f32 %v5189_v4, %v5183_v49 }
0x15bb   :  { %v5191_v24 = vadd.f32 %v5190_v50, %v5184_v56 }
0x15bd   :  { %v5192_v12 = vadd.f32 %v5191_v24, %v5185_v47 }
0x15bf   :  { %v5194_v58 = vsel %vm5193_vm2, %v5192_v12, -1e+09 }
0x15c0   :  { %5195 = vmax.xlane.f32.xlu0 %v5194_v58 }
0x164d   :  { %v5196_v30 = vpop.xlane.xlu0 %5195 }
0x164e   :  { %vm5197_vm3 = vcmp.eq.f32.partialorder %v5194_v58, %v5196_v30  ;;  %v15186_v58 = vld [vmem:[#allocation6_spill] sm:$0xff] }
0x164f   :  { %v5198_v42 = vsel %vm5197_vm3, %v15180_v63, 128 }
0x1650   :  { %v5200_v6 = vshra.s32 %v5198_v42, 16  ;;  %v5199_v17 = vand.u32 65535, %v5198_v42  ;;  %v15187_v42 = vld [vmem:[#allocation5_spill] sm:$0xff] }
0x1652   :  { %v5202_v41 = vcvt.s32.f32 %v5200_v6  ;;  %v5201_v4 = vcvt.s32.f32 %v5199_v17 }
0x1654   :  { %5203 = vmin.xlane.f32.xlu1 %v5202_v41 }
0x16e1   :  { %v5204_v49 = vpop.xlane.xlu1 %5203 }
0x16e2   :  { %vm5205_vm6 = vcmp.eq.f32.partialorder %v5202_v41, %v5204_v49  ;;  %v5210_v15 = vcvt.f32.s32 %v5204_v49  ;;  %v15188_v41 = vld [vmem:[#allocation4_spill] sm:$0xff]  ;;  %v15189_v49 = vld [vmem:[#allocation43_spill] sm:$0xff] }
0x16e3   :  { %v5206_v38 = vsel %vm5205_vm6, %v5201_v4, inf }
0x16e4   :  { %5207 = vmin.xlane.f32.xlu0 %v5206_v38  ;;  %v5211_v24 = vshll.u32 %v5210_v15, 16  ;;  %v15190_v38 = vld [vmem:[#allocation44_spill] sm:$0xff] }
0x1771   :  { %v5208_v56 = vpop.xlane.xlu0 %5207 }
0x1772   :  { %v5209_v47 = vcvt.f32.s32 %v5208_v56  ;;  %v15191_v56 = vld [vmem:[#allocation41_spill] sm:$0xff] }
0x1774   :  { %v13264_v50 = vadd.s32 %v5211_v24, %v5209_v47  ;;  %v15192_v47 = vld [vmem:[#allocation45_spill] sm:$0xff] }
0x1776   :  { %15183 = vst [vmem:[#allocation49_spill] sm:$0xff] %v13264_v50  ;;  %v13270_v8 = vsel %vm3309_vm4, %v13264_v50, %v15184_v44  ;;  %vm5214_vm8 = vcmp.eq.s32.totalorder %v15180_v63, %v13264_v50 }
0x1777   :  { %15185 = vst [vmem:[#allocation52_spill] sm:$0xff] %v13270_v8  ;;  %v8210_v12 = vsel %vm5214_vm8, 1.0, %v15050_v54  ;;  %v15193_v8 = vld [vmem:[#allocation42_spill] sm:$0xff] }
0x1778   :  { %v5228_v30 = vrot.slane %v8210_v12, %v15186_v58  ;;  %v5221_v6 = vrot.slane %v8210_v12, %v15187_v42  ;;  %v5235_v17 = vrot.slane %v8210_v12, %v15188_v41  ;;  %v5242_v4 = vrot.slane %v8210_v12, %v15189_v49  ;;  %v13289_v49 = vld [vmem:[%s14810_s13 + $0x8] sm:$0xff] }
0x1779   :  { %v5249_v15 = vrot.slane %v8210_v12, %v15190_v38  ;;  %v5256_v24 = vrot.slane %v8210_v12, %v15191_v56  ;;  %v5263_v44 = vrot.slane %v8210_v12, %v15192_v47  ;;  %v5270_v58 = vrot.slane %v8210_v12, %v15193_v8  ;;  %15194 = vst [vmem:[#allocation51_spill] sm:$0xff] %v13289_v49  ;;  %v13301_v47 = vld [vmem:[%s14810_s13 + $0x10] sm:$0xff] }
0x177a   :  { %5230 = vbcast.lane.b32.xlu1 %v5228_v30, 256  ;;  %5223 = vbcast.lane.b32.xlu0 %v5221_v6, 256  ;;  %15196 = vst [vmem:[#allocation50_spill] sm:$0xff] %v13301_v47 }
0x177e   :  { %5237 = vbcast.lane.b32.xlu1 %v5235_v17, 256  ;;  %5244 = vbcast.lane.b32.xlu0 %v5242_v4, 256  ;;  %v13295_v4 = vld [vmem:[%s14810_s13] sm:$0xff] }
0x177f   :  { %15195 = vst [vmem:[#allocation48_spill] sm:$0xff] %v13295_v4 }
0x1782   :  { %5251 = vbcast.lane.b32.xlu1 %v5249_v15, 256  ;;  %5258 = vbcast.lane.b32.xlu0 %v5256_v24, 256 }
0x1786   :  { %5265 = vbcast.lane.b32.xlu1 %v5263_v44, 256  ;;  %5272 = vbcast.lane.b32.xlu0 %v5270_v58, 256 }
0x17ec   :  { %v5231_v30 = vpop.permute.xlu1 %5230  ;;  %v5224_v6 = vpop.permute.xlu0 %5223 }
0x17ed   :  { %v5275_v17 = vmul.f32 %v13289_v49, %v5231_v30  ;;  %v5274_v15 = vmul.f32 %v13295_v4, %v5224_v6  ;;  %v13307_v49 = vld [vmem:[%s14810_s13 + $0x18] sm:$0xff] }
0x17ee   :  { %15197 = vst [vmem:[#allocation19_spill] sm:$0xff] %v13307_v49 }
0x17ef   :  { %v5288_v24 = vrot.slane %v5275_v17, 4  ;;  %v5282_v12 = vrot.slane %v5274_v15, 4 }
0x17f0   :  { %v5238_v44 = vpop.permute.xlu1 %5237  ;;  %v5245_v58 = vpop.permute.xlu0 %5244 }
0x17f1   :  { %v5289_v8 = vadd.f32 %v5288_v24, %v5275_v17  ;;  %v5283_v56 = vadd.f32 %v5282_v12, %v5274_v15  ;;  %v5276_v30 = vmul.f32 %v13301_v47, %v5238_v44  ;;  %v5277_v6 = vmul.f32 %v13307_v49, %v5245_v58  ;;  %v13313_v44 = vld [vmem:[%s14810_s13 + $0x20] sm:$0xff]  ;;  %v13319_v58 = vld [vmem:[%s14810_s13 + $0x28] sm:$0xff] }
0x17f2   :  { %15198 = vst [vmem:[#allocation11_spill] sm:$0xff] %v13313_v44  ;;  %15199 = vst [vmem:[#allocation20_spill] sm:$0xff] %v13319_v58 }
0x17f3   :  { %v5290_v4 = vrot.slane %v5289_v8, 2  ;;  %v5284_v38 = vrot.slane %v5283_v56, 2  ;;  %v5294_v41 = vrot.slane %v5276_v30, 4  ;;  %v5300_v42 = vrot.slane %v5277_v6, 4 }
0x17f4   :  { %v5252_v17 = vpop.permute.xlu1 %5251  ;;  %v5259_v15 = vpop.permute.xlu0 %5258 }
0x17f5   :  { %v5291_v24 = vadd.f32 %v5290_v4, %v5289_v8  ;;  %v5285_v12 = vadd.f32 %v5284_v38, %v5283_v56  ;;  %v5295_v50 = vadd.f32 %v5294_v41, %v5276_v30  ;;  %v5301_v63 = vadd.f32 %v5300_v42, %v5277_v6 }
0x17f6   :  { %v5278_v47 = vmul.f32 %v13313_v44, %v5252_v17  ;;  %v5279_v49 = vmul.f32 %v13319_v58, %v5259_v15  ;;  %v13331_v58 = vld [vmem:[%s14810_s13 + $0x38] sm:$0xff] }
0x17f7   :  { %v5292_v33 = vrot.slane %v5291_v24, 1  ;;  %v5286_v25 = vrot.slane %v5285_v12, 1  ;;  %v5296_v8 = vrot.slane %v5295_v50, 2  ;;  %v5302_v38 = vrot.slane %v5301_v63, 2  ;;  %15201 = vst [vmem:[#allocation21_spill] sm:$0xff] %v13331_v58 }
0x17f8   :  { %v5306_v41 = vrot.slane %v5278_v47, 4  ;;  %v5312_v42 = vrot.slane %v5279_v49, 4  ;;  %v5266_v56 = vpop.permute.xlu1 %5265  ;;  %v5273_v4 = vpop.permute.xlu0 %5272 }
0x17f9   :  { %v5293_v30 = vadd.f32 %v5292_v33, %v5291_v24  ;;  %v5287_v6 = vadd.f32 %v5286_v25, %v5285_v12  ;;  %v5297_v39 = vadd.f32 %v5296_v8, %v5295_v50  ;;  %v5303_v20 = vadd.f32 %v5302_v38, %v5301_v63 }
0x17fa   :  { %v5307_v17 = vadd.f32 %v5306_v41, %v5278_v47  ;;  %v5313_v44 = vadd.f32 %v5312_v42, %v5279_v49  ;;  %v5280_v15 = vmul.f32 %v13325_v46, %v5266_v56  ;;  %v5281_v26 = vmul.f32 %v13331_v58, %v5273_v4 }
0x17fb   :  { %v5331_v33 = vpack.c.bf16 %v5293_v30, %v5293_v30  ;;  %v5330_v25 = vpack.c.bf16 %v5287_v6, %v5287_v6  ;;  %v5298_v50 = vrot.slane %v5297_v39, 1  ;;  %v5304_v63 = vrot.slane %v5303_v20, 1 }
0x17fc   :  { %v5308_v47 = vrot.slane %v5307_v17, 2  ;;  %v5314_v49 = vrot.slane %v5313_v44, 2  ;;  %v5318_v24 = vrot.slane %v5280_v15, 4  ;;  %v5324_v12 = vrot.slane %v5281_v26, 4 }
0x17fd   :  { %v5299_v8 = vadd.f32 %v5298_v50, %v5297_v39  ;;  %v5305_v38 = vadd.f32 %v5304_v63, %v5303_v20  ;;  %v5347_v60 = vunpack.c.l.b16 %v5331_v33  ;;  %v5346_v62 = vunpack.c.l.b16 %v5330_v25 }
0x17fe   :  { %v5309_v41 = vadd.f32 %v5308_v47, %v5307_v17  ;;  %v5315_v42 = vadd.f32 %v5314_v49, %v5313_v44  ;;  %v5319_v56 = vadd.f32 %v5318_v24, %v5280_v15  ;;  %v5325_v46 = vadd.f32 %v5324_v12, %v5281_v26  ;;  %v13375_v12 = vld [vmem:[%s14813_s6 + $0x30] ss:$12 sps:$4 sm:$0xff]  }
0x17ff   :  { %v5332_v27 = vpack.c.bf16 %v5299_v8, %v5299_v8  ;;  %v5333_v3 = vpack.c.bf16 %v5305_v38, %v5305_v38  ;;  %v5354_v39 = vsel %vm4287_vm15, %v5347_v60, %v5346_v62  ;;  %v13389_v8 = vld [vmem:[%s14813_s6 + $0x48] ss:$12 sps:$4 sm:$0xff]   ;;  %v13403_v38 = vld [vmem:[%s14813_s6 + $0x60] ss:$12 sps:$4 sm:$0xff]  }
0x1800   :  { %v5310_v21 = vrot.slane %v5309_v41, 1  ;;  %v5316_v4 = vrot.slane %v5315_v42, 1  ;;  %v5320_v30 = vrot.slane %v5319_v56, 2  ;;  %v5326_v6 = vrot.slane %v5325_v46, 2 }
0x1801   :  { %v5348_v58 = vunpack.c.l.b16 %v5332_v27  ;;  %v5349_v20 = vunpack.c.l.b16 %v5333_v3 }
0x1802   :  { %v5311_v13 = vadd.f32 %v5310_v21, %v5309_v41  ;;  %v5317_v32 = vadd.f32 %v5316_v4, %v5315_v42  ;;  %v5321_v2 = vadd.f32 %v5320_v30, %v5319_v56  ;;  %v5327_v29 = vadd.f32 %v5326_v6, %v5325_v46  ;;  %v13417_v41 = vld [vmem:[%s14813_s6 + $0x78] ss:$12 sps:$4 sm:$0xff]   ;;  %v13431_v42 = vld [vmem:[%s14813_s6 + $0x90] ss:$12 sps:$4 sm:$0xff]   ;;  %v13445_v56 = vld [vmem:[%s14813_s6 + $0xa8] ss:$12 sps:$4 sm:$0xff]  }
0x1803   :  { %v5355_v44 = vsel %vm4289_vm10, %v5348_v58, %v5354_v39  ;;  %v13361_v58 = vld [vmem:[%s14813_s6 + $0x18] ss:$12 sps:$4 sm:$0xff]  }
0x1804   :  { %v5334_v17 = vpack.c.bf16 %v5311_v13, %v5311_v13  ;;  %v5335_v26 = vpack.c.bf16 %v5317_v32, %v5317_v32  ;;  %v5322_v15 = vrot.slane %v5321_v2, 1  ;;  %v5328_v33 = vrot.slane %v5327_v29, 1 }
0x1805   :  { %v5356_v63 = vsel %vm4291_vm11, %v5349_v20, %v5355_v44 }
0x1806   :  { %v5350_v25 = vunpack.c.l.b16 %v5334_v17  ;;  %v5323_v50 = vadd.f32 %v5322_v15, %v5321_v2  ;;  %v5351_v47 = vunpack.c.l.b16 %v5335_v26  ;;  %v5329_v49 = vadd.f32 %v5328_v33, %v5327_v29  ;;  %v13344_v2 = vld [vmem:[%s14813_s6] ss:$12 sps:$4 sm:$0xff]   ;;  %v13351_v29 = vld [vmem:[%s14813_s6 + $0x1c] ss:$12 sps:$4 sm:$0xff]  }
0x1808   :  { %v5357_v21 = vsel %vm4293_vm12, %v5350_v25, %v5356_v63  ;;  %v5336_v27 = vpack.c.bf16 %v5323_v50, %v5323_v50  ;;  %v5337_v24 = vpack.c.bf16 %v5329_v49, %v5329_v49 }
0x1809   :  { %v5358_v62 = vsel %vm4295_vm13, %v5351_v47, %v5357_v21 }
0x180a   :  { %v5352_v46 = vunpack.c.l.b16 %v5336_v27  ;;  %v5353_v3 = vunpack.c.l.b16 %v5337_v24 }
0x180c   :  { %v5359_v60 = vsel %vm4297_vm0, %v5352_v46, %v5358_v62  ;;  %v15202_v62 = vld [vmem:[#allocation46_spill] sm:$0xff] }
0x180d   :  { %v5360_v32 = vsel %vm4299_vm9, %v5353_v3, %v5359_v60 }
0x180e   :  { %v5361_v13 = vpack.c.b16 %v5360_v32, %v5360_v32 }
0x1810   :  { %5396 = vmatmul.mubr.bf16.vlgmr.msra.gmra.mrb[68].mxu1 %v5361_v13  ;;  %9253 = vmatmul.mubr.bf16.vlgmr.msra.gmra.mrb[100].mxu0 %v5361_v13  ;;  %v13507_v13 = vld [vmem:[%s14812_s5] ss:$12 sps:$4 sm:$0xff]  }
0x1811   :  { %5445 = vmatpush1.bf16.msra.mxu1 %v13344_v2  ;;  %9257 = vmatpush3.bf16.msra.mxu0 %v13046_v37  ;;  %v13368_v37 = vld [vmem:[%s14813_s6 + $0x34] ss:$12 sps:$4 sm:$0xff]   ;;  %15204 = vst [vmem:[#allocation22_spill] sm:$0xff] %v13507_v13 }
0x1812   :  { %5446 = vmatprep.subr.bf16.mxu1 %v13351_v29  ;;  %9258 = vmatprep.subr.bf16.mxu0 %v15050_v54 }
0x1813   :  { %5476 = vmatprep.mubr.bf16.mxu1 %v15049_v52  ;;  %9272 = vmatprep.mubr.msk.bf16.mxu0 %vm10793_vm1, %v15050_v54 }
0x1815   :  { %5447 = vmatpush1.bf16.msra.mxu1 %v13361_v58  ;;  %9259 = vmatpush3.bf16.msra.mxu0 %v13058_v55  ;;  %v13382_v55 = vld [vmem:[%s14813_s6 + $0x4c] ss:$12 sps:$4 sm:$0xff]  }
0x1816   :  { %5448 = vmatprep.subr.bf16.mxu1 %v13368_v37  ;;  %9260 = vmatprep.subr.bf16.mxu0 %v15050_v54 }
0x1819   :  { %5449 = vmatpush1.bf16.msra.mxu1 %v13375_v12  ;;  %9261 = vmatpush3.bf16.msra.mxu0 %v13067_v36  ;;  %v13396_v36 = vld [vmem:[%s14813_s6 + $0x64] ss:$12 sps:$4 sm:$0xff]  }
0x181a   :  { %5450 = vmatprep.subr.bf16.mxu1 %v13382_v55  ;;  %9262 = vmatprep.subr.bf16.mxu0 %v15050_v54 }
0x181d   :  { %5451 = vmatpush1.bf16.msra.mxu1 %v13389_v8  ;;  %9263 = vmatpush3.bf16.msra.mxu0 %v13076_v22  ;;  %v13410_v22 = vld [vmem:[%s14813_s6 + $0x7c] ss:$12 sps:$4 sm:$0xff]  }
0x181e   :  { %5452 = vmatprep.subr.bf16.mxu1 %v13396_v36  ;;  %9264 = vmatprep.subr.bf16.mxu0 %v15050_v54 }
0x1821   :  { %5453 = vmatpush1.bf16.msra.mxu1 %v13403_v38  ;;  %9265 = vmatpush3.bf16.msra.mxu0 %v13085_v34  ;;  %v13424_v34 = vld [vmem:[%s14813_s6 + $0x94] ss:$12 sps:$4 sm:$0xff]  }
0x1822   :  { %5454 = vmatprep.subr.bf16.mxu1 %v13410_v22  ;;  %9266 = vmatprep.subr.bf16.mxu0 %v15050_v54 }
0x1825   :  { %5455 = vmatpush1.bf16.msra.mxu1 %v13417_v41  ;;  %9267 = vmatpush3.bf16.msra.mxu0 %v13094_v31  ;;  %v13438_v31 = vld [vmem:[%s14813_s6 + $0xac] ss:$12 sps:$4 sm:$0xff]  }
0x1826   :  { %5456 = vmatprep.subr.bf16.mxu1 %v13424_v34  ;;  %9268 = vmatprep.subr.bf16.mxu0 %v15050_v54 }
0x1829   :  { %5457 = vmatpush1.bf16.msra.mxu1 %v13431_v42  ;;  %9269 = vmatpush3.bf16.msra.mxu0 %v13103_v48  ;;  %v13488_v48 = vld [vmem:[%s14812_s5 + $0x4] ss:$12 sps:$4 sm:$0xff]  }
0x182a   :  { %5458 = vmatprep.subr.bf16.mxu1 %v13438_v31  ;;  %9270 = vmatprep.subr.bf16.mxu0 %v15050_v54 }
0x182d   :  { %5459 = vmatpush1.bf16.msra.mxu1 %v13445_v56  ;;  %9271 = vmatpush3.bf16.msra.mxu0 %v13112_v45 }
0x182e   :  { %9276 = vmatprep.subr.bf16.mxu1 %v15050_v54  ;;  %9853 = vmatprep.subr.bf16.mxu0 %v15075_v51 }
0x1830   :  { %5477 = vmatmul.mubr.bf16.vlgmr.msra.gmra.mrb[68].mxu1 %v13202_v5  ;;  %9273 = vmatmul.mubr.bf16.vlgmr.msra.gmra.mrb[104].mxu0 %v13202_v5 }
0x1831   :  { %9277 = vmatpush3.bf16.msra.mxu1 %v13122_v40  ;;  %9292 = vmatprep.mubr.msk.bf16.mxu1 %vm10793_vm1, %v15050_v54 }
0x1832   :  { %9278 = vmatprep.subr.bf16.mxu1 %v15050_v54  ;;  %9855 = vmatpush3.bf16.msra.mxu0 %v15075_v51 }
0x1833   :  { %9857 = vmatprep.subr.bf16.mxu0 %v15077_v59 }
0x1835   :  { %9279 = vmatpush3.bf16.msra.mxu1 %v13133_v1 }
0x1836   :  { %9280 = vmatprep.subr.bf16.mxu1 %v15050_v54  ;;  %9859 = vmatpush3.bf16.msra.mxu0 %v15077_v59 }
0x1837   :  { %9861 = vmatprep.subr.bf16.mxu0 %v15079_v0 }
0x1839   :  { %9281 = vmatpush3.bf16.msra.mxu1 %v13142_v9 }
0x183a   :  { %9282 = vmatprep.subr.bf16.mxu1 %v15050_v54  ;;  %9863 = vmatpush3.bf16.msra.mxu0 %v15079_v0 }
0x183b   :  { %9865 = vmatprep.subr.bf16.mxu0 %v15081_v23 }
0x183d   :  { %9283 = vmatpush3.bf16.msra.mxu1 %v13151_v16 }
0x183e   :  { %9284 = vmatprep.subr.bf16.mxu1 %v15050_v54  ;;  %9867 = vmatpush3.bf16.msra.mxu0 %v15081_v23 }
0x183f   :  { %9869 = vmatprep.subr.bf16.mxu0 %v15083_v11 }
0x1841   :  { %9285 = vmatpush3.bf16.msra.mxu1 %v13160_v43 }
0x1842   :  { %9286 = vmatprep.subr.bf16.mxu1 %v15050_v54  ;;  %9871 = vmatpush3.bf16.msra.mxu0 %v15083_v11 }
0x1843   :  { %9873 = vmatprep.subr.bf16.mxu0 %v12459_v14 }
0x1845   :  { %9287 = vmatpush3.bf16.msra.mxu1 %v13169_v35 }
0x1846   :  { %9288 = vmatprep.subr.bf16.mxu1 %v15050_v54  ;;  %9875 = vmatpush3.bf16.msra.mxu0 %v12459_v14 }
0x1847   :  { %9877 = vmatprep.subr.bf16.mxu0 %v12472_v10 }
0x1849   :  { %9289 = vmatpush3.bf16.msra.mxu1 %v13178_v57 }
0x184a   :  { %9290 = vmatprep.subr.bf16.mxu1 %v15050_v54  ;;  %9879 = vmatpush3.bf16.msra.mxu0 %v12472_v10 }
0x184b   :  { %9881 = vmatprep.subr.bf16.mxu0 %v12477_v7 }
0x184d   :  { %9291 = vmatpush3.bf16.msra.mxu1 %v13187_v19 }
0x184e   :  { %9883 = vmatpush3.bf16.msra.mxu0 %v12477_v7  ;;  %5893 = vmatprep.subr.bf16.mxu1 %v13488_v48 }
0x184f   :  { %9340 = vmatprep.subr.bf16.mxu0 %v15050_v54 }
0x18e3   :  { %v5438_v45 = vpop.f32.mrb[100].mxu0 }
0x18e4   :  { %v9254_v40 = vpop.f32.mrb[101].mxu0  ;;  %v5439_v63 = vadd.f32 %v5438_v45, %v12424_v18  ;;  %v13514_v45 = vld [vmem:[%s14812_s5 + $0x1c] ss:$12 sps:$4 sm:$0xff]  }
0x18e5   :  { %v5441_v1 = vpop.f32.mrb[102].mxu0  ;;  %15205 = vst [vmem:[#allocation14_spill] sm:$0xff] %v13514_v45  ;;  %v13520_v40 = vld [vmem:[%s14812_s5 + $0x18] ss:$12 sps:$4 sm:$0xff]  }
0x18e6   :  { %v9255_v9 = vpop.f32.mrb[103].mxu0  ;;  %15206 = vst [vmem:[#allocation23_spill] sm:$0xff] %v13520_v40  ;;  %v13526_v1 = vld [vmem:[%s14812_s5 + $0x34] ss:$12 sps:$4 sm:$0xff]  }
0x18e7   :  { %15207 = vst [vmem:[#allocation15_spill] sm:$0xff] %v13526_v1  ;;  %v13532_v9 = vld [vmem:[%s14812_s5 + $0x30] ss:$12 sps:$4 sm:$0xff]  }
0x18e8   :  { %15208 = vst [vmem:[#allocation16_spill] sm:$0xff] %v13532_v9 }
0x1903   :  { %v5478_v16 = vpop.f32.mrb[68].mxu1  ;;  %v5519_v43 = vpop.f32.mrb[104].mxu0 }
0x1904   :  { %v10025_v35 = vadd.f32 %v15089_v28, %v5478_v16  ;;  %v5480_v57 = vpop.f32.mrb[69].mxu1  ;;  %v9274_v19 = vpop.f32.mrb[105].mxu0  ;;  %v5520_v25 = vadd.f32 %v5519_v43, %v12421_v53  ;;  %v13538_v16 = vld [vmem:[%s14812_s5 + $0x4c] ss:$12 sps:$4 sm:$0xff]   ;;  %v13544_v43 = vld [vmem:[%s14812_s5 + $0x48] ss:$12 sps:$4 sm:$0xff]  }
0x1905   :  { %v5482_v5 = vpop.f32.mrb[70].mxu1  ;;  %v5522_v4 = vpop.f32.mrb[106].mxu0  ;;  %v10027_v20 = vadd.f32 %v15090_v61, %v5480_v57  ;;  %15209 = vst [vmem:[#allocation17_spill] sm:$0xff] %v13538_v16  ;;  %15210 = vst [vmem:[#allocation18_spill] sm:$0xff] %v13544_v43  ;;  %v13556_v57 = vld [vmem:[%s14812_s5 + $0x60] ss:$12 sps:$4 sm:$0xff]  }
0x1906   :  { %v8211_v30 = vmul.f32 -1.442695, %v10025_v35  ;;  %v5483_v6 = vpop.f32.mrb[71].mxu1  ;;  %v9275_v39 = vpop.f32.mrb[107].mxu0  ;;  %v13550_v35 = vld [vmem:[%s14812_s5 + $0x64] ss:$12 sps:$4 sm:$0xff]  }
0x1907   :  { %v8212_v44 = vmul.f32 -1.442695, %v10027_v20  ;;  %15211 = vst [vmem:[#allocation27_spill] sm:$0xff] %v13550_v35  ;;  %15212 = vst [vmem:[#allocation29_spill] sm:$0xff] %v13556_v57  ;;  %v13562_v19 = vld [vmem:[%s14812_s5 + $0x7c] ss:$12 sps:$4 sm:$0xff]  }
0x1908   :  { %10454 = vpow2.f32 %v8211_v30  ;;  %15213 = vst [vmem:[#allocation53_spill] sm:$0xff] %v13562_v19  ;;  %v13568_v5 = vld [vmem:[%s14812_s5 + $0x78] ss:$12 sps:$4 sm:$0xff]   ;;  %v13574_v4 = vld [vmem:[%s14812_s5 + $0x94] ss:$12 sps:$4 sm:$0xff]  }
0x1909   :  { %10456 = vpow2.f32 %v8212_v44  ;;  %15214 = vst [vmem:[#allocation54_spill] sm:$0xff] %v13568_v5  ;;  %15215 = vst [vmem:[#allocation55_spill] sm:$0xff] %v13574_v4  ;;  %v13580_v30 = vld [vmem:[%s14812_s5 + $0x90] ss:$12 sps:$4 sm:$0xff]   ;;  %v13586_v6 = vld [vmem:[%s14812_s5 + $0xac] ss:$12 sps:$4 sm:$0xff]  }
0x190a   :  { %15216 = vst [vmem:[#allocation56_spill] sm:$0xff] %v13580_v30  ;;  %15217 = vst [vmem:[#allocation57_spill] sm:$0xff] %v13586_v6  ;;  %v13592_v39 = vld [vmem:[%s14812_s5 + $0xa8] ss:$12 sps:$4 sm:$0xff]   ;;  %v13598_v20 = vld [vmem:[%s14813_s6 + $0x4] ss:$12 sps:$4 sm:$0xff]  }
0x190b   :  { %15218 = vst [vmem:[#allocation58_spill] sm:$0xff] %v13592_v39  ;;  %15219 = vst [vmem:[#allocation59_spill] sm:$0xff] %v13598_v20 }
0x1912   :  { %v10455_v17 = vpop.eup %10454 }
0x1913   :  { %v5529_v26 = vadd.f32 1.0, %v10455_v17  ;;  %v10457_v15 = vpop.eup %10456  ;;  %v15220_v17 = vld [vmem:[#allocation8_spill] sm:$0xff] }
0x1914   :  { %v5536_v33 = vadd.f32 1.0, %v10457_v15  ;;  %v15221_v15 = vld [vmem:[#allocation10_spill] sm:$0xff] }
0x1915   :  { %10458 = vrcp.f32 %v5529_v26 }
0x1916   :  { %10460 = vrcp.f32 %v5536_v33 }
0x191f   :  { %v10459_v50 = vpop.eup %10458 }
0x1920   :  { %v5539_v47 = vmul.f32 %v10459_v50, %v5520_v25  ;;  %v10461_v21 = vpop.eup %10460  ;;  %v15222_v25 = vld [vmem:[#allocation7_spill] sm:$0xff] }
0x1921   :  { %v5542_v27 = vsub.f32 1.0, %v10461_v21  ;;  %v5544_v3 = vmul.f32 %v10461_v21, %v15202_v62  ;;  %v15224_v21 = vld [vmem:[#allocation25_spill] sm:$0xff]  ;;  %v15226_v62 = vld [vmem:[#allocation24_spill] sm:$0xff] }
0x1922   :  { %v5540_v49 = vadd.f32 %v5539_v47, %v5439_v63  ;;  %v15223_v63 = vld [vmem:[#allocation9_spill] sm:$0xff] }
0x1924   :  { %10462 = vtanh.f32 %v5540_v49 }
0x192e   :  { %v10463_v24 = vpop.eup %10462 }
0x192f   :  { %v5543_v46 = vmul.f32 %v10463_v24, %v5542_v27  ;;  %v15225_v24 = vld [vmem:[#allocation28_spill] sm:$0xff] }
0x1931   :  { %v13497_v60 = vadd.f32 %v5544_v3, %v5543_v46 }
0x1933   :  { %15203 = vst [vmem:[#allocation13_spill] sm:$0xff] %v13497_v60  ;;  %v13501_v32 = vpack.c.bf16 %v13497_v60, %v13497_v60 }
0x1935   :  { %9293 = vmatmul.mubr.bf16.vlgmr.msra.gmra.mrb[72].mxu1 %v13501_v32 }
0x1936   :  { %5894 = vmatpush1.bf16.msra.mxu1 %v13507_v13  ;;  %5925 = vmatprep.mubr.bf16.mxu1 %v15049_v52 }
0x1937   :  { %5895 = vmatprep.subr.bf16.mxu1 %v13514_v45 }
0x193a   :  { %5896 = vmatpush1.bf16.msra.mxu1 %v13520_v40 }
0x193b   :  { %5897 = vmatprep.subr.bf16.mxu1 %v13526_v1 }
0x193e   :  { %5898 = vmatpush1.bf16.msra.mxu1 %v13532_v9 }
0x193f   :  { %5899 = vmatprep.subr.bf16.mxu1 %v13538_v16 }
0x1942   :  { %5900 = vmatpush1.bf16.msra.mxu1 %v13544_v43 }
0x1943   :  { %5901 = vmatprep.subr.bf16.mxu1 %v13550_v35  ;;  %v15264_v35 = vld [vmem:[#allocation12_spill] sm:$0xff] }
0x1946   :  { %5902 = vmatpush1.bf16.msra.mxu1 %v13556_v57 }
0x1947   :  { %5903 = vmatprep.subr.bf16.mxu1 %v13562_v19  ;;  %v15242_v19 = vld [vmem:[#allocation37_spill] sm:$0xff] }
0x194a   :  { %5904 = vmatpush1.bf16.msra.mxu1 %v13568_v5 }
0x194b   :  { %5905 = vmatprep.subr.bf16.mxu1 %v13574_v4 }
0x194e   :  { %5906 = vmatpush1.bf16.msra.mxu1 %v13580_v30 }
0x194f   :  { %5907 = vmatprep.subr.bf16.mxu1 %v13586_v6 }
0x1952   :  { %5908 = vmatpush1.bf16.msra.mxu1 %v13592_v39  ;;  %v15227_v39 = vld [vmem:[#allocation26_spill] sm:$0xff] }
0x1953   :  { %5974 = vmatprep.subr.bf16.mxu1 %v13598_v20 }
0x1a08   :  { %v5581_v44 = vpop.f32.mrb[72].mxu1 }
0x1a09   :  { %v5587_v26 = vadd.f32 %v5581_v44, %v15220_v17  ;;  %v5588_v33 = vadd.f32 %v5581_v44, %v15221_v15  ;;  %v5589_v50 = vadd.f32 %v15222_v25, %v5581_v44  ;;  %v5590_v47 = vadd.f32 %v15223_v63, %v5581_v44  ;;  %v9294_v49 = vpop.f32.mrb[73].mxu1  ;;  %v15241_v17 = vld [vmem:[#allocation36_spill] sm:$0xff] }
0x1a0a   :  { %v5591_v27 = vadd.f32 %v5581_v44, %v15224_v21  ;;  %v5592_v46 = vadd.f32 %v5581_v44, %v15225_v24  ;;  %v5593_v3 = vadd.f32 %v15226_v62, %v5581_v44  ;;  %v5594_v6 = vadd.f32 %v15227_v39, %v5581_v44  ;;  %v5584_v30 = vpop.f32.mrb[74].mxu1  ;;  %v13612_v44 = vld [vmem:[%s14812_s5 + $0x8] ss:$12 sps:$4 sm:$0xff]   ;;  %v15240_v21 = vld [vmem:[#allocation35_spill] sm:$0xff] }
0x1a0b   :  { %10464 = vtanh.f32 %v5587_v26  ;;  %v9295_v20 = vpop.f32.mrb[75].mxu1  ;;  %15228 = vst [vmem:[#allocation60_spill] sm:$0xff] %v13612_v44  ;;  %v13619_v26 = vld [vmem:[%s14812_s5 + $0x20] ss:$12 sps:$4 sm:$0xff]  }
0x1a0c   :  { %10466 = vtanh.f32 %v5588_v33  ;;  %15229 = vst [vmem:[#allocation61_spill] sm:$0xff] %v13619_v26 }
0x1a0d   :  { %10468 = vtanh.f32 %v5589_v50 }
0x1a0e   :  { %10470 = vtanh.f32 %v5590_v47  ;;  %v13642_v47 = vld [vmem:[%s14812_s5 + $0x68] ss:$12 sps:$4 sm:$0xff]  }
0x1a0f   :  { %10472 = vtanh.f32 %v5591_v27  ;;  %15232 = vst [vmem:[#allocation40_spill] sm:$0xff] %v13642_v47  ;;  %v13649_v27 = vld [vmem:[%s14812_s5 + $0x80] ss:$12 sps:$4 sm:$0xff]  }
0x1a10   :  { %10474 = vtanh.f32 %v5592_v46  ;;  %15233 = vst [vmem:[#allocation63_spill] sm:$0xff] %v13649_v27  ;;  %v13656_v46 = vld [vmem:[%s14812_s5 + $0x98] ss:$12 sps:$4 sm:$0xff]  }
0x1a11   :  { %10476 = vtanh.f32 %v5593_v3  ;;  %15234 = vst [vmem:[#allocation46_spill] sm:$0xff] %v13656_v46  ;;  %v13663_v3 = vld [vmem:[%s14812_s5 + $0xb0] ss:$12 sps:$4 sm:$0xff]  }
0x1a12   :  { %10478 = vtanh.f32 %v5594_v6  ;;  %15235 = vst [vmem:[#allocation64_spill] sm:$0xff] %v13663_v3 }
0x1a15   :  { %v10465_v25 = vpop.eup %10464 }
0x1a16   :  { %v10467_v63 = vpop.eup %10466  ;;  %9328 = vmatprep.mubr.f32.mxu0 %v10465_v25  ;;  %v13626_v25 = vld [vmem:[%s14812_s5 + $0x38] ss:$12 sps:$4 sm:$0xff]  }
0x1a17   :  { %v10469_v49 = vpop.eup %10468  ;;  %9329 = vmatmul.mubr.f32.vlgmr.msra.gmra.mrb[108].mxu0 %v10467_v63  ;;  %15230 = vst [vmem:[#allocation62_spill] sm:$0xff] %v13626_v25  ;;  %v13633_v63 = vld [vmem:[%s14812_s5 + $0x50] ss:$12 sps:$4 sm:$0xff]  }
0x1a18   :  { %9331 = vmatprep.mubr.f32.mxu0 %v10469_v49  ;;  %9341 = vmatpush3.bf16.msra.mxu0 %v13612_v44  ;;  %v10471_v30 = vpop.eup %10470  ;;  %15231 = vst [vmem:[#allocation39_spill] sm:$0xff] %v13633_v63 }
0x1a19   :  { %9342 = vmatprep.subr.bf16.mxu0 %v15050_v54  ;;  %v10473_v20 = vpop.eup %10472 }
0x1a1a   :  { %v10475_v6 = vpop.eup %10474 }
0x1a1b   :  { %9332 = vmatmul.mubr.f32.gmra.mrb[110].mxu0 %v10471_v30  ;;  %v10477_v33 = vpop.eup %10476  ;;  %v15236_v30 = vld [vmem:[#allocation31_spill] sm:$0xff] }
0x1a1c   :  { %9334 = vmatprep.mubr.f32.mxu0 %v10473_v20  ;;  %9343 = vmatpush3.bf16.msra.mxu0 %v13619_v26  ;;  %v10479_v50 = vpop.eup %10478  ;;  %v15239_v26 = vld [vmem:[#allocation34_spill] sm:$0xff] }
0x1a1d   :  { %9344 = vmatprep.subr.bf16.mxu0 %v15050_v54 }
0x1a1f   :  { %9335 = vmatmul.mubr.f32.gmra.mrb[112].mxu0 %v10475_v6 }
0x1a20   :  { %9337 = vmatprep.mubr.f32.mxu0 %v10477_v33  ;;  %9345 = vmatpush3.bf16.msra.mxu0 %v13626_v25  ;;  %v15237_v33 = vld [vmem:[#allocation32_spill] sm:$0xff] }
0x1a21   :  { %9346 = vmatprep.subr.bf16.mxu0 %v15050_v54 }
0x1a23   :  { %9338 = vmatmul.mubr.f32.gmra.mrb[114].mxu0 %v10479_v50 }
0x1a24   :  { %9347 = vmatpush3.bf16.msra.mxu0 %v13633_v63  ;;  %9356 = vmatprep.mubr.msk.bf16.mxu0 %vm10793_vm1, %v15050_v54  ;;  %v15238_v63 = vld [vmem:[#allocation33_spill] sm:$0xff] }
0x1a25   :  { %9348 = vmatprep.subr.bf16.mxu0 %v15050_v54 }
0x1a28   :  { %9349 = vmatpush3.bf16.msra.mxu0 %v13642_v47 }
0x1a29   :  { %9350 = vmatprep.subr.bf16.mxu0 %v15050_v54 }
0x1a2c   :  { %9351 = vmatpush3.bf16.msra.mxu0 %v13649_v27 }
0x1a2d   :  { %9352 = vmatprep.subr.bf16.mxu0 %v15050_v54 }
0x1a30   :  { %9353 = vmatpush3.bf16.msra.mxu0 %v13656_v46 }
0x1a31   :  { %9354 = vmatprep.subr.bf16.mxu0 %v15050_v54 }
0x1a34   :  { %9355 = vmatpush3.bf16.msra.mxu0 %v13663_v3 }
0x1a35   :  { %9360 = vmatprep.subr.bf16.mxu0 %v15050_v54 }
0x1aea   :  { %v9330_v49 = vpop.f32.mrb[108].mxu0 }
0x1aeb   :  { %v5709_v20 = vmul.f32 %v9330_v49, %v15236_v30  ;;  %v5669_v6 = vpop.f32.mrb[109].mxu0 }
0x1aec   :  { %v5708_v50 = vmul.f32 %v15237_v33, %v5669_v6 }
0x1aee   :  { %v5716_v27 = vadd.f32 %v5709_v20, %v5708_v50  ;;  %v9333_v47 = vpop.f32.mrb[110].mxu0  ;;  %v15243_v50 = vld [vmem:[#allocation38_spill] sm:$0xff] }
0x1aef   :  { %v5679_v46 = vpop.f32.mrb[111].mxu0  ;;  %v5711_v44 = vmul.f32 %v9333_v47, %v15239_v26 }
0x1af0   :  { %v5710_v25 = vmul.f32 %v15238_v63, %v5679_v46  ;;  %v15244_v46 = vld [vmem:[#allocation47_spill] sm:$0xff]  ;;  %v15245_v63 = vld [vmem:[#allocation30_spill] sm:$0xff] }
0x1af2   :  { %v5717_v39 = vadd.f32 %v5716_v27, %v5710_v25  ;;  %v9336_v62 = vpop.f32.mrb[112].mxu0  ;;  %v13679_v25 = vsel %vm5214_vm8, 0.0, %v15244_v46  ;;  %v15249_v46 = vld [vmem:[#allocation52_spill] sm:$0xff] }
0x1af3   :  { %v5689_v24 = vpop.f32.mrb[113].mxu0  ;;  %v5713_v4 = vmul.f32 %v9336_v62, %v15241_v17  ;;  %15247 = vst [vmem:[#allocation47_spill] sm:$0xff] %v13679_v25  ;;  %vm5723_vm4 = vcmp.gt.f32.partialorder %v13679_v25, 0.0 }
0x1af4   :  { %v5712_v3 = vmul.f32 %v15240_v21, %v5689_v24  ;;  %v5718_v15 = vadd.f32 %v5717_v39, %v5711_v44 }
0x1af6   :  { %v5719_v5 = vadd.f32 %v5718_v15, %v5712_v3  ;;  %v9339_v49 = vpop.f32.mrb[114].mxu0 }
0x1af7   :  { %v5699_v30 = vpop.f32.mrb[115].mxu0  ;;  %v5715_v33 = vmul.f32 %v9339_v49, %v15243_v50  ;;  %v15262_v50 = vld [vmem:[#allocation11_spill] sm:$0xff] }
0x1af8   :  { %v5714_v6 = vmul.f32 %v15242_v19, %v5699_v30  ;;  %v5720_v20 = vadd.f32 %v5719_v5, %v5713_v4 }
0x1afa   :  { %v5721_v57 = vadd.f32 %v5720_v20, %v5714_v6 }
0x1afc   :  { %v5722_v27 = vadd.f32 %v5721_v57, %v5715_v33 }
0x1afe   :  { %v5724_v39 = vsel %vm5723_vm4, %v5722_v27, -1e+09 }
0x1aff   :  { %5725 = vmax.xlane.f32.xlu1 %v5724_v39 }
0x1b8c   :  { %v5726_v15 = vpop.xlane.xlu1 %5725 }
0x1b8d   :  { %vm5727_vm14 = vcmp.eq.f32.partialorder %v5724_v39, %v5726_v15  ;;  %v15251_v39 = vld [vmem:[#allocation6_spill] sm:$0xff] }
0x1b8e   :  { %v5728_v24 = vsel %vm5727_vm14, %v15245_v63, 128 }
0x1b8f   :  { %v5730_v62 = vshra.s32 %v5728_v24, 16  ;;  %v5729_v4 = vand.u32 65535, %v5728_v24  ;;  %v15252_v24 = vld [vmem:[#allocation5_spill] sm:$0xff] }
0x1b91   :  { %v5732_v5 = vcvt.s32.f32 %v5730_v62  ;;  %v5731_v3 = vcvt.s32.f32 %v5729_v4 }
0x1b93   :  { %5733 = vmin.xlane.f32.xlu0 %v5732_v5 }
0x1c20   :  { %v5734_v44 = vpop.xlane.xlu0 %5733 }
0x1c21   :  { %vm5735_vm7 = vcmp.eq.f32.partialorder %v5732_v5, %v5734_v44  ;;  %v5740_v49 = vcvt.f32.s32 %v5734_v44  ;;  %v15253_v5 = vld [vmem:[#allocation4_spill] sm:$0xff] }
0x1c22   :  { %v5736_v30 = vsel %vm5735_vm7, %v5731_v3, inf  ;;  %v15254_v44 = vld [vmem:[#allocation44_spill] sm:$0xff] }
0x1c23   :  { %5737 = vmin.xlane.f32.xlu0 %v5736_v30  ;;  %v5741_v57 = vshll.u32 %v5740_v49, 16  ;;  %v15255_v30 = vld [vmem:[#allocation43_spill] sm:$0xff] }
0x1cb0   :  { %v5738_v6 = vpop.xlane.xlu0 %5737 }
0x1cb1   :  { %v5739_v33 = vcvt.f32.s32 %v5738_v6  ;;  %v15256_v6 = vld [vmem:[#allocation45_spill] sm:$0xff] }
0x1cb3   :  { %v13683_v20 = vadd.s32 %v5741_v57, %v5739_v33  ;;  %v15257_v33 = vld [vmem:[#allocation41_spill] sm:$0xff] }
0x1cb5   :  { %15248 = vst [vmem:[#allocation49_spill] sm:$0xff] %v13683_v20  ;;  %v13689_v47 = vsel %vm3310_vm5, %v13683_v20, %v15249_v46  ;;  %vm5744_vm2 = vcmp.eq.s32.totalorder %v15245_v63, %v13683_v20  ;;  %v15260_v20 = vld [vmem:[#allocation48_spill] sm:$0xff] }
0x1cb6   :  { %15250 = vst [vmem:[#allocation52_spill] sm:$0xff] %v13689_v47  ;;  %v8213_v27 = vsel %vm5744_vm2, 1.0, %v15050_v54 }
0x1cb7   :  { %v5758_v15 = vrot.slane %v8213_v27, %v15251_v39  ;;  %v5751_v62 = vrot.slane %v8213_v27, %v15252_v24  ;;  %v5765_v4 = vrot.slane %v8213_v27, %v15253_v5  ;;  %v5779_v3 = vrot.slane %v8213_v27, %v15254_v44  ;;  %v15258_v39 = vld [vmem:[#allocation42_spill] sm:$0xff]  ;;  %v15259_v24 = vld [vmem:[#allocation51_spill] sm:$0xff] }
0x1cb8   :  { %v5772_v49 = vrot.slane %v8213_v27, %v15255_v30  ;;  %v5793_v57 = vrot.slane %v8213_v27, %v15256_v6  ;;  %v5786_v46 = vrot.slane %v8213_v27, %v15257_v33  ;;  %v5800_v47 = vrot.slane %v8213_v27, %v15258_v39 }
0x1cb9   :  { %5760 = vbcast.lane.b32.xlu1 %v5758_v15, 256  ;;  %5753 = vbcast.lane.b32.xlu0 %v5751_v62, 256 }
0x1cbd   :  { %5767 = vbcast.lane.b32.xlu1 %v5765_v4, 256  ;;  %5781 = vbcast.lane.b32.xlu0 %v5779_v3, 256 }
0x1cc1   :  { %5774 = vbcast.lane.b32.xlu1 %v5772_v49, 256  ;;  %5795 = vbcast.lane.b32.xlu0 %v5793_v57, 256  ;;  %v15261_v49 = vld [vmem:[#allocation50_spill] sm:$0xff] }
0x1cc5   :  { %5788 = vbcast.lane.b32.xlu1 %v5786_v46, 256 }
0x1cc9   :  { %5802 = vbcast.lane.b32.xlu1 %v5800_v47, 256 }
0x1d2b   :  { %v5761_v15 = vpop.permute.xlu1 %5760  ;;  %v5754_v62 = vpop.permute.xlu0 %5753 }
0x1d2c   :  { %v5805_v5 = vmul.f32 %v15259_v24, %v5761_v15  ;;  %v5804_v44 = vmul.f32 %v15260_v20, %v5754_v62  ;;  %v15263_v62 = vld [vmem:[#allocation19_spill] sm:$0xff] }
0x1d2e   :  { %v5818_v4 = vrot.slane %v5805_v5, 4  ;;  %v5812_v3 = vrot.slane %v5804_v44, 4 }
0x1d2f   :  { %v5768_v63 = vpop.permute.xlu1 %5767  ;;  %v5782_v30 = vpop.permute.xlu0 %5781 }
0x1d30   :  { %v5819_v25 = vadd.f32 %v5818_v4, %v5805_v5  ;;  %v5813_v6 = vadd.f32 %v5812_v3, %v5804_v44  ;;  %v5806_v57 = vmul.f32 %v15261_v49, %v5768_v63  ;;  %v5808_v33 = vmul.f32 %v15262_v50, %v5782_v30 }
0x1d32   :  { %v5820_v46 = vrot.slane %v5819_v25, 2  ;;  %v5814_v19 = vrot.slane %v5813_v6, 2  ;;  %v5824_v27 = vrot.slane %v5806_v57, 4  ;;  %v5836_v47 = vrot.slane %v5808_v33, 4 }
0x1d33   :  { %v5775_v39 = vpop.permute.xlu1 %5774  ;;  %v5796_v17 = vpop.permute.xlu0 %5795 }
0x1d34   :  { %v5821_v21 = vadd.f32 %v5820_v46, %v5819_v25  ;;  %v5815_v24 = vadd.f32 %v5814_v19, %v5813_v6  ;;  %v5825_v15 = vadd.f32 %v5824_v27, %v5806_v57  ;;  %v5837_v20 = vadd.f32 %v5836_v47, %v5808_v33  ;;  %v15265_v19 = vld [vmem:[#allocation20_spill] sm:$0xff] }
0x1d35   :  { %v5807_v26 = vmul.f32 %v15263_v62, %v5775_v39  ;;  %v5810_v43 = vmul.f32 %v15264_v35, %v5796_v17 }
0x1d36   :  { %v5822_v5 = vrot.slane %v5821_v21, 1  ;;  %v5816_v44 = vrot.slane %v5815_v24, 1  ;;  %v5826_v4 = vrot.slane %v5825_v15, 2  ;;  %v5838_v63 = vrot.slane %v5837_v20, 2 }
0x1d37   :  { %v5830_v3 = vrot.slane %v5807_v26, 4  ;;  %v5848_v50 = vrot.slane %v5810_v43, 4  ;;  %v5789_v30 = vpop.permute.xlu1 %5788 }
0x1d38   :  { %v5823_v49 = vadd.f32 %v5822_v5, %v5821_v21  ;;  %v5817_v16 = vadd.f32 %v5816_v44, %v5815_v24  ;;  %v5827_v9 = vadd.f32 %v5826_v4, %v5825_v15  ;;  %v5839_v1 = vadd.f32 %v5838_v63, %v5837_v20  ;;  %v15266_v21 = vld [vmem:[#allocation21_spill] sm:$0xff] }
0x1d39   :  { %v5831_v40 = vadd.f32 %v5830_v3, %v5807_v26  ;;  %v5849_v25 = vadd.f32 %v5848_v50, %v5810_v43  ;;  %v5809_v6 = vmul.f32 %v15265_v19, %v5789_v30 }
0x1d3a   :  { %v5828_v33 = vrot.slane %v5827_v9, 1  ;;  %v5861_v17 = vpack.c.bf16 %v5823_v49, %v5823_v49  ;;  %v5860_v27 = vpack.c.bf16 %v5817_v16, %v5817_v16  ;;  %v5840_v62 = vrot.slane %v5839_v1, 1 }
0x1d3b   :  { %v5832_v57 = vrot.slane %v5831_v40, 2  ;;  %v5850_v39 = vrot.slane %v5849_v25, 2  ;;  %v5842_v46 = vrot.slane %v5809_v6, 4  ;;  %v5803_v35 = vpop.permute.xlu1 %5802 }
0x1d3c   :  { %v5829_v47 = vadd.f32 %v5828_v33, %v5827_v9  ;;  %v5811_v24 = vmul.f32 %v15266_v21, %v5803_v35  ;;  %v5877_v5 = vunpack.c.l.b16 %v5861_v17  ;;  %v5841_v44 = vadd.f32 %v5840_v62, %v5839_v1 }
0x1d3d   :  { %v5833_v45 = vadd.f32 %v5832_v57, %v5831_v40  ;;  %v5851_v13 = vadd.f32 %v5850_v39, %v5849_v25  ;;  %v5843_v60 = vadd.f32 %v5842_v46, %v5809_v6  ;;  %v5876_v63 = vunpack.c.l.b16 %v5860_v27 }
0x1d3e   :  { %v5862_v15 = vpack.c.bf16 %v5829_v47, %v5829_v47  ;;  %v5854_v43 = vrot.slane %v5811_v24, 4  ;;  %v5864_v40 = vpack.c.bf16 %v5841_v44, %v5841_v44 }
0x1d3f   :  { %v5834_v20 = vrot.slane %v5833_v45, 1  ;;  %v5844_v26 = vrot.slane %v5843_v60, 2  ;;  %v5852_v4 = vrot.slane %v5851_v13, 1  ;;  %v5884_v6 = vsel %vm4287_vm15, %v5877_v5, %v5876_v63  ;;  %v13724_v5 = vld [vmem:[%s14813_s6 + $0x8] ss:$12 sps:$4 sm:$0xff]  }
0x1d40   :  { %v5855_v30 = vadd.f32 %v5854_v43, %v5811_v24  ;;  %v5878_v49 = vunpack.c.l.b16 %v5862_v15 }
0x1d41   :  { %v5835_v3 = vadd.f32 %v5834_v20, %v5833_v45  ;;  %v5845_v50 = vadd.f32 %v5844_v26, %v5843_v60  ;;  %v5853_v25 = vadd.f32 %v5852_v4, %v5851_v13  ;;  %v5880_v45 = vunpack.c.l.b16 %v5864_v40 }
0x1d42   :  { %v5856_v19 = vrot.slane %v5855_v30, 2  ;;  %v5885_v46 = vsel %vm4289_vm10, %v5878_v49, %v5884_v6 }
0x1d43   :  { %v5863_v16 = vpack.c.bf16 %v5835_v3, %v5835_v3  ;;  %v5846_v9 = vrot.slane %v5845_v50, 1  ;;  %v5866_v60 = vpack.c.bf16 %v5853_v25, %v5853_v25 }
0x1d44   :  { %v5857_v39 = vadd.f32 %v5856_v19, %v5855_v30 }
0x1d45   :  { %v5879_v33 = vunpack.c.l.b16 %v5863_v16  ;;  %v5847_v57 = vadd.f32 %v5846_v9, %v5845_v50  ;;  %v5882_v24 = vunpack.c.l.b16 %v5866_v60 }
0x1d46   :  { %v5858_v17 = vrot.slane %v5857_v39, 1 }
0x1d47   :  { %v5886_v1 = vsel %vm4291_vm11, %v5879_v33, %v5885_v46  ;;  %v5865_v35 = vpack.c.bf16 %v5847_v57, %v5847_v57 }
0x1d48   :  { %v5859_v47 = vadd.f32 %v5858_v17, %v5857_v39  ;;  %v5887_v62 = vsel %vm4293_vm12, %v5880_v45, %v5886_v1 }
0x1d49   :  { %v5881_v27 = vunpack.c.l.b16 %v5865_v35 }
0x1d4a   :  { %v5867_v13 = vpack.c.bf16 %v5859_v47, %v5859_v47 }
0x1d4b   :  { %v5888_v21 = vsel %vm4295_vm13, %v5881_v27, %v5887_v62 }
0x1d4c   :  { %v5883_v15 = vunpack.c.l.b16 %v5867_v13  ;;  %v5889_v20 = vsel %vm4297_vm0, %v5882_v24, %v5888_v21  ;;  %v15267_v24 = vld [vmem:[#allocation13_spill] sm:$0xff] }
0x1d4e   :  { %v5890_v26 = vsel %vm4299_vm9, %v5883_v15, %v5889_v20 }
0x1d4f   :  { %v5891_v43 = vpack.c.b16 %v5890_v26, %v5890_v26 }
0x1d51   :  { %5926 = vmatmul.mubr.bf16.vlgmr.msra.gmra.mrb[76].mxu1 %v5891_v43  ;;  %9357 = vmatmul.mubr.bf16.vlgmr.msra.gmra.mrb[116].mxu0 %v5891_v43  ;;  %v15269_v43 = vld [vmem:[#allocation22_spill] sm:$0xff] }
0x1d52   :  { %5975 = vmatpush1.bf16.msra.mxu1 %v13344_v2  ;;  %9361 = vmatpush3.bf16.msra.mxu0 %v13724_v5  ;;  %v13736_v2 = vld [vmem:[%s14813_s6 + $0x20] ss:$12 sps:$4 sm:$0xff]  }
0x1d53   :  { %5976 = vmatprep.subr.bf16.mxu1 %v13351_v29  ;;  %9362 = vmatprep.subr.bf16.mxu0 %v15050_v54  ;;  %v13745_v29 = vld [vmem:[%s14813_s6 + $0x38] ss:$12 sps:$4 sm:$0xff]  }
0x1d54   :  { %6006 = vmatprep.mubr.bf16.mxu1 %v15049_v52  ;;  %9376 = vmatprep.mubr.msk.bf16.mxu0 %vm10793_vm1, %v15050_v54 }
0x1d56   :  { %5977 = vmatpush1.bf16.msra.mxu1 %v13361_v58  ;;  %9363 = vmatpush3.bf16.msra.mxu0 %v13736_v2  ;;  %v13754_v58 = vld [vmem:[%s14813_s6 + $0x50] ss:$12 sps:$4 sm:$0xff]  }
0x1d57   :  { %5978 = vmatprep.subr.bf16.mxu1 %v13368_v37  ;;  %9364 = vmatprep.subr.bf16.mxu0 %v15050_v54  ;;  %v13763_v37 = vld [vmem:[%s14813_s6 + $0x68] ss:$12 sps:$4 sm:$0xff]  }
0x1d5a   :  { %5979 = vmatpush1.bf16.msra.mxu1 %v13375_v12  ;;  %9365 = vmatpush3.bf16.msra.mxu0 %v13745_v29  ;;  %v13772_v12 = vld [vmem:[%s14813_s6 + $0x80] ss:$12 sps:$4 sm:$0xff]  }
0x1d5b   :  { %5980 = vmatprep.subr.bf16.mxu1 %v13382_v55  ;;  %9366 = vmatprep.subr.bf16.mxu0 %v15050_v54  ;;  %v13781_v55 = vld [vmem:[%s14813_s6 + $0x98] ss:$12 sps:$4 sm:$0xff]  }
0x1d5e   :  { %5981 = vmatpush1.bf16.msra.mxu1 %v13389_v8  ;;  %9367 = vmatpush3.bf16.msra.mxu0 %v13754_v58  ;;  %v13790_v8 = vld [vmem:[%s14813_s6 + $0xb0] ss:$12 sps:$4 sm:$0xff]  }
0x1d5f   :  { %5982 = vmatprep.subr.bf16.mxu1 %v13396_v36  ;;  %9368 = vmatprep.subr.bf16.mxu0 %v15050_v54  ;;  %v13800_v36 = vld [vmem:[%s14814_s10] sm:$0xff]  }
0x1d62   :  { %5983 = vmatpush1.bf16.msra.mxu1 %v13403_v38  ;;  %9369 = vmatpush3.bf16.msra.mxu0 %v13763_v37  ;;  %v13811_v38 = vld [vmem:[%s14814_s10 + $0x8] sm:$0xff]  }
0x1d63   :  { %5984 = vmatprep.subr.bf16.mxu1 %v13410_v22  ;;  %9370 = vmatprep.subr.bf16.mxu0 %v15050_v54  ;;  %v13820_v22 = vld [vmem:[%s14814_s10 + $0x10] sm:$0xff]  }
0x1d66   :  { %5985 = vmatpush1.bf16.msra.mxu1 %v13417_v41  ;;  %9371 = vmatpush3.bf16.msra.mxu0 %v13772_v12  ;;  %v13829_v41 = vld [vmem:[%s14814_s10 + $0x18] sm:$0xff]  }
0x1d67   :  { %5986 = vmatprep.subr.bf16.mxu1 %v13424_v34  ;;  %9372 = vmatprep.subr.bf16.mxu0 %v15050_v54  ;;  %v13838_v34 = vld [vmem:[%s14814_s10 + $0x20] sm:$0xff]  }
0x1d6a   :  { %5987 = vmatpush1.bf16.msra.mxu1 %v13431_v42  ;;  %9373 = vmatpush3.bf16.msra.mxu0 %v13781_v55  ;;  %v13847_v42 = vld [vmem:[%s14814_s10 + $0x28] sm:$0xff]  }
0x1d6b   :  { %5988 = vmatprep.subr.bf16.mxu1 %v13438_v31  ;;  %9374 = vmatprep.subr.bf16.mxu0 %v15050_v54  ;;  %v13856_v31 = vld [vmem:[%s14814_s10 + $0x30] sm:$0xff]  }
0x1d6e   :  { %5989 = vmatpush1.bf16.msra.mxu1 %v13445_v56  ;;  %9375 = vmatpush3.bf16.msra.mxu0 %v13790_v8  ;;  %v13865_v56 = vld [vmem:[%s14814_s10 + $0x38] sm:$0xff]  }
0x1d6f   :  { %9380 = vmatprep.subr.bf16.mxu1 %v15050_v54  ;;  %9885 = vmatprep.subr.bf16.mxu0 %v15075_v51 }
0x1d71   :  { %6007 = vmatmul.mubr.bf16.vlgmr.msra.gmra.mrb[76].mxu1 %v13501_v32  ;;  %9377 = vmatmul.mubr.bf16.vlgmr.msra.gmra.mrb[120].mxu0 %v13501_v32 }
0x1d72   :  { %9381 = vmatpush3.bf16.msra.mxu1 %v13800_v36  ;;  %9396 = vmatprep.mubr.msk.bf16.mxu1 %vm10793_vm1, %v15050_v54 }
0x1d73   :  { %9382 = vmatprep.subr.bf16.mxu1 %v15050_v54  ;;  %9887 = vmatpush3.bf16.msra.mxu0 %v15075_v51 }
0x1d74   :  { %9889 = vmatprep.subr.bf16.mxu0 %v15077_v59 }
0x1d76   :  { %9383 = vmatpush3.bf16.msra.mxu1 %v13811_v38 }
0x1d77   :  { %9384 = vmatprep.subr.bf16.mxu1 %v15050_v54  ;;  %9891 = vmatpush3.bf16.msra.mxu0 %v15077_v59 }
0x1d78   :  { %9893 = vmatprep.subr.bf16.mxu0 %v15079_v0 }
0x1d7a   :  { %9385 = vmatpush3.bf16.msra.mxu1 %v13820_v22 }
0x1d7b   :  { %9386 = vmatprep.subr.bf16.mxu1 %v15050_v54  ;;  %9895 = vmatpush3.bf16.msra.mxu0 %v15079_v0 }
0x1d7c   :  { %9897 = vmatprep.subr.bf16.mxu0 %v15081_v23 }
0x1d7e   :  { %9387 = vmatpush3.bf16.msra.mxu1 %v13829_v41 }
0x1d7f   :  { %9388 = vmatprep.subr.bf16.mxu1 %v15050_v54  ;;  %9899 = vmatpush3.bf16.msra.mxu0 %v15081_v23 }
0x1d80   :  { %9901 = vmatprep.subr.bf16.mxu0 %v15083_v11 }
0x1d82   :  { %9389 = vmatpush3.bf16.msra.mxu1 %v13838_v34 }
0x1d83   :  { %9390 = vmatprep.subr.bf16.mxu1 %v15050_v54  ;;  %9903 = vmatpush3.bf16.msra.mxu0 %v15083_v11 }
0x1d84   :  { %9905 = vmatprep.subr.bf16.mxu0 %v12459_v14 }
0x1d86   :  { %9391 = vmatpush3.bf16.msra.mxu1 %v13847_v42 }
0x1d87   :  { %9392 = vmatprep.subr.bf16.mxu1 %v15050_v54  ;;  %9907 = vmatpush3.bf16.msra.mxu0 %v12459_v14 }
0x1d88   :  { %9909 = vmatprep.subr.bf16.mxu0 %v12472_v10 }
0x1d8a   :  { %9393 = vmatpush3.bf16.msra.mxu1 %v13856_v31 }
0x1d8b   :  { %9394 = vmatprep.subr.bf16.mxu1 %v15050_v54  ;;  %9911 = vmatpush3.bf16.msra.mxu0 %v12472_v10 }
0x1d8c   :  { %9913 = vmatprep.subr.bf16.mxu0 %v12477_v7 }
0x1d8e   :  { %9395 = vmatpush3.bf16.msra.mxu1 %v13865_v56 }
0x1d8f   :  { %9915 = vmatpush3.bf16.msra.mxu0 %v12477_v7  ;;  %6423 = vmatprep.subr.bf16.mxu1 %v13488_v48 }
0x1d90   :  { %9444 = vmatprep.subr.bf16.mxu0 %v15050_v54 }
0x1e24   :  { %v5968_v32 = vpop.f32.mrb[116].mxu0 }
0x1e25   :  { %v9358_v44 = vpop.f32.mrb[117].mxu0  ;;  %v5969_v45 = vadd.f32 %v5968_v32, %v12424_v18  ;;  %v15270_v32 = vld [vmem:[#allocation14_spill] sm:$0xff] }
0x1e26   :  { %v5971_v4 = vpop.f32.mrb[118].mxu0  ;;  %v15271_v44 = vld [vmem:[#allocation23_spill] sm:$0xff] }
0x1e27   :  { %v9359_v63 = vpop.f32.mrb[119].mxu0  ;;  %v15272_v4 = vld [vmem:[#allocation15_spill] sm:$0xff] }
0x1e28   :  { %v15273_v63 = vld [vmem:[#allocation16_spill] sm:$0xff] }
0x1e44   :  { %v6008_v3 = vpop.f32.mrb[76].mxu1  ;;  %v6049_v50 = vpop.f32.mrb[120].mxu0 }
0x1e45   :  { %v10029_v30 = vadd.f32 %v15089_v28, %v6008_v3  ;;  %v6010_v49 = vpop.f32.mrb[77].mxu1  ;;  %v9378_v16 = vpop.f32.mrb[121].mxu0  ;;  %v6050_v35 = vadd.f32 %v6049_v50, %v12421_v53  ;;  %v15274_v3 = vld [vmem:[#allocation17_spill] sm:$0xff]  ;;  %v15275_v50 = vld [vmem:[#allocation18_spill] sm:$0xff] }
0x1e46   :  { %v6012_v9 = vpop.f32.mrb[78].mxu1  ;;  %v6052_v19 = vpop.f32.mrb[122].mxu0  ;;  %v10031_v33 = vadd.f32 %v15090_v61, %v6010_v49  ;;  %v15277_v49 = vld [vmem:[#allocation29_spill] sm:$0xff] }
0x1e47   :  { %v8214_v40 = vmul.f32 -1.442695, %v10029_v30  ;;  %v6013_v25 = vpop.f32.mrb[79].mxu1  ;;  %v9379_v6 = vpop.f32.mrb[123].mxu0  ;;  %v15276_v30 = vld [vmem:[#allocation27_spill] sm:$0xff]  ;;  %v15278_v16 = vld [vmem:[#allocation53_spill] sm:$0xff] }
0x1e48   :  { %v8215_v48 = vmul.f32 -1.442695, %v10031_v33  ;;  %v15279_v9 = vld [vmem:[#allocation54_spill] sm:$0xff]  ;;  %v15280_v19 = vld [vmem:[#allocation55_spill] sm:$0xff]  ;;  %v15282_v25 = vld [vmem:[#allocation57_spill] sm:$0xff] }
0x1e49   :  { %10480 = vpow2.f32 %v8214_v40  ;;  %v15281_v40 = vld [vmem:[#allocation56_spill] sm:$0xff]  ;;  %v15283_v6 = vld [vmem:[#allocation58_spill] sm:$0xff]  ;;  %v15284_v33 = vld [vmem:[#allocation59_spill] sm:$0xff] }
0x1e4a   :  { %10482 = vpow2.f32 %v8215_v48 }
0x1e53   :  { %v10481_v57 = vpop.eup %10480 }
0x1e54   :  { %v6059_v39 = vadd.f32 1.0, %v10481_v57  ;;  %v10483_v46 = vpop.eup %10482  ;;  %v15285_v57 = vld [vmem:[#allocation8_spill] sm:$0xff] }
0x1e55   :  { %v6066_v1 = vadd.f32 1.0, %v10483_v46  ;;  %v15286_v46 = vld [vmem:[#allocation10_spill] sm:$0xff] }
0x1e56   :  { %10484 = vrcp.f32 %v6059_v39 }
0x1e57   :  { %10486 = vrcp.f32 %v6066_v1 }
0x1e60   :  { %v10485_v17 = vpop.eup %10484 }
0x1e61   :  { %v6069_v60 = vmul.f32 %v10485_v17, %v6050_v35  ;;  %v10487_v47 = vpop.eup %10486  ;;  %v15287_v35 = vld [vmem:[#allocation7_spill] sm:$0xff] }
0x1e62   :  { %v6072_v62 = vsub.f32 1.0, %v10487_v47  ;;  %v6074_v15 = vmul.f32 %v10487_v47, %v15267_v24  ;;  %v15289_v47 = vld [vmem:[#allocation25_spill] sm:$0xff]  ;;  %v15291_v24 = vld [vmem:[#allocation24_spill] sm:$0xff] }
0x1e63   :  { %v6070_v27 = vadd.f32 %v6069_v60, %v5969_v45  ;;  %v15288_v45 = vld [vmem:[#allocation9_spill] sm:$0xff] }
0x1e65   :  { %10488 = vtanh.f32 %v6070_v27 }
0x1e6f   :  { %v10489_v21 = vpop.eup %10488 }
0x1e70   :  { %v6073_v13 = vmul.f32 %v10489_v21, %v6072_v62  ;;  %v15290_v21 = vld [vmem:[#allocation28_spill] sm:$0xff] }
0x1e72   :  { %v13876_v20 = vadd.f32 %v6074_v15, %v6073_v13 }
0x1e74   :  { %15268 = vst [vmem:[#allocation51_spill] sm:$0xff] %v13876_v20  ;;  %v13880_v26 = vpack.c.bf16 %v13876_v20, %v13876_v20 }
0x1e76   :  { %9397 = vmatmul.mubr.bf16.vlgmr.msra.gmra.mrb[80].mxu1 %v13880_v26 }
0x1e77   :  { %6424 = vmatpush1.bf16.msra.mxu1 %v15269_v43  ;;  %6455 = vmatprep.mubr.bf16.mxu1 %v15049_v52  ;;  %v15292_v43 = vld [vmem:[#allocation26_spill] sm:$0xff] }
0x1e78   :  { %6425 = vmatprep.subr.bf16.mxu1 %v15270_v32 }
0x1e7b   :  { %6426 = vmatpush1.bf16.msra.mxu1 %v15271_v44 }
0x1e7c   :  { %6427 = vmatprep.subr.bf16.mxu1 %v15272_v4 }
0x1e7f   :  { %6428 = vmatpush1.bf16.msra.mxu1 %v15273_v63 }
0x1e80   :  { %6429 = vmatprep.subr.bf16.mxu1 %v15274_v3 }
0x1e83   :  { %6430 = vmatpush1.bf16.msra.mxu1 %v15275_v50 }
0x1e84   :  { %6431 = vmatprep.subr.bf16.mxu1 %v15276_v30  ;;  %v15293_v30 = vld [vmem:[#allocation60_spill] sm:$0xff] }
0x1e87   :  { %6432 = vmatpush1.bf16.msra.mxu1 %v15277_v49 }
0x1e88   :  { %6433 = vmatprep.subr.bf16.mxu1 %v15278_v16 }
0x1e8b   :  { %6434 = vmatpush1.bf16.msra.mxu1 %v15279_v9  ;;  %v15294_v9 = vld [vmem:[#allocation61_spill] sm:$0xff] }
0x1e8c   :  { %6435 = vmatprep.subr.bf16.mxu1 %v15280_v19 }
0x1e8f   :  { %6436 = vmatpush1.bf16.msra.mxu1 %v15281_v40 }
0x1e90   :  { %6437 = vmatprep.subr.bf16.mxu1 %v15282_v25  ;;  %v15295_v25 = vld [vmem:[#allocation62_spill] sm:$0xff] }
0x1e93   :  { %6438 = vmatpush1.bf16.msra.mxu1 %v15283_v6 }
0x1e94   :  { %6504 = vmatprep.subr.bf16.mxu1 %v15284_v33  ;;  %v15296_v33 = vld [vmem:[#allocation39_spill] sm:$0xff] }
0x1f49   :  { %v6111_v48 = vpop.f32.mrb[80].mxu1 }
0x1f4a   :  { %v6117_v39 = vadd.f32 %v6111_v48, %v15285_v57  ;;  %v6118_v1 = vadd.f32 %v6111_v48, %v15286_v46  ;;  %v6119_v17 = vadd.f32 %v15287_v35, %v6111_v48  ;;  %v6120_v60 = vadd.f32 %v15288_v45, %v6111_v48  ;;  %v9398_v27 = vpop.f32.mrb[81].mxu1 }
0x1f4b   :  { %v6121_v62 = vadd.f32 %v6111_v48, %v15289_v47  ;;  %v6122_v13 = vadd.f32 %v6111_v48, %v15290_v21  ;;  %v6123_v15 = vadd.f32 %v15291_v24, %v6111_v48  ;;  %v6124_v32 = vadd.f32 %v15292_v43, %v6111_v48  ;;  %v6114_v44 = vpop.f32.mrb[82].mxu1  ;;  %v15297_v48 = vld [vmem:[#allocation40_spill] sm:$0xff]  ;;  %v15301_v27 = vld [vmem:[#allocation31_spill] sm:$0xff] }
0x1f4c   :  { %10490 = vtanh.f32 %v6117_v39  ;;  %v9399_v4 = vpop.f32.mrb[83].mxu1  ;;  %v15298_v39 = vld [vmem:[#allocation63_spill] sm:$0xff] }
0x1f4d   :  { %10492 = vtanh.f32 %v6118_v1  ;;  %v15299_v1 = vld [vmem:[#allocation46_spill] sm:$0xff] }
0x1f4e   :  { %10494 = vtanh.f32 %v6119_v17  ;;  %v15300_v17 = vld [vmem:[#allocation64_spill] sm:$0xff] }
0x1f4f   :  { %10496 = vtanh.f32 %v6120_v60 }
0x1f50   :  { %10498 = vtanh.f32 %v6121_v62 }
0x1f51   :  { %10500 = vtanh.f32 %v6122_v13 }
0x1f52   :  { %10502 = vtanh.f32 %v6123_v15  ;;  %v15302_v15 = vld [vmem:[#allocation32_spill] sm:$0xff] }
0x1f53   :  { %10504 = vtanh.f32 %v6124_v32 }
0x1f56   :  { %v10491_v63 = vpop.eup %10490 }
0x1f57   :  { %v10493_v3 = vpop.eup %10492  ;;  %9432 = vmatprep.mubr.f32.mxu0 %v10491_v63 }
0x1f58   :  { %v10495_v50 = vpop.eup %10494  ;;  %9433 = vmatmul.mubr.f32.vlgmr.msra.gmra.mrb[124].mxu0 %v10493_v3  ;;  %v15303_v3 = vld [vmem:[#allocation33_spill] sm:$0xff] }
0x1f59   :  { %9435 = vmatprep.mubr.f32.mxu0 %v10495_v50  ;;  %9445 = vmatpush3.bf16.msra.mxu0 %v15293_v30  ;;  %v10497_v49 = vpop.eup %10496  ;;  %v15304_v30 = vld [vmem:[#allocation34_spill] sm:$0xff] }
0x1f5a   :  { %9446 = vmatprep.subr.bf16.mxu0 %v15050_v54  ;;  %v10499_v16 = vpop.eup %10498 }
0x1f5b   :  { %v10501_v19 = vpop.eup %10500 }
0x1f5c   :  { %9436 = vmatmul.mubr.f32.gmra.mrb[126].mxu0 %v10497_v49  ;;  %v10503_v40 = vpop.eup %10502 }
0x1f5d   :  { %9438 = vmatprep.mubr.f32.mxu0 %v10499_v16  ;;  %9447 = vmatpush3.bf16.msra.mxu0 %v15294_v9  ;;  %v10505_v6 = vpop.eup %10504 }
0x1f5e   :  { %9448 = vmatprep.subr.bf16.mxu0 %v15050_v54 }
0x1f60   :  { %9439 = vmatmul.mubr.f32.gmra.mrb[128].mxu0 %v10501_v19 }
0x1f61   :  { %9441 = vmatprep.mubr.f32.mxu0 %v10503_v40  ;;  %9449 = vmatpush3.bf16.msra.mxu0 %v15295_v25  ;;  %v15305_v40 = vld [vmem:[#allocation35_spill] sm:$0xff] }
0x1f62   :  { %9450 = vmatprep.subr.bf16.mxu0 %v15050_v54 }
0x1f64   :  { %9442 = vmatmul.mubr.f32.gmra.mrb[130].mxu0 %v10505_v6 }
0x1f65   :  { %9451 = vmatpush3.bf16.msra.mxu0 %v15296_v33  ;;  %9460 = vmatprep.mubr.msk.bf16.mxu0 %vm10793_vm1, %v15050_v54  ;;  %v15306_v33 = vld [vmem:[#allocation36_spill] sm:$0xff] }
0x1f66   :  { %9452 = vmatprep.subr.bf16.mxu0 %v15050_v54 }
0x1f69   :  { %9453 = vmatpush3.bf16.msra.mxu0 %v15297_v48 }
0x1f6a   :  { %9454 = vmatprep.subr.bf16.mxu0 %v15050_v54 }
0x1f6d   :  { %9455 = vmatpush3.bf16.msra.mxu0 %v15298_v39 }
0x1f6e   :  { %9456 = vmatprep.subr.bf16.mxu0 %v15050_v54 }
0x1f71   :  { %9457 = vmatpush3.bf16.msra.mxu0 %v15299_v1 }
0x1f72   :  { %9458 = vmatprep.subr.bf16.mxu0 %v15050_v54 }
0x1f75   :  { %9459 = vmatpush3.bf16.msra.mxu0 %v15300_v17 }
0x1f76   :  { %9464 = vmatprep.subr.bf16.mxu0 %v15050_v54 }
0x202b   :  { %v9434_v60 = vpop.f32.mrb[124].mxu0 }
0x202c   :  { %v6239_v62 = vmul.f32 %v9434_v60, %v15301_v27  ;;  %v6199_v13 = vpop.f32.mrb[125].mxu0  ;;  %v15307_v60 = vld [vmem:[#allocation37_spill] sm:$0xff] }
0x202d   :  { %v6238_v32 = vmul.f32 %v15302_v15, %v6199_v13 }
0x202f   :  { %v6246_v44 = vadd.f32 %v6239_v62, %v6238_v32  ;;  %v9437_v4 = vpop.f32.mrb[126].mxu0  ;;  %v15308_v32 = vld [vmem:[#allocation38_spill] sm:$0xff] }
0x2030   :  { %v6209_v63 = vpop.f32.mrb[127].mxu0  ;;  %v6241_v49 = vmul.f32 %v9437_v4, %v15304_v30 }
0x2031   :  { %v6240_v50 = vmul.f32 %v15303_v3, %v6209_v63  ;;  %v15309_v63 = vld [vmem:[#allocation47_spill] sm:$0xff]  ;;  %v15310_v3 = vld [vmem:[#allocation30_spill] sm:$0xff] }
0x2032   :  { %vm15315_vm8 = vcmp.eq.s32.totalorder %v15310_v3, 4 }
0x2033   :  { %v6247_v16 = vadd.f32 %v6246_v44, %v6240_v50  ;;  %v9440_v9 = vpop.f32.mrb[128].mxu0  ;;  %v13938_v44 = vsel %vm5744_vm2, 0.0, %v15309_v63  ;;  %v15314_v63 = vld [vmem:[#allocation52_spill] sm:$0xff] }
0x2034   :  { %v6219_v19 = vpop.f32.mrb[129].mxu0  ;;  %v6243_v48 = vmul.f32 %v9440_v9, %v15306_v33  ;;  %15312 = vst [vmem:[#allocation48_spill] sm:$0xff] %v13938_v44  ;;  %vm6253_vm5 = vcmp.gt.f32.partialorder %v13938_v44, 0.0 }
0x2035   :  { %v6242_v25 = vmul.f32 %v15305_v40, %v6219_v19  ;;  %v6248_v6 = vadd.f32 %v6247_v16, %v6241_v49  ;;  %v14003_v40 = vld [vmem:[%s14810_s13 + $0x30] sm:$0xff] }
0x2036   :  { %15331 = vst [vmem:[#allocation14_spill] sm:$0xff] %v14003_v40 }
0x2037   :  { %v6249_v39 = vadd.f32 %v6248_v6, %v6242_v25  ;;  %v9443_v1 = vpop.f32.mrb[130].mxu0 }
0x2038   :  { %v6229_v17 = vpop.f32.mrb[131].mxu0  ;;  %v6245_v15 = vmul.f32 %v9443_v1, %v15308_v32 }
0x2039   :  { %v6244_v13 = vmul.f32 %v15307_v60, %v6229_v17  ;;  %v6250_v62 = vadd.f32 %v6249_v39, %v6243_v48 }
0x203b   :  { %v6251_v27 = vadd.f32 %v6250_v62, %v6244_v13 }
0x203d   :  { %v6252_v50 = vadd.f32 %v6251_v27, %v6245_v15 }
0x203f   :  { %v6254_v49 = vsel %vm6253_vm5, %v6252_v50, -1e+09 }
0x2040   :  { %6255 = vmax.xlane.f32.xlu0 %v6254_v49 }
0x20cd   :  { %v6256_v16 = vpop.xlane.xlu0 %6255 }
0x20ce   :  { %vm6257_vm3 = vcmp.eq.f32.partialorder %v6254_v49, %v6256_v16  ;;  %v15317_v49 = vld [vmem:[#allocation6_spill] sm:$0xff] }
0x20cf   :  { %v6258_v9 = vsel %vm6257_vm3, %v15310_v3, 128 }
0x20d0   :  { %v6260_v19 = vshra.s32 %v6258_v9, 16  ;;  %v6259_v6 = vand.u32 65535, %v6258_v9  ;;  %v15318_v9 = vld [vmem:[#allocation5_spill] sm:$0xff] }
0x20d2   :  { %v6262_v25 = vcvt.s32.f32 %v6260_v19  ;;  %v6261_v39 = vcvt.s32.f32 %v6259_v6 }
0x20d4   :  { %6263 = vmin.xlane.f32.xlu1 %v6262_v25 }
0x2161   :  { %v6264_v48 = vpop.xlane.xlu1 %6263 }
0x2162   :  { %vm6265_vm6 = vcmp.eq.f32.partialorder %v6262_v25, %v6264_v48  ;;  %v6270_v17 = vcvt.f32.s32 %v6264_v48  ;;  %v15319_v25 = vld [vmem:[#allocation4_spill] sm:$0xff]  ;;  %v15320_v48 = vld [vmem:[#allocation43_spill] sm:$0xff] }
0x2163   :  { %v6266_v1 = vsel %vm6265_vm6, %v6261_v39, inf }
0x2164   :  { %6267 = vmin.xlane.f32.xlu0 %v6266_v1  ;;  %v6271_v27 = vshll.u32 %v6270_v17, 16  ;;  %v15321_v1 = vld [vmem:[#allocation44_spill] sm:$0xff] }
0x21f1   :  { %v6268_v13 = vpop.xlane.xlu0 %6267 }
0x21f2   :  { %v6269_v15 = vcvt.f32.s32 %v6268_v13  ;;  %v15322_v13 = vld [vmem:[#allocation41_spill] sm:$0xff] }
0x21f4   :  { %v13942_v62 = vadd.s32 %v6271_v27, %v6269_v15  ;;  %v15323_v15 = vld [vmem:[#allocation45_spill] sm:$0xff] }
0x21f6   :  { %15313 = vst [vmem:[#allocation50_spill] sm:$0xff] %v13942_v62  ;;  %v13948_v4 = vsel %vm15315_vm8, %v13942_v62, %v15314_v63  ;;  %vm6274_vm4 = vcmp.eq.s32.totalorder %v15310_v3, %v13942_v62 }
0x21f7   :  { %15316 = vst [vmem:[#allocation11_spill] sm:$0xff] %v13948_v4  ;;  %v8216_v50 = vsel %vm6274_vm4, 1.0, %v15050_v54  ;;  %v15324_v4 = vld [vmem:[#allocation42_spill] sm:$0xff] }
0x21f8   :  { %v6288_v16 = vrot.slane %v8216_v50, %v15317_v49  ;;  %v6281_v19 = vrot.slane %v8216_v50, %v15318_v9  ;;  %v6295_v6 = vrot.slane %v8216_v50, %v15319_v25  ;;  %v6302_v39 = vrot.slane %v8216_v50, %v15320_v48  ;;  %v13967_v48 = vld [vmem:[%s14810_s13 + $0x8] sm:$0xff] }
0x21f9   :  { %v6309_v17 = vrot.slane %v8216_v50, %v15321_v1  ;;  %v6316_v27 = vrot.slane %v8216_v50, %v15322_v13  ;;  %v6323_v63 = vrot.slane %v8216_v50, %v15323_v15  ;;  %v6330_v49 = vrot.slane %v8216_v50, %v15324_v4  ;;  %15325 = vst [vmem:[#allocation19_spill] sm:$0xff] %v13967_v48  ;;  %v13979_v15 = vld [vmem:[%s14810_s13 + $0x10] sm:$0xff] }
0x21fa   :  { %6290 = vbcast.lane.b32.xlu1 %v6288_v16, 256  ;;  %6283 = vbcast.lane.b32.xlu0 %v6281_v19, 256  ;;  %15327 = vst [vmem:[#allocation20_spill] sm:$0xff] %v13979_v15 }
0x21fe   :  { %6297 = vbcast.lane.b32.xlu1 %v6295_v6, 256  ;;  %6304 = vbcast.lane.b32.xlu0 %v6302_v39, 256  ;;  %v13973_v39 = vld [vmem:[%s14810_s13] sm:$0xff] }
0x21ff   :  { %15326 = vst [vmem:[#allocation12_spill] sm:$0xff] %v13973_v39 }
0x2202   :  { %6311 = vbcast.lane.b32.xlu1 %v6309_v17, 256  ;;  %6318 = vbcast.lane.b32.xlu0 %v6316_v27, 256 }
0x2206   :  { %6325 = vbcast.lane.b32.xlu1 %v6323_v63, 256  ;;  %6332 = vbcast.lane.b32.xlu0 %v6330_v49, 256 }
0x226c   :  { %v6291_v16 = vpop.permute.xlu1 %6290  ;;  %v6284_v19 = vpop.permute.xlu0 %6283 }
0x226d   :  { %v6335_v6 = vmul.f32 %v13967_v48, %v6291_v16  ;;  %v6334_v17 = vmul.f32 %v13973_v39, %v6284_v19  ;;  %v13985_v48 = vld [vmem:[%s14810_s13 + $0x18] sm:$0xff] }
0x226e   :  { %15328 = vst [vmem:[#allocation21_spill] sm:$0xff] %v13985_v48 }
0x226f   :  { %v6348_v27 = vrot.slane %v6335_v6, 4  ;;  %v6342_v50 = vrot.slane %v6334_v17, 4 }
0x2270   :  { %v6298_v63 = vpop.permute.xlu1 %6297  ;;  %v6305_v49 = vpop.permute.xlu0 %6304 }
0x2271   :  { %v6349_v4 = vadd.f32 %v6348_v27, %v6335_v6  ;;  %v6343_v13 = vadd.f32 %v6342_v50, %v6334_v17  ;;  %v6336_v16 = vmul.f32 %v13979_v15, %v6298_v63  ;;  %v6337_v19 = vmul.f32 %v13985_v48, %v6305_v49  ;;  %v13991_v63 = vld [vmem:[%s14810_s13 + $0x20] sm:$0xff]  ;;  %v13997_v49 = vld [vmem:[%s14810_s13 + $0x28] sm:$0xff] }
0x2272   :  { %15329 = vst [vmem:[#allocation13_spill] sm:$0xff] %v13991_v63  ;;  %15330 = vst [vmem:[#allocation22_spill] sm:$0xff] %v13997_v49 }
0x2273   :  { %v6350_v39 = vrot.slane %v6349_v4, 2  ;;  %v6344_v1 = vrot.slane %v6343_v13, 2  ;;  %v6354_v25 = vrot.slane %v6336_v16, 4  ;;  %v6360_v9 = vrot.slane %v6337_v19, 4 }
0x2274   :  { %v6312_v6 = vpop.permute.xlu1 %6311  ;;  %v6319_v17 = vpop.permute.xlu0 %6318 }
0x2275   :  { %v6351_v27 = vadd.f32 %v6350_v39, %v6349_v4  ;;  %v6345_v50 = vadd.f32 %v6344_v1, %v6343_v13  ;;  %v6355_v62 = vadd.f32 %v6354_v25, %v6336_v16  ;;  %v6361_v3 = vadd.f32 %v6360_v9, %v6337_v19 }
0x2276   :  { %v6338_v15 = vmul.f32 %v13991_v63, %v6312_v6  ;;  %v6339_v48 = vmul.f32 %v13997_v49, %v6319_v17  ;;  %v14009_v49 = vld [vmem:[%s14810_s13 + $0x38] sm:$0xff] }
0x2277   :  { %v6352_v44 = vrot.slane %v6351_v27, 1  ;;  %v6346_v32 = vrot.slane %v6345_v50, 1  ;;  %v6356_v4 = vrot.slane %v6355_v62, 2  ;;  %v6362_v1 = vrot.slane %v6361_v3, 2  ;;  %15332 = vst [vmem:[#allocation23_spill] sm:$0xff] %v14009_v49 }
0x2278   :  { %v6366_v25 = vrot.slane %v6338_v15, 4  ;;  %v6372_v9 = vrot.slane %v6339_v48, 4  ;;  %v6326_v13 = vpop.permute.xlu1 %6325  ;;  %v6333_v39 = vpop.permute.xlu0 %6332 }
0x2279   :  { %v6353_v16 = vadd.f32 %v6352_v44, %v6351_v27  ;;  %v6347_v19 = vadd.f32 %v6346_v32, %v6345_v50  ;;  %v6357_v60 = vadd.f32 %v6356_v4, %v6355_v62  ;;  %v6363_v33 = vadd.f32 %v6362_v1, %v6361_v3 }
0x227a   :  { %v6367_v6 = vadd.f32 %v6366_v25, %v6338_v15  ;;  %v6373_v63 = vadd.f32 %v6372_v9, %v6339_v48  ;;  %v6340_v17 = vmul.f32 %v14003_v40, %v6326_v13  ;;  %v6341_v30 = vmul.f32 %v14009_v49, %v6333_v39 }
0x227b   :  { %v6391_v44 = vpack.c.bf16 %v6353_v16, %v6353_v16  ;;  %v6390_v32 = vpack.c.bf16 %v6347_v19, %v6347_v19  ;;  %v6358_v62 = vrot.slane %v6357_v60, 1  ;;  %v6364_v3 = vrot.slane %v6363_v33, 1 }
0x227c   :  { %v6368_v15 = vrot.slane %v6367_v6, 2  ;;  %v6374_v48 = vrot.slane %v6373_v63, 2  ;;  %v6378_v27 = vrot.slane %v6340_v17, 4  ;;  %v6384_v50 = vrot.slane %v6341_v30, 4 }
0x227d   :  { %v6359_v4 = vadd.f32 %v6358_v62, %v6357_v60  ;;  %v6365_v1 = vadd.f32 %v6364_v3, %v6363_v33  ;;  %v6407_v43 = vunpack.c.l.b16 %v6391_v44  ;;  %v6406_v24 = vunpack.c.l.b16 %v6390_v32 }
0x227e   :  { %v6369_v25 = vadd.f32 %v6368_v15, %v6367_v6  ;;  %v6375_v9 = vadd.f32 %v6374_v48, %v6373_v63  ;;  %v6379_v13 = vadd.f32 %v6378_v27, %v6340_v17  ;;  %v6385_v40 = vadd.f32 %v6384_v50, %v6341_v30  ;;  %v14053_v50 = vld [vmem:[%s14813_s6 + $0x30] ss:$12 sps:$4 sm:$0xff]  }
0x227f   :  { %v6392_v21 = vpack.c.bf16 %v6359_v4, %v6359_v4  ;;  %v6393_v47 = vpack.c.bf16 %v6365_v1, %v6365_v1  ;;  %v6414_v60 = vsel %vm4287_vm15, %v6407_v43, %v6406_v24  ;;  %v14067_v4 = vld [vmem:[%s14813_s6 + $0x48] ss:$12 sps:$4 sm:$0xff]   ;;  %v14081_v1 = vld [vmem:[%s14813_s6 + $0x60] ss:$12 sps:$4 sm:$0xff]  }
0x2280   :  { %v6370_v45 = vrot.slane %v6369_v25, 1  ;;  %v6376_v39 = vrot.slane %v6375_v9, 1  ;;  %v6380_v16 = vrot.slane %v6379_v13, 2  ;;  %v6386_v19 = vrot.slane %v6385_v40, 2 }
0x2281   :  { %v6408_v49 = vunpack.c.l.b16 %v6392_v21  ;;  %v6409_v33 = vunpack.c.l.b16 %v6393_v47 }
0x2282   :  { %v6371_v35 = vadd.f32 %v6370_v45, %v6369_v25  ;;  %v6377_v46 = vadd.f32 %v6376_v39, %v6375_v9  ;;  %v6381_v57 = vadd.f32 %v6380_v16, %v6379_v13  ;;  %v6387_v20 = vadd.f32 %v6386_v19, %v6385_v40  ;;  %v14095_v25 = vld [vmem:[%s14813_s6 + $0x78] ss:$12 sps:$4 sm:$0xff]   ;;  %v14109_v9 = vld [vmem:[%s14813_s6 + $0x90] ss:$12 sps:$4 sm:$0xff]   ;;  %v14123_v13 = vld [vmem:[%s14813_s6 + $0xa8] ss:$12 sps:$4 sm:$0xff]  }
0x2283   :  { %v6415_v63 = vsel %vm4289_vm10, %v6408_v49, %v6414_v60  ;;  %v14039_v49 = vld [vmem:[%s14813_s6 + $0x18] ss:$12 sps:$4 sm:$0xff]  }
0x2284   :  { %v6394_v6 = vpack.c.bf16 %v6371_v35, %v6371_v35  ;;  %v6395_v30 = vpack.c.bf16 %v6377_v46, %v6377_v46  ;;  %v6382_v17 = vrot.slane %v6381_v57, 1  ;;  %v6388_v44 = vrot.slane %v6387_v20, 1 }
0x2285   :  { %v6416_v3 = vsel %vm4291_vm11, %v6409_v33, %v6415_v63 }
0x2286   :  { %v6410_v32 = vunpack.c.l.b16 %v6394_v6  ;;  %v6383_v62 = vadd.f32 %v6382_v17, %v6381_v57  ;;  %v6411_v15 = vunpack.c.l.b16 %v6395_v30  ;;  %v6389_v48 = vadd.f32 %v6388_v44, %v6387_v20  ;;  %v14022_v57 = vld [vmem:[%s14813_s6] ss:$12 sps:$4 sm:$0xff]   ;;  %v14029_v20 = vld [vmem:[%s14813_s6 + $0x1c] ss:$12 sps:$4 sm:$0xff]  }
0x2288   :  { %v6417_v45 = vsel %vm4293_vm12, %v6410_v32, %v6416_v3  ;;  %v6396_v21 = vpack.c.bf16 %v6383_v62, %v6383_v62  ;;  %v6397_v27 = vpack.c.bf16 %v6389_v48, %v6389_v48 }
0x2289   :  { %v6418_v24 = vsel %vm4295_vm13, %v6411_v15, %v6417_v45 }
0x228a   :  { %v6412_v40 = vunpack.c.l.b16 %v6396_v21  ;;  %v6413_v47 = vunpack.c.l.b16 %v6397_v27 }
0x228c   :  { %v6419_v43 = vsel %vm4297_vm0, %v6412_v40, %v6418_v24  ;;  %v15333_v24 = vld [vmem:[#allocation51_spill] sm:$0xff] }
0x228d   :  { %v6420_v46 = vsel %vm4299_vm9, %v6413_v47, %v6419_v43 }
0x228e   :  { %v6421_v35 = vpack.c.b16 %v6420_v46, %v6420_v46 }
0x2290   :  { %6456 = vmatmul.mubr.bf16.vlgmr.msra.gmra.mrb[84].mxu1 %v6421_v35  ;;  %9461 = vmatmul.mubr.bf16.vlgmr.msra.gmra.mrb[132].mxu0 %v6421_v35  ;;  %v14185_v35 = vld [vmem:[%s14812_s5] ss:$12 sps:$4 sm:$0xff]  }
0x2291   :  { %6505 = vmatpush1.bf16.msra.mxu1 %v14022_v57  ;;  %9465 = vmatpush3.bf16.msra.mxu0 %v13724_v5  ;;  %v14046_v5 = vld [vmem:[%s14813_s6 + $0x34] ss:$12 sps:$4 sm:$0xff]   ;;  %15335 = vst [vmem:[#allocation16_spill] sm:$0xff] %v14185_v35 }
0x2292   :  { %6506 = vmatprep.subr.bf16.mxu1 %v14029_v20  ;;  %9466 = vmatprep.subr.bf16.mxu0 %v15050_v54 }
0x2293   :  { %6536 = vmatprep.mubr.bf16.mxu1 %v15049_v52  ;;  %9480 = vmatprep.mubr.msk.bf16.mxu0 %vm10793_vm1, %v15050_v54 }
0x2295   :  { %6507 = vmatpush1.bf16.msra.mxu1 %v14039_v49  ;;  %9467 = vmatpush3.bf16.msra.mxu0 %v13736_v2  ;;  %v14060_v2 = vld [vmem:[%s14813_s6 + $0x4c] ss:$12 sps:$4 sm:$0xff]  }
0x2296   :  { %6508 = vmatprep.subr.bf16.mxu1 %v14046_v5  ;;  %9468 = vmatprep.subr.bf16.mxu0 %v15050_v54 }
0x2299   :  { %6509 = vmatpush1.bf16.msra.mxu1 %v14053_v50  ;;  %9469 = vmatpush3.bf16.msra.mxu0 %v13745_v29  ;;  %v14074_v29 = vld [vmem:[%s14813_s6 + $0x64] ss:$12 sps:$4 sm:$0xff]  }
0x229a   :  { %6510 = vmatprep.subr.bf16.mxu1 %v14060_v2  ;;  %9470 = vmatprep.subr.bf16.mxu0 %v15050_v54 }
0x229d   :  { %6511 = vmatpush1.bf16.msra.mxu1 %v14067_v4  ;;  %9471 = vmatpush3.bf16.msra.mxu0 %v13754_v58  ;;  %v14088_v58 = vld [vmem:[%s14813_s6 + $0x7c] ss:$12 sps:$4 sm:$0xff]  }
0x229e   :  { %6512 = vmatprep.subr.bf16.mxu1 %v14074_v29  ;;  %9472 = vmatprep.subr.bf16.mxu0 %v15050_v54 }
0x22a1   :  { %6513 = vmatpush1.bf16.msra.mxu1 %v14081_v1  ;;  %9473 = vmatpush3.bf16.msra.mxu0 %v13763_v37  ;;  %v14102_v37 = vld [vmem:[%s14813_s6 + $0x94] ss:$12 sps:$4 sm:$0xff]  }
0x22a2   :  { %6514 = vmatprep.subr.bf16.mxu1 %v14088_v58  ;;  %9474 = vmatprep.subr.bf16.mxu0 %v15050_v54 }
0x22a5   :  { %6515 = vmatpush1.bf16.msra.mxu1 %v14095_v25  ;;  %9475 = vmatpush3.bf16.msra.mxu0 %v13772_v12  ;;  %v14116_v12 = vld [vmem:[%s14813_s6 + $0xac] ss:$12 sps:$4 sm:$0xff]  }
0x22a6   :  { %6516 = vmatprep.subr.bf16.mxu1 %v14102_v37  ;;  %9476 = vmatprep.subr.bf16.mxu0 %v15050_v54 }
0x22a9   :  { %6517 = vmatpush1.bf16.msra.mxu1 %v14109_v9  ;;  %9477 = vmatpush3.bf16.msra.mxu0 %v13781_v55  ;;  %v14166_v55 = vld [vmem:[%s14812_s5 + $0x4] ss:$12 sps:$4 sm:$0xff]  }
0x22aa   :  { %6518 = vmatprep.subr.bf16.mxu1 %v14116_v12  ;;  %9478 = vmatprep.subr.bf16.mxu0 %v15050_v54 }
0x22ad   :  { %6519 = vmatpush1.bf16.msra.mxu1 %v14123_v13  ;;  %9479 = vmatpush3.bf16.msra.mxu0 %v13790_v8 }
0x22ae   :  { %9484 = vmatprep.subr.bf16.mxu1 %v15050_v54  ;;  %9917 = vmatprep.subr.bf16.mxu0 %v15075_v51 }
0x22b0   :  { %6537 = vmatmul.mubr.bf16.vlgmr.msra.gmra.mrb[84].mxu1 %v13880_v26  ;;  %9481 = vmatmul.mubr.bf16.vlgmr.msra.gmra.mrb[136].mxu0 %v13880_v26 }
0x22b1   :  { %9485 = vmatpush3.bf16.msra.mxu1 %v13800_v36  ;;  %9500 = vmatprep.mubr.msk.bf16.mxu1 %vm10793_vm1, %v15050_v54 }
0x22b2   :  { %9486 = vmatprep.subr.bf16.mxu1 %v15050_v54  ;;  %9919 = vmatpush3.bf16.msra.mxu0 %v15075_v51 }
0x22b3   :  { %9921 = vmatprep.subr.bf16.mxu0 %v15077_v59 }
0x22b5   :  { %9487 = vmatpush3.bf16.msra.mxu1 %v13811_v38 }
0x22b6   :  { %9488 = vmatprep.subr.bf16.mxu1 %v15050_v54  ;;  %9923 = vmatpush3.bf16.msra.mxu0 %v15077_v59 }
0x22b7   :  { %9925 = vmatprep.subr.bf16.mxu0 %v15079_v0 }
0x22b9   :  { %9489 = vmatpush3.bf16.msra.mxu1 %v13820_v22 }
0x22ba   :  { %9490 = vmatprep.subr.bf16.mxu1 %v15050_v54  ;;  %9927 = vmatpush3.bf16.msra.mxu0 %v15079_v0 }
0x22bb   :  { %9929 = vmatprep.subr.bf16.mxu0 %v15081_v23 }
0x22bd   :  { %9491 = vmatpush3.bf16.msra.mxu1 %v13829_v41 }
0x22be   :  { %9492 = vmatprep.subr.bf16.mxu1 %v15050_v54  ;;  %9931 = vmatpush3.bf16.msra.mxu0 %v15081_v23 }
0x22bf   :  { %9933 = vmatprep.subr.bf16.mxu0 %v15083_v11 }
0x22c1   :  { %9493 = vmatpush3.bf16.msra.mxu1 %v13838_v34 }
0x22c2   :  { %9494 = vmatprep.subr.bf16.mxu1 %v15050_v54  ;;  %9935 = vmatpush3.bf16.msra.mxu0 %v15083_v11 }
0x22c3   :  { %9937 = vmatprep.subr.bf16.mxu0 %v12459_v14 }
0x22c5   :  { %9495 = vmatpush3.bf16.msra.mxu1 %v13847_v42 }
0x22c6   :  { %9496 = vmatprep.subr.bf16.mxu1 %v15050_v54  ;;  %9939 = vmatpush3.bf16.msra.mxu0 %v12459_v14 }
0x22c7   :  { %9941 = vmatprep.subr.bf16.mxu0 %v12472_v10 }
0x22c9   :  { %9497 = vmatpush3.bf16.msra.mxu1 %v13856_v31 }
0x22ca   :  { %9498 = vmatprep.subr.bf16.mxu1 %v15050_v54  ;;  %9943 = vmatpush3.bf16.msra.mxu0 %v12472_v10 }
0x22cb   :  { %9945 = vmatprep.subr.bf16.mxu0 %v12477_v7 }
0x22cd   :  { %9499 = vmatpush3.bf16.msra.mxu1 %v13865_v56 }
0x22ce   :  { %9947 = vmatpush3.bf16.msra.mxu0 %v12477_v7  ;;  %6953 = vmatprep.subr.bf16.mxu1 %v14166_v55 }
0x22cf   :  { %9548 = vmatprep.subr.bf16.mxu0 %v15050_v54 }
0x2363   :  { %v6498_v8 = vpop.f32.mrb[132].mxu0 }
0x2364   :  { %v9462_v36 = vpop.f32.mrb[133].mxu0  ;;  %v6499_v3 = vadd.f32 %v6498_v8, %v12424_v18  ;;  %v14192_v8 = vld [vmem:[%s14812_s5 + $0x1c] ss:$12 sps:$4 sm:$0xff]  }
0x2365   :  { %v6501_v38 = vpop.f32.mrb[134].mxu0  ;;  %15336 = vst [vmem:[#allocation17_spill] sm:$0xff] %v14192_v8  ;;  %v14198_v36 = vld [vmem:[%s14812_s5 + $0x18] ss:$12 sps:$4 sm:$0xff]  }
0x2366   :  { %v9463_v22 = vpop.f32.mrb[135].mxu0  ;;  %15337 = vst [vmem:[#allocation18_spill] sm:$0xff] %v14198_v36  ;;  %v14204_v38 = vld [vmem:[%s14812_s5 + $0x34] ss:$12 sps:$4 sm:$0xff]  }
0x2367   :  { %15338 = vst [vmem:[#allocation27_spill] sm:$0xff] %v14204_v38  ;;  %v14210_v22 = vld [vmem:[%s14812_s5 + $0x30] ss:$12 sps:$4 sm:$0xff]  }
0x2368   :  { %15339 = vst [vmem:[#allocation29_spill] sm:$0xff] %v14210_v22 }
0x2383   :  { %v6538_v41 = vpop.f32.mrb[84].mxu1  ;;  %v6579_v34 = vpop.f32.mrb[136].mxu0 }
0x2384   :  { %v10033_v42 = vadd.f32 %v15089_v28, %v6538_v41  ;;  %v6540_v31 = vpop.f32.mrb[85].mxu1  ;;  %v9482_v56 = vpop.f32.mrb[137].mxu0  ;;  %v6580_v32 = vadd.f32 %v6579_v34, %v12421_v53  ;;  %v14216_v41 = vld [vmem:[%s14812_s5 + $0x4c] ss:$12 sps:$4 sm:$0xff]   ;;  %v14222_v34 = vld [vmem:[%s14812_s5 + $0x48] ss:$12 sps:$4 sm:$0xff]  }
0x2385   :  { %v6542_v26 = vpop.f32.mrb[86].mxu1  ;;  %v6582_v39 = vpop.f32.mrb[138].mxu0  ;;  %v10035_v33 = vadd.f32 %v15090_v61, %v6540_v31  ;;  %15340 = vst [vmem:[#allocation53_spill] sm:$0xff] %v14216_v41  ;;  %15341 = vst [vmem:[#allocation54_spill] sm:$0xff] %v14222_v34  ;;  %v14234_v31 = vld [vmem:[%s14812_s5 + $0x60] ss:$12 sps:$4 sm:$0xff]  }
0x2386   :  { %v8217_v16 = vmul.f32 -1.442695, %v10033_v42  ;;  %v6543_v19 = vpop.f32.mrb[87].mxu1  ;;  %v9483_v60 = vpop.f32.mrb[139].mxu0  ;;  %v14228_v42 = vld [vmem:[%s14812_s5 + $0x64] ss:$12 sps:$4 sm:$0xff]  }
0x2387   :  { %v8218_v63 = vmul.f32 -1.442695, %v10035_v33  ;;  %15342 = vst [vmem:[#allocation55_spill] sm:$0xff] %v14228_v42  ;;  %15343 = vst [vmem:[#allocation56_spill] sm:$0xff] %v14234_v31  ;;  %v14240_v56 = vld [vmem:[%s14812_s5 + $0x7c] ss:$12 sps:$4 sm:$0xff]  }
0x2388   :  { %10506 = vpow2.f32 %v8217_v16  ;;  %15344 = vst [vmem:[#allocation57_spill] sm:$0xff] %v14240_v56  ;;  %v14246_v26 = vld [vmem:[%s14812_s5 + $0x78] ss:$12 sps:$4 sm:$0xff]   ;;  %v14252_v39 = vld [vmem:[%s14812_s5 + $0x94] ss:$12 sps:$4 sm:$0xff]  }
0x2389   :  { %10508 = vpow2.f32 %v8218_v63  ;;  %15345 = vst [vmem:[#allocation58_spill] sm:$0xff] %v14246_v26  ;;  %15346 = vst [vmem:[#allocation59_spill] sm:$0xff] %v14252_v39  ;;  %v14258_v16 = vld [vmem:[%s14812_s5 + $0x90] ss:$12 sps:$4 sm:$0xff]   ;;  %v14264_v19 = vld [vmem:[%s14812_s5 + $0xac] ss:$12 sps:$4 sm:$0xff]  }
0x238a   :  { %15347 = vst [vmem:[#allocation60_spill] sm:$0xff] %v14258_v16  ;;  %15348 = vst [vmem:[#allocation61_spill] sm:$0xff] %v14264_v19  ;;  %v14270_v60 = vld [vmem:[%s14812_s5 + $0xa8] ss:$12 sps:$4 sm:$0xff]   ;;  %v14276_v33 = vld [vmem:[%s14813_s6 + $0x4] ss:$12 sps:$4 sm:$0xff]  }
0x238b   :  { %15349 = vst [vmem:[#allocation62_spill] sm:$0xff] %v14270_v60  ;;  %15350 = vst [vmem:[#allocation39_spill] sm:$0xff] %v14276_v33 }
0x2392   :  { %v10507_v6 = vpop.eup %10506 }
0x2393   :  { %v6589_v30 = vadd.f32 1.0, %v10507_v6  ;;  %v10509_v17 = vpop.eup %10508  ;;  %v15351_v6 = vld [vmem:[#allocation8_spill] sm:$0xff] }
0x2394   :  { %v6596_v44 = vadd.f32 1.0, %v10509_v17  ;;  %v15352_v17 = vld [vmem:[#allocation10_spill] sm:$0xff] }
0x2395   :  { %10510 = vrcp.f32 %v6589_v30 }
0x2396   :  { %10512 = vrcp.f32 %v6596_v44 }
0x239f   :  { %v10511_v62 = vpop.eup %10510 }
0x23a0   :  { %v6599_v15 = vmul.f32 %v10511_v62, %v6580_v32  ;;  %v10513_v45 = vpop.eup %10512  ;;  %v15353_v32 = vld [vmem:[#allocation7_spill] sm:$0xff] }
0x23a1   :  { %v6602_v21 = vsub.f32 1.0, %v10513_v45  ;;  %v6604_v47 = vmul.f32 %v10513_v45, %v15333_v24  ;;  %v15355_v45 = vld [vmem:[#allocation25_spill] sm:$0xff]  ;;  %v15357_v24 = vld [vmem:[#allocation24_spill] sm:$0xff] }
0x23a2   :  { %v6600_v48 = vadd.f32 %v6599_v15, %v6499_v3  ;;  %v15354_v3 = vld [vmem:[#allocation9_spill] sm:$0xff] }
0x23a4   :  { %10514 = vtanh.f32 %v6600_v48 }
0x23ae   :  { %v10515_v27 = vpop.eup %10514 }
0x23af   :  { %v6603_v40 = vmul.f32 %v10515_v27, %v6602_v21  ;;  %v15356_v27 = vld [vmem:[#allocation28_spill] sm:$0xff] }
0x23b1   :  { %v14175_v43 = vadd.f32 %v6604_v47, %v6603_v40 }
0x23b3   :  { %15334 = vst [vmem:[#allocation15_spill] sm:$0xff] %v14175_v43  ;;  %v14179_v46 = vpack.c.bf16 %v14175_v43, %v14175_v43 }
0x23b5   :  { %9501 = vmatmul.mubr.bf16.vlgmr.msra.gmra.mrb[88].mxu1 %v14179_v46 }
0x23b6   :  { %6954 = vmatpush1.bf16.msra.mxu1 %v14185_v35  ;;  %6985 = vmatprep.mubr.bf16.mxu1 %v15049_v52 }
0x23b7   :  { %6955 = vmatprep.subr.bf16.mxu1 %v14192_v8 }
0x23ba   :  { %6956 = vmatpush1.bf16.msra.mxu1 %v14198_v36 }
0x23bb   :  { %6957 = vmatprep.subr.bf16.mxu1 %v14204_v38 }
0x23be   :  { %6958 = vmatpush1.bf16.msra.mxu1 %v14210_v22 }
0x23bf   :  { %6959 = vmatprep.subr.bf16.mxu1 %v14216_v41 }
0x23c2   :  { %6960 = vmatpush1.bf16.msra.mxu1 %v14222_v34 }
0x23c3   :  { %6961 = vmatprep.subr.bf16.mxu1 %v14228_v42  ;;  %v15396_v42 = vld [vmem:[#allocation14_spill] sm:$0xff] }
0x23c6   :  { %6962 = vmatpush1.bf16.msra.mxu1 %v14234_v31 }
0x23c7   :  { %6963 = vmatprep.subr.bf16.mxu1 %v14240_v56  ;;  %v15373_v56 = vld [vmem:[#allocation37_spill] sm:$0xff] }
0x23ca   :  { %6964 = vmatpush1.bf16.msra.mxu1 %v14246_v26 }
0x23cb   :  { %6965 = vmatprep.subr.bf16.mxu1 %v14252_v39 }
0x23ce   :  { %6966 = vmatpush1.bf16.msra.mxu1 %v14258_v16 }
0x23cf   :  { %6967 = vmatprep.subr.bf16.mxu1 %v14264_v19 }
0x23d2   :  { %6968 = vmatpush1.bf16.msra.mxu1 %v14270_v60  ;;  %v15358_v60 = vld [vmem:[#allocation26_spill] sm:$0xff] }
0x23d3   :  { %7034 = vmatprep.subr.bf16.mxu1 %v14276_v33 }
0x2488   :  { %v6641_v63 = vpop.f32.mrb[88].mxu1 }
0x2489   :  { %v6647_v30 = vadd.f32 %v6641_v63, %v15351_v6  ;;  %v6648_v44 = vadd.f32 %v6641_v63, %v15352_v17  ;;  %v6649_v62 = vadd.f32 %v15353_v32, %v6641_v63  ;;  %v6650_v15 = vadd.f32 %v15354_v3, %v6641_v63  ;;  %v9502_v48 = vpop.f32.mrb[89].mxu1  ;;  %v15372_v6 = vld [vmem:[#allocation36_spill] sm:$0xff] }
0x248a   :  { %v6651_v21 = vadd.f32 %v6641_v63, %v15355_v45  ;;  %v6652_v40 = vadd.f32 %v6641_v63, %v15356_v27  ;;  %v6653_v47 = vadd.f32 %v15357_v24, %v6641_v63  ;;  %v6654_v19 = vadd.f32 %v15358_v60, %v6641_v63  ;;  %v6644_v16 = vpop.f32.mrb[90].mxu1  ;;  %v14290_v63 = vld [vmem:[%s14812_s5 + $0x8] ss:$12 sps:$4 sm:$0xff]   ;;  %v15371_v45 = vld [vmem:[#allocation35_spill] sm:$0xff] }
0x248b   :  { %10516 = vtanh.f32 %v6647_v30  ;;  %v9503_v33 = vpop.f32.mrb[91].mxu1  ;;  %15359 = vst [vmem:[#allocation40_spill] sm:$0xff] %v14290_v63  ;;  %v14297_v30 = vld [vmem:[%s14812_s5 + $0x20] ss:$12 sps:$4 sm:$0xff]  }
0x248c   :  { %10518 = vtanh.f32 %v6648_v44  ;;  %15360 = vst [vmem:[#allocation63_spill] sm:$0xff] %v14297_v30 }
0x248d   :  { %10520 = vtanh.f32 %v6649_v62 }
0x248e   :  { %10522 = vtanh.f32 %v6650_v15  ;;  %v14320_v15 = vld [vmem:[%s14812_s5 + $0x68] ss:$12 sps:$4 sm:$0xff]  }
0x248f   :  { %10524 = vtanh.f32 %v6651_v21  ;;  %15363 = vst [vmem:[#allocation47_spill] sm:$0xff] %v14320_v15  ;;  %v14327_v21 = vld [vmem:[%s14812_s5 + $0x80] ss:$12 sps:$4 sm:$0xff]  }
0x2490   :  { %10526 = vtanh.f32 %v6652_v40  ;;  %15364 = vst [vmem:[#allocation49_spill] sm:$0xff] %v14327_v21  ;;  %v14334_v40 = vld [vmem:[%s14812_s5 + $0x98] ss:$12 sps:$4 sm:$0xff]  }
0x2491   :  { %10528 = vtanh.f32 %v6653_v47  ;;  %15365 = vst [vmem:[#allocation52_spill] sm:$0xff] %v14334_v40  ;;  %v14341_v47 = vld [vmem:[%s14812_s5 + $0xb0] ss:$12 sps:$4 sm:$0xff]  }
0x2492   :  { %10530 = vtanh.f32 %v6654_v19  ;;  %15366 = vst [vmem:[#allocation51_spill] sm:$0xff] %v14341_v47 }
0x2495   :  { %v10517_v32 = vpop.eup %10516 }
0x2496   :  { %v10519_v3 = vpop.eup %10518  ;;  %9536 = vmatprep.mubr.f32.mxu0 %v10517_v32  ;;  %v14304_v32 = vld [vmem:[%s14812_s5 + $0x38] ss:$12 sps:$4 sm:$0xff]  }
0x2497   :  { %v10521_v48 = vpop.eup %10520  ;;  %9537 = vmatmul.mubr.f32.vlgmr.msra.gmra.mrb[140].mxu0 %v10519_v3  ;;  %15361 = vst [vmem:[#allocation46_spill] sm:$0xff] %v14304_v32  ;;  %v14311_v3 = vld [vmem:[%s14812_s5 + $0x50] ss:$12 sps:$4 sm:$0xff]  }
0x2498   :  { %9539 = vmatprep.mubr.f32.mxu0 %v10521_v48  ;;  %9549 = vmatpush3.bf16.msra.mxu0 %v14290_v63  ;;  %v10523_v16 = vpop.eup %10522  ;;  %15362 = vst [vmem:[#allocation64_spill] sm:$0xff] %v14311_v3 }
0x2499   :  { %9550 = vmatprep.subr.bf16.mxu0 %v15050_v54  ;;  %v10525_v33 = vpop.eup %10524 }
0x249a   :  { %v10527_v19 = vpop.eup %10526 }
0x249b   :  { %9540 = vmatmul.mubr.f32.gmra.mrb[142].mxu0 %v10523_v16  ;;  %v10529_v44 = vpop.eup %10528  ;;  %v15367_v16 = vld [vmem:[#allocation31_spill] sm:$0xff] }
0x249c   :  { %9542 = vmatprep.mubr.f32.mxu0 %v10525_v33  ;;  %9551 = vmatpush3.bf16.msra.mxu0 %v14297_v30  ;;  %v10531_v62 = vpop.eup %10530  ;;  %v15370_v30 = vld [vmem:[#allocation34_spill] sm:$0xff] }
0x249d   :  { %9552 = vmatprep.subr.bf16.mxu0 %v15050_v54 }
0x249f   :  { %9543 = vmatmul.mubr.f32.gmra.mrb[144].mxu0 %v10527_v19 }
0x24a0   :  { %9545 = vmatprep.mubr.f32.mxu0 %v10529_v44  ;;  %9553 = vmatpush3.bf16.msra.mxu0 %v14304_v32  ;;  %v15368_v44 = vld [vmem:[#allocation32_spill] sm:$0xff] }
0x24a1   :  { %9554 = vmatprep.subr.bf16.mxu0 %v15050_v54 }
0x24a3   :  { %9546 = vmatmul.mubr.f32.gmra.mrb[146].mxu0 %v10531_v62 }
0x24a4   :  { %9555 = vmatpush3.bf16.msra.mxu0 %v14311_v3  ;;  %9564 = vmatprep.mubr.msk.bf16.mxu0 %vm10793_vm1, %v15050_v54  ;;  %v15369_v3 = vld [vmem:[#allocation33_spill] sm:$0xff] }
0x24a5   :  { %9556 = vmatprep.subr.bf16.mxu0 %v15050_v54 }
0x24a8   :  { %9557 = vmatpush3.bf16.msra.mxu0 %v14320_v15 }
0x24a9   :  { %9558 = vmatprep.subr.bf16.mxu0 %v15050_v54 }
0x24ac   :  { %9559 = vmatpush3.bf16.msra.mxu0 %v14327_v21 }
0x24ad   :  { %9560 = vmatprep.subr.bf16.mxu0 %v15050_v54 }
0x24b0   :  { %9561 = vmatpush3.bf16.msra.mxu0 %v14334_v40 }
0x24b1   :  { %9562 = vmatprep.subr.bf16.mxu0 %v15050_v54 }
0x24b4   :  { %9563 = vmatpush3.bf16.msra.mxu0 %v14341_v47 }
0x24b5   :  { %9568 = vmatprep.subr.bf16.mxu0 %v15050_v54 }
0x256a   :  { %v9538_v48 = vpop.f32.mrb[140].mxu0 }
0x256b   :  { %v6769_v33 = vmul.f32 %v9538_v48, %v15367_v16  ;;  %v6729_v19 = vpop.f32.mrb[141].mxu0 }
0x256c   :  { %v6768_v62 = vmul.f32 %v15368_v44, %v6729_v19 }
0x256e   :  { %v6776_v21 = vadd.f32 %v6769_v33, %v6768_v62  ;;  %v9541_v15 = vpop.f32.mrb[142].mxu0  ;;  %v15374_v62 = vld [vmem:[#allocation38_spill] sm:$0xff] }
0x256f   :  { %v6739_v40 = vpop.f32.mrb[143].mxu0  ;;  %v6771_v63 = vmul.f32 %v9541_v15, %v15370_v30 }
0x2570   :  { %v6770_v32 = vmul.f32 %v15369_v3, %v6739_v40  ;;  %v15375_v40 = vld [vmem:[#allocation48_spill] sm:$0xff]  ;;  %v15376_v3 = vld [vmem:[#allocation30_spill] sm:$0xff] }
0x2571   :  { %vm15381_vm5 = vcmp.eq.s32.totalorder %v15376_v3, 5 }
0x2572   :  { %v6777_v60 = vadd.f32 %v6776_v21, %v6770_v32  ;;  %v9544_v24 = vpop.f32.mrb[144].mxu0  ;;  %v14357_v32 = vsel %vm6274_vm4, 0.0, %v15375_v40  ;;  %v15380_v40 = vld [vmem:[#allocation11_spill] sm:$0xff] }
0x2573   :  { %v6749_v27 = vpop.f32.mrb[145].mxu0  ;;  %v6773_v39 = vmul.f32 %v9544_v24, %v15372_v6  ;;  %15378 = vst [vmem:[#allocation48_spill] sm:$0xff] %v14357_v32  ;;  %vm6783_vm14 = vcmp.gt.f32.partialorder %v14357_v32, 0.0 }
0x2574   :  { %v6772_v47 = vmul.f32 %v15371_v45, %v6749_v27  ;;  %v6778_v17 = vadd.f32 %v6777_v60, %v6771_v63 }
0x2576   :  { %v6779_v26 = vadd.f32 %v6778_v17, %v6772_v47  ;;  %v9547_v48 = vpop.f32.mrb[146].mxu0 }
0x2577   :  { %v6759_v16 = vpop.f32.mrb[147].mxu0  ;;  %v6775_v44 = vmul.f32 %v9547_v48, %v15374_v62  ;;  %v15394_v62 = vld [vmem:[#allocation13_spill] sm:$0xff] }
0x2578   :  { %v6774_v19 = vmul.f32 %v15373_v56, %v6759_v16  ;;  %v6780_v33 = vadd.f32 %v6779_v26, %v6773_v39 }
0x257a   :  { %v6781_v31 = vadd.f32 %v6780_v33, %v6774_v19 }
0x257c   :  { %v6782_v21 = vadd.f32 %v6781_v31, %v6775_v44 }
0x257e   :  { %v6784_v60 = vsel %vm6783_vm14, %v6782_v21, -1e+09 }
0x257f   :  { %6785 = vmax.xlane.f32.xlu1 %v6784_v60 }
0x260c   :  { %v6786_v17 = vpop.xlane.xlu1 %6785 }
0x260d   :  { %vm6787_vm7 = vcmp.eq.f32.partialorder %v6784_v60, %v6786_v17  ;;  %v15383_v60 = vld [vmem:[#allocation6_spill] sm:$0xff] }
0x260e   :  { %v6788_v27 = vsel %vm6787_vm7, %v15376_v3, 128 }
0x260f   :  { %v6790_v24 = vshra.s32 %v6788_v27, 16  ;;  %v6789_v39 = vand.u32 65535, %v6788_v27  ;;  %v15384_v27 = vld [vmem:[#allocation5_spill] sm:$0xff] }
0x2611   :  { %v6792_v26 = vcvt.s32.f32 %v6790_v24  ;;  %v6791_v47 = vcvt.s32.f32 %v6789_v39 }
0x2613   :  { %6793 = vmin.xlane.f32.xlu0 %v6792_v26 }
0x26a0   :  { %v6794_v63 = vpop.xlane.xlu0 %6793 }
0x26a1   :  { %vm6795_vm2 = vcmp.eq.f32.partialorder %v6792_v26, %v6794_v63  ;;  %v6800_v48 = vcvt.f32.s32 %v6794_v63  ;;  %v15385_v26 = vld [vmem:[#allocation4_spill] sm:$0xff] }
0x26a2   :  { %v6796_v16 = vsel %vm6795_vm2, %v6791_v47, inf  ;;  %v15386_v63 = vld [vmem:[#allocation44_spill] sm:$0xff] }
0x26a3   :  { %6797 = vmin.xlane.f32.xlu0 %v6796_v16  ;;  %v6801_v31 = vshll.u32 %v6800_v48, 16  ;;  %v15387_v16 = vld [vmem:[#allocation43_spill] sm:$0xff] }
0x2730   :  { %v6798_v19 = vpop.xlane.xlu0 %6797 }
0x2731   :  { %v6799_v44 = vcvt.f32.s32 %v6798_v19  ;;  %v15388_v19 = vld [vmem:[#allocation45_spill] sm:$0xff] }
0x2733   :  { %v14361_v33 = vadd.s32 %v6801_v31, %v6799_v44  ;;  %v15389_v44 = vld [vmem:[#allocation41_spill] sm:$0xff] }
0x2735   :  { %15379 = vst [vmem:[#allocation50_spill] sm:$0xff] %v14361_v33  ;;  %v14367_v15 = vsel %vm15381_vm5, %v14361_v33, %v15380_v40  ;;  %vm6804_vm3 = vcmp.eq.s32.totalorder %v15376_v3, %v14361_v33  ;;  %v15392_v33 = vld [vmem:[#allocation12_spill] sm:$0xff] }
0x2736   :  { %15382 = vst [vmem:[#allocation11_spill] sm:$0xff] %v14367_v15  ;;  %v8219_v21 = vsel %vm6804_vm3, 1.0, %v15050_v54 }
0x2737   :  { %v6818_v17 = vrot.slane %v8219_v21, %v15383_v60  ;;  %v6811_v24 = vrot.slane %v8219_v21, %v15384_v27  ;;  %v6825_v39 = vrot.slane %v8219_v21, %v15385_v26  ;;  %v6839_v47 = vrot.slane %v8219_v21, %v15386_v63  ;;  %v15390_v60 = vld [vmem:[#allocation42_spill] sm:$0xff]  ;;  %v15391_v27 = vld [vmem:[#allocation19_spill] sm:$0xff] }
0x2738   :  { %v6832_v48 = vrot.slane %v8219_v21, %v15387_v16  ;;  %v6853_v31 = vrot.slane %v8219_v21, %v15388_v19  ;;  %v6846_v40 = vrot.slane %v8219_v21, %v15389_v44  ;;  %v6860_v15 = vrot.slane %v8219_v21, %v15390_v60 }
0x2739   :  { %6820 = vbcast.lane.b32.xlu1 %v6818_v17, 256  ;;  %6813 = vbcast.lane.b32.xlu0 %v6811_v24, 256 }
0x273d   :  { %6827 = vbcast.lane.b32.xlu1 %v6825_v39, 256  ;;  %6841 = vbcast.lane.b32.xlu0 %v6839_v47, 256 }
0x2741   :  { %6834 = vbcast.lane.b32.xlu1 %v6832_v48, 256  ;;  %6855 = vbcast.lane.b32.xlu0 %v6853_v31, 256  ;;  %v15393_v48 = vld [vmem:[#allocation20_spill] sm:$0xff] }
0x2745   :  { %6848 = vbcast.lane.b32.xlu1 %v6846_v40, 256 }
0x2749   :  { %6862 = vbcast.lane.b32.xlu1 %v6860_v15, 256 }
0x27ab   :  { %v6821_v17 = vpop.permute.xlu1 %6820  ;;  %v6814_v24 = vpop.permute.xlu0 %6813 }
0x27ac   :  { %v6865_v26 = vmul.f32 %v15391_v27, %v6821_v17  ;;  %v6864_v63 = vmul.f32 %v15392_v33, %v6814_v24  ;;  %v15395_v24 = vld [vmem:[#allocation21_spill] sm:$0xff] }
0x27ae   :  { %v6878_v39 = vrot.slane %v6865_v26, 4  ;;  %v6872_v47 = vrot.slane %v6864_v63, 4 }
0x27af   :  { %v6828_v3 = vpop.permute.xlu1 %6827  ;;  %v6842_v16 = vpop.permute.xlu0 %6841 }
0x27b0   :  { %v6879_v32 = vadd.f32 %v6878_v39, %v6865_v26  ;;  %v6873_v19 = vadd.f32 %v6872_v47, %v6864_v63  ;;  %v6866_v31 = vmul.f32 %v15393_v48, %v6828_v3  ;;  %v6868_v44 = vmul.f32 %v15394_v62, %v6842_v16 }
0x27b2   :  { %v6880_v40 = vrot.slane %v6879_v32, 2  ;;  %v6874_v56 = vrot.slane %v6873_v19, 2  ;;  %v6884_v21 = vrot.slane %v6866_v31, 4  ;;  %v6896_v15 = vrot.slane %v6868_v44, 4 }
0x27b3   :  { %v6835_v60 = vpop.permute.xlu1 %6834  ;;  %v6856_v6 = vpop.permute.xlu0 %6855 }
0x27b4   :  { %v6881_v45 = vadd.f32 %v6880_v40, %v6879_v32  ;;  %v6875_v27 = vadd.f32 %v6874_v56, %v6873_v19  ;;  %v6885_v17 = vadd.f32 %v6884_v21, %v6866_v31  ;;  %v6897_v33 = vadd.f32 %v6896_v15, %v6868_v44  ;;  %v15397_v56 = vld [vmem:[#allocation22_spill] sm:$0xff] }
0x27b5   :  { %v6867_v30 = vmul.f32 %v15395_v24, %v6835_v60  ;;  %v6870_v34 = vmul.f32 %v15396_v42, %v6856_v6 }
0x27b6   :  { %v6882_v26 = vrot.slane %v6881_v45, 1  ;;  %v6876_v63 = vrot.slane %v6875_v27, 1  ;;  %v6886_v39 = vrot.slane %v6885_v17, 2  ;;  %v6898_v3 = vrot.slane %v6897_v33, 2 }
0x27b7   :  { %v6890_v47 = vrot.slane %v6867_v30, 4  ;;  %v6908_v62 = vrot.slane %v6870_v34, 4  ;;  %v6849_v16 = vpop.permute.xlu1 %6848 }
0x27b8   :  { %v6883_v48 = vadd.f32 %v6882_v26, %v6881_v45  ;;  %v6877_v41 = vadd.f32 %v6876_v63, %v6875_v27  ;;  %v6887_v22 = vadd.f32 %v6886_v39, %v6885_v17  ;;  %v6899_v38 = vadd.f32 %v6898_v3, %v6897_v33  ;;  %v15398_v45 = vld [vmem:[#allocation23_spill] sm:$0xff] }
0x27b9   :  { %v6891_v36 = vadd.f32 %v6890_v47, %v6867_v30  ;;  %v6909_v32 = vadd.f32 %v6908_v62, %v6870_v34  ;;  %v6869_v19 = vmul.f32 %v15397_v56, %v6849_v16 }
0x27ba   :  { %v6888_v44 = vrot.slane %v6887_v22, 1  ;;  %v6921_v6 = vpack.c.bf16 %v6883_v48, %v6883_v48  ;;  %v6920_v21 = vpack.c.bf16 %v6877_v41, %v6877_v41  ;;  %v6900_v24 = vrot.slane %v6899_v38, 1 }
0x27bb   :  { %v6892_v31 = vrot.slane %v6891_v36, 2  ;;  %v6910_v60 = vrot.slane %v6909_v32, 2  ;;  %v6902_v40 = vrot.slane %v6869_v19, 4  ;;  %v6863_v42 = vpop.permute.xlu1 %6862 }
0x27bc   :  { %v6889_v15 = vadd.f32 %v6888_v44, %v6887_v22  ;;  %v6871_v27 = vmul.f32 %v15398_v45, %v6863_v42  ;;  %v6937_v26 = vunpack.c.l.b16 %v6921_v6  ;;  %v6901_v63 = vadd.f32 %v6900_v24, %v6899_v38 }
0x27bd   :  { %v6893_v8 = vadd.f32 %v6892_v31, %v6891_v36  ;;  %v6911_v35 = vadd.f32 %v6910_v60, %v6909_v32  ;;  %v6903_v43 = vadd.f32 %v6902_v40, %v6869_v19  ;;  %v6936_v3 = vunpack.c.l.b16 %v6920_v21 }
0x27be   :  { %v6922_v17 = vpack.c.bf16 %v6889_v15, %v6889_v15  ;;  %v6914_v34 = vrot.slane %v6871_v27, 4  ;;  %v6924_v36 = vpack.c.bf16 %v6901_v63, %v6901_v63 }
0x27bf   :  { %v6894_v33 = vrot.slane %v6893_v8, 1  ;;  %v6904_v30 = vrot.slane %v6903_v43, 2  ;;  %v6912_v39 = vrot.slane %v6911_v35, 1  ;;  %v6944_v19 = vsel %vm4287_vm15, %v6937_v26, %v6936_v3  ;;  %v14402_v26 = vld [vmem:[%s14813_s6 + $0x8] ss:$12 sps:$4 sm:$0xff]  }
0x27c0   :  { %v6915_v16 = vadd.f32 %v6914_v34, %v6871_v27  ;;  %v6938_v48 = vunpack.c.l.b16 %v6922_v17 }
0x27c1   :  { %v6895_v47 = vadd.f32 %v6894_v33, %v6893_v8  ;;  %v6905_v62 = vadd.f32 %v6904_v30, %v6903_v43  ;;  %v6913_v32 = vadd.f32 %v6912_v39, %v6911_v35  ;;  %v6940_v8 = vunpack.c.l.b16 %v6924_v36 }
0x27c2   :  { %v6916_v56 = vrot.slane %v6915_v16, 2  ;;  %v6945_v40 = vsel %vm4289_vm10, %v6938_v48, %v6944_v19 }
0x27c3   :  { %v6923_v41 = vpack.c.bf16 %v6895_v47, %v6895_v47  ;;  %v6906_v22 = vrot.slane %v6905_v62, 1  ;;  %v6926_v43 = vpack.c.bf16 %v6913_v32, %v6913_v32 }
0x27c4   :  { %v6917_v60 = vadd.f32 %v6916_v56, %v6915_v16 }
0x27c5   :  { %v6939_v44 = vunpack.c.l.b16 %v6923_v41  ;;  %v6907_v31 = vadd.f32 %v6906_v22, %v6905_v62  ;;  %v6942_v27 = vunpack.c.l.b16 %v6926_v43 }
0x27c6   :  { %v6918_v6 = vrot.slane %v6917_v60, 1 }
0x27c7   :  { %v6946_v38 = vsel %vm4291_vm11, %v6939_v44, %v6945_v40  ;;  %v6925_v42 = vpack.c.bf16 %v6907_v31, %v6907_v31 }
0x27c8   :  { %v6919_v15 = vadd.f32 %v6918_v6, %v6917_v60  ;;  %v6947_v24 = vsel %vm4293_vm12, %v6940_v8, %v6946_v38 }
0x27c9   :  { %v6941_v21 = vunpack.c.l.b16 %v6925_v42 }
0x27ca   :  { %v6927_v35 = vpack.c.bf16 %v6919_v15, %v6919_v15 }
0x27cb   :  { %v6948_v45 = vsel %vm4295_vm13, %v6941_v21, %v6947_v24 }
0x27cc   :  { %v6943_v17 = vunpack.c.l.b16 %v6927_v35  ;;  %v6949_v33 = vsel %vm4297_vm0, %v6942_v27, %v6948_v45  ;;  %v15399_v27 = vld [vmem:[#allocation15_spill] sm:$0xff] }
0x27ce   :  { %v6950_v30 = vsel %vm4299_vm9, %v6943_v17, %v6949_v33 }
0x27cf   :  { %v6951_v34 = vpack.c.b16 %v6950_v30, %v6950_v30 }
0x27d1   :  { %6986 = vmatmul.mubr.bf16.vlgmr.msra.gmra.mrb[92].mxu1 %v6951_v34  ;;  %9565 = vmatmul.mubr.bf16.vlgmr.msra.gmra.mrb[148].mxu0 %v6951_v34  ;;  %v15401_v34 = vld [vmem:[#allocation16_spill] sm:$0xff] }
0x27d2   :  { %7035 = vmatpush1.bf16.msra.mxu1 %v14022_v57  ;;  %9569 = vmatpush3.bf16.msra.mxu0 %v14402_v26  ;;  %v14414_v57 = vld [vmem:[%s14813_s6 + $0x20] ss:$12 sps:$4 sm:$0xff]  }
0x27d3   :  { %7036 = vmatprep.subr.bf16.mxu1 %v14029_v20  ;;  %9570 = vmatprep.subr.bf16.mxu0 %v15050_v54  ;;  %v14423_v20 = vld [vmem:[%s14813_s6 + $0x38] ss:$12 sps:$4 sm:$0xff]  }
0x27d4   :  { %7066 = vmatprep.mubr.bf16.mxu1 %v15049_v52  ;;  %9584 = vmatprep.mubr.msk.bf16.mxu0 %vm10793_vm1, %v15050_v54 }
0x27d6   :  { %7037 = vmatpush1.bf16.msra.mxu1 %v14039_v49  ;;  %9571 = vmatpush3.bf16.msra.mxu0 %v14414_v57  ;;  %v14432_v49 = vld [vmem:[%s14813_s6 + $0x50] ss:$12 sps:$4 sm:$0xff]  }
0x27d7   :  { %7038 = vmatprep.subr.bf16.mxu1 %v14046_v5  ;;  %9572 = vmatprep.subr.bf16.mxu0 %v15050_v54  ;;  %v14441_v5 = vld [vmem:[%s14813_s6 + $0x68] ss:$12 sps:$4 sm:$0xff]  }
0x27da   :  { %7039 = vmatpush1.bf16.msra.mxu1 %v14053_v50  ;;  %9573 = vmatpush3.bf16.msra.mxu0 %v14423_v20  ;;  %v14450_v50 = vld [vmem:[%s14813_s6 + $0x80] ss:$12 sps:$4 sm:$0xff]  }
0x27db   :  { %7040 = vmatprep.subr.bf16.mxu1 %v14060_v2  ;;  %9574 = vmatprep.subr.bf16.mxu0 %v15050_v54  ;;  %v14459_v2 = vld [vmem:[%s14813_s6 + $0x98] ss:$12 sps:$4 sm:$0xff]  }
0x27de   :  { %7041 = vmatpush1.bf16.msra.mxu1 %v14067_v4  ;;  %9575 = vmatpush3.bf16.msra.mxu0 %v14432_v49  ;;  %v14468_v4 = vld [vmem:[%s14813_s6 + $0xb0] ss:$12 sps:$4 sm:$0xff]  }
0x27df   :  { %7042 = vmatprep.subr.bf16.mxu1 %v14074_v29  ;;  %9576 = vmatprep.subr.bf16.mxu0 %v15050_v54  ;;  %v14478_v29 = vld [vmem:[%s14814_s10] sm:$0xff]  }
0x27e2   :  { %7043 = vmatpush1.bf16.msra.mxu1 %v14081_v1  ;;  %9577 = vmatpush3.bf16.msra.mxu0 %v14441_v5  ;;  %v14489_v1 = vld [vmem:[%s14814_s10 + $0x8] sm:$0xff]  }
0x27e3   :  { %7044 = vmatprep.subr.bf16.mxu1 %v14088_v58  ;;  %9578 = vmatprep.subr.bf16.mxu0 %v15050_v54  ;;  %v14498_v58 = vld [vmem:[%s14814_s10 + $0x10] sm:$0xff]  }
0x27e6   :  { %7045 = vmatpush1.bf16.msra.mxu1 %v14095_v25  ;;  %9579 = vmatpush3.bf16.msra.mxu0 %v14450_v50  ;;  %v14507_v25 = vld [vmem:[%s14814_s10 + $0x18] sm:$0xff]  }
0x27e7   :  { %7046 = vmatprep.subr.bf16.mxu1 %v14102_v37  ;;  %9580 = vmatprep.subr.bf16.mxu0 %v15050_v54  ;;  %v14516_v37 = vld [vmem:[%s14814_s10 + $0x20] sm:$0xff]  }
0x27ea   :  { %7047 = vmatpush1.bf16.msra.mxu1 %v14109_v9  ;;  %9581 = vmatpush3.bf16.msra.mxu0 %v14459_v2  ;;  %v14525_v9 = vld [vmem:[%s14814_s10 + $0x28] sm:$0xff]  }
0x27eb   :  { %7048 = vmatprep.subr.bf16.mxu1 %v14116_v12  ;;  %9582 = vmatprep.subr.bf16.mxu0 %v15050_v54  ;;  %v14534_v12 = vld [vmem:[%s14814_s10 + $0x30] sm:$0xff]  }
0x27ee   :  { %7049 = vmatpush1.bf16.msra.mxu1 %v14123_v13  ;;  %9583 = vmatpush3.bf16.msra.mxu0 %v14468_v4  ;;  %v14543_v13 = vld [vmem:[%s14814_s10 + $0x38] sm:$0xff]  }
0x27ef   :  { %9588 = vmatprep.subr.bf16.mxu1 %v15050_v54  ;;  %9949 = vmatprep.subr.bf16.mxu0 %v15075_v51 }
0x27f1   :  { %7067 = vmatmul.mubr.bf16.vlgmr.msra.gmra.mrb[92].mxu1 %v14179_v46  ;;  %9585 = vmatmul.mubr.bf16.vlgmr.msra.gmra.mrb[152].mxu0 %v14179_v46 }
0x27f2   :  { %9589 = vmatpush3.bf16.msra.mxu1 %v14478_v29  ;;  %9604 = vmatprep.mubr.msk.bf16.mxu1 %vm10793_vm1, %v15050_v54 }
0x27f3   :  { %9590 = vmatprep.subr.bf16.mxu1 %v15050_v54  ;;  %9951 = vmatpush3.bf16.msra.mxu0 %v15075_v51 }
0x27f4   :  { %9953 = vmatprep.subr.bf16.mxu0 %v15077_v59 }
0x27f6   :  { %9591 = vmatpush3.bf16.msra.mxu1 %v14489_v1 }
0x27f7   :  { %9592 = vmatprep.subr.bf16.mxu1 %v15050_v54  ;;  %9955 = vmatpush3.bf16.msra.mxu0 %v15077_v59 }
0x27f8   :  { %9957 = vmatprep.subr.bf16.mxu0 %v15079_v0 }
0x27fa   :  { %9593 = vmatpush3.bf16.msra.mxu1 %v14498_v58 }
0x27fb   :  { %9594 = vmatprep.subr.bf16.mxu1 %v15050_v54  ;;  %9959 = vmatpush3.bf16.msra.mxu0 %v15079_v0 }
0x27fc   :  { %9961 = vmatprep.subr.bf16.mxu0 %v15081_v23 }
0x27fe   :  { %9595 = vmatpush3.bf16.msra.mxu1 %v14507_v25 }
0x27ff   :  { %9596 = vmatprep.subr.bf16.mxu1 %v15050_v54  ;;  %9963 = vmatpush3.bf16.msra.mxu0 %v15081_v23 }
0x2800   :  { %9965 = vmatprep.subr.bf16.mxu0 %v15083_v11 }
0x2802   :  { %9597 = vmatpush3.bf16.msra.mxu1 %v14516_v37 }
0x2803   :  { %9598 = vmatprep.subr.bf16.mxu1 %v15050_v54  ;;  %9967 = vmatpush3.bf16.msra.mxu0 %v15083_v11 }
0x2804   :  { %9969 = vmatprep.subr.bf16.mxu0 %v12459_v14 }
0x2806   :  { %9599 = vmatpush3.bf16.msra.mxu1 %v14525_v9 }
0x2807   :  { %9600 = vmatprep.subr.bf16.mxu1 %v15050_v54  ;;  %9971 = vmatpush3.bf16.msra.mxu0 %v12459_v14 }
0x2808   :  { %9973 = vmatprep.subr.bf16.mxu0 %v12472_v10 }
0x280a   :  { %9601 = vmatpush3.bf16.msra.mxu1 %v14534_v12 }
0x280b   :  { %9602 = vmatprep.subr.bf16.mxu1 %v15050_v54  ;;  %9975 = vmatpush3.bf16.msra.mxu0 %v12472_v10 }
0x280c   :  { %9977 = vmatprep.subr.bf16.mxu0 %v12477_v7 }
0x280e   :  { %9603 = vmatpush3.bf16.msra.mxu1 %v14543_v13 }
0x280f   :  { %9979 = vmatpush3.bf16.msra.mxu0 %v12477_v7  ;;  %7483 = vmatprep.subr.bf16.mxu1 %v14166_v55 }
0x2810   :  { %9652 = vmatprep.subr.bf16.mxu0 %v15050_v54 }
0x28a4   :  { %v7028_v46 = vpop.f32.mrb[148].mxu0 }
0x28a5   :  { %v9566_v63 = vpop.f32.mrb[149].mxu0  ;;  %v7029_v8 = vadd.f32 %v7028_v46, %v12424_v18  ;;  %v15402_v46 = vld [vmem:[#allocation17_spill] sm:$0xff] }
0x28a6   :  { %v7031_v39 = vpop.f32.mrb[150].mxu0  ;;  %v15403_v63 = vld [vmem:[#allocation18_spill] sm:$0xff] }
0x28a7   :  { %v9567_v3 = vpop.f32.mrb[151].mxu0  ;;  %v15404_v39 = vld [vmem:[#allocation27_spill] sm:$0xff] }
0x28a8   :  { %v15405_v3 = vld [vmem:[#allocation29_spill] sm:$0xff] }
0x28c4   :  { %v7068_v47 = vpop.f32.mrb[92].mxu1  ;;  %v7109_v62 = vpop.f32.mrb[152].mxu0 }
0x28c5   :  { %v10037_v16 = vadd.f32 %v15089_v28, %v7068_v47  ;;  %v7070_v48 = vpop.f32.mrb[93].mxu1  ;;  %v9586_v41 = vpop.f32.mrb[153].mxu0  ;;  %v7110_v42 = vadd.f32 %v7109_v62, %v12421_v53  ;;  %v15406_v47 = vld [vmem:[#allocation53_spill] sm:$0xff]  ;;  %v15407_v62 = vld [vmem:[#allocation54_spill] sm:$0xff] }
0x28c6   :  { %v7072_v22 = vpop.f32.mrb[94].mxu1  ;;  %v7112_v56 = vpop.f32.mrb[154].mxu0  ;;  %v10039_v44 = vadd.f32 %v15090_v61, %v7070_v48  ;;  %v15409_v48 = vld [vmem:[#allocation56_spill] sm:$0xff]  ;;  %v15410_v41 = vld [vmem:[#allocation57_spill] sm:$0xff] }
0x28c7   :  { %v8220_v36 = vmul.f32 -1.442695, %v10037_v16  ;;  %v7073_v32 = vpop.f32.mrb[95].mxu1  ;;  %v9587_v19 = vpop.f32.mrb[155].mxu0  ;;  %v15408_v16 = vld [vmem:[#allocation55_spill] sm:$0xff]  ;;  %v15411_v22 = vld [vmem:[#allocation58_spill] sm:$0xff] }
0x28c8   :  { %v8221_v55 = vmul.f32 -1.442695, %v10039_v44  ;;  %v15412_v56 = vld [vmem:[#allocation59_spill] sm:$0xff]  ;;  %v15414_v32 = vld [vmem:[#allocation61_spill] sm:$0xff]  ;;  %v15415_v19 = vld [vmem:[#allocation62_spill] sm:$0xff] }
0x28c9   :  { %10532 = vpow2.f32 %v8220_v36  ;;  %v15413_v36 = vld [vmem:[#allocation60_spill] sm:$0xff]  ;;  %v15416_v44 = vld [vmem:[#allocation39_spill] sm:$0xff] }
0x28ca   :  { %10534 = vpow2.f32 %v8221_v55 }
0x28d3   :  { %v10533_v31 = vpop.eup %10532 }
0x28d4   :  { %v7119_v60 = vadd.f32 1.0, %v10533_v31  ;;  %v10535_v40 = vpop.eup %10534  ;;  %v15417_v31 = vld [vmem:[#allocation8_spill] sm:$0xff] }
0x28d5   :  { %v7126_v38 = vadd.f32 1.0, %v10535_v40  ;;  %v15418_v40 = vld [vmem:[#allocation10_spill] sm:$0xff] }
0x28d6   :  { %10536 = vrcp.f32 %v7119_v60 }
0x28d7   :  { %10538 = vrcp.f32 %v7126_v38 }
0x28e0   :  { %v10537_v6 = vpop.eup %10536 }
0x28e1   :  { %v7129_v43 = vmul.f32 %v10537_v6, %v7110_v42  ;;  %v10539_v15 = vpop.eup %10538  ;;  %v15419_v42 = vld [vmem:[#allocation7_spill] sm:$0xff] }
0x28e2   :  { %v7132_v24 = vsub.f32 1.0, %v10539_v15  ;;  %v7134_v17 = vmul.f32 %v10539_v15, %v15399_v27  ;;  %v15421_v15 = vld [vmem:[#allocation25_spill] sm:$0xff]  ;;  %v15423_v27 = vld [vmem:[#allocation24_spill] sm:$0xff] }
0x28e3   :  { %v7130_v21 = vadd.f32 %v7129_v43, %v7029_v8  ;;  %v15420_v8 = vld [vmem:[#allocation9_spill] sm:$0xff] }
0x28e5   :  { %10540 = vtanh.f32 %v7130_v21 }
0x28ef   :  { %v10541_v45 = vpop.eup %10540 }
0x28f0   :  { %v7133_v35 = vmul.f32 %v10541_v45, %v7132_v24  ;;  %v15422_v45 = vld [vmem:[#allocation28_spill] sm:$0xff] }
0x28f2   :  { %v14554_v33 = vadd.f32 %v7134_v17, %v7133_v35 }
0x28f4   :  { %15400 = vst [vmem:[#allocation19_spill] sm:$0xff] %v14554_v33  ;;  %v14558_v30 = vpack.c.bf16 %v14554_v33, %v14554_v33 }
0x28f6   :  { %9605 = vmatmul.mubr.bf16.vlgmr.msra.gmra.mrb[96].mxu1 %v14558_v30 }
0x28f7   :  { %7484 = vmatpush1.bf16.msra.mxu1 %v15401_v34  ;;  %7515 = vmatprep.mubr.bf16.mxu1 %v15049_v52  ;;  %v15424_v34 = vld [vmem:[#allocation26_spill] sm:$0xff] }
0x28f8   :  { %7485 = vmatprep.subr.bf16.mxu1 %v15402_v46 }
0x28fb   :  { %7486 = vmatpush1.bf16.msra.mxu1 %v15403_v63 }
0x28fc   :  { %7487 = vmatprep.subr.bf16.mxu1 %v15404_v39 }
0x28ff   :  { %7488 = vmatpush1.bf16.msra.mxu1 %v15405_v3 }
0x2900   :  { %7489 = vmatprep.subr.bf16.mxu1 %v15406_v47 }
0x2903   :  { %7490 = vmatpush1.bf16.msra.mxu1 %v15407_v62 }
0x2904   :  { %7491 = vmatprep.subr.bf16.mxu1 %v15408_v16  ;;  %v15425_v16 = vld [vmem:[#allocation40_spill] sm:$0xff] }
0x2907   :  { %7492 = vmatpush1.bf16.msra.mxu1 %v15409_v48 }
0x2908   :  { %7493 = vmatprep.subr.bf16.mxu1 %v15410_v41 }
0x290b   :  { %7494 = vmatpush1.bf16.msra.mxu1 %v15411_v22  ;;  %v15426_v22 = vld [vmem:[#allocation63_spill] sm:$0xff] }
0x290c   :  { %7495 = vmatprep.subr.bf16.mxu1 %v15412_v56 }
0x290f   :  { %7496 = vmatpush1.bf16.msra.mxu1 %v15413_v36 }
0x2910   :  { %7497 = vmatprep.subr.bf16.mxu1 %v15414_v32  ;;  %v15427_v32 = vld [vmem:[#allocation46_spill] sm:$0xff] }
0x2913   :  { %7498 = vmatpush1.bf16.msra.mxu1 %v15415_v19 }
0x2914   :  { %7564 = vmatprep.subr.bf16.mxu1 %v15416_v44  ;;  %v15428_v44 = vld [vmem:[#allocation64_spill] sm:$0xff] }
0x29c9   :  { %v7171_v55 = vpop.f32.mrb[96].mxu1 }
0x29ca   :  { %v7177_v60 = vadd.f32 %v7171_v55, %v15417_v31  ;;  %v7178_v38 = vadd.f32 %v7171_v55, %v15418_v40  ;;  %v7179_v6 = vadd.f32 %v15419_v42, %v7171_v55  ;;  %v7180_v43 = vadd.f32 %v15420_v8, %v7171_v55  ;;  %v9606_v21 = vpop.f32.mrb[97].mxu1 }
0x29cb   :  { %v7181_v24 = vadd.f32 %v7171_v55, %v15421_v15  ;;  %v7182_v35 = vadd.f32 %v7171_v55, %v15422_v45  ;;  %v7183_v17 = vadd.f32 %v15423_v27, %v7171_v55  ;;  %v7184_v46 = vadd.f32 %v15424_v34, %v7171_v55  ;;  %v7174_v63 = vpop.f32.mrb[98].mxu1  ;;  %v15429_v55 = vld [vmem:[#allocation47_spill] sm:$0xff] }
0x29cc   :  { %10542 = vtanh.f32 %v7177_v60  ;;  %v9607_v39 = vpop.f32.mrb[99].mxu1  ;;  %v15430_v60 = vld [vmem:[#allocation49_spill] sm:$0xff]  ;;  %v15433_v21 = vld [vmem:[#allocation31_spill] sm:$0xff] }
0x29cd   :  { %10544 = vtanh.f32 %v7178_v38  ;;  %v15431_v38 = vld [vmem:[#allocation52_spill] sm:$0xff] }
0x29ce   :  { %10546 = vtanh.f32 %v7179_v6  ;;  %v15432_v6 = vld [vmem:[#allocation51_spill] sm:$0xff] }
0x29cf   :  { %10548 = vtanh.f32 %v7180_v43 }
0x29d0   :  { %10550 = vtanh.f32 %v7181_v24 }
0x29d1   :  { %10552 = vtanh.f32 %v7182_v35 }
0x29d2   :  { %10554 = vtanh.f32 %v7183_v17  ;;  %v15434_v17 = vld [vmem:[#allocation32_spill] sm:$0xff] }
0x29d3   :  { %10556 = vtanh.f32 %v7184_v46 }
0x29d6   :  { %v10543_v3 = vpop.eup %10542 }
0x29d7   :  { %v10545_v47 = vpop.eup %10544  ;;  %9640 = vmatprep.mubr.f32.mxu0 %v10543_v3 }
0x29d8   :  { %v10547_v62 = vpop.eup %10546  ;;  %9641 = vmatmul.mubr.f32.vlgmr.msra.gmra.mrb[156].mxu0 %v10545_v47  ;;  %v15435_v47 = vld [vmem:[#allocation33_spill] sm:$0xff] }
0x29d9   :  { %9643 = vmatprep.mubr.f32.mxu0 %v10547_v62  ;;  %9653 = vmatpush3.bf16.msra.mxu0 %v15425_v16  ;;  %v10549_v48 = vpop.eup %10548  ;;  %v15436_v16 = vld [vmem:[#allocation34_spill] sm:$0xff] }
0x29da   :  { %9654 = vmatprep.subr.bf16.mxu0 %v15050_v54  ;;  %v10551_v41 = vpop.eup %10550 }
0x29db   :  { %v10553_v56 = vpop.eup %10552 }
0x29dc   :  { %9644 = vmatmul.mubr.f32.gmra.mrb[158].mxu0 %v10549_v48  ;;  %v10555_v36 = vpop.eup %10554 }
0x29dd   :  { %9646 = vmatprep.mubr.f32.mxu0 %v10551_v41  ;;  %9655 = vmatpush3.bf16.msra.mxu0 %v15426_v22  ;;  %v10557_v19 = vpop.eup %10556 }
0x29de   :  { %9656 = vmatprep.subr.bf16.mxu0 %v15050_v54 }
0x29e0   :  { %9647 = vmatmul.mubr.f32.gmra.mrb[160].mxu0 %v10553_v56 }
0x29e1   :  { %9649 = vmatprep.mubr.f32.mxu0 %v10555_v36  ;;  %9657 = vmatpush3.bf16.msra.mxu0 %v15427_v32  ;;  %v15437_v36 = vld [vmem:[#allocation35_spill] sm:$0xff] }
0x29e2   :  { %9658 = vmatprep.subr.bf16.mxu0 %v15050_v54 }
0x29e4   :  { %9650 = vmatmul.mubr.f32.gmra.mrb[162].mxu0 %v10557_v19 }
0x29e5   :  { %9659 = vmatpush3.bf16.msra.mxu0 %v15428_v44  ;;  %9668 = vmatprep.mubr.msk.bf16.mxu0 %vm10793_vm1, %v15050_v54  ;;  %v15438_v44 = vld [vmem:[#allocation36_spill] sm:$0xff] }
0x29e6   :  { %9660 = vmatprep.subr.bf16.mxu0 %v15050_v54 }
0x29e9   :  { %9661 = vmatpush3.bf16.msra.mxu0 %v15429_v55 }
0x29ea   :  { %9662 = vmatprep.subr.bf16.mxu0 %v15050_v54 }
0x29ed   :  { %9663 = vmatpush3.bf16.msra.mxu0 %v15430_v60 }
0x29ee   :  { %9664 = vmatprep.subr.bf16.mxu0 %v15050_v54 }
0x29f1   :  { %9665 = vmatpush3.bf16.msra.mxu0 %v15431_v38 }
0x29f2   :  { %9666 = vmatprep.subr.bf16.mxu0 %v15050_v54 }
0x29f5   :  { %9667 = vmatpush3.bf16.msra.mxu0 %v15432_v6 }
0x29f6   :  { %9672 = vmatprep.subr.bf16.mxu0 %v15050_v54 }
0x2aab   :  { %v9642_v43 = vpop.f32.mrb[156].mxu0 }
0x2aac   :  { %v7299_v24 = vmul.f32 %v9642_v43, %v15433_v21  ;;  %v7259_v35 = vpop.f32.mrb[157].mxu0  ;;  %v15439_v43 = vld [vmem:[#allocation37_spill] sm:$0xff] }
0x2aad   :  { %v7298_v46 = vmul.f32 %v15434_v17, %v7259_v35 }
0x2aaf   :  { %v7306_v63 = vadd.f32 %v7299_v24, %v7298_v46  ;;  %v9645_v39 = vpop.f32.mrb[158].mxu0  ;;  %v15440_v46 = vld [vmem:[#allocation38_spill] sm:$0xff] }
0x2ab0   :  { %v7269_v3 = vpop.f32.mrb[159].mxu0  ;;  %v7301_v48 = vmul.f32 %v9645_v39, %v15436_v16 }
0x2ab1   :  { %v7300_v62 = vmul.f32 %v15435_v47, %v7269_v3  ;;  %v15441_v3 = vld [vmem:[#allocation48_spill] sm:$0xff]  ;;  %v15442_v47 = vld [vmem:[#allocation30_spill] sm:$0xff] }
0x2ab2   :  { %vm15447_vm14 = vcmp.eq.s32.totalorder %v15442_v47, 6 }
0x2ab3   :  { %v7307_v41 = vadd.f32 %v7306_v63, %v7300_v62  ;;  %v9648_v22 = vpop.f32.mrb[160].mxu0  ;;  %v14616_v63 = vsel %vm6804_vm3, 0.0, %v15441_v3  ;;  %v15446_v3 = vld [vmem:[#allocation11_spill] sm:$0xff] }
0x2ab4   :  { %v7279_v56 = vpop.f32.mrb[161].mxu0  ;;  %v7303_v55 = vmul.f32 %v9648_v22, %v15438_v44  ;;  %15444 = vst [vmem:[#allocation12_spill] sm:$0xff] %v14616_v63  ;;  %vm7313_vm6 = vcmp.gt.f32.partialorder %v14616_v63, 0.0 }
0x2ab5   :  { %v7302_v32 = vmul.f32 %v15437_v36, %v7279_v56  ;;  %v7308_v19 = vadd.f32 %v7307_v41, %v7301_v48 }
0x2ab7   :  { %v7309_v60 = vadd.f32 %v7308_v19, %v7302_v32  ;;  %v9651_v38 = vpop.f32.mrb[162].mxu0 }
0x2ab8   :  { %v7289_v6 = vpop.f32.mrb[163].mxu0  ;;  %v7305_v17 = vmul.f32 %v9651_v38, %v15440_v46 }
0x2ab9   :  { %v7304_v35 = vmul.f32 %v15439_v43, %v7289_v6  ;;  %v7310_v24 = vadd.f32 %v7309_v60, %v7303_v55 }
0x2abb   :  { %v7311_v21 = vadd.f32 %v7310_v24, %v7304_v35 }
0x2abd   :  { %v7312_v62 = vadd.f32 %v7311_v21, %v7305_v17 }
0x2abf   :  { %v7314_v48 = vsel %vm7313_vm6, %v7312_v62, -1e+09 }
0x2ac0   :  { %7315 = vmax.xlane.f32.xlu0 %v7314_v48 }
0x2b4d   :  { %v7316_v41 = vpop.xlane.xlu0 %7315 }
0x2b4e   :  { %vm7317_vm8 = vcmp.eq.f32.partialorder %v7314_v48, %v7316_v41  ;;  %v15449_v48 = vld [vmem:[#allocation6_spill] sm:$0xff] }
0x2b4f   :  { %v7318_v22 = vsel %vm7317_vm8, %v15442_v47, 128 }
0x2b50   :  { %v7320_v56 = vshra.s32 %v7318_v22, 16  ;;  %v7319_v19 = vand.u32 65535, %v7318_v22  ;;  %v15450_v22 = vld [vmem:[#allocation5_spill] sm:$0xff] }
0x2b52   :  { %v7322_v32 = vcvt.s32.f32 %v7320_v56  ;;  %v7321_v60 = vcvt.s32.f32 %v7319_v19 }
0x2b54   :  { %7323 = vmin.xlane.f32.xlu1 %v7322_v32 }
0x2be1   :  { %v7324_v55 = vpop.xlane.xlu1 %7323 }
0x2be2   :  { %vm7325_vm4 = vcmp.eq.f32.partialorder %v7322_v32, %v7324_v55  ;;  %v7330_v6 = vcvt.f32.s32 %v7324_v55  ;;  %v15451_v32 = vld [vmem:[#allocation4_spill] sm:$0xff]  ;;  %v15452_v55 = vld [vmem:[#allocation43_spill] sm:$0xff] }
0x2be3   :  { %v7326_v38 = vsel %vm7325_vm4, %v7321_v60, inf }
0x2be4   :  { %7327 = vmin.xlane.f32.xlu0 %v7326_v38  ;;  %v7331_v21 = vshll.u32 %v7330_v6, 16  ;;  %v15453_v38 = vld [vmem:[#allocation44_spill] sm:$0xff] }
0x2c71   :  { %v7328_v35 = vpop.xlane.xlu0 %7327 }
0x2c72   :  { %v7329_v17 = vcvt.f32.s32 %v7328_v35  ;;  %v15454_v35 = vld [vmem:[#allocation41_spill] sm:$0xff] }
0x2c74   :  { %v14620_v24 = vadd.s32 %v7331_v21, %v7329_v17  ;;  %v15455_v17 = vld [vmem:[#allocation45_spill] sm:$0xff] }
0x2c76   :  { %15445 = vst [vmem:[#allocation20_spill] sm:$0xff] %v14620_v24  ;;  %v14626_v39 = vsel %vm15447_vm14, %v14620_v24, %v15446_v3  ;;  %vm7334_vm7 = vcmp.eq.s32.totalorder %v15442_v47, %v14620_v24 }
0x2c77   :  { %15448 = vst [vmem:[#allocation13_spill] sm:$0xff] %v14626_v39  ;;  %v8222_v62 = vsel %vm7334_vm7, 1.0, %v15050_v54  ;;  %v15456_v39 = vld [vmem:[#allocation42_spill] sm:$0xff] }
0x2c78   :  { %v7348_v41 = vrot.slane %v8222_v62, %v15449_v48  ;;  %v7341_v56 = vrot.slane %v8222_v62, %v15450_v22  ;;  %v7355_v19 = vrot.slane %v8222_v62, %v15451_v32  ;;  %v7362_v60 = vrot.slane %v8222_v62, %v15452_v55 }
0x2c79   :  { %v7369_v6 = vrot.slane %v8222_v62, %v15453_v38  ;;  %v7376_v21 = vrot.slane %v8222_v62, %v15454_v35  ;;  %v7383_v3 = vrot.slane %v8222_v62, %v15455_v17  ;;  %v7390_v48 = vrot.slane %v8222_v62, %v15456_v39  ;;  %v10770_v62 = vld [vmem:[%s14810_s13 + $0x10] sm:$0xff] }
0x2c7a   :  { %7350 = vbcast.lane.b32.xlu1 %v7348_v41, 256  ;;  %7343 = vbcast.lane.b32.xlu0 %v7341_v56, 256  ;;  %v10768_v56 = vld [vmem:[%s14810_s13 + $0x8] sm:$0xff] }
0x2c7e   :  { %7357 = vbcast.lane.b32.xlu1 %v7355_v19, 256  ;;  %7364 = vbcast.lane.b32.xlu0 %v7362_v60, 256  ;;  %v10769_v19 = vld [vmem:[%s14810_s13] sm:$0xff] }
0x2c82   :  { %7371 = vbcast.lane.b32.xlu1 %v7369_v6, 256  ;;  %7378 = vbcast.lane.b32.xlu0 %v7376_v21, 256 }
0x2c86   :  { %7385 = vbcast.lane.b32.xlu1 %v7383_v3, 256  ;;  %7392 = vbcast.lane.b32.xlu0 %v7390_v48, 256  ;;  %v10771_v3 = vld [vmem:[%s14810_s13 + $0x18] sm:$0xff] }
0x2cec   :  { %v7351_v41 = vpop.permute.xlu1 %7350  ;;  %v7344_v22 = vpop.permute.xlu0 %7343 }
0x2ced   :  { %v7395_v32 = vmul.f32 %v10768_v56, %v7351_v41  ;;  %v7394_v55 = vmul.f32 %v10769_v19, %v7344_v22 }
0x2cef   :  { %v7408_v60 = vrot.slane %v7395_v32, 4  ;;  %v7402_v38 = vrot.slane %v7394_v55, 4 }
0x2cf0   :  { %v7358_v6 = vpop.permute.xlu1 %7357  ;;  %v7365_v35 = vpop.permute.xlu0 %7364 }
0x2cf1   :  { %v7409_v21 = vadd.f32 %v7408_v60, %v7395_v32  ;;  %v7403_v39 = vadd.f32 %v7402_v38, %v7394_v55  ;;  %v7396_v17 = vmul.f32 %v10770_v62, %v7358_v6  ;;  %v7397_v48 = vmul.f32 %v10771_v3, %v7365_v35  ;;  %v10772_v60 = vld [vmem:[%s14810_s13 + $0x20] sm:$0xff]  ;;  %v10773_v6 = vld [vmem:[%s14810_s13 + $0x28] sm:$0xff] }
0x2cf3   :  { %v7410_v41 = vrot.slane %v7409_v21, 2  ;;  %v7404_v56 = vrot.slane %v7403_v39, 2  ;;  %v7414_v24 = vrot.slane %v7396_v17, 4  ;;  %v7420_v22 = vrot.slane %v7397_v48, 4 }
0x2cf4   :  { %v7372_v19 = vpop.permute.xlu1 %7371  ;;  %v7379_v47 = vpop.permute.xlu0 %7378 }
0x2cf5   :  { %v7411_v63 = vadd.f32 %v7410_v41, %v7409_v21  ;;  %v7405_v46 = vadd.f32 %v7404_v56, %v7403_v39  ;;  %v7415_v32 = vadd.f32 %v7414_v24, %v7396_v17  ;;  %v7421_v55 = vadd.f32 %v7420_v22, %v7397_v48 }
0x2cf6   :  { %v7398_v38 = vmul.f32 %v10772_v60, %v7372_v19  ;;  %v7399_v35 = vmul.f32 %v10773_v6, %v7379_v47  ;;  %v10774_v19 = vld [vmem:[%s14810_s13 + $0x30] sm:$0xff]  ;;  %v10775_v47 = vld [vmem:[%s14810_s13 + $0x38] sm:$0xff] }
0x2cf7   :  { %v7412_v62 = vrot.slane %v7411_v63, 1  ;;  %v7406_v3 = vrot.slane %v7405_v46, 1  ;;  %v7416_v43 = vrot.slane %v7415_v32, 2  ;;  %v7422_v44 = vrot.slane %v7421_v55, 2 }
0x2cf8   :  { %v7426_v36 = vrot.slane %v7398_v38, 4  ;;  %v7432_v16 = vrot.slane %v7399_v35, 4  ;;  %v7386_v21 = vpop.permute.xlu1 %7385  ;;  %v7393_v39 = vpop.permute.xlu0 %7392 }
0x2cf9   :  { %v7413_v24 = vadd.f32 %v7412_v62, %v7411_v63  ;;  %v7407_v17 = vadd.f32 %v7406_v3, %v7405_v46  ;;  %v7417_v48 = vadd.f32 %v7416_v43, %v7415_v32  ;;  %v7423_v41 = vadd.f32 %v7422_v44, %v7421_v55 }
0x2cfa   :  { %v7427_v56 = vadd.f32 %v7426_v36, %v7398_v38  ;;  %v7433_v22 = vadd.f32 %v7432_v16, %v7399_v35  ;;  %v7400_v60 = vmul.f32 %v10774_v19, %v7386_v21  ;;  %v7401_v6 = vmul.f32 %v10775_v47, %v7393_v39 }
0x2cfb   :  { %v7451_v34 = vpack.c.bf16 %v7413_v24, %v7413_v24  ;;  %v7450_v27 = vpack.c.bf16 %v7407_v17, %v7407_v17  ;;  %v7418_v45 = vrot.slane %v7417_v48, 1  ;;  %v7424_v15 = vrot.slane %v7423_v41, 1 }
0x2cfc   :  { %v7428_v63 = vrot.slane %v7427_v56, 2  ;;  %v7434_v46 = vrot.slane %v7433_v22, 2  ;;  %v7438_v43 = vrot.slane %v7400_v60, 4  ;;  %v7444_v44 = vrot.slane %v7401_v6, 4 }
0x2cfd   :  { %v7419_v36 = vadd.f32 %v7418_v45, %v7417_v48  ;;  %v7425_v16 = vadd.f32 %v7424_v15, %v7423_v41  ;;  %v7467_v62 = vunpack.c.l.b16 %v7451_v34  ;;  %v7466_v3 = vunpack.c.l.b16 %v7450_v27 }
0x2cfe   :  { %v7429_v32 = vadd.f32 %v7428_v63, %v7427_v56  ;;  %v7435_v55 = vadd.f32 %v7434_v46, %v7433_v22  ;;  %v7439_v38 = vadd.f32 %v7438_v43, %v7400_v60  ;;  %v7445_v35 = vadd.f32 %v7444_v44, %v7401_v6 }
0x2cff   :  { %v7452_v21 = vpack.c.bf16 %v7419_v36, %v7419_v36  ;;  %v7453_v19 = vpack.c.bf16 %v7425_v16, %v7425_v16  ;;  %v7474_v45 = vsel %vm4287_vm15, %v7467_v62, %v7466_v3  ;;  %v10783_v62 = vld [vmem:[%s14813_s6 + $0x64] ss:$12 sps:$4 sm:$0xff]   ;;  %v10785_v3 = vld [vmem:[%s14813_s6 + $0x7c] ss:$12 sps:$4 sm:$0xff]  }
0x2d00   :  { %v7430_v8 = vrot.slane %v7429_v32, 1  ;;  %v7436_v39 = vrot.slane %v7435_v55, 1  ;;  %v7440_v24 = vrot.slane %v7439_v38, 2  ;;  %v7446_v17 = vrot.slane %v7445_v35, 2 }
0x2d01   :  { %v7468_v47 = vunpack.c.l.b16 %v7452_v21  ;;  %v7469_v15 = vunpack.c.l.b16 %v7453_v19  ;;  %v10787_v21 = vld [vmem:[%s14813_s6 + $0x94] ss:$12 sps:$4 sm:$0xff]   ;;  %v10789_v19 = vld [vmem:[%s14813_s6 + $0xac] ss:$12 sps:$4 sm:$0xff]  }
0x2d02   :  { %v7431_v42 = vadd.f32 %v7430_v8, %v7429_v32  ;;  %v7437_v40 = vadd.f32 %v7436_v39, %v7435_v55  ;;  %v7441_v31 = vadd.f32 %v7440_v24, %v7439_v38  ;;  %v7447_v33 = vadd.f32 %v7446_v17, %v7445_v35  ;;  %v10778_v38 = vld [vmem:[%s14813_s6 + $0x18] ss:$12 sps:$4 sm:$0xff]  }
0x2d03   :  { %v7475_v48 = vsel %vm4289_vm10, %v7468_v47, %v7474_v45  ;;  %v10781_v35 = vld [vmem:[%s14813_s6 + $0x4c] ss:$12 sps:$4 sm:$0xff]   ;;  %vm15479_vm10 = vcmask 64512  }
0x2d04   :  { %v7454_v41 = vpack.c.bf16 %v7431_v42, %v7431_v42  ;;  %v7455_v56 = vpack.c.bf16 %v7437_v40, %v7437_v40  ;;  %v7442_v34 = vrot.slane %v7441_v31, 1  ;;  %v7448_v27 = vrot.slane %v7447_v33, 1 }
0x2d05   :  { %v7476_v6 = vsel %vm4291_vm11, %v7469_v15, %v7475_v48 }
0x2d06   :  { %v7470_v22 = vunpack.c.l.b16 %v7454_v41  ;;  %v7443_v60 = vadd.f32 %v7442_v34, %v7441_v31  ;;  %v7471_v63 = vunpack.c.l.b16 %v7455_v56  ;;  %v7449_v46 = vadd.f32 %v7448_v27, %v7447_v33  ;;  %v10776_v31 = vld [vmem:[%s14813_s6] ss:$12 sps:$4 sm:$0xff]   ;;  %v10777_v33 = vld [vmem:[%s14813_s6 + $0x1c] ss:$12 sps:$4 sm:$0xff]  }
0x2d07   :  { %v15457_v41 = vld [vmem:[#allocation19_spill] sm:$0xff] }
0x2d08   :  { %v7477_v8 = vsel %vm4293_vm12, %v7470_v22, %v7476_v6  ;;  %v7456_v43 = vpack.c.bf16 %v7443_v60, %v7443_v60  ;;  %v7457_v44 = vpack.c.bf16 %v7449_v46, %v7449_v46  ;;  %v15458_v60 = vld [vmem:[#allocation8_spill] sm:$0xff]  ;;  %v15460_v46 = vld [vmem:[#allocation7_spill] sm:$0xff] }
0x2d09   :  { %v7478_v16 = vsel %vm4295_vm13, %v7471_v63, %v7477_v8  ;;  %v15461_v8 = vld [vmem:[#allocation9_spill] sm:$0xff] }
0x2d0a   :  { %v7472_v36 = vunpack.c.l.b16 %v7456_v43  ;;  %v7473_v32 = vunpack.c.l.b16 %v7457_v44 }
0x2d0c   :  { %v7479_v55 = vsel %vm4297_vm0, %v7472_v36, %v7478_v16  ;;  %v15462_v36 = vld [vmem:[#allocation25_spill] sm:$0xff] }
0x2d0d   :  { %v7480_v40 = vsel %vm4299_vm9, %v7473_v32, %v7479_v55  ;;  %v15463_v32 = vld [vmem:[#allocation28_spill] sm:$0xff] }
0x2d0e   :  { %v7481_v42 = vpack.c.b16 %v7480_v40, %v7480_v40  ;;  %v15464_v40 = vld [vmem:[#allocation24_spill] sm:$0xff] }
0x2d10   :  { %7516 = vmatmul.mubr.bf16.vlgmr.msra.gmra.mrb[100].mxu1 %v7481_v42  ;;  %9669 = vmatmul.mubr.bf16.vlgmr.msra.gmra.mrb[164].mxu0 %v7481_v42 }
0x2d11   :  { %7565 = vmatpush1.bf16.msra.mxu1 %v10776_v31  ;;  %9673 = vmatpush3.bf16.msra.mxu0 %v14402_v26  ;;  %v10779_v26 = vld [vmem:[%s14813_s6 + $0x34] ss:$12 sps:$4 sm:$0xff]  }
0x2d12   :  { %7566 = vmatprep.subr.bf16.mxu1 %v10777_v33  ;;  %9674 = vmatprep.subr.bf16.mxu0 %v15050_v54  ;;  %v15465_v31 = vld [vmem:[#allocation26_spill] sm:$0xff] }
0x2d13   :  { %7596 = vmatprep.mubr.bf16.mxu1 %v15049_v52  ;;  %9688 = vmatprep.mubr.msk.bf16.mxu0 %vm10793_vm1, %v15050_v54  ;;  %v10780_v52 = vld [vmem:[%s14813_s6 + $0x30] ss:$12 sps:$4 sm:$0xff]  }
0x2d15   :  { %7567 = vmatpush1.bf16.msra.mxu1 %v10778_v38  ;;  %9675 = vmatpush3.bf16.msra.mxu0 %v14414_v57  ;;  %v10782_v57 = vld [vmem:[%s14813_s6 + $0x48] ss:$12 sps:$4 sm:$0xff]  }
0x2d16   :  { %7568 = vmatprep.subr.bf16.mxu1 %v10779_v26  ;;  %9676 = vmatprep.subr.bf16.mxu0 %v15050_v54 }
0x2d19   :  { %7569 = vmatpush1.bf16.msra.mxu1 %v10780_v52  ;;  %9677 = vmatpush3.bf16.msra.mxu0 %v14423_v20  ;;  %v10784_v20 = vld [vmem:[%s14813_s6 + $0x60] ss:$12 sps:$4 sm:$0xff]  }
0x2d1a   :  { %7570 = vmatprep.subr.bf16.mxu1 %v10781_v35  ;;  %9678 = vmatprep.subr.bf16.mxu0 %v15050_v54 }
0x2d1d   :  { %7571 = vmatpush1.bf16.msra.mxu1 %v10782_v57  ;;  %9679 = vmatpush3.bf16.msra.mxu0 %v14432_v49  ;;  %v10786_v49 = vld [vmem:[%s14813_s6 + $0x78] ss:$12 sps:$4 sm:$0xff]  }
0x2d1e   :  { %7572 = vmatprep.subr.bf16.mxu1 %v10783_v62  ;;  %9680 = vmatprep.subr.bf16.mxu0 %v15050_v54 }
0x2d21   :  { %7573 = vmatpush1.bf16.msra.mxu1 %v10784_v20  ;;  %9681 = vmatpush3.bf16.msra.mxu0 %v14441_v5  ;;  %v10788_v5 = vld [vmem:[%s14813_s6 + $0x90] ss:$12 sps:$4 sm:$0xff]  }
0x2d22   :  { %7574 = vmatprep.subr.bf16.mxu1 %v10785_v3  ;;  %9682 = vmatprep.subr.bf16.mxu0 %v15050_v54 }
0x2d25   :  { %7575 = vmatpush1.bf16.msra.mxu1 %v10786_v49  ;;  %9683 = vmatpush3.bf16.msra.mxu0 %v14450_v50  ;;  %v10790_v50 = vld [vmem:[%s14813_s6 + $0xa8] ss:$12 sps:$4 sm:$0xff]  }
0x2d26   :  { %7576 = vmatprep.subr.bf16.mxu1 %v10787_v21  ;;  %9684 = vmatprep.subr.bf16.mxu0 %v15050_v54 }
0x2d29   :  { %7577 = vmatpush1.bf16.msra.mxu1 %v10788_v5  ;;  %9685 = vmatpush3.bf16.msra.mxu0 %v14459_v2 }
0x2d2a   :  { %7578 = vmatprep.subr.bf16.mxu1 %v10789_v19  ;;  %9686 = vmatprep.subr.bf16.mxu0 %v15050_v54  ;;  %v15466_v19 = vld [vmem:[#allocation31_spill] sm:$0xff] }
0x2d2d   :  { %7579 = vmatpush1.bf16.msra.mxu1 %v10790_v50  ;;  %9687 = vmatpush3.bf16.msra.mxu0 %v14468_v4 }
0x2d2e   :  { %9692 = vmatprep.subr.bf16.mxu1 %v15050_v54  ;;  %9981 = vmatprep.subr.bf16.mxu0 %v15075_v51 }
0x2d30   :  { %7597 = vmatmul.mubr.bf16.vlgmr.msra.gmra.mrb[100].mxu1 %v14558_v30  ;;  %9689 = vmatmul.mubr.bf16.vlgmr.msra.gmra.mrb[168].mxu0 %v14558_v30 }
0x2d31   :  { %9693 = vmatpush3.bf16.msra.mxu1 %v14478_v29  ;;  %9708 = vmatprep.mubr.msk.bf16.mxu1 %vm10793_vm1, %v15050_v54 }
0x2d32   :  { %9694 = vmatprep.subr.bf16.mxu1 %v15050_v54  ;;  %9983 = vmatpush3.bf16.msra.mxu0 %v15075_v51 }
0x2d33   :  { %9985 = vmatprep.subr.bf16.mxu0 %v15077_v59 }
0x2d35   :  { %9695 = vmatpush3.bf16.msra.mxu1 %v14489_v1 }
0x2d36   :  { %9696 = vmatprep.subr.bf16.mxu1 %v15050_v54  ;;  %9987 = vmatpush3.bf16.msra.mxu0 %v15077_v59 }
0x2d37   :  { %9989 = vmatprep.subr.bf16.mxu0 %v15079_v0 }
0x2d39   :  { %9697 = vmatpush3.bf16.msra.mxu1 %v14498_v58 }
0x2d3a   :  { %9698 = vmatprep.subr.bf16.mxu1 %v15050_v54  ;;  %9991 = vmatpush3.bf16.msra.mxu0 %v15079_v0 }
0x2d3b   :  { %9993 = vmatprep.subr.bf16.mxu0 %v15081_v23 }
0x2d3d   :  { %9699 = vmatpush3.bf16.msra.mxu1 %v14507_v25 }
0x2d3e   :  { %9700 = vmatprep.subr.bf16.mxu1 %v15050_v54  ;;  %9995 = vmatpush3.bf16.msra.mxu0 %v15081_v23 }
0x2d3f   :  { %9997 = vmatprep.subr.bf16.mxu0 %v15083_v11 }
0x2d41   :  { %9701 = vmatpush3.bf16.msra.mxu1 %v14516_v37 }
0x2d42   :  { %9702 = vmatprep.subr.bf16.mxu1 %v15050_v54  ;;  %9999 = vmatpush3.bf16.msra.mxu0 %v15083_v11 }
0x2d43   :  { %10001 = vmatprep.subr.bf16.mxu0 %v12459_v14 }
0x2d45   :  { %9703 = vmatpush3.bf16.msra.mxu1 %v14525_v9 }
0x2d46   :  { %9704 = vmatprep.subr.bf16.mxu1 %v15050_v54  ;;  %10003 = vmatpush3.bf16.msra.mxu0 %v12459_v14 }
0x2d47   :  { %10005 = vmatprep.subr.bf16.mxu0 %v12472_v10 }
0x2d49   :  { %9705 = vmatpush3.bf16.msra.mxu1 %v14534_v12 }
0x2d4a   :  { %9706 = vmatprep.subr.bf16.mxu1 %v15050_v54  ;;  %10007 = vmatpush3.bf16.msra.mxu0 %v12472_v10 }
0x2d4b   :  { %10009 = vmatprep.subr.bf16.mxu0 %v12477_v7 }
0x2d4d   :  { %9707 = vmatpush3.bf16.msra.mxu1 %v14543_v13 }
0x2d4e   :  { %10011 = vmatpush3.bf16.msra.mxu0 %v12477_v7 }
0x2de3   :  { %v7558_v51 = vpop.f32.mrb[164].mxu0 }
0x2de4   :  { %v9670_v59 = vpop.f32.mrb[165].mxu0  ;;  %v7559_v24 = vadd.f32 %v7558_v51, %v12424_v18 }
0x2de5   :  { %v7561_v0 = vpop.f32.mrb[166].mxu0  ;;  %v15467_v59 = vld [vmem:[#allocation32_spill] sm:$0xff] }
0x2de6   :  { %v9671_v23 = vpop.f32.mrb[167].mxu0 }
0x2e03   :  { %v7598_v11 = vpop.f32.mrb[100].mxu1  ;;  %v7639_v14 = vpop.f32.mrb[168].mxu0 }
0x2e04   :  { %v10041_v2 = vadd.f32 %v15089_v28, %v7598_v11  ;;  %v7600_v4 = vpop.f32.mrb[101].mxu1  ;;  %v9690_v29 = vpop.f32.mrb[169].mxu0  ;;  %v7640_v39 = vadd.f32 %v7639_v14, %v12421_v53  ;;  %v15459_v53 = vld [vmem:[#allocation10_spill] sm:$0xff] }
0x2e05   :  { %v7602_v1 = vpop.f32.mrb[102].mxu1  ;;  %v7642_v54 = vpop.f32.mrb[170].mxu0  ;;  %v10043_v37 = vadd.f32 %v15090_v61, %v7600_v4  ;;  %v15469_v29 = vld [vmem:[#allocation34_spill] sm:$0xff] }
0x2e06   :  { %v8223_v58 = vmul.f32 -1.442695, %v10041_v2  ;;  %v7603_v10 = vpop.f32.mrb[103].mxu1  ;;  %v9691_v25 = vpop.f32.mrb[171].mxu0  ;;  %v15468_v2 = vld [vmem:[#allocation33_spill] sm:$0xff] }
0x2e07   :  { %v8224_v9 = vmul.f32 -1.442695, %v10043_v37  ;;  %v15470_v25 = vld [vmem:[#allocation35_spill] sm:$0xff] }
0x2e08   :  { %10558 = vpow2.f32 %v8223_v58 }
0x2e09   :  { %10560 = vpow2.f32 %v8224_v9 }
0x2e12   :  { %v10559_v7 = vpop.eup %10558 }
0x2e13   :  { %v7649_v12 = vadd.f32 1.0, %v10559_v7  ;;  %v10561_v13 = vpop.eup %10560  ;;  %v15471_v7 = vld [vmem:[#allocation36_spill] sm:$0xff] }
0x2e14   :  { %v7656_v30 = vadd.f32 1.0, %v10561_v13 }
0x2e15   :  { %10562 = vrcp.f32 %v7649_v12 }
0x2e16   :  { %10564 = vrcp.f32 %v7656_v30 }
0x2e1f   :  { %v10563_v28 = vpop.eup %10562 }
0x2e20   :  { %v7659_v17 = vmul.f32 %v10563_v28, %v7640_v39  ;;  %v10565_v45 = vpop.eup %10564  ;;  %v15472_v28 = vld [vmem:[#allocation37_spill] sm:$0xff] }
0x2e21   :  { %v7662_v15 = vsub.f32 1.0, %v10565_v45  ;;  %v7664_v56 = vmul.f32 %v10565_v45, %v15457_v41 }
0x2e22   :  { %v7660_v47 = vadd.f32 %v7659_v17, %v7559_v24 }
0x2e24   :  { %10566 = vtanh.f32 %v7660_v47  ;;  %v15473_v47 = vld [vmem:[#allocation38_spill] sm:$0xff] }
0x2e2e   :  { %v10567_v61 = vpop.eup %10566 }
0x2e2f   :  { %v7663_v48 = vmul.f32 %v10567_v61, %v7662_v15  ;;  %v15474_v61 = vld [vmem:[#allocation12_spill] sm:$0xff] }
0x2e31   :  { %v7665_v34 = vadd.f32 %v7664_v56, %v7663_v48  ;;  %v15475_v48 = vld [vmem:[#allocation30_spill] sm:$0xff]  ;;  %v7335_v56 = vsel %vm7334_vm7, 0.0, %v15474_v61 }
0x2e32   :  { %vm7843_vm0 = vcmp.gt.f32.partialorder %v7335_v56, 0.0  ;;  %vm15478_vm15 = vcmp.eq.s32.totalorder %v15475_v48, 7 }
0x2e33   :  { %v7666_v27 = vpack.c.bf16 %v7665_v34, %v7665_v34 }
0x2e35   :  { %9709 = vmatmul.mubr.bf16.vlgmr.msra.gmra.mrb[104].mxu1 %v7666_v27 }
0x2f08   :  { %v7701_v22 = vpop.f32.mrb[104].mxu1 }
0x2f09   :  { %v7707_v6 = vadd.f32 %v7701_v22, %v15458_v60  ;;  %v7708_v63 = vadd.f32 %v7701_v22, %v15459_v53  ;;  %v7709_v18 = vadd.f32 %v15460_v46, %v7701_v22  ;;  %v7710_v43 = vadd.f32 %v15461_v8, %v7701_v22  ;;  %v9710_v44 = vpop.f32.mrb[105].mxu1 }
0x2f0a   :  { %v7711_v16 = vadd.f32 %v7701_v22, %v15462_v36  ;;  %v7712_v55 = vadd.f32 %v7701_v22, %v15463_v32  ;;  %v7713_v42 = vadd.f32 %v15464_v40, %v7701_v22  ;;  %v7714_v33 = vadd.f32 %v15465_v31, %v7701_v22  ;;  %v7704_v38 = vpop.f32.mrb[106].mxu1 }
0x2f0b   :  { %10568 = vtanh.f32 %v7707_v6  ;;  %v9711_v26 = vpop.f32.mrb[107].mxu1 }
0x2f0c   :  { %10570 = vtanh.f32 %v7708_v63 }
0x2f0d   :  { %10572 = vtanh.f32 %v7709_v18 }
0x2f0e   :  { %10574 = vtanh.f32 %v7710_v43 }
0x2f0f   :  { %10576 = vtanh.f32 %v7711_v16 }
0x2f10   :  { %10578 = vtanh.f32 %v7712_v55  ;;  %v15477_v55 = vld [vmem:[#allocation13_spill] sm:$0xff] }
0x2f11   :  { %10580 = vtanh.f32 %v7713_v42 }
0x2f12   :  { %10582 = vtanh.f32 %v7714_v33 }
0x2f15   :  { %v10569_v52 = vpop.eup %10568 }
0x2f16   :  { %v10571_v35 = vpop.eup %10570  ;;  %9744 = vmatprep.mubr.f32.mxu0 %v10569_v52 }
0x2f17   :  { %v10573_v57 = vpop.eup %10572  ;;  %9745 = vmatmul.mubr.f32.vlgmr.msra.gmra.mrb[172].mxu0 %v10571_v35 }
0x2f18   :  { %9747 = vmatprep.mubr.f32.mxu0 %v10573_v57  ;;  %v10575_v62 = vpop.eup %10574 }
0x2f19   :  { %v10577_v20 = vpop.eup %10576 }
0x2f1a   :  { %v10579_v3 = vpop.eup %10578 }
0x2f1b   :  { %9748 = vmatmul.mubr.f32.gmra.mrb[174].mxu0 %v10575_v62  ;;  %v10581_v49 = vpop.eup %10580 }
0x2f1c   :  { %9750 = vmatprep.mubr.f32.mxu0 %v10577_v20  ;;  %v10583_v21 = vpop.eup %10582 }
0x2f1f   :  { %9751 = vmatmul.mubr.f32.gmra.mrb[176].mxu0 %v10579_v3 }
0x2f20   :  { %9753 = vmatprep.mubr.f32.mxu0 %v10581_v49 }
0x2f23   :  { %9754 = vmatmul.mubr.f32.gmra.mrb[178].mxu0 %v10583_v21 }
0x2fea   :  { %v9746_v5 = vpop.f32.mrb[172].mxu0 }
0x2feb   :  { %v7829_v50 = vmul.f32 %v9746_v5, %v15466_v19  ;;  %v7789_v51 = vpop.f32.mrb[173].mxu0 }
0x2fec   :  { %v7828_v0 = vmul.f32 %v15467_v59, %v7789_v51 }
0x2fee   :  { %v7836_v23 = vadd.f32 %v7829_v50, %v7828_v0  ;;  %v9749_v11 = vpop.f32.mrb[174].mxu0 }
0x2fef   :  { %v7799_v14 = vpop.f32.mrb[175].mxu0  ;;  %v7831_v1 = vmul.f32 %v9749_v11, %v15469_v29 }
0x2ff0   :  { %v7830_v4 = vmul.f32 %v15468_v2, %v7799_v14 }
0x2ff2   :  { %v7837_v54 = vadd.f32 %v7836_v23, %v7830_v4  ;;  %v9752_v58 = vpop.f32.mrb[176].mxu0 }
0x2ff3   :  { %v7809_v10 = vpop.f32.mrb[177].mxu0  ;;  %v7833_v12 = vmul.f32 %v9752_v58, %v15471_v7 }
0x2ff4   :  { %v7832_v37 = vmul.f32 %v15470_v25, %v7809_v10  ;;  %v7838_v9 = vadd.f32 %v7837_v54, %v7831_v1 }
0x2ff6   :  { %v7839_v13 = vadd.f32 %v7838_v9, %v7832_v37  ;;  %v9755_v30 = vpop.f32.mrb[178].mxu0 }
0x2ff7   :  { %v7819_v39 = vpop.f32.mrb[179].mxu0  ;;  %v7835_v45 = vmul.f32 %v9755_v30, %v15473_v47 }
0x2ff8   :  { %v7834_v24 = vmul.f32 %v15472_v28, %v7819_v39  ;;  %v7840_v17 = vadd.f32 %v7839_v13, %v7833_v12 }
0x2ffa   :  { %v7841_v15 = vadd.f32 %v7840_v17, %v7834_v24 }
0x2ffc   :  { %v7842_v34 = vadd.f32 %v7841_v15, %v7835_v45 }
0x2ffe   :  { %v7844_v27 = vsel %vm7843_vm0, %v7842_v34, -1e+09 }
0x2fff   :  { %7845 = vmax.xlane.f32.xlu1 %v7844_v27 }
0x308c   :  { %v7846_v22 = vpop.xlane.xlu1 %7845 }
0x308d   :  { %vm7847_vm1 = vcmp.eq.f32.partialorder %v7844_v27, %v7846_v22 }
0x308e   :  { %v7848_v60 = vsel %vm7847_vm1, %v15475_v48, 128 }
0x308f   :  { %v7850_v6 = vshra.s32 %v7848_v60, 16  ;;  %v7849_v63 = vand.u32 65535, %v7848_v60 }
0x3091   :  { %v7852_v53 = vcvt.s32.f32 %v7850_v6  ;;  %v7851_v18 = vcvt.s32.f32 %v7849_v63 }
0x3093   :  { %7853 = vmin.xlane.f32.xlu0 %v7852_v53 }
0x3120   :  { %v7854_v46 = vpop.xlane.xlu0 %7853 }
0x3121   :  { %vm7855_vm9 = vcmp.eq.f32.partialorder %v7852_v53, %v7854_v46  ;;  %v7860_v43 = vcvt.f32.s32 %v7854_v46 }
0x3122   :  { %v7856_v8 = vsel %vm7855_vm9, %v7851_v18, inf }
0x3123   :  { %7857 = vmin.xlane.f32.xlu0 %v7856_v8  ;;  %v7861_v36 = vshll.u32 %v7860_v43, 16 }
0x31b0   :  { %v7858_v44 = vpop.xlane.xlu0 %7857 }
0x31b1   :  { %v7859_v16 = vcvt.f32.s32 %v7858_v44 }
0x31b3   :  { %v7862_v32 = vadd.s32 %v7861_v36, %v7859_v16 }
0x31b5   :  { %v7863_v40 = vsel %vm15478_vm15, %v7862_v32, %v15477_v55 }
0x31b6   :  { %7864 = vst.msk [vmem:[%s14818_s12] sm:$0xff] %vm15479_vm10, %v7863_v40 }

</bundles_post_ra>
